<compile_context>
chip_gen: v6e
topology: v6e:2x2x1
jax: 0.10.0
libtpu: 0.0.40
codegen_flags: <defaults>
</compile_context>

<pallas_src>
import functools

import jax
import jax.numpy as jnp
from jax.experimental import pallas as pl
from jax.experimental.pallas import tpu as pltpu

EPS = 1e-5
CP = 128  # lane-padded channel width (TPU lane count)


# ---------------------------------------------------------------------------
# In-kernel helpers
# ---------------------------------------------------------------------------
def _bn_train(y, gamma, beta, eps):
    """BatchNorm2d training-mode forward over the (M, CP) activation: one-pass
    batch statistics (sum / sum-of-squares), biased variance, then affine.
    Variance is clamped at 0 (one-pass form can cancel slightly negative)."""
    m = y.shape[0]
    mu = jnp.sum(y, axis=0, keepdims=True) * (1.0 / m)
    ms = jnp.sum(y * y, axis=0, keepdims=True) * (1.0 / m)
    var = jnp.maximum(ms - mu * mu, 0.0)
    return (y - mu) * jax.lax.rsqrt(var + eps) * gamma + beta


# ---------------------------------------------------------------------------
# Fused Res18Block kernel:
#   conv1(3x3) -> BN1 -> ReLU -> conv2(3x3, stride 1) -> BN2 -> +shortcut -> ReLU
# The intermediate activation `h` never leaves VMEM.
# ---------------------------------------------------------------------------
def _res18_block_kernel(*refs, downsample, n, ho, wo, eps):
    if downsample:
        (p00_ref, p01_ref, p10_ref, p11_ref,
         w1_ref, wsc_ref, w2_ref,
         g1_ref, b1_ref, gsc_ref, bsc_ref, g2_ref, b2_ref,
         o_ref, hp_ref) = refs
        parity = ((p00_ref, p01_ref), (p10_ref, p11_ref))
    else:
        (xp_ref, w1_ref, w2_ref,
         g1_ref, b1_ref, g2_ref, b2_ref,
         o_ref, hp_ref) = refs

    m = n * ho * wo
    cp = o_ref.shape[-1]

    # ---- conv1: gather the 9 taps in-kernel, concatenate into an (m, 9*cp) bf16
    # ---- im2col tile and issue ONE K=9*cp GEMM (better MXU fill on v6e/v7x's
    # ---- 2x256^2 MXU; K is a multiple of 128 so it is also native width on v5e).
    taps1 = []
    for kh in range(3):
        for kw in range(3):
            if downsample:
                # stride-2 tap (kh,kw) == static slice of the (kh%2, kw%2) parity view
                src = parity[kh % 2][kw % 2]
                tap = src[:, kh // 2:kh // 2 + ho, kw // 2:kw // 2 + wo, :]
            else:
                tap = xp_ref[:, kh:kh + ho, kw:kw + wo, :]
            taps1.append(tap.reshape(m, cp).astype(jnp.bfloat16))
    acc1 = jnp.dot(jnp.concatenate(taps1, axis=-1), w1_ref[...],
                   preferred_element_type=jnp.float32)

    # ---- BN1 (batch stats) + ReLU -------------------------------------------
    h = jnp.maximum(_bn_train(acc1, g1_ref[...], b1_ref[...], eps), 0.0)

    # ---- shortcut / residual -------------------------------------------------
    if downsample:
        # 1x1 stride-2 shortcut input = odd/odd parity view (no extra input array)
        xs = parity[1][1][:, :ho, :wo, :].reshape(m, cp).astype(jnp.bfloat16)
        r = jnp.dot(xs, wsc_ref[...], preferred_element_type=jnp.float32)
        r = _bn_train(r, gsc_ref[...], bsc_ref[...], eps)
    else:
        # identity shortcut: interior of the spatially padded input (f32)
        r = xp_ref[:, 1:1 + ho, 1:1 + wo, :].reshape(m, cp)

    # ---- stage h (spatially padded) in VMEM scratch: zero ONLY the 1-px halo,
    # ---- write the interior exactly once (no double store of the interior).
    zrow = jnp.zeros((n, 1, wo + 2, cp), hp_ref.dtype)
    zcol = jnp.zeros((n, ho, 1, cp), hp_ref.dtype)
    hp_ref[:, 0:1, :, :] = zrow
    hp_ref[:, ho + 1:ho + 2, :, :] = zrow
    hp_ref[:, 1:ho + 1, 0:1, :] = zcol
    hp_ref[:, 1:ho + 1, wo + 1:wo + 2, :] = zcol
    hp_ref[:, 1:1 + ho, 1:1 + wo, :] = h.reshape(n, ho, wo, cp)

    # ---- conv2 (3x3, stride 1) from the VMEM-resident padded h: same im2col GEMM
    taps2 = []
    for kh in range(3):
        for kw in range(3):
            tap = hp_ref[:, kh:kh + ho, kw:kw + wo, :]
            taps2.append(tap.reshape(m, cp).astype(jnp.bfloat16))
    acc2 = jnp.dot(jnp.concatenate(taps2, axis=-1), w2_ref[...],
                   preferred_element_type=jnp.float32)

    # ---- BN2 + residual + ReLU (lane-dense bf16 output) ----------------------
    y = _bn_train(acc2, g2_ref[...], b2_ref[...], eps)
    o_ref[...] = jnp.maximum(y + r, 0.0).astype(o_ref.dtype)


# ---------------------------------------------------------------------------
# Wrapper-side helpers (plain-JAX glue: layout, zero padding to 128 lanes)
# ---------------------------------------------------------------------------
def _pad_last(a, target):
    c = a.shape[-1]
    if c == target:
        return a
    pad = [(0, 0)] * (a.ndim - 1) + [(0, target - c)]
    return jnp.pad(a, pad)


def _w_im2col(w):
    """torch conv weight (Cout, Cin, KH, KW) -> (KH*KW*CP, CP) bf16, zero-padded,
    K laid out as [tap0 | tap1 | ... ] matching the in-kernel tap concat order."""
    cout, cin, kh, kw = w.shape
    w = jnp.transpose(w, (2, 3, 1, 0)).reshape(kh * kw, cin, cout)
    w = jnp.pad(w, ((0, 0), (0, CP - cin), (0, CP - cout)))
    return w.reshape(kh * kw * CP, CP).astype(jnp.bfloat16)


def _bn_param(v):
    """(C,) -> (1, CP) f32, ZERO-padded.  NOTE: zero padding of gamma/beta (and of
    the conv weights) is load-bearing: it keeps the padded lanes exactly 0 through
    conv -> BN -> ReLU -> residual.  Do not pad gamma with ones."""
    return _pad_last(v.reshape(1, -1).astype(jnp.float32), CP)


def _zero_index_map(ndim):
    zeros = (0,) * ndim
    return lambda i: zeros


def _res18_block_pallas(x, p, cin, cout):
    """One Res18Block.  x: (N, H, W, CP) channel-padded NHWC (f32 or bf16).
    Returns (N, Ho, Wo, CP) channel-padded NHWC bf16."""
    N, H, W, cpd = x.shape
    stride = cout // cin
    downsample = cin != cout
    Ho, Wo = H // stride, W // stride
    M = N * Ho * Wo

    # Spatially padded input; kept f32 so in-kernel odd sublane-offset tap slices
    # stay on the natively supported f32 path (taps are cast to bf16 post-slice).
    xpad = jnp.pad(x.astype(jnp.float32), ((0, 0), (1, 1), (1, 1), (0, 0)))

    w1 = _w_im2col(p["w1"])
    w2 = _w_im2col(p["w2"])
    g1, b1 = _bn_param(p["g1"]), _bn_param(p["b1"])
    g2, b2 = _bn_param(p["g2"]), _bn_param(p["b2"])

    if downsample:
        assert stride == 2
        # Four parity-subsampled views of xpad (even/odd rows x even/odd cols):
        # exactly the same total bytes as xpad (no 9x duplication); all stride-2
        # conv1 taps and the 1x1-stride-2 shortcut input are static slices of
        # these views inside the kernel.
        p00 = xpad[:, 0::2, 0::2, :]
        p01 = xpad[:, 0::2, 1::2, :]
        p10 = xpad[:, 1::2, 0::2, :]
        p11 = xpad[:, 1::2, 1::2, :]
        wsc = _w_im2col(p["wsc"])
        gsc, bsc = _bn_param(p["gsc"]), _bn_param(p["bsc"])
        inputs = [p00, p01, p10, p11, w1, wsc, w2, g1, b1, gsc, bsc, g2, b2]
        flops = 2 * M * (9 * cpd) * cpd * 2 + 2 * M * cpd * cpd
    else:
        assert stride == 1
        inputs = [xpad, w1, w2, g1, b1, g2, b2]
        flops = 2 * M * (9 * cpd) * cpd * 2

    kern = functools.partial(_res18_block_kernel, downsample=downsample,
                             n=N, ho=Ho, wo=Wo, eps=EPS)

    bytes_accessed = int(sum(a.size * a.dtype.itemsize for a in inputs) + M * cpd * 2)
    cost = pl.CostEstimate(flops=int(flops), transcendentals=int(3 * cpd),
                           bytes_accessed=bytes_accessed)

    out2d = pl.pallas_call(
        kern,
        grid=(1,),
        in_specs=[pl.BlockSpec(a.shape, _zero_index_map(a.ndim)) for a in inputs],
        out_specs=pl.BlockSpec((M, cpd), lambda i: (0, 0)),
        out_shape=jax.ShapeDtypeStruct((M, cpd), jnp.bfloat16),
        scratch_shapes=[pltpu.VMEM((N, Ho + 2, Wo + 2, cpd), jnp.float32)],
        compiler_params=pltpu.CompilerParams(
            dimension_semantics=("arbitrary",),
            vmem_limit_bytes=32 * 1024 * 1024),
        cost_estimate=cost,
    )(*inputs)
    return out2d.reshape(N, Ho, Wo, cpd)


def res18_conv_layer(x_nchw, params, cin, cout, shape):
    """Res18ConvLayer.forward.  x_nchw: (N, Cin, H, W) like PyTorch."""
    assert x_nchw.shape[1:] == shape
    assert cin <= CP and cout <= CP
    x = jnp.transpose(x_nchw, (0, 2, 3, 1))          # NCHW -> NHWC
    x = _pad_last(x.astype(jnp.float32), CP)         # pad channels to 128 lanes
    x = _res18_block_pallas(x, params["block1"], cin, cout)   # bf16 activations
    x = _res18_block_pallas(x, params["block2"], cout, cout)  # between blocks
    x = x[..., :cout].astype(jnp.float32)            # drop padded lanes
    return jnp.transpose(x, (0, 3, 1, 2))            # NHWC -> NCHW


# ---------------------------------------------------------------------------
# Parameter init (torch layout conv weights, BN gamma/beta)
# ---------------------------------------------------------------------------
def init_block_params(key, cin, cout):
    ks = jax.random.split(key, 9)
    p = {
        "w1": 0.1 * jax.random.normal(ks[0], (cout, cin, 3, 3), jnp.float32),
        "g1": 1.0 + 0.1 * jax.random.normal(ks[1], (cout,), jnp.float32),
        "b1": 0.1 * jax.random.normal(ks[2], (cout,), jnp.float32),
        "w2": 0.1 * jax.random.normal(ks[3], (cout, cout, 3, 3), jnp.float32),
        "g2": 1.0 + 0.1 * jax.random.normal(ks[4], (cout,), jnp.float32),
        "b2": 0.1 * jax.random.normal(ks[5], (cout,), jnp.float32),
    }
    if cin != cout:
        assert cout == 2 * cin
        p["wsc"] = 0.1 * jax.random.normal(ks[6], (cout, cin, 1, 1), jnp.float32)
        p["gsc"] = 1.0 + 0.1 * jax.random.normal(ks[7], (cout,), jnp.float32)
        p["bsc"] = 0.1 * jax.random.normal(ks[8], (cout,), jnp.float32)
    return p


# ---------------------------------------------------------------------------
# Pure-JAX reference (lax.conv, f32 end-to-end) for a numerical sanity check
# ---------------------------------------------------------------------------
def _ref_conv(x, w_torch, stride, pad):
    w = jnp.transpose(w_torch, (2, 3, 1, 0))  # (Cout,Cin,KH,KW) -> HWIO
    return jax.lax.conv_general_dilated(
        x, w, (stride, stride), [(pad, pad), (pad, pad)],
        dimension_numbers=("NHWC", "HWIO", "NHWC"))


def _ref_bn(y, gamma, beta):
    mu = jnp.mean(y, axis=(0, 1, 2), keepdims=True)
    var = jnp.mean((y - mu) ** 2, axis=(0, 1, 2), keepdims=True)
    return (y - mu) * jax.lax.rsqrt(var + EPS) * gamma + beta


def _ref_block(x, p, cin, cout):
    stride = cout // cin
    if cin != cout:
        residual = _ref_bn(_ref_conv(x, p["wsc"], stride, 0), p["gsc"], p["bsc"])
    else:
        residual = x
    h = jnp.maximum(_ref_bn(_ref_conv(x, p["w1"], stride, 1), p["g1"], p["b1"]), 0.0)
    o = _ref_bn(_ref_conv(h, p["w2"], 1, 1), p["g2"], p["b2"]) + residual
    return jnp.maximum(o, 0.0)


def _ref_layer(x_nchw, params, cin, cout):
    x = jnp.transpose(x_nchw, (0, 2, 3, 1))
    x = _ref_block(x, params["block1"], cin, cout)
    x = _ref_block(x, params["block2"], cout, cout)
    return jnp.transpose(x, (0, 3, 1, 2))


# ---------------------------------------------------------------------------
if __name__ == "__main__":
    N, CIN, H, W = 2, 4, 16, 16
    COUT = 8
    shape = (CIN, H, W)

    key = jax.random.PRNGKey(0)
    kx, k1, k2 = jax.random.split(key, 3)
    x = jax.random.normal(kx, (N, CIN, H, W), jnp.float32)

    params = {
        "block1": init_block_params(k1, CIN, COUT),
        "block2": init_block_params(k2, COUT, COUT),
    }

    fwd = jax.jit(functools.partial(res18_conv_layer, cin=CIN, cout=COUT, shape=shape))
    out = jax.block_until_ready(fwd(x, params))
    assert out.shape == (N, COUT, H // 2, W // 2), out.shape

    ref = jax.block_until_ready(_ref_layer(x, params, CIN, COUT))
    diff = out - ref
    rel_err = float(jnp.linalg.norm(diff) / jnp.linalg.norm(ref))
    max_err = float(jnp.max(jnp.abs(diff)))
    # bf16 MXU operands + bf16 inter-block activations vs an f32 reference:
    # expect ~1% relative error; an algorithmic bug would be O(100%).
    assert rel_err < 2e-2 and max_err < 1e-1, (rel_err, max_err)

    print("KERNEL_OK")
</pallas_src>

<mosaic_0001>
module attributes {stable_mosaic.version = 11 : i64} {
  func.func @_res18_block_kernel(%arg0: i32, %arg1: memref<2x9x9x128xf32, #tpu.memory_space<vmem>>, %arg2: memref<2x9x9x128xf32, #tpu.memory_space<vmem>>, %arg3: memref<2x9x9x128xf32, #tpu.memory_space<vmem>>, %arg4: memref<2x9x9x128xf32, #tpu.memory_space<vmem>>, %arg5: memref<1152x128xbf16, #tpu.memory_space<vmem>>, %arg6: memref<128x128xbf16, #tpu.memory_space<vmem>>, %arg7: memref<1152x128xbf16, #tpu.memory_space<vmem>>, %arg8: memref<1x128xf32, #tpu.memory_space<vmem>>, %arg9: memref<1x128xf32, #tpu.memory_space<vmem>>, %arg10: memref<1x128xf32, #tpu.memory_space<vmem>>, %arg11: memref<1x128xf32, #tpu.memory_space<vmem>>, %arg12: memref<1x128xf32, #tpu.memory_space<vmem>>, %arg13: memref<1x128xf32, #tpu.memory_space<vmem>>, %arg14: memref<128x128xbf16, #tpu.memory_space<vmem>>, %arg15: memref<2x10x10x128xf32, #tpu.memory_space<vmem>>) attributes {dimension_semantics = [#tpu.dimension_semantics<arbitrary>], iteration_bounds = array<i64: 1>, scalar_prefetch = 0 : i64, scratch_operands = 1 : i64, tpu.core_type = #tpu.core_type<tc>, window_params = [{pipeline_mode = #tpu.pipeline_mode<synchronous>, transform_indices = @transform_0, window_bounds = array<i64: 2, 9, 9, 128>}, {pipeline_mode = #tpu.pipeline_mode<synchronous>, transform_indices = @transform_1, window_bounds = array<i64: 2, 9, 9, 128>}, {pipeline_mode = #tpu.pipeline_mode<synchronous>, transform_indices = @transform_2, window_bounds = array<i64: 2, 9, 9, 128>}, {pipeline_mode = #tpu.pipeline_mode<synchronous>, transform_indices = @transform_3, window_bounds = array<i64: 2, 9, 9, 128>}, {pipeline_mode = #tpu.pipeline_mode<synchronous>, transform_indices = @transform_4, window_bounds = array<i64: 1152, 128>}, {pipeline_mode = #tpu.pipeline_mode<synchronous>, transform_indices = @transform_5, window_bounds = array<i64: 128, 128>}, {pipeline_mode = #tpu.pipeline_mode<synchronous>, transform_indices = @transform_6, window_bounds = array<i64: 1152, 128>}, {pipeline_mode = #tpu.pipeline_mode<synchronous>, transform_indices = @transform_7, window_bounds = array<i64: 1, 128>}, {pipeline_mode = #tpu.pipeline_mode<synchronous>, transform_indices = @transform_8, window_bounds = array<i64: 1, 128>}, {pipeline_mode = #tpu.pipeline_mode<synchronous>, transform_indices = @transform_9, window_bounds = array<i64: 1, 128>}, {pipeline_mode = #tpu.pipeline_mode<synchronous>, transform_indices = @transform_10, window_bounds = array<i64: 1, 128>}, {pipeline_mode = #tpu.pipeline_mode<synchronous>, transform_indices = @transform_11, window_bounds = array<i64: 1, 128>}, {pipeline_mode = #tpu.pipeline_mode<synchronous>, transform_indices = @transform_12, window_bounds = array<i64: 1, 128>}, {pipeline_mode = #tpu.pipeline_mode<synchronous>, transform_indices = @transform_13, window_bounds = array<i64: 128, 128>}]} {
    %c0 = arith.constant 0 : index
    %c0_0 = arith.constant 0 : index
    %c0_1 = arith.constant 0 : index
    %c0_2 = arith.constant 0 : index
    %0 = vector.load %arg1[%c0, %c0_0, %c0_1, %c0_2] : memref<2x9x9x128xf32, #tpu.memory_space<vmem>>, vector<2x8x8x128xf32>
    %1 = vector.shape_cast %0 : vector<2x8x8x128xf32> to vector<128x128xf32>
    %2 = arith.truncf %1 : vector<128x128xf32> to vector<128x128xbf16>
    %c0_3 = arith.constant 0 : index
    %c0_4 = arith.constant 0 : index
    %c0_5 = arith.constant 0 : index
    %c0_6 = arith.constant 0 : index
    %3 = vector.load %arg2[%c0_3, %c0_4, %c0_5, %c0_6] : memref<2x9x9x128xf32, #tpu.memory_space<vmem>>, vector<2x8x8x128xf32>
    %4 = vector.shape_cast %3 : vector<2x8x8x128xf32> to vector<128x128xf32>
    %5 = arith.truncf %4 : vector<128x128xf32> to vector<128x128xbf16>
    %c0_7 = arith.constant 0 : index
    %c0_8 = arith.constant 0 : index
    %c1 = arith.constant 1 : index
    %c0_9 = arith.constant 0 : index
    %6 = vector.load %arg1[%c0_7, %c0_8, %c1, %c0_9] : memref<2x9x9x128xf32, #tpu.memory_space<vmem>>, vector<2x8x8x128xf32>
    %7 = vector.shape_cast %6 : vector<2x8x8x128xf32> to vector<128x128xf32>
    %8 = arith.truncf %7 : vector<128x128xf32> to vector<128x128xbf16>
    %c0_10 = arith.constant 0 : index
    %c0_11 = arith.constant 0 : index
    %c0_12 = arith.constant 0 : index
    %c0_13 = arith.constant 0 : index
    %9 = vector.load %arg3[%c0_10, %c0_11, %c0_12, %c0_13] : memref<2x9x9x128xf32, #tpu.memory_space<vmem>>, vector<2x8x8x128xf32>
    %10 = vector.shape_cast %9 : vector<2x8x8x128xf32> to vector<128x128xf32>
    %11 = arith.truncf %10 : vector<128x128xf32> to vector<128x128xbf16>
    %c0_14 = arith.constant 0 : index
    %c0_15 = arith.constant 0 : index
    %c0_16 = arith.constant 0 : index
    %c0_17 = arith.constant 0 : index
    %12 = vector.load %arg4[%c0_14, %c0_15, %c0_16, %c0_17] : memref<2x9x9x128xf32, #tpu.memory_space<vmem>>, vector<2x8x8x128xf32>
    %13 = vector.shape_cast %12 : vector<2x8x8x128xf32> to vector<128x128xf32>
    %14 = arith.truncf %13 : vector<128x128xf32> to vector<128x128xbf16>
    %c0_18 = arith.constant 0 : index
    %c0_19 = arith.constant 0 : index
    %c1_20 = arith.constant 1 : index
    %c0_21 = arith.constant 0 : index
    %15 = vector.load %arg3[%c0_18, %c0_19, %c1_20, %c0_21] : memref<2x9x9x128xf32, #tpu.memory_space<vmem>>, vector<2x8x8x128xf32>
    %16 = vector.shape_cast %15 : vector<2x8x8x128xf32> to vector<128x128xf32>
    %17 = arith.truncf %16 : vector<128x128xf32> to vector<128x128xbf16>
    %c0_22 = arith.constant 0 : index
    %c1_23 = arith.constant 1 : index
    %c0_24 = arith.constant 0 : index
    %c0_25 = arith.constant 0 : index
    %18 = vector.load %arg1[%c0_22, %c1_23, %c0_24, %c0_25] : memref<2x9x9x128xf32, #tpu.memory_space<vmem>>, vector<2x8x8x128xf32>
    %19 = vector.shape_cast %18 : vector<2x8x8x128xf32> to vector<128x128xf32>
    %20 = arith.truncf %19 : vector<128x128xf32> to vector<128x128xbf16>
    %c0_26 = arith.constant 0 : index
    %c1_27 = arith.constant 1 : index
    %c0_28 = arith.constant 0 : index
    %c0_29 = arith.constant 0 : index
    %21 = vector.load %arg2[%c0_26, %c1_27, %c0_28, %c0_29] : memref<2x9x9x128xf32, #tpu.memory_space<vmem>>, vector<2x8x8x128xf32>
    %22 = vector.shape_cast %21 : vector<2x8x8x128xf32> to vector<128x128xf32>
    %23 = arith.truncf %22 : vector<128x128xf32> to vector<128x128xbf16>
    %c0_30 = arith.constant 0 : index
    %c1_31 = arith.constant 1 : index
    %c1_32 = arith.constant 1 : index
    %c0_33 = arith.constant 0 : index
    %24 = vector.load %arg1[%c0_30, %c1_31, %c1_32, %c0_33] : memref<2x9x9x128xf32, #tpu.memory_space<vmem>>, vector<2x8x8x128xf32>
    %25 = vector.shape_cast %24 : vector<2x8x8x128xf32> to vector<128x128xf32>
    %26 = arith.truncf %25 : vector<128x128xf32> to vector<128x128xbf16>
    %27 = tpu.concatenate %2, %5, %8, %11, %14, %17, %20, %23, %26 in 1 : vector<128x128xbf16>, vector<128x128xbf16>, vector<128x128xbf16>, vector<128x128xbf16>, vector<128x128xbf16>, vector<128x128xbf16>, vector<128x128xbf16>, vector<128x128xbf16>, vector<128x128xbf16> -> vector<128x1152xbf16>
    %c0_34 = arith.constant 0 : index
    %c0_35 = arith.constant 0 : index
    %28 = vector.load %arg5[%c0_34, %c0_35] : memref<1152x128xbf16, #tpu.memory_space<vmem>>, vector<1152x128xbf16>
    %cst = arith.constant dense<0.000000e+00> : vector<128x128xf32>
    %29 = tpu.matmul %27, %28, %cst {dimension_numbers = #tpu.dot_dimension_numbers<[1], [0], [0], [1], [0, 0, 1, 1], [], []>} : vector<128x1152xbf16>, vector<1152x128xbf16>, vector<128x128xf32> -> vector<128x128xf32>
    %c0_36 = arith.constant 0 : index
    %c0_37 = arith.constant 0 : index
    %30 = vector.load %arg8[%c0_36, %c0_37] : memref<1x128xf32, #tpu.memory_space<vmem>>, vector<1x128xf32>
    %c0_38 = arith.constant 0 : index
    %c0_39 = arith.constant 0 : index
    %31 = vector.load %arg9[%c0_38, %c0_39] : memref<1x128xf32, #tpu.memory_space<vmem>>, vector<1x128xf32>
    %cst_40 = arith.constant dense<0.000000e+00> : vector<128xf32>
    %32 = vector.multi_reduction <add>, %29, %cst_40 [0] : vector<128x128xf32> to vector<128xf32>
    %33 = vector.shape_cast %32 : vector<128xf32> to vector<1x128xf32>
    %cst_41 = arith.constant 7.812500e-03 : f32
    %34 = vector.broadcast %cst_41 : f32 to vector<1x128xf32>
    %35 = arith.mulf %33, %34 : vector<1x128xf32>
    %36 = arith.mulf %29, %29 : vector<128x128xf32>
    %cst_42 = arith.constant dense<0.000000e+00> : vector<128xf32>
    %37 = vector.multi_reduction <add>, %36, %cst_42 [0] : vector<128x128xf32> to vector<128xf32>
    %38 = vector.shape_cast %37 : vector<128xf32> to vector<1x128xf32>
    %cst_43 = arith.constant 7.812500e-03 : f32
    %39 = vector.broadcast %cst_43 : f32 to vector<1x128xf32>
    %40 = arith.mulf %38, %39 : vector<1x128xf32>
    %41 = arith.mulf %35, %35 : vector<1x128xf32>
    %42 = arith.subf %40, %41 : vector<1x128xf32>
    %cst_44 = arith.constant 0.000000e+00 : f32
    %43 = vector.broadcast %cst_44 : f32 to vector<1x128xf32>
    %44 = arith.maximumf %42, %43 : vector<1x128xf32>
    %45 = vector.broadcast %35 : vector<1x128xf32> to vector<128x128xf32>
    %46 = arith.subf %29, %45 : vector<128x128xf32>
    %cst_45 = arith.constant 9.99999974E-6 : f32
    %47 = vector.broadcast %cst_45 : f32 to vector<1x128xf32>
    %48 = arith.addf %44, %47 : vector<1x128xf32>
    %49 = math.rsqrt %48 : vector<1x128xf32>
    %50 = vector.broadcast %49 : vector<1x128xf32> to vector<128x128xf32>
    %51 = arith.mulf %46, %50 : vector<128x128xf32>
    %52 = vector.broadcast %30 : vector<1x128xf32> to vector<128x128xf32>
    %53 = arith.mulf %51, %52 : vector<128x128xf32>
    %54 = vector.broadcast %31 : vector<1x128xf32> to vector<128x128xf32>
    %55 = arith.addf %53, %54 : vector<128x128xf32>
    %cst_46 = arith.constant 0.000000e+00 : f32
    %56 = vector.broadcast %cst_46 : f32 to vector<128x128xf32>
    %57 = arith.maximumf %55, %56 : vector<128x128xf32>
    %c0_47 = arith.constant 0 : index
    %c0_48 = arith.constant 0 : index
    %c0_49 = arith.constant 0 : index
    %c0_50 = arith.constant 0 : index
    %58 = vector.load %arg4[%c0_47, %c0_48, %c0_49, %c0_50] : memref<2x9x9x128xf32, #tpu.memory_space<vmem>>, vector<2x8x8x128xf32>
    %59 = vector.shape_cast %58 : vector<2x8x8x128xf32> to vector<128x128xf32>
    %60 = arith.truncf %59 : vector<128x128xf32> to vector<128x128xbf16>
    %c0_51 = arith.constant 0 : index
    %c0_52 = arith.constant 0 : index
    %61 = vector.load %arg6[%c0_51, %c0_52] : memref<128x128xbf16, #tpu.memory_space<vmem>>, vector<128x128xbf16>
    %cst_53 = arith.constant dense<0.000000e+00> : vector<128x128xf32>
    %62 = tpu.matmul %60, %61, %cst_53 {dimension_numbers = #tpu.dot_dimension_numbers<[1], [0], [0], [1], [0, 0, 1, 1], [], []>} : vector<128x128xbf16>, vector<128x128xbf16>, vector<128x128xf32> -> vector<128x128xf32>
    %c0_54 = arith.constant 0 : index
    %c0_55 = arith.constant 0 : index
    %63 = vector.load %arg10[%c0_54, %c0_55] : memref<1x128xf32, #tpu.memory_space<vmem>>, vector<1x128xf32>
    %c0_56 = arith.constant 0 : index
    %c0_57 = arith.constant 0 : index
    %64 = vector.load %arg11[%c0_56, %c0_57] : memref<1x128xf32, #tpu.memory_space<vmem>>, vector<1x128xf32>
    %cst_58 = arith.constant dense<0.000000e+00> : vector<128xf32>
    %65 = vector.multi_reduction <add>, %62, %cst_58 [0] : vector<128x128xf32> to vector<128xf32>
    %66 = vector.shape_cast %65 : vector<128xf32> to vector<1x128xf32>
    %cst_59 = arith.constant 7.812500e-03 : f32
    %67 = vector.broadcast %cst_59 : f32 to vector<1x128xf32>
    %68 = arith.mulf %66, %67 : vector<1x128xf32>
    %69 = arith.mulf %62, %62 : vector<128x128xf32>
    %cst_60 = arith.constant dense<0.000000e+00> : vector<128xf32>
    %70 = vector.multi_reduction <add>, %69, %cst_60 [0] : vector<128x128xf32> to vector<128xf32>
    %71 = vector.shape_cast %70 : vector<128xf32> to vector<1x128xf32>
    %cst_61 = arith.constant 7.812500e-03 : f32
    %72 = vector.broadcast %cst_61 : f32 to vector<1x128xf32>
    %73 = arith.mulf %71, %72 : vector<1x128xf32>
    %74 = arith.mulf %68, %68 : vector<1x128xf32>
    %75 = arith.subf %73, %74 : vector<1x128xf32>
    %cst_62 = arith.constant 0.000000e+00 : f32
    %76 = vector.broadcast %cst_62 : f32 to vector<1x128xf32>
    %77 = arith.maximumf %75, %76 : vector<1x128xf32>
    %78 = vector.broadcast %68 : vector<1x128xf32> to vector<128x128xf32>
    %79 = arith.subf %62, %78 : vector<128x128xf32>
    %cst_63 = arith.constant 9.99999974E-6 : f32
    %80 = vector.broadcast %cst_63 : f32 to vector<1x128xf32>
    %81 = arith.addf %77, %80 : vector<1x128xf32>
    %82 = math.rsqrt %81 : vector<1x128xf32>
    %83 = vector.broadcast %82 : vector<1x128xf32> to vector<128x128xf32>
    %84 = arith.mulf %79, %83 : vector<128x128xf32>
    %85 = vector.broadcast %63 : vector<1x128xf32> to vector<128x128xf32>
    %86 = arith.mulf %84, %85 : vector<128x128xf32>
    %87 = vector.broadcast %64 : vector<1x128xf32> to vector<128x128xf32>
    %88 = arith.addf %86, %87 : vector<128x128xf32>
    %cst_64 = arith.constant 0.000000e+00 : f32
    %89 = vector.broadcast %cst_64 : f32 to vector<2x1x10x128xf32>
    %cst_65 = arith.constant 0.000000e+00 : f32
    %90 = vector.broadcast %cst_65 : f32 to vector<2x8x1x128xf32>
    %c0_66 = arith.constant 0 : index
    %c0_67 = arith.constant 0 : index
    %c0_68 = arith.constant 0 : index
    %c0_69 = arith.constant 0 : index
    %91 = vector.load %arg15[%c0_66, %c0_67, %c0_68, %c0_69] : memref<2x10x10x128xf32, #tpu.memory_space<vmem>>, vector<2x1x10x128xf32>
    tpu.vector_store %arg15[%c0_66, %c0_67, %c0_68, %c0_69], %89 {strides = array<i32>} : memref<2x10x10x128xf32, #tpu.memory_space<vmem>>, vector<2x1x10x128xf32>,
    %c0_70 = arith.constant 0 : index
    %c9 = arith.constant 9 : index
    %c0_71 = arith.constant 0 : index
    %c0_72 = arith.constant 0 : index
    %92 = vector.load %arg15[%c0_70, %c9, %c0_71, %c0_72] : memref<2x10x10x128xf32, #tpu.memory_space<vmem>>, vector<2x1x10x128xf32>
    tpu.vector_store %arg15[%c0_70, %c9, %c0_71, %c0_72], %89 {strides = array<i32>} : memref<2x10x10x128xf32, #tpu.memory_space<vmem>>, vector<2x1x10x128xf32>,
    %c0_73 = arith.constant 0 : index
    %c1_74 = arith.constant 1 : index
    %c0_75 = arith.constant 0 : index
    %c0_76 = arith.constant 0 : index
    %93 = vector.load %arg15[%c0_73, %c1_74, %c0_75, %c0_76] : memref<2x10x10x128xf32, #tpu.memory_space<vmem>>, vector<2x8x1x128xf32>
    tpu.vector_store %arg15[%c0_73, %c1_74, %c0_75, %c0_76], %90 {strides = array<i32>} : memref<2x10x10x128xf32, #tpu.memory_space<vmem>>, vector<2x8x1x128xf32>,
    %c0_77 = arith.constant 0 : index
    %c1_78 = arith.constant 1 : index
    %c9_79 = arith.constant 9 : index
    %c0_80 = arith.constant 0 : index
    %94 = vector.load %arg15[%c0_77, %c1_78, %c9_79, %c0_80] : memref<2x10x10x128xf32, #tpu.memory_space<vmem>>, vector<2x8x1x128xf32>
    tpu.vector_store %arg15[%c0_77, %c1_78, %c9_79, %c0_80], %90 {strides = array<i32>} : memref<2x10x10x128xf32, #tpu.memory_space<vmem>>, vector<2x8x1x128xf32>,
    %95 = vector.shape_cast %57 : vector<128x128xf32> to vector<2x8x8x128xf32>
    %c0_81 = arith.constant 0 : index
    %c1_82 = arith.constant 1 : index
    %c1_83 = arith.constant 1 : index
    %c0_84 = arith.constant 0 : index
    %96 = vector.load %arg15[%c0_81, %c1_82, %c1_83, %c0_84] : memref<2x10x10x128xf32, #tpu.memory_space<vmem>>, vector<2x8x8x128xf32>
    tpu.vector_store %arg15[%c0_81, %c1_82, %c1_83, %c0_84], %95 {strides = array<i32>} : memref<2x10x10x128xf32, #tpu.memory_space<vmem>>, vector<2x8x8x128xf32>,
    %c0_85 = arith.constant 0 : index
    %c0_86 = arith.constant 0 : index
    %c0_87 = arith.constant 0 : index
    %c0_88 = arith.constant 0 : index
    %97 = vector.load %arg15[%c0_85, %c0_86, %c0_87, %c0_88] : memref<2x10x10x128xf32, #tpu.memory_space<vmem>>, vector<2x8x8x128xf32>
    %98 = vector.shape_cast %97 : vector<2x8x8x128xf32> to vector<128x128xf32>
    %99 = arith.truncf %98 : vector<128x128xf32> to vector<128x128xbf16>
    %c0_89 = arith.constant 0 : index
    %c0_90 = arith.constant 0 : index
    %c1_91 = arith.constant 1 : index
    %c0_92 = arith.constant 0 : index
    %100 = vector.load %arg15[%c0_89, %c0_90, %c1_91, %c0_92] : memref<2x10x10x128xf32, #tpu.memory_space<vmem>>, vector<2x8x8x128xf32>
    %101 = vector.shape_cast %100 : vector<2x8x8x128xf32> to vector<128x128xf32>
    %102 = arith.truncf %101 : vector<128x128xf32> to vector<128x128xbf16>
    %c0_93 = arith.constant 0 : index
    %c0_94 = arith.constant 0 : index
    %c2 = arith.constant 2 : index
    %c0_95 = arith.constant 0 : index
    %103 = vector.load %arg15[%c0_93, %c0_94, %c2, %c0_95] : memref<2x10x10x128xf32, #tpu.memory_space<vmem>>, vector<2x8x8x128xf32>
    %104 = vector.shape_cast %103 : vector<2x8x8x128xf32> to vector<128x128xf32>
    %105 = arith.truncf %104 : vector<128x128xf32> to vector<128x128xbf16>
    %c0_96 = arith.constant 0 : index
    %c1_97 = arith.constant 1 : index
    %c0_98 = arith.constant 0 : index
    %c0_99 = arith.constant 0 : index
    %106 = vector.load %arg15[%c0_96, %c1_97, %c0_98, %c0_99] : memref<2x10x10x128xf32, #tpu.memory_space<vmem>>, vector<2x8x8x128xf32>
    %107 = vector.shape_cast %106 : vector<2x8x8x128xf32> to vector<128x128xf32>
    %108 = arith.truncf %107 : vector<128x128xf32> to vector<128x128xbf16>
    %c0_100 = arith.constant 0 : index
    %c1_101 = arith.constant 1 : index
    %c1_102 = arith.constant 1 : index
    %c0_103 = arith.constant 0 : index
    %109 = vector.load %arg15[%c0_100, %c1_101, %c1_102, %c0_103] : memref<2x10x10x128xf32, #tpu.memory_space<vmem>>, vector<2x8x8x128xf32>
    %110 = vector.shape_cast %109 : vector<2x8x8x128xf32> to vector<128x128xf32>
    %111 = arith.truncf %110 : vector<128x128xf32> to vector<128x128xbf16>
    %c0_104 = arith.constant 0 : index
    %c1_105 = arith.constant 1 : index
    %c2_106 = arith.constant 2 : index
    %c0_107 = arith.constant 0 : index
    %112 = vector.load %arg15[%c0_104, %c1_105, %c2_106, %c0_107] : memref<2x10x10x128xf32, #tpu.memory_space<vmem>>, vector<2x8x8x128xf32>
    %113 = vector.shape_cast %112 : vector<2x8x8x128xf32> to vector<128x128xf32>
    %114 = arith.truncf %113 : vector<128x128xf32> to vector<128x128xbf16>
    %c0_108 = arith.constant 0 : index
    %c2_109 = arith.constant 2 : index
    %c0_110 = arith.constant 0 : index
    %c0_111 = arith.constant 0 : index
    %115 = vector.load %arg15[%c0_108, %c2_109, %c0_110, %c0_111] : memref<2x10x10x128xf32, #tpu.memory_space<vmem>>, vector<2x8x8x128xf32>
    %116 = vector.shape_cast %115 : vector<2x8x8x128xf32> to vector<128x128xf32>
    %117 = arith.truncf %116 : vector<128x128xf32> to vector<128x128xbf16>
    %c0_112 = arith.constant 0 : index
    %c2_113 = arith.constant 2 : index
    %c1_114 = arith.constant 1 : index
    %c0_115 = arith.constant 0 : index
    %118 = vector.load %arg15[%c0_112, %c2_113, %c1_114, %c0_115] : memref<2x10x10x128xf32, #tpu.memory_space<vmem>>, vector<2x8x8x128xf32>
    %119 = vector.shape_cast %118 : vector<2x8x8x128xf32> to vector<128x128xf32>
    %120 = arith.truncf %119 : vector<128x128xf32> to vector<128x128xbf16>
    %c0_116 = arith.constant 0 : index
    %c2_117 = arith.constant 2 : index
    %c2_118 = arith.constant 2 : index
    %c0_119 = arith.constant 0 : index
    %121 = vector.load %arg15[%c0_116, %c2_117, %c2_118, %c0_119] : memref<2x10x10x128xf32, #tpu.memory_space<vmem>>, vector<2x8x8x128xf32>
    %122 = vector.shape_cast %121 : vector<2x8x8x128xf32> to vector<128x128xf32>
    %123 = arith.truncf %122 : vector<128x128xf32> to vector<128x128xbf16>
    %124 = tpu.concatenate %99, %102, %105, %108, %111, %114, %117, %120, %123 in 1 : vector<128x128xbf16>, vector<128x128xbf16>, vector<128x128xbf16>, vector<128x128xbf16>, vector<128x128xbf16>, vector<128x128xbf16>, vector<128x128xbf16>, vector<128x128xbf16>, vector<128x128xbf16> -> vector<128x1152xbf16>
    %c0_120 = arith.constant 0 : index
    %c0_121 = arith.constant 0 : index
    %125 = vector.load %arg7[%c0_120, %c0_121] : memref<1152x128xbf16, #tpu.memory_space<vmem>>, vector<1152x128xbf16>
    %cst_122 = arith.constant dense<0.000000e+00> : vector<128x128xf32>
    %126 = tpu.matmul %124, %125, %cst_122 {dimension_numbers = #tpu.dot_dimension_numbers<[1], [0], [0], [1], [0, 0, 1, 1], [], []>} : vector<128x1152xbf16>, vector<1152x128xbf16>, vector<128x128xf32> -> vector<128x128xf32>
    %c0_123 = arith.constant 0 : index
    %c0_124 = arith.constant 0 : index
    %127 = vector.load %arg12[%c0_123, %c0_124] : memref<1x128xf32, #tpu.memory_space<vmem>>, vector<1x128xf32>
    %c0_125 = arith.constant 0 : index
    %c0_126 = arith.constant 0 : index
    %128 = vector.load %arg13[%c0_125, %c0_126] : memref<1x128xf32, #tpu.memory_space<vmem>>, vector<1x128xf32>
    %cst_127 = arith.constant dense<0.000000e+00> : vector<128xf32>
    %129 = vector.multi_reduction <add>, %126, %cst_127 [0] : vector<128x128xf32> to vector<128xf32>
    %130 = vector.shape_cast %129 : vector<128xf32> to vector<1x128xf32>
    %cst_128 = arith.constant 7.812500e-03 : f32
    %131 = vector.broadcast %cst_128 : f32 to vector<1x128xf32>
    %132 = arith.mulf %130, %131 : vector<1x128xf32>
    %133 = arith.mulf %126, %126 : vector<128x128xf32>
    %cst_129 = arith.constant dense<0.000000e+00> : vector<128xf32>
    %134 = vector.multi_reduction <add>, %133, %cst_129 [0] : vector<128x128xf32> to vector<128xf32>
    %135 = vector.shape_cast %134 : vector<128xf32> to vector<1x128xf32>
    %cst_130 = arith.constant 7.812500e-03 : f32
    %136 = vector.broadcast %cst_130 : f32 to vector<1x128xf32>
    %137 = arith.mulf %135, %136 : vector<1x128xf32>
    %138 = arith.mulf %132, %132 : vector<1x128xf32>
    %139 = arith.subf %137, %138 : vector<1x128xf32>
    %cst_131 = arith.constant 0.000000e+00 : f32
    %140 = vector.broadcast %cst_131 : f32 to vector<1x128xf32>
    %141 = arith.maximumf %139, %140 : vector<1x128xf32>
    %142 = vector.broadcast %132 : vector<1x128xf32> to vector<128x128xf32>
    %143 = arith.subf %126, %142 : vector<128x128xf32>
    %cst_132 = arith.constant 9.99999974E-6 : f32
    %144 = vector.broadcast %cst_132 : f32 to vector<1x128xf32>
    %145 = arith.addf %141, %144 : vector<1x128xf32>
    %146 = math.rsqrt %145 : vector<1x128xf32>
    %147 = vector.broadcast %146 : vector<1x128xf32> to vector<128x128xf32>
    %148 = arith.mulf %143, %147 : vector<128x128xf32>
    %149 = vector.broadcast %127 : vector<1x128xf32> to vector<128x128xf32>
    %150 = arith.mulf %148, %149 : vector<128x128xf32>
    %151 = vector.broadcast %128 : vector<1x128xf32> to vector<128x128xf32>
    %152 = arith.addf %150, %151 : vector<128x128xf32>
    %153 = arith.addf %152, %88 : vector<128x128xf32>
    %cst_133 = arith.constant 0.000000e+00 : f32
    %154 = vector.broadcast %cst_133 : f32 to vector<128x128xf32>
    %155 = arith.maximumf %153, %154 : vector<128x128xf32>
    %156 = arith.truncf %155 : vector<128x128xf32> to vector<128x128xbf16>
    %c0_134 = arith.constant 0 : index
    %c0_135 = arith.constant 0 : index
    %157 = vector.load %arg14[%c0_134, %c0_135] : memref<128x128xbf16, #tpu.memory_space<vmem>>, vector<128x128xbf16>
    tpu.vector_store %arg14[%c0_134, %c0_135], %156 {strides = array<i32>} : memref<128x128xbf16, #tpu.memory_space<vmem>>, vector<128x128xbf16>,
    return
  }
  func.func @transform_0(%arg0: i32) -> (i32, i32, i32, i32) {
    %c0_i32 = arith.constant 0 : i32
    %c0_i32_0 = arith.constant 0 : i32
    %c0_i32_1 = arith.constant 0 : i32
    %c0_i32_2 = arith.constant 0 : i32
    %c0_i32_3 = arith.constant 0 : i32
    return %c0_i32, %c0_i32_0, %c0_i32_1, %c0_i32_2 : i32, i32, i32, i32
  }
  func.func @transform_1(%arg0: i32) -> (i32, i32, i32, i32) {
    %c0_i32 = arith.constant 0 : i32
    %c0_i32_0 = arith.constant 0 : i32
    %c0_i32_1 = arith.constant 0 : i32
    %c0_i32_2 = arith.constant 0 : i32
    %c0_i32_3 = arith.constant 0 : i32
    return %c0_i32, %c0_i32_0, %c0_i32_1, %c0_i32_2 : i32, i32, i32, i32
  }
  func.func @transform_2(%arg0: i32) -> (i32, i32, i32, i32) {
    %c0_i32 = arith.constant 0 : i32
    %c0_i32_0 = arith.constant 0 : i32
    %c0_i32_1 = arith.constant 0 : i32
    %c0_i32_2 = arith.constant 0 : i32
    %c0_i32_3 = arith.constant 0 : i32
    return %c0_i32, %c0_i32_0, %c0_i32_1, %c0_i32_2 : i32, i32, i32, i32
  }
  func.func @transform_3(%arg0: i32) -> (i32, i32, i32, i32) {
    %c0_i32 = arith.constant 0 : i32
    %c0_i32_0 = arith.constant 0 : i32
    %c0_i32_1 = arith.constant 0 : i32
    %c0_i32_2 = arith.constant 0 : i32
    %c0_i32_3 = arith.constant 0 : i32
    return %c0_i32, %c0_i32_0, %c0_i32_1, %c0_i32_2 : i32, i32, i32, i32
  }
  func.func @transform_4(%arg0: i32) -> (i32, i32) {
    %c0_i32 = arith.constant 0 : i32
    %c0_i32_0 = arith.constant 0 : i32
    %c0_i32_1 = arith.constant 0 : i32
    return %c0_i32, %c0_i32_0 : i32, i32
  }
  func.func @transform_5(%arg0: i32) -> (i32, i32) {
    %c0_i32 = arith.constant 0 : i32
    %c0_i32_0 = arith.constant 0 : i32
    %c0_i32_1 = arith.constant 0 : i32
    return %c0_i32, %c0_i32_0 : i32, i32
  }
  func.func @transform_6(%arg0: i32) -> (i32, i32) {
    %c0_i32 = arith.constant 0 : i32
    %c0_i32_0 = arith.constant 0 : i32
    %c0_i32_1 = arith.constant 0 : i32
    return %c0_i32, %c0_i32_0 : i32, i32
  }
  func.func @transform_7(%arg0: i32) -> (i32, i32) {
    %c0_i32 = arith.constant 0 : i32
    %c0_i32_0 = arith.constant 0 : i32
    %c0_i32_1 = arith.constant 0 : i32
    return %c0_i32, %c0_i32_0 : i32, i32
  }
  func.func @transform_8(%arg0: i32) -> (i32, i32) {
    %c0_i32 = arith.constant 0 : i32
    %c0_i32_0 = arith.constant 0 : i32
    %c0_i32_1 = arith.constant 0 : i32
    return %c0_i32, %c0_i32_0 : i32, i32
  }
  func.func @transform_9(%arg0: i32) -> (i32, i32) {
    %c0_i32 = arith.constant 0 : i32
    %c0_i32_0 = arith.constant 0 : i32
    %c0_i32_1 = arith.constant 0 : i32
    return %c0_i32, %c0_i32_0 : i32, i32
  }
  func.func @transform_10(%arg0: i32) -> (i32, i32) {
    %c0_i32 = arith.constant 0 : i32
    %c0_i32_0 = arith.constant 0 : i32
    %c0_i32_1 = arith.constant 0 : i32
    return %c0_i32, %c0_i32_0 : i32, i32
  }
  func.func @transform_11(%arg0: i32) -> (i32, i32) {
    %c0_i32 = arith.constant 0 : i32
    %c0_i32_0 = arith.constant 0 : i32
    %c0_i32_1 = arith.constant 0 : i32
    return %c0_i32, %c0_i32_0 : i32, i32
  }
  func.func @transform_12(%arg0: i32) -> (i32, i32) {
    %c0_i32 = arith.constant 0 : i32
    %c0_i32_0 = arith.constant 0 : i32
    %c0_i32_1 = arith.constant 0 : i32
    return %c0_i32, %c0_i32_0 : i32, i32
  }
  func.func @transform_13(%arg0: i32) -> (i32, i32) {
    %c0_i32 = arith.constant 0 : i32
    %c0_i32_0 = arith.constant 0 : i32
    %c0_i32_1 = arith.constant 0 : i32
    return %c0_i32, %c0_i32_0 : i32, i32
  }
}

module attributes {stable_mosaic.version = 11 : i64} {
  func.func @_res18_block_kernel(%arg0: i32, %arg1: memref<2x10x10x128xf32, #tpu.memory_space<vmem>>, %arg2: memref<1152x128xbf16, #tpu.memory_space<vmem>>, %arg3: memref<1152x128xbf16, #tpu.memory_space<vmem>>, %arg4: memref<1x128xf32, #tpu.memory_space<vmem>>, %arg5: memref<1x128xf32, #tpu.memory_space<vmem>>, %arg6: memref<1x128xf32, #tpu.memory_space<vmem>>, %arg7: memref<1x128xf32, #tpu.memory_space<vmem>>, %arg8: memref<128x128xbf16, #tpu.memory_space<vmem>>, %arg9: memref<2x10x10x128xf32, #tpu.memory_space<vmem>>) attributes {dimension_semantics = [#tpu.dimension_semantics<arbitrary>], iteration_bounds = array<i64: 1>, scalar_prefetch = 0 : i64, scratch_operands = 1 : i64, tpu.core_type = #tpu.core_type<tc>, window_params = [{pipeline_mode = #tpu.pipeline_mode<synchronous>, transform_indices = @transform_0, window_bounds = array<i64: 2, 10, 10, 128>}, {pipeline_mode = #tpu.pipeline_mode<synchronous>, transform_indices = @transform_1, window_bounds = array<i64: 1152, 128>}, {pipeline_mode = #tpu.pipeline_mode<synchronous>, transform_indices = @transform_2, window_bounds = array<i64: 1152, 128>}, {pipeline_mode = #tpu.pipeline_mode<synchronous>, transform_indices = @transform_3, window_bounds = array<i64: 1, 128>}, {pipeline_mode = #tpu.pipeline_mode<synchronous>, transform_indices = @transform_4, window_bounds = array<i64: 1, 128>}, {pipeline_mode = #tpu.pipeline_mode<synchronous>, transform_indices = @transform_5, window_bounds = array<i64: 1, 128>}, {pipeline_mode = #tpu.pipeline_mode<synchronous>, transform_indices = @transform_6, window_bounds = array<i64: 1, 128>}, {pipeline_mode = #tpu.pipeline_mode<synchronous>, transform_indices = @transform_7, window_bounds = array<i64: 128, 128>}]} {
    %c0 = arith.constant 0 : index
    %c0_0 = arith.constant 0 : index
    %c0_1 = arith.constant 0 : index
    %c0_2 = arith.constant 0 : index
    %0 = vector.load %arg1[%c0, %c0_0, %c0_1, %c0_2] : memref<2x10x10x128xf32, #tpu.memory_space<vmem>>, vector<2x8x8x128xf32>
    %1 = vector.shape_cast %0 : vector<2x8x8x128xf32> to vector<128x128xf32>
    %2 = arith.truncf %1 : vector<128x128xf32> to vector<128x128xbf16>
    %c0_3 = arith.constant 0 : index
    %c0_4 = arith.constant 0 : index
    %c1 = arith.constant 1 : index
    %c0_5 = arith.constant 0 : index
    %3 = vector.load %arg1[%c0_3, %c0_4, %c1, %c0_5] : memref<2x10x10x128xf32, #tpu.memory_space<vmem>>, vector<2x8x8x128xf32>
    %4 = vector.shape_cast %3 : vector<2x8x8x128xf32> to vector<128x128xf32>
    %5 = arith.truncf %4 : vector<128x128xf32> to vector<128x128xbf16>
    %c0_6 = arith.constant 0 : index
    %c0_7 = arith.constant 0 : index
    %c2 = arith.constant 2 : index
    %c0_8 = arith.constant 0 : index
    %6 = vector.load %arg1[%c0_6, %c0_7, %c2, %c0_8] : memref<2x10x10x128xf32, #tpu.memory_space<vmem>>, vector<2x8x8x128xf32>
    %7 = vector.shape_cast %6 : vector<2x8x8x128xf32> to vector<128x128xf32>
    %8 = arith.truncf %7 : vector<128x128xf32> to vector<128x128xbf16>
    %c0_9 = arith.constant 0 : index
    %c1_10 = arith.constant 1 : index
    %c0_11 = arith.constant 0 : index
    %c0_12 = arith.constant 0 : index
    %9 = vector.load %arg1[%c0_9, %c1_10, %c0_11, %c0_12] : memref<2x10x10x128xf32, #tpu.memory_space<vmem>>, vector<2x8x8x128xf32>
    %10 = vector.shape_cast %9 : vector<2x8x8x128xf32> to vector<128x128xf32>
    %11 = arith.truncf %10 : vector<128x128xf32> to vector<128x128xbf16>
    %c0_13 = arith.constant 0 : index
    %c1_14 = arith.constant 1 : index
    %c1_15 = arith.constant 1 : index
    %c0_16 = arith.constant 0 : index
    %12 = vector.load %arg1[%c0_13, %c1_14, %c1_15, %c0_16] : memref<2x10x10x128xf32, #tpu.memory_space<vmem>>, vector<2x8x8x128xf32>
    %13 = vector.shape_cast %12 : vector<2x8x8x128xf32> to vector<128x128xf32>
    %14 = arith.truncf %13 : vector<128x128xf32> to vector<128x128xbf16>
    %c0_17 = arith.constant 0 : index
    %c1_18 = arith.constant 1 : index
    %c2_19 = arith.constant 2 : index
    %c0_20 = arith.constant 0 : index
    %15 = vector.load %arg1[%c0_17, %c1_18, %c2_19, %c0_20] : memref<2x10x10x128xf32, #tpu.memory_space<vmem>>, vector<2x8x8x128xf32>
    %16 = vector.shape_cast %15 : vector<2x8x8x128xf32> to vector<128x128xf32>
    %17 = arith.truncf %16 : vector<128x128xf32> to vector<128x128xbf16>
    %c0_21 = arith.constant 0 : index
    %c2_22 = arith.constant 2 : index
    %c0_23 = arith.constant 0 : index
    %c0_24 = arith.constant 0 : index
    %18 = vector.load %arg1[%c0_21, %c2_22, %c0_23, %c0_24] : memref<2x10x10x128xf32, #tpu.memory_space<vmem>>, vector<2x8x8x128xf32>
    %19 = vector.shape_cast %18 : vector<2x8x8x128xf32> to vector<128x128xf32>
    %20 = arith.truncf %19 : vector<128x128xf32> to vector<128x128xbf16>
    %c0_25 = arith.constant 0 : index
    %c2_26 = arith.constant 2 : index
    %c1_27 = arith.constant 1 : index
    %c0_28 = arith.constant 0 : index
    %21 = vector.load %arg1[%c0_25, %c2_26, %c1_27, %c0_28] : memref<2x10x10x128xf32, #tpu.memory_space<vmem>>, vector<2x8x8x128xf32>
    %22 = vector.shape_cast %21 : vector<2x8x8x128xf32> to vector<128x128xf32>
    %23 = arith.truncf %22 : vector<128x128xf32> to vector<128x128xbf16>
    %c0_29 = arith.constant 0 : index
    %c2_30 = arith.constant 2 : index
    %c2_31 = arith.constant 2 : index
    %c0_32 = arith.constant 0 : index
    %24 = vector.load %arg1[%c0_29, %c2_30, %c2_31, %c0_32] : memref<2x10x10x128xf32, #tpu.memory_space<vmem>>, vector<2x8x8x128xf32>
    %25 = vector.shape_cast %24 : vector<2x8x8x128xf32> to vector<128x128xf32>
    %26 = arith.truncf %25 : vector<128x128xf32> to vector<128x128xbf16>
    %27 = tpu.concatenate %2, %5, %8, %11, %14, %17, %20, %23, %26 in 1 : vector<128x128xbf16>, vector<128x128xbf16>, vector<128x128xbf16>, vector<128x128xbf16>, vector<128x128xbf16>, vector<128x128xbf16>, vector<128x128xbf16>, vector<128x128xbf16>, vector<128x128xbf16> -> vector<128x1152xbf16>
    %c0_33 = arith.constant 0 : index
    %c0_34 = arith.constant 0 : index
    %28 = vector.load %arg2[%c0_33, %c0_34] : memref<1152x128xbf16, #tpu.memory_space<vmem>>, vector<1152x128xbf16>
    %cst = arith.constant dense<0.000000e+00> : vector<128x128xf32>
    %29 = tpu.matmul %27, %28, %cst {dimension_numbers = #tpu.dot_dimension_numbers<[1], [0], [0], [1], [0, 0, 1, 1], [], []>} : vector<128x1152xbf16>, vector<1152x128xbf16>, vector<128x128xf32> -> vector<128x128xf32>
    %c0_35 = arith.constant 0 : index
    %c0_36 = arith.constant 0 : index
    %30 = vector.load %arg4[%c0_35, %c0_36] : memref<1x128xf32, #tpu.memory_space<vmem>>, vector<1x128xf32>
    %c0_37 = arith.constant 0 : index
    %c0_38 = arith.constant 0 : index
    %31 = vector.load %arg5[%c0_37, %c0_38] : memref<1x128xf32, #tpu.memory_space<vmem>>, vector<1x128xf32>
    %cst_39 = arith.constant dense<0.000000e+00> : vector<128xf32>
    %32 = vector.multi_reduction <add>, %29, %cst_39 [0] : vector<128x128xf32> to vector<128xf32>
    %33 = vector.shape_cast %32 : vector<128xf32> to vector<1x128xf32>
    %cst_40 = arith.constant 7.812500e-03 : f32
    %34 = vector.broadcast %cst_40 : f32 to vector<1x128xf32>
    %35 = arith.mulf %33, %34 : vector<1x128xf32>
    %36 = arith.mulf %29, %29 : vector<128x128xf32>
    %cst_41 = arith.constant dense<0.000000e+00> : vector<128xf32>
    %37 = vector.multi_reduction <add>, %36, %cst_41 [0] : vector<128x128xf32> to vector<128xf32>
    %38 = vector.shape_cast %37 : vector<128xf32> to vector<1x128xf32>
    %cst_42 = arith.constant 7.812500e-03 : f32
    %39 = vector.broadcast %cst_42 : f32 to vector<1x128xf32>
    %40 = arith.mulf %38, %39 : vector<1x128xf32>
    %41 = arith.mulf %35, %35 : vector<1x128xf32>
    %42 = arith.subf %40, %41 : vector<1x128xf32>
    %cst_43 = arith.constant 0.000000e+00 : f32
    %43 = vector.broadcast %cst_43 : f32 to vector<1x128xf32>
    %44 = arith.maximumf %42, %43 : vector<1x128xf32>
    %45 = vector.broadcast %35 : vector<1x128xf32> to vector<128x128xf32>
    %46 = arith.subf %29, %45 : vector<128x128xf32>
    %cst_44 = arith.constant 9.99999974E-6 : f32
    %47 = vector.broadcast %cst_44 : f32 to vector<1x128xf32>
    %48 = arith.addf %44, %47 : vector<1x128xf32>
    %49 = math.rsqrt %48 : vector<1x128xf32>
    %50 = vector.broadcast %49 : vector<1x128xf32> to vector<128x128xf32>
    %51 = arith.mulf %46, %50 : vector<128x128xf32>
    %52 = vector.broadcast %30 : vector<1x128xf32> to vector<128x128xf32>
    %53 = arith.mulf %51, %52 : vector<128x128xf32>
    %54 = vector.broadcast %31 : vector<1x128xf32> to vector<128x128xf32>
    %55 = arith.addf %53, %54 : vector<128x128xf32>
    %cst_45 = arith.constant 0.000000e+00 : f32
    %56 = vector.broadcast %cst_45 : f32 to vector<128x128xf32>
    %57 = arith.maximumf %55, %56 : vector<128x128xf32>
    %c0_46 = arith.constant 0 : index
    %c1_47 = arith.constant 1 : index
    %c1_48 = arith.constant 1 : index
    %c0_49 = arith.constant 0 : index
    %58 = vector.load %arg1[%c0_46, %c1_47, %c1_48, %c0_49] : memref<2x10x10x128xf32, #tpu.memory_space<vmem>>, vector<2x8x8x128xf32>
    %59 = vector.shape_cast %58 : vector<2x8x8x128xf32> to vector<128x128xf32>
    %cst_50 = arith.constant 0.000000e+00 : f32
    %60 = vector.broadcast %cst_50 : f32 to vector<2x1x10x128xf32>
    %cst_51 = arith.constant 0.000000e+00 : f32
    %61 = vector.broadcast %cst_51 : f32 to vector<2x8x1x128xf32>
    %c0_52 = arith.constant 0 : index
    %c0_53 = arith.constant 0 : index
    %c0_54 = arith.constant 0 : index
    %c0_55 = arith.constant 0 : index
    %62 = vector.load %arg9[%c0_52, %c0_53, %c0_54, %c0_55] : memref<2x10x10x128xf32, #tpu.memory_space<vmem>>, vector<2x1x10x128xf32>
    tpu.vector_store %arg9[%c0_52, %c0_53, %c0_54, %c0_55], %60 {strides = array<i32>} : memref<2x10x10x128xf32, #tpu.memory_space<vmem>>, vector<2x1x10x128xf32>,
    %c0_56 = arith.constant 0 : index
    %c9 = arith.constant 9 : index
    %c0_57 = arith.constant 0 : index
    %c0_58 = arith.constant 0 : index
    %63 = vector.load %arg9[%c0_56, %c9, %c0_57, %c0_58] : memref<2x10x10x128xf32, #tpu.memory_space<vmem>>, vector<2x1x10x128xf32>
    tpu.vector_store %arg9[%c0_56, %c9, %c0_57, %c0_58], %60 {strides = array<i32>} : memref<2x10x10x128xf32, #tpu.memory_space<vmem>>, vector<2x1x10x128xf32>,
    %c0_59 = arith.constant 0 : index
    %c1_60 = arith.constant 1 : index
    %c0_61 = arith.constant 0 : index
    %c0_62 = arith.constant 0 : index
    %64 = vector.load %arg9[%c0_59, %c1_60, %c0_61, %c0_62] : memref<2x10x10x128xf32, #tpu.memory_space<vmem>>, vector<2x8x1x128xf32>
    tpu.vector_store %arg9[%c0_59, %c1_60, %c0_61, %c0_62], %61 {strides = array<i32>} : memref<2x10x10x128xf32, #tpu.memory_space<vmem>>, vector<2x8x1x128xf32>,
    %c0_63 = arith.constant 0 : index
    %c1_64 = arith.constant 1 : index
    %c9_65 = arith.constant 9 : index
    %c0_66 = arith.constant 0 : index
    %65 = vector.load %arg9[%c0_63, %c1_64, %c9_65, %c0_66] : memref<2x10x10x128xf32, #tpu.memory_space<vmem>>, vector<2x8x1x128xf32>
    tpu.vector_store %arg9[%c0_63, %c1_64, %c9_65, %c0_66], %61 {strides = array<i32>} : memref<2x10x10x128xf32, #tpu.memory_space<vmem>>, vector<2x8x1x128xf32>,
    %66 = vector.shape_cast %57 : vector<128x128xf32> to vector<2x8x8x128xf32>
    %c0_67 = arith.constant 0 : index
    %c1_68 = arith.constant 1 : index
    %c1_69 = arith.constant 1 : index
    %c0_70 = arith.constant 0 : index
    %67 = vector.load %arg9[%c0_67, %c1_68, %c1_69, %c0_70] : memref<2x10x10x128xf32, #tpu.memory_space<vmem>>, vector<2x8x8x128xf32>
    tpu.vector_store %arg9[%c0_67, %c1_68, %c1_69, %c0_70], %66 {strides = array<i32>} : memref<2x10x10x128xf32, #tpu.memory_space<vmem>>, vector<2x8x8x128xf32>,
    %c0_71 = arith.constant 0 : index
    %c0_72 = arith.constant 0 : index
    %c0_73 = arith.constant 0 : index
    %c0_74 = arith.constant 0 : index
    %68 = vector.load %arg9[%c0_71, %c0_72, %c0_73, %c0_74] : memref<2x10x10x128xf32, #tpu.memory_space<vmem>>, vector<2x8x8x128xf32>
    %69 = vector.shape_cast %68 : vector<2x8x8x128xf32> to vector<128x128xf32>
    %70 = arith.truncf %69 : vector<128x128xf32> to vector<128x128xbf16>
    %c0_75 = arith.constant 0 : index
    %c0_76 = arith.constant 0 : index
    %c1_77 = arith.constant 1 : index
    %c0_78 = arith.constant 0 : index
    %71 = vector.load %arg9[%c0_75, %c0_76, %c1_77, %c0_78] : memref<2x10x10x128xf32, #tpu.memory_space<vmem>>, vector<2x8x8x128xf32>
    %72 = vector.shape_cast %71 : vector<2x8x8x128xf32> to vector<128x128xf32>
    %73 = arith.truncf %72 : vector<128x128xf32> to vector<128x128xbf16>
    %c0_79 = arith.constant 0 : index
    %c0_80 = arith.constant 0 : index
    %c2_81 = arith.constant 2 : index
    %c0_82 = arith.constant 0 : index
    %74 = vector.load %arg9[%c0_79, %c0_80, %c2_81, %c0_82] : memref<2x10x10x128xf32, #tpu.memory_space<vmem>>, vector<2x8x8x128xf32>
    %75 = vector.shape_cast %74 : vector<2x8x8x128xf32> to vector<128x128xf32>
    %76 = arith.truncf %75 : vector<128x128xf32> to vector<128x128xbf16>
    %c0_83 = arith.constant 0 : index
    %c1_84 = arith.constant 1 : index
    %c0_85 = arith.constant 0 : index
    %c0_86 = arith.constant 0 : index
    %77 = vector.load %arg9[%c0_83, %c1_84, %c0_85, %c0_86] : memref<2x10x10x128xf32, #tpu.memory_space<vmem>>, vector<2x8x8x128xf32>
    %78 = vector.shape_cast %77 : vector<2x8x8x128xf32> to vector<128x128xf32>
    %79 = arith.truncf %78 : vector<128x128xf32> to vector<128x128xbf16>
    %c0_87 = arith.constant 0 : index
    %c1_88 = arith.constant 1 : index
    %c1_89 = arith.constant 1 : index
    %c0_90 = arith.constant 0 : index
    %80 = vector.load %arg9[%c0_87, %c1_88, %c1_89, %c0_90] : memref<2x10x10x128xf32, #tpu.memory_space<vmem>>, vector<2x8x8x128xf32>
    %81 = vector.shape_cast %80 : vector<2x8x8x128xf32> to vector<128x128xf32>
    %82 = arith.truncf %81 : vector<128x128xf32> to vector<128x128xbf16>
    %c0_91 = arith.constant 0 : index
    %c1_92 = arith.constant 1 : index
    %c2_93 = arith.constant 2 : index
    %c0_94 = arith.constant 0 : index
    %83 = vector.load %arg9[%c0_91, %c1_92, %c2_93, %c0_94] : memref<2x10x10x128xf32, #tpu.memory_space<vmem>>, vector<2x8x8x128xf32>
    %84 = vector.shape_cast %83 : vector<2x8x8x128xf32> to vector<128x128xf32>
    %85 = arith.truncf %84 : vector<128x128xf32> to vector<128x128xbf16>
    %c0_95 = arith.constant 0 : index
    %c2_96 = arith.constant 2 : index
    %c0_97 = arith.constant 0 : index
    %c0_98 = arith.constant 0 : index
    %86 = vector.load %arg9[%c0_95, %c2_96, %c0_97, %c0_98] : memref<2x10x10x128xf32, #tpu.memory_space<vmem>>, vector<2x8x8x128xf32>
    %87 = vector.shape_cast %86 : vector<2x8x8x128xf32> to vector<128x128xf32>
    %88 = arith.truncf %87 : vector<128x128xf32> to vector<128x128xbf16>
    %c0_99 = arith.constant 0 : index
    %c2_100 = arith.constant 2 : index
    %c1_101 = arith.constant 1 : index
    %c0_102 = arith.constant 0 : index
    %89 = vector.load %arg9[%c0_99, %c2_100, %c1_101, %c0_102] : memref<2x10x10x128xf32, #tpu.memory_space<vmem>>, vector<2x8x8x128xf32>
    %90 = vector.shape_cast %89 : vector<2x8x8x128xf32> to vector<128x128xf32>
    %91 = arith.truncf %90 : vector<128x128xf32> to vector<128x128xbf16>
    %c0_103 = arith.constant 0 : index
    %c2_104 = arith.constant 2 : index
    %c2_105 = arith.constant 2 : index
    %c0_106 = arith.constant 0 : index
    %92 = vector.load %arg9[%c0_103, %c2_104, %c2_105, %c0_106] : memref<2x10x10x128xf32, #tpu.memory_space<vmem>>, vector<2x8x8x128xf32>
    %93 = vector.shape_cast %92 : vector<2x8x8x128xf32> to vector<128x128xf32>
    %94 = arith.truncf %93 : vector<128x128xf32> to vector<128x128xbf16>
    %95 = tpu.concatenate %70, %73, %76, %79, %82, %85, %88, %91, %94 in 1 : vector<128x128xbf16>, vector<128x128xbf16>, vector<128x128xbf16>, vector<128x128xbf16>, vector<128x128xbf16>, vector<128x128xbf16>, vector<128x128xbf16>, vector<128x128xbf16>, vector<128x128xbf16> -> vector<128x1152xbf16>
    %c0_107 = arith.constant 0 : index
    %c0_108 = arith.constant 0 : index
    %96 = vector.load %arg3[%c0_107, %c0_108] : memref<1152x128xbf16, #tpu.memory_space<vmem>>, vector<1152x128xbf16>
    %cst_109 = arith.constant dense<0.000000e+00> : vector<128x128xf32>
    %97 = tpu.matmul %95, %96, %cst_109 {dimension_numbers = #tpu.dot_dimension_numbers<[1], [0], [0], [1], [0, 0, 1, 1], [], []>} : vector<128x1152xbf16>, vector<1152x128xbf16>, vector<128x128xf32> -> vector<128x128xf32>
    %c0_110 = arith.constant 0 : index
    %c0_111 = arith.constant 0 : index
    %98 = vector.load %arg6[%c0_110, %c0_111] : memref<1x128xf32, #tpu.memory_space<vmem>>, vector<1x128xf32>
    %c0_112 = arith.constant 0 : index
    %c0_113 = arith.constant 0 : index
    %99 = vector.load %arg7[%c0_112, %c0_113] : memref<1x128xf32, #tpu.memory_space<vmem>>, vector<1x128xf32>
    %cst_114 = arith.constant dense<0.000000e+00> : vector<128xf32>
    %100 = vector.multi_reduction <add>, %97, %cst_114 [0] : vector<128x128xf32> to vector<128xf32>
    %101 = vector.shape_cast %100 : vector<128xf32> to vector<1x128xf32>
    %cst_115 = arith.constant 7.812500e-03 : f32
    %102 = vector.broadcast %cst_115 : f32 to vector<1x128xf32>
    %103 = arith.mulf %101, %102 : vector<1x128xf32>
    %104 = arith.mulf %97, %97 : vector<128x128xf32>
    %cst_116 = arith.constant dense<0.000000e+00> : vector<128xf32>
    %105 = vector.multi_reduction <add>, %104, %cst_116 [0] : vector<128x128xf32> to vector<128xf32>
    %106 = vector.shape_cast %105 : vector<128xf32> to vector<1x128xf32>
    %cst_117 = arith.constant 7.812500e-03 : f32
    %107 = vector.broadcast %cst_117 : f32 to vector<1x128xf32>
    %108 = arith.mulf %106, %107 : vector<1x128xf32>
    %109 = arith.mulf %103, %103 : vector<1x128xf32>
    %110 = arith.subf %108, %109 : vector<1x128xf32>
    %cst_118 = arith.constant 0.000000e+00 : f32
    %111 = vector.broadcast %cst_118 : f32 to vector<1x128xf32>
    %112 = arith.maximumf %110, %111 : vector<1x128xf32>
    %113 = vector.broadcast %103 : vector<1x128xf32> to vector<128x128xf32>
    %114 = arith.subf %97, %113 : vector<128x128xf32>
    %cst_119 = arith.constant 9.99999974E-6 : f32
    %115 = vector.broadcast %cst_119 : f32 to vector<1x128xf32>
    %116 = arith.addf %112, %115 : vector<1x128xf32>
    %117 = math.rsqrt %116 : vector<1x128xf32>
    %118 = vector.broadcast %117 : vector<1x128xf32> to vector<128x128xf32>
    %119 = arith.mulf %114, %118 : vector<128x128xf32>
    %120 = vector.broadcast %98 : vector<1x128xf32> to vector<128x128xf32>
    %121 = arith.mulf %119, %120 : vector<128x128xf32>
    %122 = vector.broadcast %99 : vector<1x128xf32> to vector<128x128xf32>
    %123 = arith.addf %121, %122 : vector<128x128xf32>
    %124 = arith.addf %123, %59 : vector<128x128xf32>
    %cst_120 = arith.constant 0.000000e+00 : f32
    %125 = vector.broadcast %cst_120 : f32 to vector<128x128xf32>
    %126 = arith.maximumf %124, %125 : vector<128x128xf32>
    %127 = arith.truncf %126 : vector<128x128xf32> to vector<128x128xbf16>
    %c0_121 = arith.constant 0 : index
    %c0_122 = arith.constant 0 : index
    %128 = vector.load %arg8[%c0_121, %c0_122] : memref<128x128xbf16, #tpu.memory_space<vmem>>, vector<128x128xbf16>
    tpu.vector_store %arg8[%c0_121, %c0_122], %127 {strides = array<i32>} : memref<128x128xbf16, #tpu.memory_space<vmem>>, vector<128x128xbf16>,
    return
  }
  func.func @transform_0(%arg0: i32) -> (i32, i32, i32, i32) {
    %c0_i32 = arith.constant 0 : i32
    %c0_i32_0 = arith.constant 0 : i32
    %c0_i32_1 = arith.constant 0 : i32
    %c0_i32_2 = arith.constant 0 : i32
    %c0_i32_3 = arith.constant 0 : i32
    return %c0_i32, %c0_i32_0, %c0_i32_1, %c0_i32_2 : i32, i32, i32, i32
  }
  func.func @transform_1(%arg0: i32) -> (i32, i32) {
    %c0_i32 = arith.constant 0 : i32
    %c0_i32_0 = arith.constant 0 : i32
    %c0_i32_1 = arith.constant 0 : i32
    return %c0_i32, %c0_i32_0 : i32, i32
  }
  func.func @transform_2(%arg0: i32) -> (i32, i32) {
    %c0_i32 = arith.constant 0 : i32
    %c0_i32_0 = arith.constant 0 : i32
    %c0_i32_1 = arith.constant 0 : i32
    return %c0_i32, %c0_i32_0 : i32, i32
  }
  func.func @transform_3(%arg0: i32) -> (i32, i32) {
    %c0_i32 = arith.constant 0 : i32
    %c0_i32_0 = arith.constant 0 : i32
    %c0_i32_1 = arith.constant 0 : i32
    return %c0_i32, %c0_i32_0 : i32, i32
  }
  func.func @transform_4(%arg0: i32) -> (i32, i32) {
    %c0_i32 = arith.constant 0 : i32
    %c0_i32_0 = arith.constant 0 : i32
    %c0_i32_1 = arith.constant 0 : i32
    return %c0_i32, %c0_i32_0 : i32, i32
  }
  func.func @transform_5(%arg0: i32) -> (i32, i32) {
    %c0_i32 = arith.constant 0 : i32
    %c0_i32_0 = arith.constant 0 : i32
    %c0_i32_1 = arith.constant 0 : i32
    return %c0_i32, %c0_i32_0 : i32, i32
  }
  func.func @transform_6(%arg0: i32) -> (i32, i32) {
    %c0_i32 = arith.constant 0 : i32
    %c0_i32_0 = arith.constant 0 : i32
    %c0_i32_1 = arith.constant 0 : i32
    return %c0_i32, %c0_i32_0 : i32, i32
  }
  func.func @transform_7(%arg0: i32) -> (i32, i32) {
    %c0_i32 = arith.constant 0 : i32
    %c0_i32_0 = arith.constant 0 : i32
    %c0_i32_1 = arith.constant 0 : i32
    return %c0_i32, %c0_i32_0 : i32, i32
  }
}

</mosaic_0001>

<bundles_post_ra>
// kernel: res18_conv_layer.3
= control target key start
LH: loop header
LB: loop body
LE: loop exit
PB: predicated region body
PF: predicated region fallthrough
CT: control target
= control target key end

     0   :  { %s6016_s1 = inlined_call_operand.vmem [shape: bf16[1152,128], index: 1, kind: input, shape index: {}]   ;;  %s6017_s0 = inlined_call_operand.vmem [shape: f32[2,10,10,128], index: 0, kind: input, shape index: {}]   ;;  %s6018_s2 = inlined_call_operand.vmem [shape: bf16[1152,128], index: 2, kind: input, shape index: {}]   ;;  %s6019_s3 = inlined_call_operand.vmem [shape: f32[1,128], index: 3, kind: input, shape index: {}]   ;;  %s6020_s4 = inlined_call_operand.vmem [shape: f32[1,128], index: 4, kind: input, shape index: {}]   ;;  %s6021_s5 = inlined_call_operand.vmem [shape: f32[1,128], index: 5, kind: input, shape index: {}]   ;;  %s6022_s6 = inlined_call_operand.vmem [shape: f32[1,128], index: 6, kind: input, shape index: {}]   ;;  %s6023_s7 = inlined_call_operand.vmem [shape: bf16[128,128], index: 7, kind: output, shape index: {}]  }
   0x1   :  { %v3992_v0 = vld [vmem:[%s6016_s1 + $0x78] sm:$0xff]   ;;  %v3996_v4 = vld [vmem:[%s6016_s1 + $0x70] sm:$0xff]   ;;  %v4000_v8 = vld [vmem:[%s6016_s1 + $0x68] sm:$0xff]  }
   0x2   :  { %v3993_v1 = vld [vmem:[%s6016_s1 + $0xf8] sm:$0xff]   ;;  %3383 = vmatprep.subr.bf16.mxu0 %v3992_v0  ;;  %v3997_v5 = vld [vmem:[%s6016_s1 + $0xf0] sm:$0xff]   ;;  %v4001_v9 = vld [vmem:[%s6016_s1 + $0xe8] sm:$0xff]  }
   0x3   :  { %v3994_v2 = vld [vmem:[%s6016_s1 + $0x38] sm:$0xff]   ;;  %3447 = vmatprep.subr.bf16.mxu1 %v3993_v1  ;;  %v3998_v6 = vld [vmem:[%s6016_s1 + $0x30] sm:$0xff]   ;;  %v4002_v10 = vld [vmem:[%s6016_s1 + $0x28] sm:$0xff]  }
   0x4   :  { %v3995_v3 = vld [vmem:[%s6016_s1 + $0xb8] sm:$0xff]   ;;  %3384 = vmatpush3.bf16.msra.mxu0 %v3994_v2  ;;  %v3999_v7 = vld [vmem:[%s6016_s1 + $0xb0] sm:$0xff]   ;;  %v4003_v11 = vld [vmem:[%s6016_s1 + $0xa8] sm:$0xff]  }
   0x5   :  { %3448 = vmatpush3.bf16.msra.mxu1 %v3995_v3  ;;  %3385 = vmatprep.subr.bf16.mxu0 %v3996_v4  ;;  %v4004_v12 = vld [vmem:[%s6016_s1 + $0x60] sm:$0xff]   ;;  %v4008_v16 = vld [vmem:[%s6016_s1 + $0x58] sm:$0xff]   ;;  %v4012_v20 = vld [vmem:[%s6016_s1 + $0x50] sm:$0xff]  }
   0x6   :  { %3449 = vmatprep.subr.bf16.mxu1 %v3997_v5  ;;  %v4005_v13 = vld [vmem:[%s6016_s1 + $0xe0] sm:$0xff]   ;;  %v4009_v17 = vld [vmem:[%s6016_s1 + $0xd8] sm:$0xff]   ;;  %v4013_v21 = vld [vmem:[%s6016_s1 + $0xd0] sm:$0xff]  }
   0x7   :  { %v4006_v14 = vld [vmem:[%s6016_s1 + $0x20] sm:$0xff]   ;;  %v4010_v18 = vld [vmem:[%s6016_s1 + $0x18] sm:$0xff]   ;;  %v4014_v22 = vld [vmem:[%s6016_s1 + $0x10] sm:$0xff]  }
   0x8   :  { %3386 = vmatpush3.bf16.msra.mxu0 %v3998_v6  ;;  %v4007_v15 = vld [vmem:[%s6016_s1 + $0xa0] sm:$0xff]   ;;  %v4011_v19 = vld [vmem:[%s6016_s1 + $0x98] sm:$0xff]   ;;  %v4015_v23 = vld [vmem:[%s6016_s1 + $0x90] sm:$0xff]  }
   0x9   :  { %3450 = vmatpush3.bf16.msra.mxu1 %v3999_v7  ;;  %3387 = vmatprep.subr.bf16.mxu0 %v4000_v8  ;;  %v4016_v24 = vld [vmem:[%s6016_s1 + $0x48] sm:$0xff]   ;;  %v4020_v28 = vld [vmem:[%s6016_s1 + $0x40] sm:$0xff]   ;;  %v4300_v33 = vld [vmem:[%s6017_s0 + $0x11] sm:$0xff] }
   0xa   :  { %3451 = vmatprep.subr.bf16.mxu1 %v4001_v9  ;;  %v4017_v25 = vld [vmem:[%s6016_s1 + $0xc8] sm:$0xff]   ;;  %v4021_v29 = vld [vmem:[%s6016_s1 + $0xc0] sm:$0xff]   ;;  %v3060_v34 = vld [vmem:[%s6017_s0 + $0x10] sm:$0xff] }
   0xb   :  { %v4018_v26 = vld [vmem:[%s6016_s1 + $0x8] sm:$0xff]   ;;  %v4022_v30 = vld [vmem:[%s6016_s1] sm:$0xff]   ;;  %v4318_v41 = vld [vmem:[%s6017_s0 + $0x12] sm:$0xff] }
   0xc   :  { %3388 = vmatpush3.bf16.msra.mxu0 %v4002_v10  ;;  %v4019_v27 = vld [vmem:[%s6016_s1 + $0x88] sm:$0xff]   ;;  %v4023_v31 = vld [vmem:[%s6016_s1 + $0x80] sm:$0xff]   ;;  %v4024_v43 = vld [vmem:[%s6016_s1 + $0x178] sm:$0xff]  }
   0xd   :  { %3452 = vmatpush3.bf16.msra.mxu1 %v4003_v11  ;;  %3389 = vmatprep.subr.bf16.mxu0 %v4004_v12  ;;  %v51_v32 = vld [vmem:[%s6017_s0 + $0x1] sm:$0xff]  ;;  %v4025_v44 = vld [vmem:[%s6016_s1 + $0x138] sm:$0xff]   ;;  %v3062_v48 = vld [vmem:[%s6017_s0 + $0x30] sm:$0xff] }
   0xe   :  { %3453 = vmatprep.subr.bf16.mxu1 %v4005_v13  ;;  %v67_v35 = vpack.c.bf16 %v4300_v33, %v51_v32  ;;  %v3061_v36 = vld [vmem:[%s6017_s0 + $0x20] sm:$0xff]  ;;  %v4335_v46 = vld [vmem:[%s6017_s0 + $0x31] sm:$0xff]  ;;  %v4028_v63 = vld [vmem:[%s6016_s1 + $0x168] sm:$0xff]  }
   0xf   :  { %v27_v37 = vld [vmem:[%s6017_s0] sm:$0xff]  ;;  %v116_v39 = vpack.c.bf16 %v3061_v36, %v3060_v34  ;;  %v4355_v52 = vld [vmem:[%s6017_s0 + $0x32] sm:$0xff]  ;;  %v4361_v54 = vpack.c.bf16 %v3062_v48, %v3061_v36  ;;  %v4029_v2 = vld [vmem:[%s6016_s1 + $0x128] sm:$0xff]  }
  0x10   :  { %3390 = vmatpush3.bf16.msra.mxu0 %v4006_v14  ;;  %v75_v38 = vld [vmem:[%s6017_s0 + $0x2] sm:$0xff]  ;;  %v43_v40 = vpack.c.bf16 %v3060_v34, %v27_v37  ;;  %853 = vmatprep.mubr.bf16.mxu0 %v67_v35  ;;  %v4026_v53 = vld [vmem:[%s6016_s1 + $0x170] sm:$0xff]   ;;  %v4032_v13 = vld [vmem:[%s6016_s1 + $0x158] sm:$0xff]  }
  0x11   :  { %3454 = vmatpush3.bf16.msra.mxu1 %v4007_v15  ;;  %3391 = vmatprep.subr.bf16.mxu0 %v4008_v16  ;;  %v91_v42 = vpack.c.bf16 %v4318_v41, %v75_v38  ;;  %v4330_v45 = vld [vmem:[%s6017_s0 + $0x21] sm:$0xff]  ;;  %v4027_v55 = vld [vmem:[%s6016_s1 + $0x130] sm:$0xff]  }
  0x12   :  { %3455 = vmatprep.subr.bf16.mxu1 %v4009_v17  ;;  %950 = vmatprep.mubr.bf16.mxu1 %v116_v39  ;;  %v4339_v47 = vpack.c.bf16 %v4335_v46, %v4330_v45  ;;  %v3063_v49 = vld [vmem:[%s6017_s0 + $0x40] sm:$0xff]  ;;  %v4374_v57 = vld [vmem:[%s6017_s0 + $0x51] sm:$0xff]  ;;  %v4040_v38 = vld [vmem:[%s6016_s1 + $0x1e8] sm:$0xff]  }
  0x13   :  { %v4350_v50 = vld [vmem:[%s6017_s0 + $0x22] sm:$0xff]  ;;  %v117_v51 = vpack.c.bf16 %v3063_v49, %v3062_v48  ;;  %v3064_v60 = vld [vmem:[%s6017_s0 + $0x50] sm:$0xff] }
  0x14   :  { %3392 = vmatpush3.bf16.msra.mxu0 %v4010_v18  ;;  %v4369_v56 = vld [vmem:[%s6017_s0 + $0x41] sm:$0xff]  ;;  %v4378_v58 = vpack.c.bf16 %v4355_v52, %v4350_v50  ;;  %v4402_v1 = vld [vmem:[%s6017_s0 + $0x52] sm:$0xff]  ;;  %v4430_v8 = vpack.c.bf16 %v3064_v60, %v3063_v49 }
  0x15   :  { %3456 = vmatpush3.bf16.msra.mxu1 %v4011_v19  ;;  %3393 = vmatprep.subr.bf16.mxu0 %v4012_v20  ;;  %v4382_v59 = vpack.c.bf16 %v4374_v57, %v4369_v56  ;;  %v3065_v61 = vld [vmem:[%s6017_s0 + $0x60] sm:$0xff]  ;;  %v4417_v4 = vld [vmem:[%s6017_s0 + $0x71] sm:$0xff]  ;;  %v4041_v39 = vld [vmem:[%s6016_s1 + $0x1a8] sm:$0xff]  }
  0x16   :  { %3457 = vmatprep.subr.bf16.mxu1 %v4013_v21  ;;  %v118_v62 = vpack.c.bf16 %v3065_v61, %v3064_v60  ;;  %v4397_v0 = vld [vmem:[%s6017_s0 + $0x42] sm:$0xff]  ;;  %v3066_v5 = vld [vmem:[%s6017_s0 + $0x70] sm:$0xff]  ;;  %v4033_v18 = vld [vmem:[%s6016_s1 + $0x1f8] sm:$0xff]  }
  0x17   :  { %v4412_v3 = vld [vmem:[%s6017_s0 + $0x61] sm:$0xff]  ;;  %v4437_v10 = vpack.c.bf16 %v4402_v1, %v4397_v0  ;;  %v4456_v15 = vld [vmem:[%s6017_s0 + $0x72] sm:$0xff] }
  0x18   :  { %3394 = vmatpush3.bf16.msra.mxu0 %v4014_v22  ;;  %v4425_v6 = vld [vmem:[%s6017_s0 + $0x80] sm:$0xff]  ;;  %v4441_v11 = vpack.c.bf16 %v4417_v4, %v4412_v3  ;;  %v4464_v17 = vld [vmem:[%s6017_s0 + $0xb1] sm:$0xff] }
  0x19   :  { %3458 = vmatpush3.bf16.msra.mxu1 %v4015_v23  ;;  %3395 = vmatprep.subr.bf16.mxu0 %v4016_v24  ;;  %v4030_v7 = vld [vmem:[%s6016_s1 + $0x160] sm:$0xff]   ;;  %v119_v12 = vpack.c.bf16 %v4425_v6, %v3066_v5  ;;  %v3068_v19 = vld [vmem:[%s6017_s0 + $0xb0] sm:$0xff]  ;;  %v4034_v20 = vld [vmem:[%s6016_s1 + $0x118] sm:$0xff]   ;;  %v4486_v24 = vpack.c.bf16 %v3066_v5, %v3065_v61 }
  0x1a   :  { %3459 = vmatprep.subr.bf16.mxu1 %v4017_v25  ;;  %v4031_v9 = vld [vmem:[%s6016_s1 + $0x120] sm:$0xff]   ;;  %v4035_v21 = vld [vmem:[%s6016_s1 + $0x1b8] sm:$0xff]   ;;  %v4036_v23 = vld [vmem:[%s6016_s1 + $0x1f0] sm:$0xff]  }
  0x1b   :  { %v4451_v14 = vld [vmem:[%s6017_s0 + $0x62] sm:$0xff]  ;;  %v4509_v32 = vld [vmem:[%s6017_s0 + $0xb2] sm:$0xff] }
  0x1c   :  { %3396 = vmatpush3.bf16.msra.mxu0 %v4018_v26  ;;  %v59_v16 = vld [vmem:[%s6017_s0 + $0xa1] sm:$0xff]  ;;  %v4490_v25 = vpack.c.bf16 %v4456_v15, %v4451_v14  ;;  %v4519_v35 = vld [vmem:[%s6017_s0 + $0xd1] sm:$0xff] }
  0x1d   :  { %3460 = vmatpush3.bf16.msra.mxu1 %v4019_v27  ;;  %3397 = vmatprep.subr.bf16.mxu0 %v4020_v28  ;;  %v3069_v22 = vld [vmem:[%s6017_s0 + $0xc0] sm:$0xff]  ;;  %v71_v26 = vpack.c.bf16 %v4464_v17, %v59_v16  ;;  %v4037_v27 = vld [vmem:[%s6016_s1 + $0x1b0] sm:$0xff]   ;;  %v4046_v5 = vld [vmem:[%s6016_s1 + $0x1d8] sm:$0xff]  }
  0x1e   :  { %3461 = vmatprep.subr.bf16.mxu1 %v4021_v29  ;;  %v120_v28 = vpack.c.bf16 %v3069_v22, %v3068_v19  ;;  %v35_v29 = vld [vmem:[%s6017_s0 + $0xa0] sm:$0xff]  ;;  %v4039_v36 = vld [vmem:[%s6016_s1 + $0x110] sm:$0xff]  }
  0x1f   :  { %v4514_v34 = vld [vmem:[%s6017_s0 + $0xc1] sm:$0xff]  ;;  %v3070_v37 = vld [vmem:[%s6017_s0 + $0xd0] sm:$0xff] }
  0x20   :  { %3398 = vmatpush3.bf16.msra.mxu0 %v4022_v30  ;;  %v4038_v30 = vld [vmem:[%s6016_s1 + $0x150] sm:$0xff]   ;;  %v4543_v48 = vpack.c.bf16 %v4519_v35, %v4514_v34  ;;  %v4043_v49 = vld [vmem:[%s6016_s1 + $0x1a0] sm:$0xff]  }
  0x21   :  { %3462 = vmatpush3.bf16.msra.mxu1 %v4023_v31  ;;  %3511 = vmatprep.subr.bf16.mxu0 %v4024_v43  ;;  %v83_v31 = vld [vmem:[%s6017_s0 + $0xa2] sm:$0xff]  ;;  %v47_v43 = vpack.c.bf16 %v3068_v19, %v35_v29  ;;  %v4559_v60 = vld [vmem:[%s6017_s0 + $0xd2] sm:$0xff] }
  0x22   :  { %3575 = vmatprep.subr.bf16.mxu1 %v4033_v18  ;;  %v4564_v61 = vld [vmem:[%s6017_s0 + $0xe1] sm:$0xff]  ;;  %v4049_v19 = vld [vmem:[%s6016_s1 + $0x190] sm:$0xff]  }
  0x23   :  { %854 = vmatmul.mubr.bf16.vlgmr.msra.gmra.mxu0 %v43_v40  ;;  %v3071_v40 = vld [vmem:[%s6017_s0 + $0xe0] sm:$0xff]  ;;  %v3074_v29 = vld [vmem:[%s6017_s0 + $0x110] sm:$0xff] }
  0x24   :  { %951 = vmatmul.mubr.bf16.vlgmr.msra.gmra.mxu1 %v91_v42  ;;  %3512 = vmatpush3.bf16.msra.mxu0 %v4025_v44  ;;  %v4042_v42 = vld [vmem:[%s6016_s1 + $0x1e0] sm:$0xff]   ;;  %v95_v44 = vpack.c.bf16 %v4509_v32, %v83_v31  ;;  %v4052_v31 = vld [vmem:[%s6016_s1 + $0x1c8] sm:$0xff]  }
  0x25   :  { %861 = vmatprep.mubr.bf16.mxu0 %v4339_v47  ;;  %958 = vmatprep.mubr.bf16.mxu1 %v117_v51  ;;  %v121_v51 = vpack.c.bf16 %v3071_v40, %v3070_v37 }
  0x26   :  { %3513 = vmatprep.subr.bf16.mxu0 %v4026_v53  ;;  %3576 = vmatpush3.bf16.msra.mxu1 %v4035_v21  ;;  %v4044_v53 = vld [vmem:[%s6016_s1 + $0x148] sm:$0xff]   ;;  %v4050_v21 = vld [vmem:[%s6016_s1 + $0x140] sm:$0xff]  }
  0x27   :  { %3577 = vmatprep.subr.bf16.mxu1 %v4036_v23  ;;  %v4615_v23 = vld [vmem:[%s6017_s0 + $0xf2] sm:$0xff] }
  0x28   :  { %3514 = vmatpush3.bf16.msra.mxu0 %v4027_v55  ;;  %v4554_v55 = vld [vmem:[%s6017_s0 + $0xc2] sm:$0xff] }
  0x29   :  { %3515 = vmatprep.subr.bf16.mxu0 %v4028_v63  ;;  %v4045_v63 = vld [vmem:[%s6016_s1 + $0x108] sm:$0xff]   ;;  %v4594_v16 = vpack.c.bf16 %v4559_v60, %v4554_v55 }
  0x2a   :  { %3578 = vmatpush3.bf16.msra.mxu1 %v4037_v27  ;;  %v4625_v27 = vld [vmem:[%s6017_s0 + $0x111] sm:$0xff] }
  0x2b   :  { %862 = vmatmul.mubr.bf16.gmra.mxu0 %v4361_v54  ;;  %3579 = vmatprep.subr.bf16.mxu1 %v4040_v38 }
  0x2c   :  { %959 = vmatmul.mubr.bf16.gmra.mxu1 %v4378_v58  ;;  %869 = vmatprep.mubr.bf16.mxu0 %v4382_v59 }
  0x2d   :  { %966 = vmatprep.mubr.bf16.mxu1 %v118_v62  ;;  %3516 = vmatpush3.bf16.msra.mxu0 %v4029_v2  ;;  %v4569_v62 = vld [vmem:[%s6017_s0 + $0xf1] sm:$0xff] }
  0x2e   :  { %3517 = vmatprep.subr.bf16.mxu0 %v4030_v7  ;;  %3580 = vmatpush3.bf16.msra.mxu1 %v4041_v39  ;;  %v3072_v2 = vld [vmem:[%s6017_s0 + $0xf0] sm:$0xff]  ;;  %v4047_v7 = vld [vmem:[%s6016_s1 + $0x198] sm:$0xff]   ;;  %v4598_v18 = vpack.c.bf16 %v4569_v62, %v4564_v61  ;;  %v4055_v39 = vld [vmem:[%s6016_s1 + $0x180] sm:$0xff]  }
  0x2f   :  { %3581 = vmatprep.subr.bf16.mxu1 %v4042_v42  ;;  %v4649_v38 = vpack.c.bf16 %v3072_v2, %v3071_v40 }
  0x31   :  { %3518 = vmatpush3.bf16.msra.mxu0 %v4031_v9  ;;  %v3073_v9 = vld [vmem:[%s6017_s0 + $0x100] sm:$0xff] }
  0x32   :  { %3519 = vmatprep.subr.bf16.mxu0 %v4032_v13  ;;  %3582 = vmatpush3.bf16.msra.mxu1 %v4043_v49  ;;  %v4590_v13 = vpack.c.bf16 %v3070_v37, %v3069_v22  ;;  %v4610_v22 = vld [vmem:[%s6017_s0 + $0xe2] sm:$0xff] }
  0x33   :  { %870 = vmatmul.mubr.bf16.gmra.mxu0 %v4430_v8  ;;  %3583 = vmatprep.subr.bf16.mxu1 %v4046_v5  ;;  %v4054_v37 = vld [vmem:[%s6016_s1 + $0x1c0] sm:$0xff]   ;;  %v4656_v42 = vpack.c.bf16 %v4615_v23, %v4610_v22 }
  0x34   :  { %967 = vmatmul.mubr.bf16.gmra.mxu1 %v4437_v10  ;;  %877 = vmatprep.mubr.bf16.mxu0 %v4441_v11  ;;  %v4672_v49 = vld [vmem:[%s6017_s0 + $0x102] sm:$0xff] }
  0x35   :  { %974 = vmatprep.mubr.bf16.mxu1 %v119_v12  ;;  %3520 = vmatpush3.bf16.msra.mxu0 %v4034_v20  ;;  %v4048_v12 = vld [vmem:[%s6016_s1 + $0x1d0] sm:$0xff]   ;;  %v122_v20 = vpack.c.bf16 %v3073_v9, %v3072_v2  ;;  %v4683_v2 = vpack.c.bf16 %v3074_v29, %v3073_v9 }
  0x36   :  { %3521 = vmatprep.subr.bf16.mxu0 %v4038_v30  ;;  %3584 = vmatpush3.bf16.msra.mxu1 %v4047_v7  ;;  %v4638_v30 = vld [vmem:[%s6017_s0 + $0x120] sm:$0xff]  ;;  %v164_v7 = vpack.c.bf16 %v4350_v50, %v4318_v41  ;;  %v165_v41 = vpack.c.bf16 %v4397_v0, %v4355_v52  ;;  %v4057_v50 = vld [vmem:[%s6016_s1 + $0x230] sm:$0xff]   ;;  %v142_v0 = vpack.c.bf16 %v4412_v3, %v4374_v57  ;;  %v4062_v57 = vld [vmem:[%s6016_s1 + $0x208] sm:$0xff]  }
  0x37   :  { %3585 = vmatprep.subr.bf16.mxu1 %v4048_v12  ;;  %v123_v40 = vpack.c.bf16 %v4638_v30, %v3074_v29  ;;  %v4694_v12 = vld [vmem:[%s6017_s0 + $0x130] sm:$0xff]  ;;  %v4059_v52 = vld [vmem:[%s6016_s1 + $0x220] sm:$0xff]  }
  0x39   :  { %3522 = vmatpush3.bf16.msra.mxu0 %v4039_v36  ;;  %v4053_v36 = vld [vmem:[%s6016_s1 + $0x188] sm:$0xff]  }
  0x3a   :  { %3523 = vmatprep.subr.bf16.mxu0 %v4044_v53  ;;  %3586 = vmatpush3.bf16.msra.mxu1 %v4049_v19  ;;  %v4680_v53 = vld [vmem:[%s6017_s0 + $0x112] sm:$0xff]  ;;  %v196_v19 = vpack.c.bf16 %v4694_v12, %v4638_v30 }
  0x3b   :  { %878 = vmatmul.mubr.bf16.gmra.mxu0 %v4486_v24  ;;  %3587 = vmatprep.subr.bf16.mxu1 %v4052_v31  ;;  %v4687_v5 = vpack.c.bf16 %v4680_v53, %v4672_v49 }
  0x3c   :  { %975 = vmatmul.mubr.bf16.gmra.mxu1 %v4490_v25  ;;  %885 = vmatprep.mubr.bf16.mxu0 %v71_v26  ;;  %v4620_v26 = vld [vmem:[%s6017_s0 + $0x101] sm:$0xff] }
  0x3d   :  { %982 = vmatprep.mubr.bf16.mxu1 %v120_v28  ;;  %3524 = vmatpush3.bf16.msra.mxu0 %v4045_v63  ;;  %v4051_v28 = vld [vmem:[%s6016_s1 + $0x100] sm:$0xff]  }
  0x3e   :  { %3525 = vmatprep.subr.bf16.mxu0 %v4050_v21  ;;  %3588 = vmatpush3.bf16.msra.mxu1 %v4053_v36 }
  0x3f   :  { %3589 = vmatprep.subr.bf16.mxu1 %v4054_v37 }
  0x41   :  { %3526 = vmatpush3.bf16.msra.mxu0 %v4051_v28 }
  0x42   :  { %3590 = vmatpush3.bf16.msra.mxu1 %v4055_v39 }
  0x43   :  { %886 = vmatmul.mubr.bf16.gmra.mxu0 %v47_v43  ;;  %v4660_v43 = vpack.c.bf16 %v4625_v27, %v4620_v26 }
  0x44   :  { %983 = vmatmul.mubr.bf16.gmra.mxu1 %v95_v44  ;;  %893 = vmatprep.mubr.bf16.mxu0 %v4543_v48  ;;  %v4056_v44 = vld [vmem:[%s6016_s1 + $0x238] sm:$0xff]  }
  0x45   :  { %990 = vmatprep.mubr.bf16.mxu1 %v121_v51  ;;  %3927 = vmatprep.subr.bf16.mxu0 %v4056_v44  ;;  %v3115_v51 = vld [vmem:[%s6017_s0 + $0x90] sm:$0xff] }
  0x46   :  { %v192_v63 = vpack.c.bf16 %v3115_v51, %v4425_v6  ;;  %v140_v6 = vpack.c.bf16 %v4330_v45, %v4300_v33  ;;  %v141_v33 = vpack.c.bf16 %v4369_v56, %v4335_v46  ;;  %v166_v45 = vpack.c.bf16 %v4451_v14, %v4402_v1  ;;  %v3099_v46 = vld [vmem:[%s6017_s0 + $0x82] sm:$0xff]  ;;  %v3131_v56 = vld [vmem:[%s6017_s0 + $0x91] sm:$0xff] }
  0x47   :  { %v167_v1 = vpack.c.bf16 %v3099_v46, %v4456_v15  ;;  %v168_v14 = vpack.c.bf16 %v4554_v55, %v4509_v32  ;;  %v4063_v15 = vld [vmem:[%s6016_s1 + $0x200] sm:$0xff]   ;;  %v145_v32 = vpack.c.bf16 %v4564_v61, %v4519_v35  ;;  %v3139_v35 = vld [vmem:[%s6017_s0 + $0x131] sm:$0xff]  ;;  %v146_v55 = vpack.c.bf16 %v4620_v26, %v4569_v62 }
  0x48   :  { %v3147_v62 = vld [vmem:[%s6017_s0 + $0x92] sm:$0xff] }
  0x4b   :  { %894 = vmatmul.mubr.bf16.gmra.mxu0 %v4590_v13 }
  0x4c   :  { %991 = vmatmul.mubr.bf16.gmra.mxu1 %v4594_v16  ;;  %901 = vmatprep.mubr.bf16.mxu0 %v4598_v18 }
  0x4d   :  { %998 = vmatprep.mubr.bf16.mxu1 %v122_v20 }
  0x53   :  { %902 = vmatmul.mubr.bf16.gmra.mxu0 %v4649_v38 }
  0x54   :  { %999 = vmatmul.mubr.bf16.gmra.mxu1 %v4656_v42  ;;  %909 = vmatprep.mubr.bf16.mxu0 %v4660_v43 }
  0x55   :  { %1006 = vmatprep.mubr.bf16.mxu1 %v123_v40 }
  0x5b   :  { %910 = vmatmul.mubr.bf16.gmra.mxu0 %v4683_v2 }
  0x5c   :  { %1007 = vmatmul.mubr.bf16.gmra.mxu1 %v4687_v5  ;;  %1047 = vmatprep.mubr.bf16.mxu0 %v164_v7 }
  0x5d   :  { %1144 = vmatprep.mubr.bf16.mxu1 %v4339_v47  ;;  %v4058_v47 = vld [vmem:[%s6016_s1 + $0x228] sm:$0xff]  }
  0x63   :  { %1048 = vmatmul.mubr.bf16.vlgmr.msra.gmra.mxu0 %v140_v6 }
  0x64   :  { %3928 = vmatpush3.bf16.msra.mxu0 %v4056_v44  ;;  %1145 = vmatmul.mubr.bf16.vlgmr.msra.gmra.mxu1 %v4361_v54  ;;  %v3083_v54 = vld [vmem:[%s6017_s0 + $0x81] sm:$0xff] }
  0x65   :  { %1055 = vmatprep.mubr.bf16.mxu0 %v165_v41  ;;  %3929 = vmatprep.subr.bf16.mxu0 %v4057_v50  ;;  %v143_v3 = vpack.c.bf16 %v3083_v54, %v4417_v4  ;;  %v169_v4 = vpack.c.bf16 %v4610_v22, %v4559_v60 }
  0x66   :  { %1152 = vmatprep.mubr.bf16.mxu1 %v4382_v59  ;;  %v4060_v59 = vld [vmem:[%s6016_s1 + $0x218] sm:$0xff]  }
  0x68   :  { %3930 = vmatpush3.bf16.msra.mxu0 %v4057_v50 }
  0x69   :  { %3931 = vmatprep.subr.bf16.mxu0 %v4058_v47 }
  0x6b   :  { %1056 = vmatmul.mubr.bf16.gmra.mxu0 %v141_v33 }
  0x6c   :  { %1153 = vmatmul.mubr.bf16.gmra.mxu1 %v4430_v8  ;;  %1063 = vmatprep.mubr.bf16.mxu0 %v166_v45  ;;  %v216_v8 = vpack.c.bf16 %v3131_v56, %v3083_v54 }
  0x6d   :  { %1160 = vmatprep.mubr.bf16.mxu1 %v4441_v11  ;;  %3932 = vmatpush3.bf16.msra.mxu0 %v4058_v47  ;;  %v4061_v11 = vld [vmem:[%s6016_s1 + $0x210] sm:$0xff]  }
  0x6e   :  { %3933 = vmatprep.subr.bf16.mxu0 %v4059_v52 }
  0x71   :  { %3934 = vmatpush3.bf16.msra.mxu0 %v4059_v52 }
  0x72   :  { %3935 = vmatprep.subr.bf16.mxu0 %v4060_v59 }
  0x73   :  { %1064 = vmatmul.mubr.bf16.gmra.mxu0 %v142_v0 }
  0x74   :  { %1161 = vmatmul.mubr.bf16.gmra.mxu1 %v4486_v24  ;;  %1071 = vmatprep.mubr.bf16.mxu0 %v167_v1  ;;  %v144_v24 = vpack.c.bf16 %v4514_v34, %v4464_v17  ;;  %v3107_v17 = vld [vmem:[%s6017_s0 + $0x122] sm:$0xff] }
  0x75   :  { %1168 = vmatprep.mubr.bf16.mxu1 %v216_v8  ;;  %3936 = vmatpush3.bf16.msra.mxu0 %v4060_v59  ;;  %v3091_v34 = vld [vmem:[%s6017_s0 + $0x121] sm:$0xff]  ;;  %v171_v60 = vpack.c.bf16 %v3107_v17, %v4680_v53 }
  0x76   :  { %3937 = vmatprep.subr.bf16.mxu0 %v4061_v11  ;;  %v220_v61 = vpack.c.bf16 %v3139_v35, %v3091_v34  ;;  %v147_v9 = vpack.c.bf16 %v3091_v34, %v4625_v27 }
  0x79   :  { %3938 = vmatpush3.bf16.msra.mxu0 %v4061_v11 }
  0x7a   :  { %3939 = vmatprep.subr.bf16.mxu0 %v4062_v57 }
  0x7b   :  { %1072 = vmatmul.mubr.bf16.gmra.mxu0 %v143_v3 }
  0x7c   :  { %1169 = vmatmul.mubr.bf16.gmra.mxu1 %v192_v63  ;;  %1079 = vmatprep.mubr.bf16.mxu0 %v168_v14 }
  0x7d   :  { %1176 = vmatprep.mubr.bf16.mxu1 %v4543_v48  ;;  %3940 = vmatpush3.bf16.msra.mxu0 %v4062_v57  ;;  %v170_v48 = vpack.c.bf16 %v4672_v49, %v4615_v23 }
  0x7e   :  { %3941 = vmatprep.subr.bf16.mxu0 %v4063_v15 }
  0x81   :  { %3942 = vmatpush3.bf16.msra.mxu0 %v4063_v15 }
  0x83   :  { %1080 = vmatmul.mubr.bf16.gmra.mxu0 %v144_v24 }
  0x84   :  { %1177 = vmatmul.mubr.bf16.gmra.mxu1 %v4590_v13  ;;  %1087 = vmatprep.mubr.bf16.mxu0 %v169_v4  ;;  %v240_v13 = vpack.c.bf16 %v3147_v62, %v3099_v46 }
  0x85   :  { %1184 = vmatprep.mubr.bf16.mxu1 %v4598_v18 }
  0x8b   :  { %1088 = vmatmul.mubr.bf16.gmra.mxu0 %v145_v32 }
  0x8c   :  { %1185 = vmatmul.mubr.bf16.gmra.mxu1 %v4649_v38  ;;  %1095 = vmatprep.mubr.bf16.mxu0 %v170_v48 }
  0x8d   :  { %1192 = vmatprep.mubr.bf16.mxu1 %v4660_v43 }
  0x93   :  { %1096 = vmatmul.mubr.bf16.gmra.mxu0 %v146_v55 }
  0x94   :  { %1193 = vmatmul.mubr.bf16.gmra.mxu1 %v4683_v2  ;;  %1103 = vmatprep.mubr.bf16.mxu0 %v171_v60 }
  0x95   :  { %1200 = vmatprep.mubr.bf16.mxu1 %v220_v61 }
  0x9b   :  { %1104 = vmatmul.mubr.bf16.gmra.mxu0 %v147_v9 }
  0x9c   :  { %1201 = vmatmul.mubr.bf16.gmra.mxu1 %v196_v19  ;;  %3943 = vmatprep.mubr.bf16.mxu0 %v4378_v58  ;;  %v3155_v58 = vld [vmem:[%s6017_s0 + $0x132] sm:$0xff] }
  0x9d   :  { %v244_v18 = vpack.c.bf16 %v3155_v58, %v3107_v17 }
  0xa3   :  { %3944 = vmatmul.mubr.bf16.vlgmr.msra.gmra.mxu0 %v4437_v10 }
  0xa4   :  { %3947 = vmatprep.mubr.bf16.mxu0 %v4490_v25 }
  0xab   :  { %3948 = vmatmul.mubr.bf16.gmra.mxu0 %v240_v13 }
  0xac   :  { %3951 = vmatprep.mubr.bf16.mxu0 %v4594_v16 }
  0xb3   :  { %3952 = vmatmul.mubr.bf16.gmra.mxu0 %v4656_v42 }
  0xb4   :  { %3955 = vmatprep.mubr.bf16.mxu0 %v4687_v5 }
  0xbb   :  { %3956 = vmatmul.mubr.bf16.gmra.mxu0 %v244_v18 }
  0xe3   :  { %v3399_v10 = vpop.f32.mrf.mxu0 }
  0xe4   :  { %v3463_v25 = vpop.f32.mrf.mxu1 }
  0xe5   :  { %v3400_v20 = vpop.f32.mrf.mxu0 }
  0xe6   :  { %v3401_v21 = vadd.f32 %v3400_v20, %v3399_v10  ;;  %v3464_v22 = vpop.f32.mrf.mxu1 }
  0xe7   :  { %v3465_v23 = vadd.f32 %v3464_v22, %v3463_v25  ;;  %v3402_v26 = vpop.f32.mrf.mxu0 }
  0xe8   :  { %v3466_v27 = vpop.f32.mrf.mxu1 }
  0xe9   :  { %v4792_v28 = vadd.f32 %v3465_v23, %v3401_v21  ;;  %v3403_v16 = vpop.f32.mrf.mxu0 }
  0xea   :  { %v3404_v29 = vadd.f32 %v3403_v16, %v3402_v26  ;;  %v3467_v30 = vpop.f32.mrf.mxu1 }
  0xeb   :  { %v3468_v31 = vadd.f32 %v3467_v30, %v3466_v27  ;;  %v3405_v36 = vpop.f32.mrf.mxu0 }
  0xec   :  { %v3469_v37 = vpop.f32.mrf.mxu1 }
  0xed   :  { %v4794_v38 = vadd.f32 %v3468_v31, %v3404_v29  ;;  %v3406_v39 = vpop.f32.mrf.mxu0 }
  0xee   :  { %v3407_v42 = vadd.f32 %v3406_v39, %v3405_v36  ;;  %v3470_v43 = vpop.f32.mrf.mxu1 }
  0xef   :  { %v3471_v44 = vadd.f32 %v3470_v43, %v3469_v37  ;;  %v3408_v40 = vpop.f32.mrf.mxu0 }
  0xf0   :  { %v3472_v49 = vpop.f32.mrf.mxu1 }
  0xf1   :  { %v4796_v51 = vadd.f32 %v3471_v44, %v3407_v42  ;;  %v3409_v53 = vpop.f32.mrf.mxu0 }
  0xf2   :  { %v3410_v63 = vadd.f32 %v3409_v53, %v3408_v40  ;;  %v3473_v2 = vpop.f32.mrf.mxu1 }
  0xf3   :  { %v3474_v5 = vadd.f32 %v3473_v2, %v3472_v49  ;;  %v3411_v7 = vpop.f32.mrf.mxu0 }
  0xf4   :  { %v3475_v12 = vpop.f32.mrf.mxu1 }
  0xf5   :  { %v4798_v19 = vadd.f32 %v3474_v5, %v3410_v63  ;;  %v3412_v6 = vpop.f32.mrf.mxu0 }
  0xf6   :  { %v3413_v41 = vadd.f32 %v3412_v6, %v3411_v7  ;;  %v3476_v50 = vpop.f32.mrf.mxu1 }
  0xf7   :  { %v3477_v47 = vadd.f32 %v3476_v50, %v3475_v12  ;;  %v3414_v33 = vpop.f32.mrf.mxu0 }
  0xf8   :  { %v3478_v45 = vpop.f32.mrf.mxu1 }
  0xf9   :  { %v4800_v52 = vadd.f32 %v3477_v47, %v3413_v41  ;;  %v3415_v46 = vpop.f32.mrf.mxu0 }
  0xfa   :  { %v3416_v54 = vadd.f32 %v3415_v46, %v3414_v33  ;;  %v3479_v56 = vpop.f32.mrf.mxu1 }
  0xfb   :  { %v3480_v59 = vadd.f32 %v3479_v56, %v3478_v45  ;;  %v3417_v0 = vpop.f32.mrf.mxu0 }
  0xfc   :  { %v3481_v1 = vpop.f32.mrf.mxu1 }
  0xfd   :  { %v4802_v8 = vadd.f32 %v3480_v59, %v3416_v54  ;;  %v3418_v11 = vpop.f32.mrf.mxu0 }
  0xfe   :  { %v3419_v57 = vadd.f32 %v3418_v11, %v3417_v0  ;;  %v3482_v3 = vpop.f32.mrf.mxu1 }
  0xff   :  { %v3483_v14 = vadd.f32 %v3482_v3, %v3481_v1  ;;  %v3420_v15 = vpop.f32.mrf.mxu0 }
 0x100   :  { %v3484_v24 = vpop.f32.mrf.mxu1 }
 0x101   :  { %v4804_v4 = vadd.f32 %v3483_v14, %v3419_v57  ;;  %v3421_v32 = vpop.f32.mrf.mxu0  ;;  %v4064_v14 = vld [vmem:[%s6018_s2 + $0x78] sm:$0xff]  }
 0x102   :  { %v3422_v48 = vadd.f32 %v3421_v32, %v3420_v15  ;;  %v3485_v17 = vpop.f32.mrf.mxu1  ;;  %3655 = vmatprep.subr.bf16.mxu1 %v4064_v14 }
 0x103   :  { %v3486_v34 = vadd.f32 %v3485_v17, %v3484_v24  ;;  %v3423_v35 = vpop.f32.mrf.mxu0  ;;  %v4065_v24 = vld [vmem:[%s6018_s2 + $0x38] sm:$0xff]  }
 0x104   :  { %v3487_v55 = vpop.f32.mrf.mxu1  ;;  %3656 = vmatpush3.bf16.msra.mxu1 %v4065_v24  ;;  %v4087_v24 = vld [vmem:[%s6018_s2 + $0x98] sm:$0xff]  }
 0x105   :  { %v4806_v60 = vadd.f32 %v3486_v34, %v3422_v48  ;;  %v3424_v61 = vpop.f32.mrf.mxu0 }
 0x106   :  { %v3425_v9 = vadd.f32 %v3424_v61, %v3423_v35  ;;  %v3488_v62 = vpop.f32.mrf.mxu1  ;;  %v4066_v35 = vld [vmem:[%s6018_s2 + $0x70] sm:$0xff]  }
 0x107   :  { %v3489_v13 = vadd.f32 %v3488_v62, %v3487_v55  ;;  %v3426_v58 = vpop.f32.mrf.mxu0  ;;  %v4067_v61 = vld [vmem:[%s6018_s2 + $0x30] sm:$0xff]   ;;  %3657 = vmatprep.subr.bf16.mxu1 %v4066_v35 }
 0x108   :  { %v3490_v18 = vpop.f32.mrf.mxu1  ;;  %3658 = vmatpush3.bf16.msra.mxu1 %v4067_v61  ;;  %v4088_v35 = vld [vmem:[%s6018_s2 + $0xd0] sm:$0xff]  }
 0x109   :  { %v4808_v10 = vadd.f32 %v3489_v13, %v3425_v9  ;;  %v3427_v25 = vpop.f32.mrf.mxu0 }
 0x10a   :  { %v3428_v20 = vadd.f32 %v3427_v25, %v3426_v58  ;;  %v3491_v21 = vpop.f32.mrf.mxu1  ;;  %v4073_v25 = vld [vmem:[%s6018_s2 + $0xf8] sm:$0xff]  }
 0x10b   :  { %v3492_v22 = vadd.f32 %v3491_v21, %v3490_v18  ;;  %v3429_v23 = vpop.f32.mrf.mxu0  ;;  %v4068_v18 = vld [vmem:[%s6018_s2 + $0x68] sm:$0xff]   ;;  %3719 = vmatprep.subr.bf16.mxu0 %v4073_v25 }
 0x10c   :  { %v3493_v26 = vpop.f32.mrf.mxu1  ;;  %3659 = vmatprep.subr.bf16.mxu1 %v4068_v18  ;;  %v4089_v18 = vld [vmem:[%s6018_s2 + $0x90] sm:$0xff]  }
 0x10d   :  { %v4810_v27 = vadd.f32 %v3492_v22, %v3428_v20  ;;  %v3430_v16 = vpop.f32.mrf.mxu0  ;;  %v4069_v22 = vld [vmem:[%s6018_s2 + $0x28] sm:$0xff]  }
 0x10e   :  { %v3431_v29 = vadd.f32 %v3430_v16, %v3429_v23  ;;  %v3494_v30 = vpop.f32.mrf.mxu1  ;;  %3660 = vmatpush3.bf16.msra.mxu1 %v4069_v22  ;;  %v4092_v22 = vld [vmem:[%s6018_s2] sm:$0xff]  }
 0x10f   :  { %6025 = vst [vmem:[#allocation3_spill] sm:$0xff] %v4810_v27  ;;  %v3495_v31 = vadd.f32 %v3494_v30, %v3493_v26  ;;  %v3432_v36 = vpop.f32.mrf.mxu0  ;;  %v4075_v26 = vld [vmem:[%s6018_s2 + $0xb8] sm:$0xff]   ;;  %v4070_v30 = vld [vmem:[%s6018_s2 + $0x60] sm:$0xff]  }
 0x110   :  { %v3496_v37 = vpop.f32.mrf.mxu1  ;;  %3720 = vmatpush3.bf16.msra.mxu0 %v4075_v26  ;;  %3661 = vmatprep.subr.bf16.mxu1 %v4070_v30 }
 0x111   :  { %v4812_v39 = vadd.f32 %v3495_v31, %v3431_v29  ;;  %v3433_v42 = vpop.f32.mrf.mxu0  ;;  %v4077_v31 = vld [vmem:[%s6018_s2 + $0xb0] sm:$0xff]  }
 0x112   :  { %v3434_v43 = vadd.f32 %v3433_v42, %v3432_v36  ;;  %v3497_v44 = vpop.f32.mrf.mxu1 }
 0x113   :  { %6026 = vst [vmem:[#allocation4_spill] sm:$0xff] %v4812_v39  ;;  %v3498_v40 = vadd.f32 %v3497_v44, %v3496_v37  ;;  %v3435_v49 = vpop.f32.mrf.mxu0  ;;  %v4071_v37 = vld [vmem:[%s6018_s2 + $0x20] sm:$0xff]  }
 0x114   :  { %v3499_v53 = vpop.f32.mrf.mxu1  ;;  %3662 = vmatpush3.bf16.msra.mxu1 %v4071_v37 }
 0x115   :  { %v4814_v63 = vadd.f32 %v3498_v40, %v3434_v43  ;;  %v3436_v2 = vpop.f32.mrf.mxu0  ;;  %v4079_v43 = vld [vmem:[%s6018_s2 + $0xe8] sm:$0xff]  }
 0x116   :  { %v3437_v5 = vadd.f32 %v3436_v2, %v3435_v49  ;;  %v3500_v7 = vpop.f32.mrf.mxu1  ;;  %v4072_v49 = vld [vmem:[%s6018_s2 + $0x58] sm:$0xff]  }
 0x117   :  { %6027 = vst [vmem:[#allocation5_spill] sm:$0xff] %v4814_v63  ;;  %v3501_v12 = vadd.f32 %v3500_v7, %v3499_v53  ;;  %v3438_v6 = vpop.f32.mrf.mxu0  ;;  %v4081_v53 = vld [vmem:[%s6018_s2 + $0xa8] sm:$0xff]   ;;  %v6024_v7 = vmov 0.0   ;;  %3663 = vmatprep.subr.bf16.mxu1 %v4072_v49  ;;  %v4094_v49 = vld [vmem:[%s6018_s2 + $0xc0] sm:$0xff]  }
 0x118   :  { %v3502_v41 = vpop.f32.mrf.mxu1  ;;  %1465 = vst [vmem:[#allocation2] sm:$0xff] %v6024_v7  ;;  %1466 = vst [vmem:[#allocation2 + $0x8] sm:$0x3] %v6024_v7 }
 0x119   :  { %v4816_v50 = vadd.f32 %v3501_v12, %v3437_v5  ;;  %v3439_v47 = vpop.f32.mrf.mxu0  ;;  %v4074_v5 = vld [vmem:[%s6018_s2 + $0x18] sm:$0xff]   ;;  %1467 = vst [vmem:[#allocation2 + $0xa0] sm:$0xff] %v6024_v7  ;;  %1468 = vst [vmem:[#allocation2 + $0xa8] sm:$0x3] %v6024_v7 }
 0x11a   :  { %v3440_v33 = vadd.f32 %v3439_v47, %v3438_v6  ;;  %v3503_v45 = vpop.f32.mrf.mxu1  ;;  %1470 = vst [vmem:[#allocation2 + $0x90] sm:$0xff] %v6024_v7  ;;  %1471 = vst [vmem:[#allocation2 + $0x98] sm:$0x3] %v6024_v7  ;;  %v4082_v6 = vld [vmem:[%s6018_s2 + $0xe0] sm:$0xff]   ;;  %3664 = vmatpush3.bf16.msra.mxu1 %v4074_v5 }
 0x11b   :  { %6028 = vst [vmem:[#allocation6_spill] sm:$0xff] %v4816_v50  ;;  %v3504_v46 = vadd.f32 %v3503_v45, %v3502_v41  ;;  %v3441_v54 = vpop.f32.mrf.mxu0  ;;  %1472 = vst [vmem:[#allocation2 + $0x130] sm:$0xff] %v6024_v7  ;;  %v4083_v47 = vld [vmem:[%s6018_s2 + $0xa0] sm:$0xff]   ;;  %v4078_v45 = vld [vmem:[%s6018_s2 + $0x50] sm:$0xff]  }
 0x11c   :  { %v3505_v56 = vpop.f32.mrf.mxu1  ;;  %1473 = vst [vmem:[#allocation2 + $0x138] sm:$0x3] %v6024_v7  ;;  %1475 = vst [vmem:[#allocation2 + $0x10] sm:$0x1] %v6024_v7  ;;  %3665 = vmatprep.subr.bf16.mxu1 %v4078_v45  ;;  %v4095_v45 = vld [vmem:[%s6018_s2 + $0x80] sm:$0xff]  }
 0x11d   :  { %v4818_v59 = vadd.f32 %v3504_v46, %v3440_v33  ;;  %v3442_v0 = vpop.f32.mrf.mxu0  ;;  %1476 = vst [vmem:[#allocation2 + $0x20] sm:$0x1] %v6024_v7  ;;  %1477 = vst [vmem:[#allocation2 + $0x30] sm:$0x1] %v6024_v7 }
 0x11e   :  { %v3443_v1 = vadd.f32 %v3442_v0, %v3441_v54  ;;  %v3506_v11 = vpop.f32.mrf.mxu1  ;;  %1478 = vst [vmem:[#allocation2 + $0x40] sm:$0x1] %v6024_v7  ;;  %1479 = vst [vmem:[#allocation2 + $0x50] sm:$0x1] %v6024_v7  ;;  %v4080_v54 = vld [vmem:[%s6018_s2 + $0x10] sm:$0xff]  }
 0x11f   :  { %6029 = vst [vmem:[#allocation7_spill] sm:$0xff] %v4818_v59  ;;  %v3507_v57 = vadd.f32 %v3506_v11, %v3505_v56  ;;  %v4820_v3 = vpop.f32.mrf.mxu0  ;;  %1480 = vst [vmem:[#allocation2 + $0x60] sm:$0x1] %v6024_v7  ;;  %v4085_v56 = vld [vmem:[%s6018_s2 + $0xd8] sm:$0xff]   ;;  %3666 = vmatpush3.bf16.msra.mxu1 %v4080_v54  ;;  %v4084_v11 = vld [vmem:[%s6018_s2 + $0x48] sm:$0xff]  }
 0x120   :  { %v4825_v15 = vpop.f32.mrf.mxu1  ;;  %1481 = vst [vmem:[#allocation2 + $0x70] sm:$0x1] %v6024_v7  ;;  %1482 = vst [vmem:[#allocation2 + $0x80] sm:$0x1] %v6024_v7  ;;  %3667 = vmatprep.subr.bf16.mxu1 %v4084_v11 }
 0x121   :  { %v4830_v32 = vadd.f32 %v3507_v57, %v3443_v1  ;;  %v4832_v48 = vpop.f32.mrf.mxu0  ;;  %1483 = vst [vmem:[#allocation2 + $0xb0] sm:$0x1] %v6024_v7  ;;  %1484 = vst [vmem:[#allocation2 + $0xc0] sm:$0x1] %v6024_v7  ;;  %v4086_v57 = vld [vmem:[%s6018_s2 + $0x8] sm:$0xff]  }
 0x122   :  { %v4834_v17 = vpop.f32.mrf.mxu1  ;;  %1485 = vst [vmem:[#allocation2 + $0xd0] sm:$0x1] %v6024_v7  ;;  %1486 = vst [vmem:[#allocation2 + $0xe0] sm:$0x1] %v6024_v7 }
 0x123   :  { %6030 = vst [vmem:[#allocation8_spill] sm:$0xff] %v4830_v32  ;;  %v3527_v34 = vpop.f32.mrf.mxu0  ;;  %1487 = vst [vmem:[#allocation2 + $0xf0] sm:$0x1] %v6024_v7  ;;  %3668 = vmatpush3.bf16.msra.mxu1 %v4086_v57 }
 0x124   :  { %v4839_v55 = vpop.f32.mrf.mxu1  ;;  %1488 = vst [vmem:[#allocation2 + $0x100] sm:$0x1] %v6024_v7  ;;  %1489 = vst [vmem:[#allocation2 + $0x110] sm:$0x1] %v6024_v7 }
 0x125   :  { %v3528_v9 = vpop.f32.mrf.mxu0  ;;  %1490 = vst [vmem:[#allocation2 + $0x120] sm:$0x1] %v6024_v7  ;;  %1491 = vst [vmem:[#allocation2 + $0x19] sm:$0x1] %v6024_v7 }
 0x126   :  { %v3529_v62 = vadd.f32 %v3528_v9, %v3527_v34  ;;  %v4844_v13 = vpop.f32.mrf.mxu1  ;;  %1492 = vst [vmem:[#allocation2 + $0x29] sm:$0x1] %v6024_v7  ;;  %1493 = vst [vmem:[#allocation2 + $0x39] sm:$0x1] %v6024_v7  ;;  %v4090_v9 = vld [vmem:[%s6018_s2 + $0x40] sm:$0xff]  }
 0x127   :  { %v4846_v58 = vpop.f32.mrf.mxu0  ;;  %1494 = vst [vmem:[#allocation2 + $0x49] sm:$0x1] %v6024_v7  ;;  %1495 = vst [vmem:[#allocation2 + $0x59] sm:$0x1] %v6024_v7  ;;  %3669 = vmatprep.subr.bf16.mxu1 %v4090_v9 }
 0x128   :  { %v4855_v20 = vadd.f32 %v3529_v62, %v4792_v28  ;;  %v4857_v21 = vpop.f32.mrf.mxu1  ;;  %v4076_v28 = vld [vmem:[%s6018_s2 + $0xf0] sm:$0xff]   ;;  %1496 = vst [vmem:[#allocation2 + $0x69] sm:$0x1] %v6024_v7  ;;  %1497 = vst [vmem:[#allocation2 + $0x79] sm:$0x1] %v6024_v7  ;;  %3670 = vmatpush3.bf16.msra.mxu1 %v4092_v22 }
 0x129   :  { %v4862_v23 = vpop.f32.mrf.mxu0  ;;  %3721 = vmatprep.subr.bf16.mxu0 %v4076_v28  ;;  %1498 = vst [vmem:[#allocation2 + $0x89] sm:$0x1] %v6024_v7  ;;  %1499 = vst [vmem:[#allocation2 + $0xb9] sm:$0x1] %v6024_v7  ;;  %v4091_v28 = vld [vmem:[%s6018_s2 + $0xc8] sm:$0xff]  }
 0x12a   :  { %v4867_v16 = vpop.f32.mrf.mxu1  ;;  %3722 = vmatpush3.bf16.msra.mxu0 %v4077_v31  ;;  %1500 = vst [vmem:[#allocation2 + $0xc9] sm:$0x1] %v6024_v7  ;;  %1501 = vst [vmem:[#allocation2 + $0xd9] sm:$0x1] %v6024_v7 }
 0x12b   :  { %v4872_v29 = vpop.f32.mrf.mxu0  ;;  %3723 = vmatprep.subr.bf16.mxu0 %v4079_v43  ;;  %1502 = vst [vmem:[#allocation2 + $0xe9] sm:$0x1] %v6024_v7  ;;  %1503 = vst [vmem:[#allocation2 + $0xf9] sm:$0x1] %v6024_v7  ;;  %v4093_v43 = vld [vmem:[%s6018_s2 + $0x88] sm:$0xff]  }
 0x12c   :  { %v4880_v36 = vpop.f32.mrf.mxu1  ;;  %1504 = vst [vmem:[#allocation2 + $0x109] sm:$0x1] %v6024_v7  ;;  %1505 = vst [vmem:[#allocation2 + $0x119] sm:$0x1] %v6024_v7 }
 0x12d   :  { %v4885_v42 = vpop.f32.mrf.mxu0  ;;  %1506 = vst [vmem:[#allocation2 + $0x129] sm:$0x1] %v6024_v7 }
 0x12e   :  { %v4890_v44 = vpop.f32.mrf.mxu1  ;;  %3724 = vmatpush3.bf16.msra.mxu0 %v4081_v53 }
 0x12f   :  { %v4892_v40 = vpop.f32.mrf.mxu0  ;;  %3725 = vmatprep.subr.bf16.mxu0 %v4082_v6  ;;  %v4096_v6 = vld [vmem:[%s6018_s2 + $0x178] sm:$0xff]  }
 0x130   :  { %v4900_v2 = vpop.f32.mrf.mxu1  ;;  %3783 = vmatprep.subr.bf16.mxu1 %v4096_v6 }
 0x131   :  { %v4945_v12 = vpop.f32.mrf.mxu0 }
 0x132   :  { %v4950_v41 = vpop.f32.mrf.mxu1  ;;  %3726 = vmatpush3.bf16.msra.mxu0 %v4083_v47 }
 0x133   :  { %v4955_v33 = vpop.f32.mrf.mxu0  ;;  %3727 = vmatprep.subr.bf16.mxu0 %v4085_v56 }
 0x134   :  { %v4960_v46 = vpop.f32.mrf.mxu1 }
 0x135   :  { %v4968_v0 = vpop.f32.mrf.mxu0 }
 0x136   :  { %v4970_v1 = vpop.f32.mrf.mxu1  ;;  %3728 = vmatpush3.bf16.msra.mxu0 %v4087_v24 }
 0x137   :  { %v4978_v14 = vpop.f32.mrf.mxu0  ;;  %3729 = vmatprep.subr.bf16.mxu0 %v4088_v35 }
 0x138   :  { %v4983_v34 = vpop.f32.mrf.mxu1 }
 0x139   :  { %v4988_v61 = vpop.f32.mrf.mxu0 }
 0x13a   :  { %v4993_v62 = vpop.f32.mrf.mxu1  ;;  %3730 = vmatpush3.bf16.msra.mxu0 %v4089_v18 }
 0x13b   :  { %v4998_v25 = vpop.f32.mrf.mxu0  ;;  %3731 = vmatprep.subr.bf16.mxu0 %v4091_v28 }
 0x13c   :  { %v5003_v26 = vpop.f32.mrf.mxu1 }
 0x13d   :  { %v5008_v30 = vpop.f32.mrf.mxu0 }
 0x13e   :  { %v5010_v31 = vpop.f32.mrf.mxu1  ;;  %3732 = vmatpush3.bf16.msra.mxu0 %v4093_v43 }
 0x13f   :  { %v3548_v37 = vpop.f32.mrf.mxu0  ;;  %3733 = vmatprep.subr.bf16.mxu0 %v4094_v49 }
 0x140   :  { %v5018_v53 = vpop.f32.mrf.mxu1 }
 0x141   :  { %v3549_v5 = vpop.f32.mrf.mxu0 }
 0x142   :  { %v5023_v47 = vpop.f32.mrf.mxu1  ;;  %3734 = vmatpush3.bf16.msra.mxu0 %v4095_v45 }
 0x143   :  { %v3551_v54 = vpop.f32.mrf.mxu0 }
 0x144   :  { %v5028_v56 = vpop.f32.mrf.mxu1 }
 0x145   :  { %v3552_v11 = vpop.f32.mrf.mxu0 }
 0x146   :  { %v5030_v57 = vpop.f32.mrf.mxu1 }
 0x147   :  { %v5032_v24 = vpop.f32.mrf.mxu0 }
 0x148   :  { %v5034_v35 = vpop.f32.mrf.mxu1 }
 0x149   :  { %6031 = vst [vmem:[#allocation9_spill] sm:$0xff] %v5034_v35  ;;  %v5036_v9 = vpop.f32.mrf.mxu0 }
 0x14a   :  { %v5038_v18 = vpop.f32.mrf.mxu1 }
 0x14b   :  { %6032 = vst [vmem:[#allocation10_spill] sm:$0xff] %v5038_v18  ;;  %v5040_v22 = vpop.f32.mrf.mxu0 }
 0x14c   :  { %v5044_v43 = vpop.f32.mrf.mxu1 }
 0x14d   :  { %v5042_v28 = vpop.f32.mrf.mxu0  ;;  %6033 = vst [vmem:[#allocation11_spill] sm:$0xff] %v5044_v43 }
 0x14e   :  { %v5050_v7 = vpop.f32.mrf.mxu1 }
 0x14f   :  { %v5046_v6 = vpop.f32.mrf.mxu0  ;;  %6034 = vst [vmem:[#allocation12_spill] sm:$0xff] %v5050_v7  ;;  %v3532_v7 = vadd.f32 %v4862_v23, %v4846_v58 }
 0x150   :  { %v5056_v59 = vpop.f32.mrf.mxu1 }
 0x151   :  { %v5048_v49 = vpop.f32.mrf.mxu0  ;;  %6035 = vst [vmem:[#allocation13_spill] sm:$0xff] %v5056_v59  ;;  %v3535_v59 = vadd.f32 %v4885_v42, %v4872_v29  ;;  %v1053_v23 = vadd.f32 %v3532_v7, %v4794_v38  ;;  %v3596_v29 = vadd.f32 %v4867_v16, %v4857_v21  ;;  %v3544_v38 = vadd.f32 %v4988_v61, %v4978_v14 }
 0x152   :  { %v5062_v39 = vpop.f32.mrf.mxu1  ;;  %v3611_v61 = vadd.f32 %v5010_v31, %v5003_v26  ;;  %v3446_v26 = vadd.f32 %v4832_v48, %v4820_v3  ;;  %v3556_v3 = vadd.f32 %v5036_v9, %v5032_v24 }
 0x153   :  { %v5052_v32 = vpop.f32.mrf.mxu0  ;;  %6038 = vst [vmem:[#allocation16_spill] sm:$0xff] %v5062_v39  ;;  %v1058_v42 = vadd.f32 %v3535_v59, %v4796_v51  ;;  %v3547_v59 = vadd.f32 %v5008_v30, %v4998_v25  ;;  %v3614_v30 = vadd.f32 %v5023_v47, %v5018_v53  ;;  %v3617_v53 = vadd.f32 %v5030_v57, %v5028_v56 }
 0x154   :  { %v5068_v35 = vpop.f32.mrf.mxu1 }
 0x155   :  { %v5054_v45 = vpop.f32.mrf.mxu0  ;;  %v1074_v14 = vadd.f32 %v3547_v59, %v4804_v4  ;;  %v6045_v59 = vld [vmem:[#allocation4_spill] sm:$0xff] }
 0x157   :  { %v5058_v50 = vpop.f32.mrf.mxu0 }
 0x158   :  { %6036 = vst [vmem:[#allocation14_spill] sm:$0xff] %v5058_v50  ;;  %v3538_v50 = vadd.f32 %v4945_v12, %v4892_v40  ;;  %v3599_v40 = vadd.f32 %v4890_v44, %v4880_v36 }
 0x159   :  { %v5060_v63 = vpop.f32.mrf.mxu0 }
 0x15a   :  { %6037 = vst [vmem:[#allocation15_spill] sm:$0xff] %v5060_v63  ;;  %v3541_v63 = vadd.f32 %v4968_v0, %v4955_v33  ;;  %v1061_v12 = vadd.f32 %v3538_v50, %v4798_v19  ;;  %v3602_v33 = vadd.f32 %v4950_v41, %v4900_v2  ;;  %v3550_v19 = vadd.f32 %v3549_v5, %v3548_v37 }
 0x15b   :  { %v5064_v18 = vpop.f32.mrf.mxu0  ;;  %v1155_v16 = vadd.f32 %v3599_v40, %v1058_v42  ;;  %v1069_v41 = vadd.f32 %v3544_v38, %v4802_v8  ;;  %v3562_v42 = vadd.f32 %v5048_v49, %v5046_v6  ;;  %v3565_v40 = vadd.f32 %v5054_v45, %v5052_v32  ;;  %v6044_v6 = vld [vmem:[#allocation10_spill] sm:$0xff]  ;;  %v6046_v45 = vld [vmem:[#allocation11_spill] sm:$0xff] }
 0x15c   :  { %6039 = vst [vmem:[#allocation17_spill] sm:$0xff] %v5064_v18  ;;  %v5087_v18 = vpop.f32.mrf.mxu1  ;;  %v1158_v44 = vadd.f32 %v3602_v33, %v1061_v12  ;;  %v1077_v25 = vadd.f32 %v3550_v19, %v4806_v60  ;;  %v3510_v60 = vadd.f32 %v4834_v17, %v4825_v15  ;;  %v1171_v15 = vadd.f32 %v3611_v61, %v1074_v14  ;;  %v6047_v19 = vld [vmem:[#allocation12_spill] sm:$0xff] }
 0x15d   :  { %v5066_v43 = vpop.f32.mrf.mxu0  ;;  %v6050_v14 = vld [vmem:[#allocation16_spill] sm:$0xff] }
 0x15e   :  { %6040 = vst [vmem:[#allocation18_spill] sm:$0xff] %v5066_v43  ;;  %v4105_v43 = vld [vmem:[%s6018_s2 + $0x1f8] sm:$0xff]   ;;  %v5103_v21 = vpop.f32.mrf.mxu1 }
 0x15f   :  { %v5070_v27 = vpop.f32.mrf.mxu0  ;;  %3847 = vmatprep.subr.bf16.mxu0 %v4105_v43 }
 0x160   :  { %6041 = vst [vmem:[#allocation19_spill] sm:$0xff] %v5070_v27  ;;  %v3593_v27 = vadd.f32 %v4844_v13, %v4839_v55  ;;  %v1066_v55 = vadd.f32 %v3541_v63, %v4800_v52  ;;  %v3605_v13 = vadd.f32 %v4970_v1, %v4960_v46  ;;  %v1150_v52 = vadd.f32 %v3596_v29, %v1053_v23  ;;  %v5113_v1 = vpop.f32.mrf.mxu1 }
 0x161   :  { %v5080_v39 = vpop.f32.mrf.mxu0  ;;  %v3553_v63 = vadd.f32 %v3552_v11, %v3551_v54  ;;  %v3608_v46 = vadd.f32 %v4993_v62, %v4983_v34  ;;  %v1174_v29 = vadd.f32 %v3614_v30, %v1077_v25  ;;  %v6051_v25 = vld [vmem:[#allocation6_spill] sm:$0xff] }
 0x162   :  { %v1147_v51 = vadd.f32 %v3593_v27, %v4855_v20  ;;  %v1163_v7 = vadd.f32 %v3605_v13, %v1066_v55  ;;  %v5140_v47 = vpop.f32.mrf.mxu1  ;;  %v1098_v30 = vadd.f32 %v3565_v40, %v6051_v25 }
 0x163   :  { %v3945_v58 = vpop.f32.mrf.mxu0  ;;  %v1082_v31 = vadd.f32 %v3553_v63, %v4808_v10  ;;  %v3559_v10 = vadd.f32 %v5042_v28, %v5040_v22  ;;  %v1166_v17 = vadd.f32 %v3608_v46, %v1069_v41  ;;  %v6049_v46 = vld [vmem:[#allocation13_spill] sm:$0xff] }
 0x164   :  { %v5115_v27 = vadd.f32 %v3945_v58, %v1155_v16  ;;  %v3634_v28 = vpop.f32.mrf.mxu1  ;;  %v3626_v61 = vadd.f32 %v6050_v14, %v6049_v46 }
 0x165   :  { %v1243_v0 = vpop.f32.mrf.mxu0  ;;  %v1179_v22 = vadd.f32 %v3617_v53, %v1082_v31  ;;  %v1090_v32 = vadd.f32 %v3559_v10, %v6045_v59  ;;  %v6054_v10 = vld [vmem:[#allocation17_spill] sm:$0xff]  ;;  %v3635_v59 = vadd.f32 %v3634_v28, %v5140_v47 }
 0x166   :  { %v5108_v36 = vadd.f32 %v1243_v0, %v1147_v51  ;;  %v1332_v54 = vmul.f32 %v5115_v27, %v5115_v27  ;;  %v6042_v0 = vld [vmem:[#allocation3_spill] sm:$0xff]  ;;  %v6043_v51 = vld [vmem:[#allocation9_spill] sm:$0xff] }
 0x167   :  { %v3946_v50 = vpop.f32.mrf.mxu0  ;;  %v1085_v38 = vadd.f32 %v3556_v3, %v6042_v0  ;;  %v3620_v49 = vadd.f32 %v6044_v6, %v6043_v51  ;;  %v6057_v51 = vld [vmem:[#allocation7_spill] sm:$0xff] }
 0x168   :  { %v1330_v34 = vmul.f32 %v5108_v36, %v5108_v36  ;;  %v5127_v62 = vadd.f32 %v3946_v50, %v1158_v44  ;;  %v3623_v50 = vadd.f32 %v6047_v19, %v6046_v45 }
 0x169   :  { %v1246_v2 = vpop.f32.mrf.mxu0 }
 0x16a   :  { %v5117_v20 = vadd.f32 %v1246_v2, %v1150_v52  ;;  %v1333_v56 = vmul.f32 %v5127_v62, %v5127_v62 }
 0x16b   :  { %v3949_v8 = vpop.f32.mrf.mxu0 }
 0x16c   :  { %v1308_v37 = vadd.f32 %v5117_v20, %v5108_v36  ;;  %v1331_v4 = vmul.f32 %v5117_v20, %v5117_v20  ;;  %v5158_v24 = vadd.f32 %v3949_v8, %v1171_v15  ;;  %v3629_v8 = vadd.f32 %v5087_v18, %v5068_v35  ;;  %v6055_v15 = vld [vmem:[#allocation18_spill] sm:$0xff] }
 0x16d   :  { %v1259_v5 = vpop.f32.mrf.mxu0 }
 0x16e   :  { %v1309_v11 = vadd.f32 %v1308_v37, %v5115_v27  ;;  %v1346_v43 = vadd.f32 %v1331_v4, %v1330_v34  ;;  %v5145_v58 = vadd.f32 %v1259_v5, %v1163_v7  ;;  %v6048_v7 = vld [vmem:[#allocation5_spill] sm:$0xff]  ;;  %v3636_v37 = vpop.f32.mrf.mxu1  ;;  %v1336_v4 = vmul.f32 %v5158_v24, %v5158_v24 }
 0x16f   :  { %v3950_v48 = vpop.f32.mrf.mxu0  ;;  %v1093_v41 = vadd.f32 %v3562_v42, %v6048_v7 }
 0x170   :  { %v1347_v57 = vadd.f32 %v1346_v43, %v1332_v54  ;;  %v1310_v23 = vadd.f32 %v1309_v11, %v5127_v62  ;;  %v1334_v33 = vmul.f32 %v5145_v58, %v5145_v58  ;;  %v5171_v63 = vadd.f32 %v3950_v48, %v1174_v29  ;;  %v6052_v11 = vld [vmem:[#allocation14_spill] sm:$0xff]  ;;  %v6053_v43 = vld [vmem:[#allocation15_spill] sm:$0xff] }
 0x171   :  { %v1262_v9 = vpop.f32.mrf.mxu0  ;;  %v1012_v54 = vadd.f32 %v3510_v60, %v3446_v26  ;;  %v3568_v3 = vadd.f32 %v6053_v43, %v6052_v11  ;;  %v3571_v48 = vadd.f32 %v6055_v15, %v6054_v10  ;;  %v6056_v29 = vld [vmem:[#allocation19_spill] sm:$0xff]  ;;  %v1190_v26 = vadd.f32 %v3626_v61, %v1093_v41 }
 0x172   :  { %v1311_v12 = vadd.f32 %v1310_v23, %v5145_v58  ;;  %v1348_v55 = vadd.f32 %v1347_v57, %v1333_v56  ;;  %v5163_v13 = vadd.f32 %v1262_v9, %v1166_v17  ;;  %v1187_v17 = vadd.f32 %v3623_v50, %v1090_v32 }
 0x173   :  { %v3953_v16 = vpop.f32.mrf.mxu0  ;;  %v1337_v35 = vmul.f32 %v5171_v63, %v5171_v63  ;;  %v1182_v23 = vadd.f32 %v3620_v49, %v1085_v38  ;;  %v3574_v42 = vadd.f32 %v5080_v39, %v6056_v29  ;;  %v1195_v9 = vadd.f32 %v3629_v8, %v1098_v30  ;;  %v6058_v39 = vld [vmem:[#allocation8_spill] sm:$0xff] }
 0x174   :  { %v1349_v52 = vadd.f32 %v1348_v55, %v1334_v33  ;;  %v1312_v44 = vadd.f32 %v1311_v12, %v5163_v13  ;;  %v1335_v2 = vmul.f32 %v5163_v13, %v5163_v13  ;;  %v5196_v40 = vadd.f32 %v3953_v16, %v1187_v17 }
 0x175   :  { %v1275_v34 = vpop.f32.mrf.mxu0  ;;  %v1101_v6 = vadd.f32 %v3568_v3, %v6057_v51  ;;  %v3632_v38 = vadd.f32 %v5113_v1, %v5103_v21  ;;  %v1106_v49 = vadd.f32 %v3571_v48, %v6058_v39 }
 0x176   :  { %v1313_v31 = vadd.f32 %v1312_v44, %v5158_v24  ;;  %v1350_v53 = vadd.f32 %v1349_v52, %v1335_v2  ;;  %v5185_v5 = vadd.f32 %v1275_v34, %v1179_v22  ;;  %v3637_v22 = vpop.f32.mrf.mxu1  ;;  %v1109_v52 = vadd.f32 %v3574_v42, %v1012_v54 }
 0x177   :  { %v3954_v56 = vpop.f32.mrf.mxu0  ;;  %v3638_v44 = vadd.f32 %v3637_v22, %v3636_v37  ;;  %v1340_v7 = vmul.f32 %v5196_v40, %v5196_v40  ;;  %v1203_v47 = vadd.f32 %v3635_v59, %v1106_v49  ;;  %v1198_v25 = vadd.f32 %v3632_v38, %v1101_v6 }
 0x178   :  { %v1351_v18 = vadd.f32 %v1350_v53, %v1336_v4  ;;  %v1314_v57 = vadd.f32 %v1313_v31, %v5171_v63  ;;  %v1338_v33 = vmul.f32 %v5185_v5, %v5185_v5  ;;  %v5208_v19 = vadd.f32 %v3954_v56, %v1190_v26 }
 0x179   :  { %v1278_v60 = vpop.f32.mrf.mxu0  ;;  %v1206_v8 = vadd.f32 %v3638_v44, %v1109_v52 }
 0x17a   :  { %v1315_v12 = vadd.f32 %v1314_v57, %v5185_v5  ;;  %v1352_v55 = vadd.f32 %v1351_v18, %v1337_v35  ;;  %v5201_v0 = vadd.f32 %v1278_v60, %v1182_v23  ;;  %v1341_v46 = vmul.f32 %v5208_v19, %v5208_v19 }
 0x17b   :  { %v3957_v32 = vpop.f32.mrf.mxu0 }
 0x17c   :  { %v1353_v45 = vadd.f32 %v1352_v55, %v1338_v33  ;;  %v1316_v50 = vadd.f32 %v1315_v12, %v5201_v0  ;;  %v1339_v16 = vmul.f32 %v5201_v0, %v5201_v0  ;;  %v5221_v30 = vadd.f32 %v3957_v32, %v1203_v47 }
 0x17d   :  { %v1291_v2 = vpop.f32.mrf.mxu0 }
 0x17e   :  { %v1317_v21 = vadd.f32 %v1316_v50, %v5196_v40  ;;  %v1354_v1 = vadd.f32 %v1353_v45, %v1339_v16  ;;  %v5216_v41 = vadd.f32 %v1291_v2, %v1195_v9  ;;  %v1344_v10 = vmul.f32 %v5221_v30, %v5221_v30 }
 0x17f   :  { %v3958_v28 = vpop.f32.mrf.mxu0 }
 0x180   :  { %v1355_v14 = vadd.f32 %v1354_v1, %v1340_v7  ;;  %v1318_v61 = vadd.f32 %v1317_v21, %v5208_v19  ;;  %v1342_v4 = vmul.f32 %v5216_v41, %v5216_v41  ;;  %v5226_v11 = vadd.f32 %v3958_v28, %v1206_v8 }
 0x181   :  { %v1294_v34 = vpop.f32.mrf.mxu0 }
 0x182   :  { %v1319_v37 = vadd.f32 %v1318_v61, %v5216_v41  ;;  %v1356_v31 = vadd.f32 %v1355_v14, %v1341_v46  ;;  %v1295_v53 = vadd.f32 %v1294_v34, %v1198_v25  ;;  %v1345_v17 = vmul.f32 %v5226_v11, %v5226_v11  ;;  %v5277_v46 = vld [vmem:[%s6020_s4] ss:$0 sm:$0xff] }
 0x184   :  { %v1357_v54 = vadd.f32 %v1356_v31, %v1342_v4  ;;  %v1320_v43 = vadd.f32 %v1319_v37, %v1295_v53  ;;  %v1343_v3 = vmul.f32 %v1295_v53, %v1295_v53 }
 0x186   :  { %v1321_v15 = vadd.f32 %v1320_v43, %v5221_v30  ;;  %v1358_v48 = vadd.f32 %v1357_v54, %v1343_v3 }
 0x188   :  { %v1322_v56 = vadd.f32 %v1321_v15, %v5226_v11  ;;  %v1359_v35 = vadd.f32 %v1358_v48, %v1344_v10 }
 0x18a   :  { %v1323_v18 = vrot.slane %v1322_v56, 4  ;;  %v1360_v57 = vadd.f32 %v1359_v35, %v1345_v17 }
 0x18c   :  { %v1324_v23 = vadd.f32 %v1323_v18, %v1322_v56  ;;  %v1361_v29 = vrot.slane %v1360_v57, 4  ;;  %v1547_v56 = vld [vmem:[#allocation2 + $0x1] sm:$0xff] }
 0x18e   :  { %v1325_v42 = vrot.slane %v1324_v23, 2  ;;  %v1362_v26 = vadd.f32 %v1361_v29, %v1360_v57 }
 0x190   :  { %v1326_v60 = vadd.f32 %v1325_v42, %v1324_v23  ;;  %v1363_v9 = vrot.slane %v1362_v26, 2 }
 0x192   :  { %v1327_v22 = vrot.slane %v1326_v60, 1  ;;  %v1364_v12 = vadd.f32 %v1363_v9, %v1362_v26 }
 0x194   :  { %v1328_v33 = vadd.f32 %v1327_v22, %v1326_v60  ;;  %v1365_v55 = vrot.slane %v1364_v12, 1 }
 0x196   :  { %v5234_v51 = vmul.f32 0.0078125, %v1328_v33  ;;  %v1366_v6 = vadd.f32 %v1365_v55, %v1364_v12 }
 0x198   :  { %v1367_v38 = vmul.f32 0.0078125, %v1366_v6  ;;  %v1368_v39 = vmul.f32 %v5234_v51, %v5234_v51  ;;  %v1384_v49 = vsub.f32 %v1295_v53, %v5234_v51  ;;  %v1371_v59 = vsub.f32 %v5108_v36, %v5234_v51 }
 0x199   :  { %v1372_v32 = vsub.f32 %v5117_v20, %v5234_v51  ;;  %v1373_v45 = vsub.f32 %v5115_v27, %v5234_v51  ;;  %v1374_v50 = vsub.f32 %v5127_v62, %v5234_v51  ;;  %v1375_v16 = vsub.f32 %v5145_v58, %v5234_v51 }
 0x19a   :  { %v1369_v52 = vsub.f32 %v1367_v38, %v1368_v39  ;;  %v1376_v44 = vsub.f32 %v5163_v13, %v5234_v51  ;;  %v1377_v2 = vsub.f32 %v5158_v24, %v5234_v51  ;;  %v1378_v36 = vsub.f32 %v5171_v63, %v5234_v51 }
 0x19b   :  { %v1379_v20 = vsub.f32 %v5185_v5, %v5234_v51  ;;  %v1380_v27 = vsub.f32 %v5201_v0, %v5234_v51  ;;  %v1381_v62 = vsub.f32 %v5196_v40, %v5234_v51  ;;  %v1382_v58 = vsub.f32 %v5208_v19, %v5234_v51  ;;  %v5272_v40 = vld [vmem:[%s6019_s3] ss:$0 sm:$0xff] }
 0x19c   :  { %v1370_v7 = vmax.f32 %v1369_v52, 0.0  ;;  %v1383_v13 = vsub.f32 %v5216_v41, %v5234_v51  ;;  %v1385_v24 = vsub.f32 %v5221_v30, %v5234_v51  ;;  %v1386_v63 = vsub.f32 %v5226_v11, %v5234_v51 }
 0x19e   :  { %v1387_v5 = vadd.f32 1e-05, %v1370_v7  ;;  %v1571_v7 = vld [vmem:[#allocation2 + $0x2] sm:$0xff] }
 0x1a0   :  { %4136 = vrsqrt.f32 %v1387_v5 }
 0x1ad   :  { %v4137_v21 = vpop.eup %4136 }
 0x1ae   :  { %v1402_v0 = vmul.f32 %v4137_v21, %v1384_v49  ;;  %v1389_v1 = vmul.f32 %v4137_v21, %v1371_v59  ;;  %v1390_v47 = vmul.f32 %v4137_v21, %v1372_v32  ;;  %v1391_v28 = vmul.f32 %v4137_v21, %v1373_v45 }
 0x1af   :  { %v1392_v14 = vmul.f32 %v4137_v21, %v1374_v50  ;;  %v1393_v61 = vmul.f32 %v4137_v21, %v1375_v16  ;;  %v1394_v25 = vmul.f32 %v4137_v21, %v1376_v44  ;;  %v1395_v8 = vmul.f32 %v4137_v21, %v1377_v2 }
 0x1b0   :  { %v1424_v34 = vmul.f32 %v5272_v40, %v1402_v0  ;;  %v1411_v37 = vmul.f32 %v5272_v40, %v1389_v1  ;;  %v1412_v4 = vmul.f32 %v5272_v40, %v1390_v47  ;;  %v1413_v31 = vmul.f32 %v5272_v40, %v1391_v28 }
 0x1b1   :  { %v1414_v53 = vmul.f32 %v5272_v40, %v1392_v14  ;;  %v1415_v54 = vmul.f32 %v5272_v40, %v1393_v61  ;;  %v1416_v43 = vmul.f32 %v5272_v40, %v1394_v25  ;;  %v1417_v3 = vmul.f32 %v5272_v40, %v1395_v8 }
 0x1b2   :  { %v5288_v10 = vadd.f32 %v5277_v46, %v1424_v34  ;;  %v1433_v15 = vadd.f32 %v5277_v46, %v1411_v37  ;;  %v1434_v48 = vadd.f32 %v5277_v46, %v1412_v4  ;;  %v1435_v17 = vadd.f32 %v5277_v46, %v1413_v31 }
 0x1b3   :  { %v1436_v35 = vadd.f32 %v5277_v46, %v1414_v53  ;;  %v1437_v18 = vadd.f32 %v5277_v46, %v1415_v54  ;;  %v1438_v57 = vadd.f32 %v5277_v46, %v1416_v43  ;;  %v1439_v23 = vadd.f32 %v5277_v46, %v1417_v3  ;;  %v4097_v53 = vld [vmem:[%s6018_s2 + $0x138] sm:$0xff]  }
 0x1b4   :  { %v1462_v29 = vmax.f32 %v5288_v10, 0.0  ;;  %v5298_v42 = vmax.f32 %v1433_v15, 0.0  ;;  %v5300_v26 = vmax.f32 %v1434_v48, 0.0  ;;  %v5302_v60 = vmax.f32 %v1435_v17, 0.0  ;;  %v4107_v3 = vld [vmem:[%s6018_s2 + $0x1b8] sm:$0xff]   ;;  %v4108_v48 = vld [vmem:[%s6018_s2 + $0x1f0] sm:$0xff]  }
 0x1b5   :  { %v5304_v9 = vmax.f32 %v1436_v35, 0.0  ;;  %v5306_v22 = vmax.f32 %v1437_v18, 0.0  ;;  %v5308_v12 = vmax.f32 %v1438_v57, 0.0  ;;  %v5310_v33 = vmax.f32 %v1439_v23, 0.0  ;;  %v4099_v18 = vld [vmem:[%s6018_s2 + $0x130] sm:$0xff]   ;;  %v4100_v23 = vld [vmem:[%s6018_s2 + $0x168] sm:$0xff]  }
 0x1b6   :  { %1520 = vst [vmem:[#allocation2 + $0x101] sm:$0xff] %v1462_v29  ;;  %1507 = vst [vmem:[#allocation2 + $0x11] sm:$0xff] %v5298_v42  ;;  %v1563_v55 = vpack.c.bf16 %v5298_v42, %v1547_v56  ;;  %v5320_v6 = vpack.c.bf16 %v5302_v60, %v5300_v26  ;;  %v1396_v38 = vmul.f32 %v4137_v21, %v1378_v36  ;;  %v6059_v8 = vmov 0.0  }
 0x1b7   :  { %1508 = vst [vmem:[#allocation2 + $0x21] sm:$0xff] %v5300_v26  ;;  %1509 = vst [vmem:[#allocation2 + $0x31] sm:$0xff] %v5302_v60  ;;  %v1397_v39 = vmul.f32 %v4137_v21, %v1379_v20  ;;  %v5326_v49 = vpack.c.bf16 %v5306_v22, %v5304_v9  ;;  %v5332_v59 = vpack.c.bf16 %v5310_v33, %v5308_v12 }
 0x1b8   :  { %1510 = vst [vmem:[#allocation2 + $0x41] sm:$0xff] %v5304_v9  ;;  %1511 = vst [vmem:[#allocation2 + $0x51] sm:$0xff] %v5306_v22  ;;  %v1398_v32 = vmul.f32 %v4137_v21, %v1380_v27  ;;  %v1399_v45 = vmul.f32 %v4137_v21, %v1381_v62  ;;  %2348 = vmatprep.mubr.bf16.mxu1 %v1563_v55  ;;  %v1418_v50 = vmul.f32 %v5272_v40, %v1396_v38  ;;  %v4109_v55 = vld [vmem:[%s6018_s2 + $0x1b0] sm:$0xff]  }
 0x1b9   :  { %1512 = vst [vmem:[#allocation2 + $0x61] sm:$0xff] %v5308_v12  ;;  %1513 = vst [vmem:[#allocation2 + $0x71] sm:$0xff] %v5310_v33  ;;  %v1419_v16 = vmul.f32 %v5272_v40, %v1397_v39  ;;  %v1400_v52 = vmul.f32 %v4137_v21, %v1382_v58  ;;  %v1401_v44 = vmul.f32 %v4137_v21, %v1383_v13 }
 0x1ba   :  { %v1420_v2 = vmul.f32 %v5272_v40, %v1398_v32  ;;  %v1421_v36 = vmul.f32 %v5272_v40, %v1399_v45  ;;  %v1403_v20 = vmul.f32 %v4137_v21, %v1385_v24  ;;  %v1404_v27 = vmul.f32 %v4137_v21, %v1386_v63 }
 0x1bb   :  { %v1440_v62 = vadd.f32 %v5277_v46, %v1418_v50  ;;  %v1441_v19 = vadd.f32 %v5277_v46, %v1419_v16  ;;  %v1422_v58 = vmul.f32 %v5272_v40, %v1400_v52  ;;  %v1423_v41 = vmul.f32 %v5272_v40, %v1401_v44  ;;  %v4111_v50 = vld [vmem:[%s6018_s2 + $0x1e8] sm:$0xff]  }
 0x1bc   :  { %v1442_v13 = vadd.f32 %v5277_v46, %v1420_v2  ;;  %v1443_v5 = vadd.f32 %v5277_v46, %v1421_v36  ;;  %v1425_v30 = vmul.f32 %v5272_v40, %v1403_v20  ;;  %v1426_v24 = vmul.f32 %v5272_v40, %v1404_v27  ;;  %v4101_v27 = vld [vmem:[%s6018_s2 + $0x128] sm:$0xff]  }
 0x1bd   :  { %v5358_v0 = vmax.f32 %v1440_v62, 0.0  ;;  %v5360_v11 = vmax.f32 %v1441_v19, 0.0  ;;  %v1444_v51 = vadd.f32 %v5277_v46, %v1422_v58  ;;  %v1445_v63 = vadd.f32 %v5277_v46, %v1423_v41  ;;  %v1595_v21 = vld [vmem:[#allocation2 + $0x10] sm:$0xff]  ;;  %v4102_v19 = vld [vmem:[%s6018_s2 + $0x160] sm:$0xff]   ;;  %v4113_v58 = vld [vmem:[%s6018_s2 + $0x1a8] sm:$0xff]  }
 0x1be   :  { %v1596_v1 = vld [vmem:[#allocation2 + $0x20] sm:$0xff]  ;;  %v5364_v47 = vld [vmem:[#allocation2 + $0x12] sm:$0xff]  ;;  %v5366_v28 = vmax.f32 %v1442_v13, 0.0  ;;  %v5368_v14 = vmax.f32 %v1443_v5, 0.0  ;;  %v1447_v61 = vadd.f32 %v5277_v46, %v1425_v30  ;;  %v1448_v40 = vadd.f32 %v5277_v46, %v1426_v24 }
 0x1bf   :  { %v1611_v25 = vpack.c.bf16 %v1596_v1, %v1595_v21  ;;  %v1539_v34 = vpack.c.bf16 %v1595_v21, %v6059_v8  ;;  %v1587_v37 = vpack.c.bf16 %v5364_v47, %v1571_v7  ;;  %v1597_v4 = vld [vmem:[#allocation2 + $0x30] sm:$0xff]  ;;  %v5374_v31 = vld [vmem:[#allocation2 + $0x40] sm:$0xff]  ;;  %1514 = vst [vmem:[#allocation2 + $0x81] sm:$0xff] %v5358_v0  ;;  %1515 = vst [vmem:[#allocation2 + $0xb1] sm:$0xff] %v5360_v11  ;;  %v5390_v43 = vmax.f32 %v1444_v51, 0.0 }
 0x1c0   :  { %v4098_v46 = vld [vmem:[%s6018_s2 + $0x170] sm:$0xff]   ;;  %1516 = vst [vmem:[#allocation2 + $0xc1] sm:$0xff] %v5366_v28  ;;  %1517 = vst [vmem:[#allocation2 + $0xd1] sm:$0xff] %v5368_v14  ;;  %v5388_v54 = vpack.c.bf16 %v5368_v14, %v5366_v28  ;;  %v1612_v15 = vpack.c.bf16 %v5374_v31, %v1597_v4  ;;  %v5399_v17 = vmax.f32 %v1445_v63, 0.0  ;;  %v5403_v56 = vmax.f32 %v1447_v61, 0.0  ;;  %v5430_v32 = vld [vmem:[#allocation2 + $0x22] sm:$0xff] }
 0x1c1   :  { %2445 = vmatprep.mubr.bf16.mxu0 %v1611_v25  ;;  %2349 = vmatmul.mubr.bf16.vlgmr.msra.gmra.mxu1 %v1539_v34  ;;  %1518 = vst [vmem:[#allocation2 + $0xe1] sm:$0xff] %v5390_v43  ;;  %v5405_v35 = vmax.f32 %v1448_v40, 0.0  ;;  %v1635_v39 = vpack.c.bf16 %v5300_v26, %v5298_v42  ;;  %v5432_v45 = vld [vmem:[#allocation2 + $0x32] sm:$0xff]  ;;  %v1636_v10 = vpack.c.bf16 %v5304_v9, %v5302_v60  ;;  %v1600_v52 = vld [vmem:[#allocation2 + $0x60] sm:$0xff] }
 0x1c2   :  { %2446 = vmatmul.mubr.bf16.vlgmr.msra.gmra.mxu0 %v1587_v37  ;;  %2356 = vmatprep.mubr.bf16.mxu1 %v5320_v6  ;;  %1519 = vst [vmem:[#allocation2 + $0xf1] sm:$0xff] %v5399_v17  ;;  %v5413_v57 = vpack.c.bf16 %v5399_v17, %v5390_v43  ;;  %1521 = vst [vmem:[#allocation2 + $0x111] sm:$0xff] %v5403_v56  ;;  %v5425_v38 = vpack.c.bf16 %v5403_v56, %v1462_v29  ;;  %v1599_v16 = vld [vmem:[#allocation2 + $0x50] sm:$0xff]  ;;  %v4114_v7 = vld [vmem:[%s6018_s2 + $0x1e0] sm:$0xff]  }
 0x1c3   :  { %2453 = vmatprep.mubr.bf16.mxu0 %v1612_v15  ;;  %3784 = vmatpush3.bf16.msra.mxu1 %v4097_v53  ;;  %1522 = vst [vmem:[#allocation2 + $0x121] sm:$0xff] %v5405_v35  ;;  %v1637_v29 = vpack.c.bf16 %v5308_v12, %v5306_v22  ;;  %v1638_v44 = vpack.c.bf16 %v5358_v0, %v5310_v33  ;;  %v4103_v13 = vld [vmem:[%s6018_s2 + $0x120] sm:$0xff]   ;;  %v4104_v5 = vld [vmem:[%s6018_s2 + $0x158] sm:$0xff]   ;;  %v4110_v34 = vld [vmem:[%s6018_s2 + $0x150] sm:$0xff]  }
 0x1c4   :  { %3785 = vmatprep.subr.bf16.mxu1 %v4098_v46  ;;  %3848 = vmatpush3.bf16.msra.mxu0 %v4107_v3  ;;  %v1639_v2 = vpack.c.bf16 %v5366_v28, %v5360_v11  ;;  %v1640_v36 = vpack.c.bf16 %v5390_v43, %v5368_v14  ;;  %v5447_v20 = vpack.c.bf16 %v1597_v4, %v1596_v1  ;;  %v4115_v30 = vld [vmem:[%s6018_s2 + $0x1a0] sm:$0xff]   ;;  %v5479_v51 = vld [vmem:[#allocation2 + $0x52] sm:$0xff]  ;;  %v4116_v3 = vld [vmem:[%s6018_s2 + $0x148] sm:$0xff]  }
 0x1c5   :  { %3849 = vmatprep.subr.bf16.mxu0 %v4108_v48  ;;  %v5454_v62 = vpack.c.bf16 %v5432_v45, %v5430_v32  ;;  %v1613_v41 = vpack.c.bf16 %v1600_v52, %v1599_v16  ;;  %v5477_v24 = vld [vmem:[#allocation2 + $0x42] sm:$0xff]  ;;  %v4117_v63 = vld [vmem:[%s6018_s2 + $0x1d8] sm:$0xff]   ;;  %v1642_v21 = vpack.c.bf16 %v5405_v35, %v5403_v56  ;;  %v1601_v1 = vld [vmem:[#allocation2 + $0x70] sm:$0xff]  ;;  %v5489_v40 = vpack.c.bf16 %v1599_v16, %v5374_v31 }
 0x1c6   :  { %v5486_v61 = vld [vmem:[#allocation2 + $0x80] sm:$0xff]  ;;  %v4106_v25 = vld [vmem:[%s6018_s2 + $0x118] sm:$0xff]   ;;  %v5496_v8 = vpack.c.bf16 %v5479_v51, %v5477_v24  ;;  %v4120_v31 = vld [vmem:[%s6018_s2 + $0x1d0] sm:$0xff]   ;;  %v5527_v16 = vpack.c.bf16 %v1601_v1, %v1600_v52 }
 0x1c7   :  { %3786 = vmatpush3.bf16.msra.mxu1 %v4099_v18  ;;  %v4119_v37 = vld [vmem:[%s6018_s2 + $0x198] sm:$0xff]   ;;  %v1614_v4 = vpack.c.bf16 %v5486_v61, %v1601_v1  ;;  %v4112_v53 = vld [vmem:[%s6018_s2 + $0x110] sm:$0xff]   ;;  %v1555_v46 = vld [vmem:[#allocation2 + $0xa1] sm:$0xff] }
 0x1c8   :  { %3787 = vmatprep.subr.bf16.mxu1 %v4100_v23  ;;  %3850 = vmatpush3.bf16.msra.mxu0 %v4109_v55  ;;  %v4121_v15 = vld [vmem:[%s6018_s2 + $0x190] sm:$0xff]   ;;  %v5520_v48 = vld [vmem:[#allocation2 + $0x62] sm:$0xff]  ;;  %v4132_v26 = vld [vmem:[%s6018_s2 + $0x218] sm:$0xff]  }
 0x1c9   :  { %2357 = vmatmul.mubr.bf16.gmra.mxu1 %v5447_v20  ;;  %3851 = vmatprep.subr.bf16.mxu0 %v4111_v50  ;;  %v5522_v18 = vld [vmem:[#allocation2 + $0x72] sm:$0xff]  ;;  %v4123_v23 = vld [vmem:[%s6018_s2 + $0x1c8] sm:$0xff]   ;;  %v1604_v50 = vld [vmem:[#allocation2 + $0xc0] sm:$0xff] }
 0x1ca   :  { %2454 = vmatmul.mubr.bf16.gmra.mxu0 %v5454_v62  ;;  %2364 = vmatprep.mubr.bf16.mxu1 %v5326_v49  ;;  %v1603_v55 = vld [vmem:[#allocation2 + $0xb0] sm:$0xff]  ;;  %v4125_v52 = vld [vmem:[%s6018_s2 + $0x188] sm:$0xff]   ;;  %v4131_v42 = vld [vmem:[%s6018_s2 + $0x220] sm:$0xff]  }
 0x1cb   :  { %2461 = vmatprep.mubr.bf16.mxu0 %v1613_v41  ;;  %3788 = vmatpush3.bf16.msra.mxu1 %v4101_v27  ;;  %v4118_v27 = vld [vmem:[%s6018_s2 + $0x108] sm:$0xff]   ;;  %v4122_v41 = vld [vmem:[%s6018_s2 + $0x140] sm:$0xff]   ;;  %v4133_v60 = vld [vmem:[%s6018_s2 + $0x210] sm:$0xff]  }
 0x1cc   :  { %3789 = vmatprep.subr.bf16.mxu1 %v4102_v19  ;;  %3852 = vmatpush3.bf16.msra.mxu0 %v4113_v58  ;;  %v5534_v19 = vpack.c.bf16 %v5522_v18, %v5520_v48  ;;  %v1567_v58 = vpack.c.bf16 %v5360_v11, %v1555_v46  ;;  %v1579_v1 = vld [vmem:[#allocation2 + $0xa2] sm:$0xff]  ;;  %v1707_v28 = vld [vmem:[#allocation2 + $0x131] sm:$0xff] }
 0x1cd   :  { %3853 = vmatprep.subr.bf16.mxu0 %v4114_v7  ;;  %v1615_v7 = vpack.c.bf16 %v1604_v50, %v1603_v55  ;;  %v4135_v12 = vld [vmem:[%s6018_s2 + $0x200] sm:$0xff]   ;;  %v1723_v43 = vld [vmem:[#allocation2 + $0x92] sm:$0xff] }
 0x1ce   :  { %v1704_v33 = vld [vmem:[#allocation2 + $0x101] sm:$0xff] }
 0x1cf   :  { %3790 = vmatpush3.bf16.msra.mxu1 %v4103_v13  ;;  %v4126_v13 = vld [vmem:[%s6018_s2 + $0x1c0] sm:$0xff]  }
 0x1d0   :  { %3791 = vmatprep.subr.bf16.mxu1 %v4104_v5  ;;  %3854 = vmatpush3.bf16.msra.mxu0 %v4115_v30  ;;  %v4124_v5 = vld [vmem:[%s6018_s2 + $0x100] sm:$0xff]  }
 0x1d1   :  { %2365 = vmatmul.mubr.bf16.gmra.mxu1 %v5489_v40  ;;  %3855 = vmatprep.subr.bf16.mxu0 %v4117_v63  ;;  %v4127_v30 = vld [vmem:[%s6018_s2 + $0x180] sm:$0xff]   ;;  %v4128_v63 = vld [vmem:[%s6018_s2 + $0x238] sm:$0xff]  }
 0x1d2   :  { %2462 = vmatmul.mubr.bf16.gmra.mxu0 %v5496_v8  ;;  %2372 = vmatprep.mubr.bf16.mxu1 %v5332_v59  ;;  %v1658_v11 = vld [vmem:[#allocation2 + $0x122] sm:$0xff] }
 0x1d3   :  { %2469 = vmatprep.mubr.bf16.mxu0 %v1614_v4  ;;  %3792 = vmatpush3.bf16.msra.mxu1 %v4106_v25  ;;  %v5557_v25 = vld [vmem:[#allocation2 + $0xb2] sm:$0xff]  ;;  %v5559_v4 = vld [vmem:[#allocation2] sm:$0xff] }
 0x1d4   :  { %3793 = vmatprep.subr.bf16.mxu1 %v4110_v34  ;;  %3856 = vmatpush3.bf16.msra.mxu0 %v4119_v37  ;;  %v1605_v34 = vld [vmem:[#allocation2 + $0xd0] sm:$0xff]  ;;  %v1606_v37 = vld [vmem:[#allocation2 + $0xe0] sm:$0xff] }
 0x1d5   :  { %3857 = vmatprep.subr.bf16.mxu0 %v4120_v31  ;;  %v1543_v31 = vpack.c.bf16 %v1603_v55, %v5559_v4  ;;  %v1616_v46 = vpack.c.bf16 %v1606_v37, %v1605_v34 }
 0x1d7   :  { %3794 = vmatpush3.bf16.msra.mxu1 %v4112_v53  ;;  %v1591_v53 = vpack.c.bf16 %v5557_v25, %v1579_v1 }
 0x1d8   :  { %3795 = vmatprep.subr.bf16.mxu1 %v4116_v3  ;;  %3858 = vmatpush3.bf16.msra.mxu0 %v4121_v15  ;;  %v5564_v3 = vld [vmem:[#allocation2 + $0xc2] sm:$0xff]  ;;  %v5566_v15 = vld [vmem:[#allocation2 + $0xd2] sm:$0xff] }
 0x1d9   :  { %2373 = vmatmul.mubr.bf16.gmra.mxu1 %v5527_v16  ;;  %3859 = vmatprep.subr.bf16.mxu0 %v4123_v23  ;;  %v1607_v23 = vld [vmem:[#allocation2 + $0xf0] sm:$0xff]  ;;  %v5572_v55 = vpack.c.bf16 %v5566_v15, %v5564_v3  ;;  %v1663_v22 = vpack.c.bf16 %v5564_v3, %v5557_v25 }
 0x1da   :  { %2470 = vmatmul.mubr.bf16.gmra.mxu0 %v5534_v19  ;;  %2380 = vmatprep.mubr.bf16.mxu1 %v1567_v58  ;;  %v5568_v58 = vpack.c.bf16 %v1605_v34, %v1604_v50  ;;  %v5583_v50 = vpack.c.bf16 %v1607_v23, %v1606_v37  ;;  %v5593_v34 = vld [vmem:[#allocation2 + $0x102] sm:$0xff] }
 0x1db   :  { %2477 = vmatprep.mubr.bf16.mxu0 %v1615_v7  ;;  %3796 = vmatpush3.bf16.msra.mxu1 %v4118_v27  ;;  %v1608_v27 = vld [vmem:[#allocation2 + $0x100] sm:$0xff]  ;;  %v5579_v7 = vld [vmem:[#allocation2 + $0xf2] sm:$0xff] }
 0x1dc   :  { %3797 = vmatprep.subr.bf16.mxu1 %v4122_v41  ;;  %3860 = vmatpush3.bf16.msra.mxu0 %v4125_v52  ;;  %v1617_v41 = vpack.c.bf16 %v1608_v27, %v1607_v23  ;;  %v5577_v52 = vld [vmem:[#allocation2 + $0xe2] sm:$0xff]  ;;  %v4129_v23 = vld [vmem:[%s6018_s2 + $0x230] sm:$0xff]  }
 0x1dd   :  { %3861 = vmatprep.subr.bf16.mxu0 %v4126_v13  ;;  %v1609_v13 = vld [vmem:[#allocation2 + $0x110] sm:$0xff] }
 0x1df   :  { %3798 = vmatpush3.bf16.msra.mxu1 %v4124_v5  ;;  %v5581_v5 = vld [vmem:[#allocation2 + $0x120] sm:$0xff] }
 0x1e0   :  { %3862 = vmatpush3.bf16.msra.mxu0 %v4127_v30  ;;  %3959 = vmatprep.subr.bf16.mxu1 %v4128_v63  ;;  %v5587_v30 = vpack.c.bf16 %v5579_v7, %v5577_v52  ;;  %v1618_v1 = vpack.c.bf16 %v5581_v5, %v1609_v13  ;;  %v1691_v14 = vpack.c.bf16 %v5559_v4, %v5581_v5 }
 0x1e1   :  { %2381 = vmatmul.mubr.bf16.gmra.mxu1 %v1543_v31  ;;  %v5595_v31 = vld [vmem:[#allocation2 + $0x112] sm:$0xff] }
 0x1e2   :  { %2478 = vmatmul.mubr.bf16.gmra.mxu0 %v1591_v53  ;;  %2388 = vmatprep.mubr.bf16.mxu1 %v5388_v54  ;;  %v5597_v53 = vpack.c.bf16 %v1609_v13, %v1608_v27  ;;  %v5601_v37 = vpack.c.bf16 %v5595_v31, %v5593_v34 }
 0x1e3   :  { %2485 = vmatprep.mubr.bf16.mxu0 %v1616_v46  ;;  %v1659_v46 = vpack.c.bf16 %v5430_v32, %v5364_v47  ;;  %v1661_v47 = vpack.c.bf16 %v5520_v48, %v5479_v51 }
 0x1e9   :  { %2389 = vmatmul.mubr.bf16.gmra.mxu1 %v5568_v58 }
 0x1ea   :  { %2486 = vmatmul.mubr.bf16.gmra.mxu0 %v5572_v55  ;;  %2396 = vmatprep.mubr.bf16.mxu1 %v5413_v57 }
 0x1eb   :  { %2493 = vmatprep.mubr.bf16.mxu0 %v1617_v41 }
 0x1f1   :  { %2397 = vmatmul.mubr.bf16.gmra.mxu1 %v5583_v50 }
 0x1f2   :  { %2494 = vmatmul.mubr.bf16.gmra.mxu0 %v5587_v30  ;;  %2404 = vmatprep.mubr.bf16.mxu1 %v5425_v38  ;;  %v1660_v38 = vpack.c.bf16 %v5477_v24, %v5432_v45  ;;  %v1687_v45 = vpack.c.bf16 %v5559_v4, %v5486_v61 }
 0x1f3   :  { %2501 = vmatprep.mubr.bf16.mxu0 %v1618_v1 }
 0x1f9   :  { %2405 = vmatmul.mubr.bf16.gmra.mxu1 %v5597_v53 }
 0x1fa   :  { %2502 = vmatmul.mubr.bf16.gmra.mxu0 %v5601_v37  ;;  %2542 = vmatprep.mubr.bf16.mxu1 %v1659_v46 }
 0x1fb   :  { %2639 = vmatprep.mubr.bf16.mxu0 %v5320_v6  ;;  %v4130_v6 = vld [vmem:[%s6018_s2 + $0x228] sm:$0xff]  }
 0x201   :  { %2543 = vmatmul.mubr.bf16.vlgmr.msra.gmra.mxu1 %v1635_v39  ;;  %v1699_v39 = vld [vmem:[#allocation2 + $0x91] sm:$0xff] }
 0x202   :  { %2640 = vmatmul.mubr.bf16.vlgmr.msra.gmra.mxu0 %v5447_v20  ;;  %2550 = vmatprep.mubr.bf16.mxu1 %v1660_v38  ;;  %v1711_v9 = vpack.c.bf16 %v1699_v39, %v5358_v0  ;;  %v1665_v0 = vpack.c.bf16 %v5593_v34, %v5579_v7 }
 0x203   :  { %2647 = vmatprep.mubr.bf16.mxu0 %v5326_v49  ;;  %3960 = vmatpush3.bf16.msra.mxu1 %v4128_v63  ;;  %v1650_v49 = vld [vmem:[#allocation2 + $0x82] sm:$0xff] }
 0x204   :  { %3961 = vmatprep.subr.bf16.mxu1 %v4129_v23  ;;  %v1662_v32 = vpack.c.bf16 %v1650_v49, %v5522_v18 }
 0x207   :  { %3962 = vmatpush3.bf16.msra.mxu1 %v4129_v23 }
 0x208   :  { %3963 = vmatprep.subr.bf16.mxu1 %v4130_v6 }
 0x209   :  { %2551 = vmatmul.mubr.bf16.gmra.mxu1 %v1636_v10  ;;  %v1664_v10 = vpack.c.bf16 %v5577_v52, %v5566_v15 }
 0x20a   :  { %2648 = vmatmul.mubr.bf16.gmra.mxu0 %v5489_v40  ;;  %2558 = vmatprep.mubr.bf16.mxu1 %v1661_v47 }
 0x20b   :  { %2655 = vmatprep.mubr.bf16.mxu0 %v5332_v59  ;;  %3964 = vmatpush3.bf16.msra.mxu1 %v4130_v6  ;;  %v4134_v59 = vld [vmem:[%s6018_s2 + $0x208] sm:$0xff]  }
 0x20c   :  { %3965 = vmatprep.subr.bf16.mxu1 %v4131_v42 }
 0x20f   :  { %3966 = vmatpush3.bf16.msra.mxu1 %v4131_v42 }
 0x210   :  { %3967 = vmatprep.subr.bf16.mxu1 %v4132_v26 }
 0x211   :  { %2559 = vmatmul.mubr.bf16.gmra.mxu1 %v1637_v29  ;;  %v1641_v29 = vpack.c.bf16 %v1704_v33, %v5399_v17  ;;  %v1735_v17 = vpack.c.bf16 %v1723_v43, %v1650_v49 }
 0x212   :  { %2656 = vmatmul.mubr.bf16.gmra.mxu0 %v5527_v16  ;;  %2566 = vmatprep.mubr.bf16.mxu1 %v1662_v32 }
 0x213   :  { %2663 = vmatprep.mubr.bf16.mxu0 %v1711_v9  ;;  %3968 = vmatpush3.bf16.msra.mxu1 %v4132_v26 }
 0x214   :  { %3969 = vmatprep.subr.bf16.mxu1 %v4133_v60 }
 0x217   :  { %3970 = vmatpush3.bf16.msra.mxu1 %v4133_v60 }
 0x218   :  { %3971 = vmatprep.subr.bf16.mxu1 %v4134_v59 }
 0x219   :  { %2567 = vmatmul.mubr.bf16.gmra.mxu1 %v1638_v44  ;;  %v1715_v44 = vpack.c.bf16 %v1707_v28, %v5405_v35 }
 0x21a   :  { %2664 = vmatmul.mubr.bf16.gmra.mxu0 %v1687_v45  ;;  %2574 = vmatprep.mubr.bf16.mxu1 %v1663_v22 }
 0x21b   :  { %2671 = vmatprep.mubr.bf16.mxu0 %v5388_v54  ;;  %3972 = vmatpush3.bf16.msra.mxu1 %v4134_v59  ;;  %v1714_v54 = vpack.c.bf16 %v5403_v56, %v1704_v33 }
 0x21c   :  { %3973 = vmatprep.subr.bf16.mxu1 %v4135_v12 }
 0x21f   :  { %3974 = vmatpush3.bf16.msra.mxu1 %v4135_v12 }
 0x221   :  { %2575 = vmatmul.mubr.bf16.gmra.mxu1 %v1639_v2  ;;  %v1731_v2 = vld [vmem:[#allocation2 + $0x132] sm:$0xff] }
 0x222   :  { %2672 = vmatmul.mubr.bf16.gmra.mxu0 %v5568_v58  ;;  %2582 = vmatprep.mubr.bf16.mxu1 %v1664_v10 }
 0x223   :  { %2679 = vmatprep.mubr.bf16.mxu0 %v5413_v57  ;;  %v1666_v57 = vpack.c.bf16 %v1658_v11, %v5595_v31 }
 0x229   :  { %2583 = vmatmul.mubr.bf16.gmra.mxu1 %v1640_v36  ;;  %v1739_v36 = vpack.c.bf16 %v1731_v2, %v1658_v11 }
 0x22a   :  { %2680 = vmatmul.mubr.bf16.gmra.mxu0 %v5583_v50  ;;  %2590 = vmatprep.mubr.bf16.mxu1 %v1665_v0 }
 0x22b   :  { %2687 = vmatprep.mubr.bf16.mxu0 %v1714_v54 }
 0x231   :  { %2591 = vmatmul.mubr.bf16.gmra.mxu1 %v1641_v29 }
 0x232   :  { %2688 = vmatmul.mubr.bf16.gmra.mxu0 %v5597_v53  ;;  %2598 = vmatprep.mubr.bf16.mxu1 %v1666_v57 }
 0x233   :  { %2695 = vmatprep.mubr.bf16.mxu0 %v1715_v44 }
 0x239   :  { %2599 = vmatmul.mubr.bf16.gmra.mxu1 %v1642_v21 }
 0x23a   :  { %2696 = vmatmul.mubr.bf16.gmra.mxu0 %v1691_v14  ;;  %3975 = vmatprep.mubr.bf16.mxu1 %v5454_v62 }
 0x241   :  { %3976 = vmatmul.mubr.bf16.vlgmr.msra.gmra.mxu1 %v5496_v8 }
 0x242   :  { %3979 = vmatprep.mubr.bf16.mxu1 %v5534_v19 }
 0x249   :  { %3980 = vmatmul.mubr.bf16.gmra.mxu1 %v1735_v17 }
 0x24a   :  { %3983 = vmatprep.mubr.bf16.mxu1 %v5572_v55 }
 0x251   :  { %3984 = vmatmul.mubr.bf16.gmra.mxu1 %v5587_v30 }
 0x252   :  { %3987 = vmatprep.mubr.bf16.mxu1 %v5601_v37 }
 0x259   :  { %3988 = vmatmul.mubr.bf16.gmra.mxu1 %v1739_v36 }
 0x281   :  { %v3671_v56 = vpop.f32.mrf.mxu1 }
 0x282   :  { %v3735_v35 = vpop.f32.mrf.mxu0 }
 0x283   :  { %v3672_v20 = vpop.f32.mrf.mxu1 }
 0x284   :  { %v3673_v62 = vadd.f32 %v3672_v20, %v3671_v56  ;;  %v3736_v24 = vpop.f32.mrf.mxu0 }
 0x285   :  { %v3737_v51 = vadd.f32 %v3736_v24, %v3735_v35  ;;  %v3674_v21 = vpop.f32.mrf.mxu1 }
 0x286   :  { %v3738_v61 = vpop.f32.mrf.mxu0 }
 0x287   :  { %v5686_v40 = vadd.f32 %v3737_v51, %v3673_v62  ;;  %v3675_v8 = vpop.f32.mrf.mxu1 }
 0x288   :  { %v3676_v48 = vadd.f32 %v3675_v8, %v3674_v21  ;;  %v3739_v18 = vpop.f32.mrf.mxu0 }
 0x289   :  { %v3740_v16 = vadd.f32 %v3739_v18, %v3738_v61  ;;  %v3677_v19 = vpop.f32.mrf.mxu1 }
 0x28a   :  { %v3741_v63 = vpop.f32.mrf.mxu0 }
 0x28b   :  { %v5688_v25 = vadd.f32 %v3740_v16, %v3676_v48  ;;  %v3678_v4 = vpop.f32.mrf.mxu1 }
 0x28c   :  { %v3679_v3 = vadd.f32 %v3678_v4, %v3677_v19  ;;  %v3742_v15 = vpop.f32.mrf.mxu0 }
 0x28d   :  { %v3743_v27 = vadd.f32 %v3742_v15, %v3741_v63  ;;  %v3680_v58 = vpop.f32.mrf.mxu1 }
 0x28e   :  { %v3744_v55 = vpop.f32.mrf.mxu0 }
 0x28f   :  { %v5690_v41 = vadd.f32 %v3743_v27, %v3679_v3  ;;  %v3681_v52 = vpop.f32.mrf.mxu1 }
 0x290   :  { %v3682_v7 = vadd.f32 %v3681_v52, %v3680_v58  ;;  %v3745_v13 = vpop.f32.mrf.mxu0 }
 0x291   :  { %v3746_v5 = vadd.f32 %v3745_v13, %v3744_v55  ;;  %v3683_v50 = vpop.f32.mrf.mxu1 }
 0x292   :  { %v3747_v30 = vpop.f32.mrf.mxu0 }
 0x293   :  { %v5692_v1 = vadd.f32 %v3746_v5, %v3682_v7  ;;  %v3684_v34 = vpop.f32.mrf.mxu1 }
 0x294   :  { %v3685_v31 = vadd.f32 %v3684_v34, %v3683_v50  ;;  %v3748_v53 = vpop.f32.mrf.mxu0 }
 0x295   :  { %v3749_v37 = vadd.f32 %v3748_v53, %v3747_v30  ;;  %v3686_v46 = vpop.f32.mrf.mxu1 }
 0x296   :  { %v3750_v38 = vpop.f32.mrf.mxu0 }
 0x297   :  { %v5694_v23 = vadd.f32 %v3749_v37, %v3685_v31  ;;  %v3687_v6 = vpop.f32.mrf.mxu1 }
 0x298   :  { %v3688_v47 = vadd.f32 %v3687_v6, %v3686_v46  ;;  %v3751_v42 = vpop.f32.mrf.mxu0 }
 0x299   :  { %v3752_v26 = vadd.f32 %v3751_v42, %v3750_v38  ;;  %v3689_v49 = vpop.f32.mrf.mxu1 }
 0x29a   :  { %v3753_v39 = vpop.f32.mrf.mxu0 }
 0x29b   :  { %v5696_v32 = vadd.f32 %v3752_v26, %v3688_v47  ;;  %v3690_v60 = vpop.f32.mrf.mxu1 }
 0x29c   :  { %v3691_v9 = vadd.f32 %v3690_v60, %v3689_v49  ;;  %v3754_v59 = vpop.f32.mrf.mxu0 }
 0x29d   :  { %v3755_v45 = vadd.f32 %v3754_v59, %v3753_v39  ;;  %v3692_v22 = vpop.f32.mrf.mxu1 }
 0x29e   :  { %v3756_v12 = vpop.f32.mrf.mxu0 }
 0x29f   :  { %v5698_v10 = vadd.f32 %v3755_v45, %v3691_v9  ;;  %v3693_v33 = vpop.f32.mrf.mxu1 }
 0x2a0   :  { %v3694_v0 = vadd.f32 %v3693_v33, %v3692_v22  ;;  %v3757_v54 = vpop.f32.mrf.mxu0 }
 0x2a1   :  { %v3758_v11 = vadd.f32 %v3757_v54, %v3756_v12  ;;  %v3695_v28 = vpop.f32.mrf.mxu1 }
 0x2a2   :  { %v3759_v29 = vpop.f32.mrf.mxu0 }
 0x2a3   :  { %v5700_v57 = vadd.f32 %v3758_v11, %v3694_v0  ;;  %v3696_v44 = vpop.f32.mrf.mxu1 }
 0x2a4   :  { %v3697_v14 = vadd.f32 %v3696_v44, %v3695_v28  ;;  %v3760_v43 = vpop.f32.mrf.mxu0 }
 0x2a5   :  { %v3761_v17 = vadd.f32 %v3760_v43, %v3759_v29  ;;  %v3698_v2 = vpop.f32.mrf.mxu1 }
 0x2a6   :  { %v3762_v36 = vpop.f32.mrf.mxu0 }
 0x2a7   :  { %v5702_v56 = vadd.f32 %v3761_v17, %v3697_v14  ;;  %v3699_v35 = vpop.f32.mrf.mxu1 }
 0x2a8   :  { %v3700_v20 = vadd.f32 %v3699_v35, %v3698_v2  ;;  %v3763_v62 = vpop.f32.mrf.mxu0 }
 0x2a9   :  { %v3764_v24 = vadd.f32 %v3763_v62, %v3762_v36  ;;  %v3701_v51 = vpop.f32.mrf.mxu1 }
 0x2aa   :  { %v3765_v21 = vpop.f32.mrf.mxu0 }
 0x2ab   :  { %v5704_v61 = vadd.f32 %v3764_v24, %v3700_v20  ;;  %v3702_v8 = vpop.f32.mrf.mxu1 }
 0x2ac   :  { %v3703_v48 = vadd.f32 %v3702_v8, %v3701_v51  ;;  %v3766_v18 = vpop.f32.mrf.mxu0 }
 0x2ad   :  { %6060 = vst [vmem:[#allocation3_spill] sm:$0xff] %v5704_v61  ;;  %v3767_v16 = vadd.f32 %v3766_v18, %v3765_v21  ;;  %v3704_v19 = vpop.f32.mrf.mxu1 }
 0x2ae   :  { %v3768_v63 = vpop.f32.mrf.mxu0 }
 0x2af   :  { %v5706_v4 = vadd.f32 %v3767_v16, %v3703_v48  ;;  %v3705_v3 = vpop.f32.mrf.mxu1 }
 0x2b0   :  { %v3706_v15 = vadd.f32 %v3705_v3, %v3704_v19  ;;  %v3769_v27 = vpop.f32.mrf.mxu0 }
 0x2b1   :  { %6061 = vst [vmem:[#allocation9_spill] sm:$0xff] %v5706_v4  ;;  %v3770_v58 = vadd.f32 %v3769_v27, %v3768_v63  ;;  %v3707_v55 = vpop.f32.mrf.mxu1 }
 0x2b2   :  { %v3771_v52 = vpop.f32.mrf.mxu0 }
 0x2b3   :  { %v5708_v7 = vadd.f32 %v3770_v58, %v3706_v15  ;;  %v3708_v13 = vpop.f32.mrf.mxu1 }
 0x2b4   :  { %v3709_v5 = vadd.f32 %v3708_v13, %v3707_v55  ;;  %v3772_v50 = vpop.f32.mrf.mxu0 }
 0x2b5   :  { %6062 = vst [vmem:[#allocation10_spill] sm:$0xff] %v5708_v7  ;;  %v3773_v30 = vadd.f32 %v3772_v50, %v3771_v52  ;;  %v3710_v34 = vpop.f32.mrf.mxu1 }
 0x2b6   :  { %v3774_v31 = vpop.f32.mrf.mxu0 }
 0x2b7   :  { %v5710_v53 = vadd.f32 %v3773_v30, %v3709_v5  ;;  %v3711_v37 = vpop.f32.mrf.mxu1 }
 0x2b8   :  { %v3712_v46 = vadd.f32 %v3711_v37, %v3710_v34  ;;  %v3775_v38 = vpop.f32.mrf.mxu0 }
 0x2b9   :  { %6063 = vst [vmem:[#allocation4_spill] sm:$0xff] %v5710_v53  ;;  %v3776_v6 = vadd.f32 %v3775_v38, %v3774_v31  ;;  %v3713_v47 = vpop.f32.mrf.mxu1 }
 0x2ba   :  { %v3777_v42 = vpop.f32.mrf.mxu0 }
 0x2bb   :  { %v5712_v26 = vadd.f32 %v3776_v6, %v3712_v46  ;;  %v3714_v49 = vpop.f32.mrf.mxu1 }
 0x2bc   :  { %v3715_v39 = vadd.f32 %v3714_v49, %v3713_v47  ;;  %v3778_v60 = vpop.f32.mrf.mxu0 }
 0x2bd   :  { %6064 = vst [vmem:[#allocation11_spill] sm:$0xff] %v5712_v26  ;;  %v3779_v9 = vadd.f32 %v3778_v60, %v3777_v42  ;;  %v3716_v59 = vpop.f32.mrf.mxu1 }
 0x2be   :  { %v5714_v45 = vpop.f32.mrf.mxu0 }
 0x2bf   :  { %v5716_v22 = vadd.f32 %v3779_v9, %v3715_v39  ;;  %v3717_v12 = vpop.f32.mrf.mxu1 }
 0x2c0   :  { %v5718_v33 = vadd.f32 %v3717_v12, %v3716_v59  ;;  %v5720_v0 = vpop.f32.mrf.mxu0 }
 0x2c1   :  { %6065 = vst [vmem:[#allocation12_spill] sm:$0xff] %v5716_v22  ;;  %v3799_v54 = vpop.f32.mrf.mxu1 }
 0x2c2   :  { %6066 = vst [vmem:[#allocation5_spill] sm:$0xff] %v5718_v33  ;;  %v3863_v11 = vpop.f32.mrf.mxu0 }
 0x2c3   :  { %v3800_v28 = vpop.f32.mrf.mxu1 }
 0x2c4   :  { %v3801_v29 = vadd.f32 %v3800_v28, %v3799_v54  ;;  %v3864_v44 = vpop.f32.mrf.mxu0 }
 0x2c5   :  { %v3802_v14 = vpop.f32.mrf.mxu1 }
 0x2c6   :  { %v5723_v43 = vadd.f32 %v3801_v29, %v5686_v40  ;;  %v3866_v17 = vpop.f32.mrf.mxu0 }
 0x2c7   :  { %v3803_v2 = vpop.f32.mrf.mxu1 }
 0x2c8   :  { %v3867_v36 = vpop.f32.mrf.mxu0 }
 0x2c9   :  { %v3805_v35 = vpop.f32.mrf.mxu1 }
 0x2ca   :  { %v3869_v20 = vpop.f32.mrf.mxu0 }
 0x2cb   :  { %v3806_v62 = vpop.f32.mrf.mxu1 }
 0x2cc   :  { %v3870_v24 = vpop.f32.mrf.mxu0 }
 0x2cd   :  { %v3808_v51 = vpop.f32.mrf.mxu1 }
 0x2ce   :  { %v3872_v21 = vpop.f32.mrf.mxu0 }
 0x2cf   :  { %v3809_v8 = vpop.f32.mrf.mxu1 }
 0x2d0   :  { %v3873_v48 = vpop.f32.mrf.mxu0  ;;  %v3810_v61 = vadd.f32 %v3809_v8, %v3808_v51 }
 0x2d1   :  { %v3811_v18 = vpop.f32.mrf.mxu1 }
 0x2d2   :  { %v3875_v16 = vpop.f32.mrf.mxu0 }
 0x2d3   :  { %v3812_v19 = vpop.f32.mrf.mxu1 }
 0x2d4   :  { %v3876_v63 = vpop.f32.mrf.mxu0 }
 0x2d5   :  { %v3814_v3 = vpop.f32.mrf.mxu1 }
 0x2d6   :  { %v5725_v15 = vpop.f32.mrf.mxu0 }
 0x2d7   :  { %v3815_v40 = vpop.f32.mrf.mxu1 }
 0x2d8   :  { %v5727_v27 = vpop.f32.mrf.mxu0 }
 0x2d9   :  { %v3817_v58 = vpop.f32.mrf.mxu1 }
 0x2da   :  { %v5729_v55 = vpop.f32.mrf.mxu0 }
 0x2db   :  { %v3818_v52 = vpop.f32.mrf.mxu1 }
 0x2dc   :  { %v5731_v13 = vpop.f32.mrf.mxu0 }
 0x2dd   :  { %v3820_v5 = vpop.f32.mrf.mxu1 }
 0x2de   :  { %v5733_v50 = vpop.f32.mrf.mxu0 }
 0x2df   :  { %v3821_v30 = vpop.f32.mrf.mxu1 }
 0x2e0   :  { %v5735_v34 = vpop.f32.mrf.mxu0  ;;  %v3822_v8 = vadd.f32 %v3821_v30, %v3820_v5 }
 0x2e1   :  { %v3823_v31 = vpop.f32.mrf.mxu1 }
 0x2e2   :  { %v5737_v37 = vpop.f32.mrf.mxu0 }
 0x2e3   :  { %v3824_v46 = vpop.f32.mrf.mxu1 }
 0x2e4   :  { %v5739_v38 = vpop.f32.mrf.mxu0 }
 0x2e5   :  { %v5741_v6 = vpop.f32.mrf.mxu1 }
 0x2e6   :  { %v5743_v47 = vpop.f32.mrf.mxu0 }
 0x2e7   :  { %6067 = vst [vmem:[#allocation13_spill] sm:$0xff] %v5743_v47  ;;  %v5745_v42 = vpop.f32.mrf.mxu1  ;;  %v3807_v47 = vadd.f32 %v3806_v62, %v3805_v35  ;;  %v3816_v62 = vadd.f32 %v3815_v40, %v3814_v3  ;;  %v3889_v3 = vadd.f32 %v5739_v38, %v5737_v37 }
 0x2e8   :  { %v5747_v49 = vpop.f32.mrf.mxu0 }
 0x2e9   :  { %6068 = vst [vmem:[#allocation16_spill] sm:$0xff] %v5747_v49  ;;  %v5749_v39 = vpop.f32.mrf.mxu1 }
 0x2ea   :  { %v5753_v9 = vpop.f32.mrf.mxu0 }
 0x2eb   :  { %v5751_v60 = vpop.f32.mrf.mxu1  ;;  %6069 = vst [vmem:[#allocation6_spill] sm:$0xff] %v5753_v9 }
 0x2ec   :  { %v5759_v54 = vpop.f32.mrf.mxu0 }
 0x2ed   :  { %v5755_v59 = vpop.f32.mrf.mxu1  ;;  %6072 = vst [vmem:[#allocation17_spill] sm:$0xff] %v5759_v54  ;;  %v3804_v54 = vadd.f32 %v3803_v2, %v3802_v14  ;;  %v3877_v2 = vadd.f32 %v3876_v63, %v3875_v16  ;;  %v3782_v63 = vadd.f32 %v5720_v0, %v5714_v45 }
 0x2ee   :  { %6070 = vst [vmem:[#allocation14_spill] sm:$0xff] %v5755_v59  ;;  %v5765_v22 = vpop.f32.mrf.mxu0  ;;  %v3874_v59 = vadd.f32 %v3873_v48, %v3872_v21 }
 0x2ef   :  { %v5757_v12 = vpop.f32.mrf.mxu1  ;;  %6075 = vst [vmem:[#allocation7_spill] sm:$0xff] %v5765_v22  ;;  %v3865_v22 = vadd.f32 %v3864_v44, %v3863_v11  ;;  %v3819_v44 = vadd.f32 %v3818_v52, %v3817_v58 }
 0x2f0   :  { %6071 = vst [vmem:[#allocation15_spill] sm:$0xff] %v5757_v12  ;;  %v5771_v53 = vpop.f32.mrf.mxu0  ;;  %v3868_v12 = vadd.f32 %v3867_v36, %v3866_v17  ;;  %v3825_v36 = vadd.f32 %v3824_v46, %v3823_v31 }
 0x2f1   :  { %v5761_v28 = vpop.f32.mrf.mxu1  ;;  %6078 = vst [vmem:[#allocation21_spill] sm:$0xff] %v5771_v53  ;;  %v2548_v53 = vadd.f32 %v3804_v54, %v5688_v25  ;;  %v2642_v11 = vadd.f32 %v3865_v22, %v5723_v43  ;;  %v3886_v43 = vadd.f32 %v5735_v34, %v5733_v50 }
 0x2f2   :  { %6073 = vst [vmem:[#allocation18_spill] sm:$0xff] %v5761_v28  ;;  %v5777_v4 = vpop.f32.mrf.mxu0 }
 0x2f3   :  { %v5763_v29 = vpop.f32.mrf.mxu1  ;;  %6081 = vst [vmem:[#allocation24_spill] sm:$0xff] %v5777_v4  ;;  %v2556_v4 = vadd.f32 %v3810_v61, %v5692_v1 }
 0x2f4   :  { %6074 = vst [vmem:[#allocation19_spill] sm:$0xff] %v5763_v29  ;;  %v3813_v29 = vadd.f32 %v3812_v19, %v3811_v18 }
 0x2f5   :  { %v5767_v26 = vpop.f32.mrf.mxu1  ;;  %v6082_v37 = vld [vmem:[#allocation14_spill] sm:$0xff] }
 0x2f6   :  { %6076 = vst [vmem:[#allocation8_spill] sm:$0xff] %v5767_v26  ;;  %v5783_v26 = vpop.f32.mrf.mxu0  ;;  %v2561_v14 = vadd.f32 %v3813_v29, %v5694_v23  ;;  %v2564_v23 = vadd.f32 %v3816_v62, %v5696_v32  ;;  %v6087_v62 = vld [vmem:[#allocation13_spill] sm:$0xff] }
 0x2f7   :  { %v5769_v33 = vpop.f32.mrf.mxu1  ;;  %v6083_v46 = vld [vmem:[#allocation15_spill] sm:$0xff] }
 0x2f8   :  { %6077 = vst [vmem:[#allocation20_spill] sm:$0xff] %v5769_v33  ;;  %v5789_v51 = vpop.f32.mrf.mxu0  ;;  %v2658_v61 = vadd.f32 %v3877_v2, %v2561_v14  ;;  %v3834_v38 = vadd.f32 %v6083_v46, %v6082_v37  ;;  %v6086_v2 = vld [vmem:[#allocation3_spill] sm:$0xff] }
 0x2f9   :  { %v5773_v7 = vpop.f32.mrf.mxu1 }
 0x2fa   :  { %6079 = vst [vmem:[#allocation22_spill] sm:$0xff] %v5773_v7  ;;  %v2553_v7 = vadd.f32 %v3807_v47, %v5690_v41  ;;  %v2645_v41 = vadd.f32 %v3868_v12, %v2548_v53  ;;  %v5797_v21 = vpop.f32.mrf.mxu0  ;;  %v3883_v53 = vadd.f32 %v5731_v13, %v5729_v55  ;;  %v3828_v13 = vadd.f32 %v5745_v42, %v5741_v6  ;;  %v6084_v47 = vld [vmem:[#allocation18_spill] sm:$0xff] }
 0x2fb   :  { %v5775_v9 = vpop.f32.mrf.mxu1 }
 0x2fc   :  { %6080 = vst [vmem:[#allocation23_spill] sm:$0xff] %v5775_v9  ;;  %v3871_v9 = vadd.f32 %v3870_v24, %v3869_v20  ;;  %v2653_v20 = vadd.f32 %v3874_v59, %v2556_v4  ;;  %v3880_v24 = vadd.f32 %v5727_v27, %v5725_v15  ;;  %v2572_v4 = vadd.f32 %v3822_v8, %v5700_v57  ;;  %v5822_v40 = vpop.f32.mrf.mxu0  ;;  %v6089_v8 = vld [vmem:[#allocation9_spill] sm:$0xff] }
 0x2fd   :  { %v5779_v49 = vpop.f32.mrf.mxu1  ;;  %v2577_v57 = vadd.f32 %v3825_v36, %v5702_v56  ;;  %v3831_v56 = vadd.f32 %v5751_v60, %v5749_v39 }
 0x2fe   :  { %v2650_v25 = vadd.f32 %v3871_v9, %v2553_v7  ;;  %v2569_v7 = vadd.f32 %v3819_v44, %v5698_v10  ;;  %v2661_v5 = vadd.f32 %v3880_v24, %v2564_v23  ;;  %v2669_v31 = vadd.f32 %v3886_v43, %v2572_v4  ;;  %v6085_v9 = vld [vmem:[#allocation19_spill] sm:$0xff]  ;;  %v3906_v60 = vpop.f32.mrf.mxu0  ;;  %v6094_v43 = vld [vmem:[#allocation21_spill] sm:$0xff] }
 0x2ff   :  { %v5781_v28 = vpop.f32.mrf.mxu1  ;;  %v3837_v59 = vadd.f32 %v6085_v9, %v6084_v47  ;;  %v2674_v39 = vadd.f32 %v3889_v3, %v2577_v57  ;;  %v6093_v4 = vld [vmem:[#allocation7_spill] sm:$0xff] }
 0x300   :  { %v2666_v45 = vadd.f32 %v3883_v53, %v2569_v7  ;;  %v6092_v7 = vld [vmem:[#allocation10_spill] sm:$0xff] }
 0x301   :  { %v3977_v33 = vpop.f32.mrf.mxu1  ;;  %v2588_v53 = vadd.f32 %v3834_v38, %v6092_v7 }
 0x302   :  { %v5799_v48 = vadd.f32 %v3977_v33, %v2650_v25  ;;  %v6090_v25 = vld [vmem:[#allocation6_spill] sm:$0xff] }
 0x303   :  { %v2738_v35 = vpop.f32.mrf.mxu1 }
 0x304   :  { %v5792_v17 = vadd.f32 %v2738_v35, %v2642_v11  ;;  %v2827_v27 = vmul.f32 %v5799_v48, %v5799_v48  ;;  %v2580_v35 = vadd.f32 %v3828_v13, %v6086_v2  ;;  %v6088_v11 = vld [vmem:[#allocation16_spill] sm:$0xff] }
 0x305   :  { %v3978_v18 = vpop.f32.mrf.mxu1  ;;  %v3892_v44 = vadd.f32 %v6088_v11, %v6087_v62 }
 0x306   :  { %v2825_v16 = vmul.f32 %v5792_v17, %v5792_v17  ;;  %v5811_v19 = vadd.f32 %v3978_v18, %v2653_v20  ;;  %v2585_v18 = vadd.f32 %v3831_v56, %v6089_v8  ;;  %v6097_v56 = vld [vmem:[#allocation5_spill] sm:$0xff]  ;;  %v6102_v8 = vld [vmem:[#allocation11_spill] sm:$0xff] }
 0x307   :  { %v2741_v1 = vpop.f32.mrf.mxu1  ;;  %v2677_v9 = vadd.f32 %v3892_v44, %v2580_v35  ;;  %v3904_v35 = vadd.f32 %v5797_v21, %v5789_v51  ;;  %v3907_v44 = vadd.f32 %v3906_v60, %v5822_v40 }
 0x308   :  { %v5801_v22 = vadd.f32 %v2741_v1, %v2645_v41  ;;  %v2828_v50 = vmul.f32 %v5811_v19, %v5811_v19  ;;  %v6091_v41 = vld [vmem:[#allocation17_spill] sm:$0xff] }
 0x309   :  { %v3981_v32 = vpop.f32.mrf.mxu1  ;;  %v3895_v36 = vadd.f32 %v6091_v41, %v6090_v25 }
 0x30a   :  { %v2803_v33 = vadd.f32 %v5801_v22, %v5792_v17  ;;  %v2826_v10 = vmul.f32 %v5801_v22, %v5801_v22  ;;  %v5840_v6 = vadd.f32 %v3981_v32, %v2666_v45  ;;  %v3898_v32 = vadd.f32 %v6094_v43, %v6093_v4 }
 0x30b   :  { %v2754_v15 = vpop.f32.mrf.mxu1  ;;  %v2507_v45 = vadd.f32 %v3782_v63, %v6097_v56  ;;  %v2682_v37 = vadd.f32 %v3895_v36, %v2585_v18 }
 0x30c   :  { %v2804_v58 = vadd.f32 %v2803_v33, %v5799_v48  ;;  %v2841_v55 = vadd.f32 %v2826_v10, %v2825_v16  ;;  %v5827_v52 = vadd.f32 %v2754_v15, %v2658_v61  ;;  %v6095_v16 = vld [vmem:[#allocation4_spill] sm:$0xff]  ;;  %v3908_v15 = vpop.f32.mrf.mxu0  ;;  %v2685_v63 = vadd.f32 %v3898_v32, %v2588_v53 }
 0x30d   :  { %v3982_v0 = vpop.f32.mrf.mxu1  ;;  %v2593_v33 = vadd.f32 %v3837_v59, %v6095_v16  ;;  %v6096_v10 = vld [vmem:[#allocation24_spill] sm:$0xff]  ;;  %v3846_v59 = vadd.f32 %v5781_v28, %v5779_v49 }
 0x30e   :  { %v2842_v30 = vadd.f32 %v2841_v55, %v2827_v27  ;;  %v2805_v34 = vadd.f32 %v2804_v58, %v5811_v19  ;;  %v2829_v54 = vmul.f32 %v5827_v52, %v5827_v52  ;;  %v5853_v61 = vadd.f32 %v3982_v0, %v2669_v31  ;;  %v6098_v0 = vld [vmem:[#allocation8_spill] sm:$0xff] }
 0x30f   :  { %v2757_v42 = vpop.f32.mrf.mxu1  ;;  %v3901_v57 = vadd.f32 %v5783_v26, %v6096_v10  ;;  %v2831_v27 = vmul.f32 %v5840_v6, %v5840_v6  ;;  %v6103_v49 = vld [vmem:[#allocation12_spill] sm:$0xff] }
 0x310   :  { %v2806_v12 = vadd.f32 %v2805_v34, %v5827_v52  ;;  %v2843_v29 = vadd.f32 %v2842_v30, %v2828_v50  ;;  %v5845_v14 = vadd.f32 %v2757_v42, %v2661_v5  ;;  %v6099_v5 = vld [vmem:[#allocation20_spill] sm:$0xff]  ;;  %v6100_v30 = vld [vmem:[#allocation22_spill] sm:$0xff]  ;;  %v6101_v34 = vld [vmem:[#allocation23_spill] sm:$0xff]  ;;  %v2832_v46 = vmul.f32 %v5853_v61, %v5853_v61 }
 0x311   :  { %v3985_v20 = vpop.f32.mrf.mxu1  ;;  %v3840_v50 = vadd.f32 %v6099_v5, %v6098_v0  ;;  %v3843_v31 = vadd.f32 %v6101_v34, %v6100_v30 }
 0x312   :  { %v2844_v1 = vadd.f32 %v2843_v29, %v2829_v54  ;;  %v2807_v23 = vadd.f32 %v2806_v12, %v5845_v14  ;;  %v2830_v24 = vmul.f32 %v5845_v14, %v5845_v14  ;;  %v5879_v42 = vadd.f32 %v3985_v20, %v2682_v37  ;;  %v3909_v54 = vpop.f32.mrf.mxu0 }
 0x313   :  { %v2770_v3 = vpop.f32.mrf.mxu1  ;;  %v2690_v12 = vadd.f32 %v3901_v57, %v2593_v33  ;;  %v2596_v18 = vadd.f32 %v3840_v50, %v6102_v8  ;;  %v2601_v28 = vadd.f32 %v3843_v31, %v6103_v49 }
 0x314   :  { %v2808_v58 = vadd.f32 %v2807_v23, %v5840_v6  ;;  %v2845_v55 = vadd.f32 %v2844_v1, %v2830_v24  ;;  %v5867_v13 = vadd.f32 %v2770_v3, %v2674_v39  ;;  %v2604_v23 = vadd.f32 %v3846_v59, %v2507_v45 }
 0x315   :  { %v3986_v26 = vpop.f32.mrf.mxu1  ;;  %v3910_v24 = vadd.f32 %v3909_v54, %v3908_v15  ;;  %v2835_v53 = vmul.f32 %v5879_v42, %v5879_v42  ;;  %v2698_v40 = vadd.f32 %v3907_v44, %v2601_v28  ;;  %v2693_v33 = vadd.f32 %v3904_v35, %v2596_v18 }
 0x316   :  { %v2846_v38 = vadd.f32 %v2845_v55, %v2831_v27  ;;  %v2809_v47 = vadd.f32 %v2808_v58, %v5853_v61  ;;  %v2833_v2 = vmul.f32 %v5867_v13, %v5867_v13  ;;  %v5891_v36 = vadd.f32 %v3986_v26, %v2685_v63 }
 0x317   :  { %v2773_v39 = vpop.f32.mrf.mxu1  ;;  %v2701_v57 = vadd.f32 %v3910_v24, %v2604_v23 }
 0x318   :  { %v2810_v29 = vadd.f32 %v2809_v47, %v5867_v13  ;;  %v2847_v62 = vadd.f32 %v2846_v38, %v2832_v46  ;;  %v5884_v11 = vadd.f32 %v2773_v39, %v2677_v9  ;;  %v2836_v43 = vmul.f32 %v5891_v36, %v5891_v36 }
 0x319   :  { %v3989_v25 = vpop.f32.mrf.mxu1 }
 0x31a   :  { %v2848_v41 = vadd.f32 %v2847_v62, %v2833_v2  ;;  %v2811_v20 = vadd.f32 %v2810_v29, %v5884_v11  ;;  %v2834_v1 = vmul.f32 %v5884_v11, %v5884_v11  ;;  %v5904_v10 = vadd.f32 %v3989_v25, %v2698_v40 }
 0x31b   :  { %v2786_v7 = vpop.f32.mrf.mxu1 }
 0x31c   :  { %v2812_v51 = vadd.f32 %v2811_v20, %v5879_v42  ;;  %v2849_v21 = vadd.f32 %v2848_v41, %v2834_v1  ;;  %v5899_v4 = vadd.f32 %v2786_v7, %v2690_v12  ;;  %v2839_v50 = vmul.f32 %v5904_v10, %v5904_v10 }
 0x31d   :  { %v3990_v60 = vpop.f32.mrf.mxu1 }
 0x31e   :  { %v2850_v32 = vadd.f32 %v2849_v21, %v2835_v53  ;;  %v2813_v16 = vadd.f32 %v2812_v51, %v5891_v36  ;;  %v2837_v27 = vmul.f32 %v5899_v4, %v5899_v4  ;;  %v5911_v45 = vadd.f32 %v3990_v60, %v2701_v57 }
 0x31f   :  { %v2789_v3 = vpop.f32.mrf.mxu1 }
 0x320   :  { %v2814_v15 = vadd.f32 %v2813_v16, %v5899_v4  ;;  %v2851_v58 = vadd.f32 %v2850_v32, %v2836_v43  ;;  %v5909_v55 = vadd.f32 %v2789_v3, %v2693_v33  ;;  %v2840_v31 = vmul.f32 %v5911_v45, %v5911_v45 }
 0x322   :  { %v2852_v56 = vadd.f32 %v2851_v58, %v2837_v27  ;;  %v2815_v0 = vadd.f32 %v2814_v15, %v5909_v55  ;;  %v2838_v5 = vmul.f32 %v5909_v55, %v5909_v55 }
 0x324   :  { %v2816_v30 = vadd.f32 %v2815_v0, %v5904_v10  ;;  %v2853_v34 = vadd.f32 %v2852_v56, %v2838_v5  ;;  %v3303_v5 = vld [vmem:[%s6022_s6] ss:$0 sm:$0xff] }
 0x326   :  { %v2817_v37 = vadd.f32 %v2816_v30, %v5911_v45  ;;  %v2854_v26 = vadd.f32 %v2853_v34, %v2839_v50 }
 0x328   :  { %v2818_v46 = vrot.slane %v2817_v37, 4  ;;  %v2855_v38 = vadd.f32 %v2854_v26, %v2840_v31 }
 0x32a   :  { %v2819_v47 = vadd.f32 %v2818_v46, %v2817_v37  ;;  %v2856_v9 = vrot.slane %v2855_v38, 4 }
 0x32c   :  { %v2820_v59 = vrot.slane %v2819_v47, 2  ;;  %v2857_v63 = vadd.f32 %v2856_v9, %v2855_v38 }
 0x32e   :  { %v2821_v39 = vadd.f32 %v2820_v59, %v2819_v47  ;;  %v2858_v12 = vrot.slane %v2857_v63, 2 }
 0x330   :  { %v2822_v54 = vrot.slane %v2821_v39, 1  ;;  %v2859_v29 = vadd.f32 %v2858_v12, %v2857_v63 }
 0x332   :  { %v2823_v2 = vadd.f32 %v2822_v54, %v2821_v39  ;;  %v2860_v62 = vrot.slane %v2859_v29, 1 }
 0x334   :  { %v2824_v8 = vmul.f32 0.0078125, %v2823_v2  ;;  %v2861_v18 = vadd.f32 %v2860_v62, %v2859_v29 }
 0x336   :  { %v2862_v35 = vmul.f32 0.0078125, %v2861_v18  ;;  %v2863_v49 = vmul.f32 %v2824_v8, %v2824_v8  ;;  %v2866_v28 = vsub.f32 %v5792_v17, %v2824_v8  ;;  %v2867_v44 = vsub.f32 %v5801_v22, %v2824_v8 }
 0x337   :  { %v2868_v25 = vsub.f32 %v5799_v48, %v2824_v8  ;;  %v2869_v41 = vsub.f32 %v5811_v19, %v2824_v8  ;;  %v2870_v20 = vsub.f32 %v5827_v52, %v2824_v8  ;;  %v2871_v1 = vsub.f32 %v5845_v14, %v2824_v8 }
 0x338   :  { %v2864_v23 = vsub.f32 %v2862_v35, %v2863_v49  ;;  %v2872_v24 = vsub.f32 %v5840_v6, %v2824_v8  ;;  %v2873_v7 = vsub.f32 %v5853_v61, %v2824_v8  ;;  %v2874_v53 = vsub.f32 %v5867_v13, %v2824_v8 }
 0x339   :  { %v2875_v51 = vsub.f32 %v5884_v11, %v2824_v8  ;;  %v2876_v17 = vsub.f32 %v5879_v42, %v2824_v8  ;;  %v2877_v22 = vsub.f32 %v5891_v36, %v2824_v8  ;;  %v2878_v48 = vsub.f32 %v5899_v4, %v2824_v8  ;;  %v3302_v42 = vld [vmem:[%s6021_s5] ss:$0 sm:$0xff] }
 0x33a   :  { %v2865_v19 = vmax.f32 %v2864_v23, 0.0  ;;  %v2879_v52 = vsub.f32 %v5909_v55, %v2824_v8  ;;  %v2880_v14 = vsub.f32 %v5904_v10, %v2824_v8  ;;  %v2881_v21 = vsub.f32 %v5911_v45, %v2824_v8  ;;  %v4141_v23 = vld [vmem:[%s6017_s0 + $0x11] sm:$0xff] }
 0x33c   :  { %v2882_v6 = vadd.f32 1e-05, %v2865_v19  ;;  %v4145_v19 = vld [vmem:[%s6017_s0 + $0x51] sm:$0xff] }
 0x33e   :  { %4138 = vrsqrt.f32 %v2882_v6  ;;  %v4147_v6 = vld [vmem:[%s6017_s0 + $0x71] sm:$0xff] }
 0x34b   :  { %v4139_v61 = vpop.eup %4138 }
 0x34c   :  { %v2884_v40 = vmul.f32 %v4139_v61, %v2866_v28  ;;  %v2885_v13 = vmul.f32 %v4139_v61, %v2867_v44  ;;  %v2886_v60 = vmul.f32 %v4139_v61, %v2868_v25  ;;  %v2887_v11 = vmul.f32 %v4139_v61, %v2869_v41 }
 0x34d   :  { %v2888_v36 = vmul.f32 %v4139_v61, %v2870_v20  ;;  %v2889_v4 = vmul.f32 %v4139_v61, %v2871_v1  ;;  %v2890_v43 = vmul.f32 %v4139_v61, %v2872_v24  ;;  %v2891_v32 = vmul.f32 %v4139_v61, %v2873_v7  ;;  %v4142_v7 = vld [vmem:[%s6017_s0 + $0x21] sm:$0xff] }
 0x34e   :  { %v2892_v16 = vmul.f32 %v4139_v61, %v2874_v53  ;;  %v2893_v33 = vmul.f32 %v4139_v61, %v2875_v51  ;;  %v2894_v10 = vmul.f32 %v4139_v61, %v2876_v17  ;;  %v2895_v57 = vmul.f32 %v4139_v61, %v2877_v22  ;;  %v4143_v51 = vld [vmem:[%s6017_s0 + $0x31] sm:$0xff]  ;;  %v4144_v22 = vld [vmem:[%s6017_s0 + $0x41] sm:$0xff] }
 0x34f   :  { %v2896_v3 = vmul.f32 %v4139_v61, %v2878_v48  ;;  %v2897_v15 = vmul.f32 %v4139_v61, %v2879_v52  ;;  %v2898_v27 = vmul.f32 %v4139_v61, %v2880_v14  ;;  %v2899_v58 = vmul.f32 %v4139_v61, %v2881_v21  ;;  %v4146_v14 = vld [vmem:[%s6017_s0 + $0x61] sm:$0xff] }
 0x350   :  { %v2906_v55 = vmul.f32 %v3302_v42, %v2884_v40  ;;  %v2907_v56 = vmul.f32 %v3302_v42, %v2885_v13  ;;  %v2908_v45 = vmul.f32 %v3302_v42, %v2886_v60  ;;  %v2909_v0 = vmul.f32 %v3302_v42, %v2887_v11  ;;  %v4148_v40 = vld [vmem:[%s6017_s0 + $0x81] sm:$0xff]  ;;  %v4149_v60 = vld [vmem:[%s6017_s0 + $0xb1] sm:$0xff] }
 0x351   :  { %v2910_v50 = vmul.f32 %v3302_v42, %v2888_v36  ;;  %v2911_v30 = vmul.f32 %v3302_v42, %v2889_v4  ;;  %v2912_v34 = vmul.f32 %v3302_v42, %v2890_v43  ;;  %v2913_v31 = vmul.f32 %v3302_v42, %v2891_v32  ;;  %v4151_v4 = vld [vmem:[%s6017_s0 + $0xd1] sm:$0xff]  ;;  %v4152_v32 = vld [vmem:[%s6017_s0 + $0xe1] sm:$0xff] }
 0x352   :  { %v2914_v37 = vmul.f32 %v3302_v42, %v2892_v16  ;;  %v2915_v26 = vmul.f32 %v3302_v42, %v2893_v33  ;;  %v2916_v46 = vmul.f32 %v3302_v42, %v2894_v10  ;;  %v2917_v38 = vmul.f32 %v3302_v42, %v2895_v57  ;;  %v4153_v33 = vld [vmem:[%s6017_s0 + $0xf1] sm:$0xff]  ;;  %v4154_v57 = vld [vmem:[%s6017_s0 + $0x101] sm:$0xff] }
 0x353   :  { %v2918_v47 = vmul.f32 %v3302_v42, %v2896_v3  ;;  %v2919_v9 = vmul.f32 %v3302_v42, %v2897_v15  ;;  %v2920_v59 = vmul.f32 %v3302_v42, %v2898_v27  ;;  %v2921_v63 = vmul.f32 %v3302_v42, %v2899_v58  ;;  %v4150_v42 = vld [vmem:[%s6017_s0 + $0xc1] sm:$0xff]  ;;  %v4155_v15 = vld [vmem:[%s6017_s0 + $0x111] sm:$0xff] }
 0x354   :  { %v2928_v39 = vadd.f32 %v3303_v5, %v2906_v55  ;;  %v2929_v12 = vadd.f32 %v3303_v5, %v2907_v56  ;;  %v2930_v54 = vadd.f32 %v3303_v5, %v2908_v45  ;;  %v2931_v29 = vadd.f32 %v3303_v5, %v2909_v0  ;;  %v4156_v58 = vld [vmem:[%s6017_s0 + $0x121] sm:$0xff] }
 0x355   :  { %v2932_v2 = vadd.f32 %v3303_v5, %v2910_v50  ;;  %v2933_v62 = vadd.f32 %v3303_v5, %v2911_v30  ;;  %v2934_v8 = vadd.f32 %v3303_v5, %v2912_v34  ;;  %v2935_v18 = vadd.f32 %v3303_v5, %v2913_v31 }
 0x356   :  { %v2936_v35 = vadd.f32 %v3303_v5, %v2914_v37  ;;  %v2937_v49 = vadd.f32 %v3303_v5, %v2915_v26  ;;  %v2938_v28 = vadd.f32 %v3303_v5, %v2916_v46  ;;  %v2939_v44 = vadd.f32 %v3303_v5, %v2917_v38 }
 0x357   :  { %v2940_v25 = vadd.f32 %v3303_v5, %v2918_v47  ;;  %v2941_v41 = vadd.f32 %v3303_v5, %v2919_v9  ;;  %v2942_v20 = vadd.f32 %v3303_v5, %v2920_v59  ;;  %v2943_v1 = vadd.f32 %v3303_v5, %v2921_v63 }
 0x358   :  { %v2944_v24 = vadd.f32 %v4141_v23, %v2928_v39  ;;  %v2945_v53 = vadd.f32 %v4142_v7, %v2929_v12  ;;  %v2946_v17 = vadd.f32 %v4143_v51, %v2930_v54  ;;  %v2947_v48 = vadd.f32 %v4144_v22, %v2931_v29 }
 0x359   :  { %v2948_v52 = vadd.f32 %v4145_v19, %v2932_v2  ;;  %v2949_v21 = vadd.f32 %v4146_v14, %v2933_v62  ;;  %v2950_v61 = vadd.f32 %v4147_v6, %v2934_v8  ;;  %v2951_v13 = vadd.f32 %v4148_v40, %v2935_v18 }
 0x35a   :  { %v2952_v11 = vadd.f32 %v4149_v60, %v2936_v35  ;;  %v2953_v36 = vadd.f32 %v4150_v42, %v2937_v49  ;;  %v2954_v43 = vadd.f32 %v4151_v4, %v2938_v28  ;;  %v2955_v16 = vadd.f32 %v4152_v32, %v2939_v44 }
 0x35b   :  { %v2956_v10 = vadd.f32 %v4153_v33, %v2940_v25  ;;  %v2957_v3 = vadd.f32 %v4154_v57, %v2941_v41  ;;  %v2958_v27 = vadd.f32 %v4155_v15, %v2942_v20  ;;  %v2959_v55 = vadd.f32 %v4156_v58, %v2943_v1 }
 0x35c   :  { %v2960_v56 = vmax.f32 %v2944_v24, 0.0  ;;  %v2961_v45 = vmax.f32 %v2945_v53, 0.0  ;;  %v2962_v0 = vmax.f32 %v2946_v17, 0.0  ;;  %v2963_v5 = vmax.f32 %v2947_v48, 0.0 }
 0x35d   :  { %v2964_v50 = vmax.f32 %v2948_v52, 0.0  ;;  %v2965_v30 = vmax.f32 %v2949_v21, 0.0  ;;  %v2966_v34 = vmax.f32 %v2950_v61, 0.0  ;;  %v2967_v31 = vmax.f32 %v2951_v13, 0.0 }
 0x35e   :  { %v2968_v37 = vmax.f32 %v2952_v11, 0.0  ;;  %v2969_v26 = vmax.f32 %v2953_v36, 0.0  ;;  %v2970_v46 = vmax.f32 %v2954_v43, 0.0  ;;  %v2971_v38 = vmax.f32 %v2955_v16, 0.0 }
 0x35f   :  { %v2972_v47 = vmax.f32 %v2956_v10, 0.0  ;;  %v2973_v9 = vmax.f32 %v2957_v3, 0.0  ;;  %v2974_v59 = vmax.f32 %v2958_v27, 0.0  ;;  %v2975_v63 = vmax.f32 %v2959_v55, 0.0 }
 0x360   :  { %v3339_v39 = vpack.c.bf16 %v2961_v45, %v2960_v56  ;;  %v3344_v12 = vpack.c.bf16 %v2963_v5, %v2962_v0  ;;  %v3349_v54 = vpack.c.bf16 %v2965_v30, %v2964_v50  ;;  %v3354_v29 = vpack.c.bf16 %v2967_v31, %v2966_v34 }
 0x361   :  { %v3359_v2 = vpack.c.bf16 %v2969_v26, %v2968_v37  ;;  %v3364_v62 = vpack.c.bf16 %v2971_v38, %v2970_v46  ;;  %v3369_v8 = vpack.c.bf16 %v2973_v9, %v2972_v47  ;;  %v3374_v18 = vpack.c.bf16 %v2975_v63, %v2974_v59 }
 0x362   :  { %3340 = vst [vmem:[%s6023_s7] sm:$0xff] %v3339_v39   ;;  %3376 = vst [vmem:[%s6023_s7 + $0x8] sm:$0xff] %v3344_v12  }
 0x363   :  { %3377 = vst [vmem:[%s6023_s7 + $0x10] sm:$0xff] %v3349_v54   ;;  %3378 = vst [vmem:[%s6023_s7 + $0x18] sm:$0xff] %v3354_v29  }
 0x364   :  { %3379 = vst [vmem:[%s6023_s7 + $0x20] sm:$0xff] %v3359_v2   ;;  %3380 = vst [vmem:[%s6023_s7 + $0x28] sm:$0xff] %v3364_v62  }
 0x365   :  { %3381 = vst [vmem:[%s6023_s7 + $0x30] sm:$0xff] %v3369_v8   ;;  %3382 = vst [vmem:[%s6023_s7 + $0x38] sm:$0xff] %v3374_v18  }

// kernel: res18_conv_layer.2
= control target key start
LH: loop header
LB: loop body
LE: loop exit
PB: predicated region body
PF: predicated region fallthrough
CT: control target
= control target key end

     0   :  { %s6851_s4 = inlined_call_operand.vmem [shape: bf16[1152,128], index: 4, kind: input, shape index: {}]   ;;  %s6852_s1 = inlined_call_operand.vmem [shape: f32[2,9,9,128], index: 1, kind: input, shape index: {}]   ;;  %s6853_s2 = inlined_call_operand.vmem [shape: f32[2,9,9,128], index: 2, kind: input, shape index: {}]   ;;  %s6854_s0 = inlined_call_operand.vmem [shape: f32[2,9,9,128], index: 0, kind: input, shape index: {}]   ;;  %s6855_s3 = inlined_call_operand.vmem [shape: f32[2,9,9,128], index: 3, kind: input, shape index: {}]   ;;  %s6856_s5 = inlined_call_operand.vmem [shape: bf16[128,128], index: 5, kind: input, shape index: {}]   ;;  %s6857_s6 = inlined_call_operand.vmem [shape: bf16[1152,128], index: 6, kind: input, shape index: {}]   ;;  %s6858_s7 = inlined_call_operand.vmem [shape: f32[1,128], index: 7, kind: input, shape index: {}]   ;;  %s6859_s8 = inlined_call_operand.vmem [shape: f32[1,128], index: 8, kind: input, shape index: {}]   ;;  %s6860_s9 = inlined_call_operand.vmem [shape: f32[1,128], index: 9, kind: input, shape index: {}]   ;;  %s6861_s10 = inlined_call_operand.vmem [shape: f32[1,128], index: 10, kind: input, shape index: {}]   ;;  %s6862_s11 = inlined_call_operand.vmem [shape: f32[1,128], index: 11, kind: input, shape index: {}]   ;;  %s6863_s12 = inlined_call_operand.vmem [shape: f32[1,128], index: 12, kind: input, shape index: {}]   ;;  %s6864_s13 = inlined_call_operand.vmem [shape: bf16[128,128], index: 13, kind: output, shape index: {}]  }
   0x1   :  { %v4340_v0 = vld [vmem:[%s6851_s4 + $0x78] sm:$0xff]   ;;  %v4344_v4 = vld [vmem:[%s6851_s4 + $0x70] sm:$0xff]   ;;  %v4348_v8 = vld [vmem:[%s6851_s4 + $0x68] sm:$0xff]  }
   0x2   :  { %v4341_v1 = vld [vmem:[%s6851_s4 + $0xf8] sm:$0xff]   ;;  %3667 = vmatprep.subr.bf16.mxu0 %v4340_v0  ;;  %v4345_v5 = vld [vmem:[%s6851_s4 + $0xf0] sm:$0xff]   ;;  %v4349_v9 = vld [vmem:[%s6851_s4 + $0xe8] sm:$0xff]  }
   0x3   :  { %v4342_v2 = vld [vmem:[%s6851_s4 + $0x38] sm:$0xff]   ;;  %3731 = vmatprep.subr.bf16.mxu1 %v4341_v1  ;;  %v4346_v6 = vld [vmem:[%s6851_s4 + $0x30] sm:$0xff]   ;;  %v4350_v10 = vld [vmem:[%s6851_s4 + $0x28] sm:$0xff]  }
   0x4   :  { %v4343_v3 = vld [vmem:[%s6851_s4 + $0xb8] sm:$0xff]   ;;  %3668 = vmatpush3.bf16.msra.mxu0 %v4342_v2  ;;  %v4347_v7 = vld [vmem:[%s6851_s4 + $0xb0] sm:$0xff]   ;;  %v4351_v11 = vld [vmem:[%s6851_s4 + $0xa8] sm:$0xff]  }
   0x5   :  { %3732 = vmatpush3.bf16.msra.mxu1 %v4343_v3  ;;  %3669 = vmatprep.subr.bf16.mxu0 %v4344_v4  ;;  %v4352_v12 = vld [vmem:[%s6851_s4 + $0x60] sm:$0xff]   ;;  %v4356_v16 = vld [vmem:[%s6851_s4 + $0x58] sm:$0xff]   ;;  %v4360_v20 = vld [vmem:[%s6851_s4 + $0x50] sm:$0xff]  }
   0x6   :  { %3733 = vmatprep.subr.bf16.mxu1 %v4345_v5  ;;  %v4353_v13 = vld [vmem:[%s6851_s4 + $0xe0] sm:$0xff]   ;;  %v4357_v17 = vld [vmem:[%s6851_s4 + $0xd8] sm:$0xff]   ;;  %v4361_v21 = vld [vmem:[%s6851_s4 + $0xd0] sm:$0xff]  }
   0x7   :  { %v4354_v14 = vld [vmem:[%s6851_s4 + $0x20] sm:$0xff]   ;;  %v4358_v18 = vld [vmem:[%s6851_s4 + $0x18] sm:$0xff]   ;;  %v4362_v22 = vld [vmem:[%s6851_s4 + $0x10] sm:$0xff]  }
   0x8   :  { %3670 = vmatpush3.bf16.msra.mxu0 %v4346_v6  ;;  %v4355_v15 = vld [vmem:[%s6851_s4 + $0xa0] sm:$0xff]   ;;  %v4359_v19 = vld [vmem:[%s6851_s4 + $0x98] sm:$0xff]   ;;  %v4363_v23 = vld [vmem:[%s6851_s4 + $0x90] sm:$0xff]  }
   0x9   :  { %3734 = vmatpush3.bf16.msra.mxu1 %v4347_v7  ;;  %3671 = vmatprep.subr.bf16.mxu0 %v4348_v8  ;;  %v4364_v24 = vld [vmem:[%s6851_s4 + $0x48] sm:$0xff]   ;;  %v4368_v28 = vld [vmem:[%s6851_s4 + $0x40] sm:$0xff]   ;;  %v4672_v33 = vld [vmem:[%s6852_s1 + $0x10] sm:$0xff] }
   0xa   :  { %3735 = vmatprep.subr.bf16.mxu1 %v4349_v9  ;;  %v4365_v25 = vld [vmem:[%s6851_s4 + $0xc8] sm:$0xff]   ;;  %v4369_v29 = vld [vmem:[%s6851_s4 + $0xc0] sm:$0xff]   ;;  %v118_v36 = vld [vmem:[%s6853_s2 + $0x10] sm:$0xff] }
   0xb   :  { %v4366_v26 = vld [vmem:[%s6851_s4 + $0x8] sm:$0xff]   ;;  %v4370_v30 = vld [vmem:[%s6851_s4] sm:$0xff]   ;;  %v4687_v38 = vld [vmem:[%s6854_s0 + $0x10] sm:$0xff] }
   0xc   :  { %3672 = vmatpush3.bf16.msra.mxu0 %v4350_v10  ;;  %v4367_v27 = vld [vmem:[%s6851_s4 + $0x88] sm:$0xff]   ;;  %v4371_v31 = vld [vmem:[%s6851_s4 + $0x80] sm:$0xff]   ;;  %v4696_v42 = vld [vmem:[%s6854_s0 + $0x11] sm:$0xff] }
   0xd   :  { %3736 = vmatpush3.bf16.msra.mxu1 %v4351_v11  ;;  %3673 = vmatprep.subr.bf16.mxu0 %v4352_v12  ;;  %v69_v32 = vld [vmem:[%s6852_s1] sm:$0xff]  ;;  %v4372_v44 = vld [vmem:[%s6851_s4 + $0x178] sm:$0xff]   ;;  %v4713_v47 = vld [vmem:[%s6852_s1 + $0x30] sm:$0xff] }
   0xe   :  { %3737 = vmatprep.subr.bf16.mxu1 %v4353_v13  ;;  %v117_v34 = vld [vmem:[%s6853_s2] sm:$0xff]  ;;  %v85_v35 = vpack.c.bf16 %v4672_v33, %v69_v32  ;;  %v4373_v45 = vld [vmem:[%s6851_s4 + $0x138] sm:$0xff]   ;;  %v120_v49 = vld [vmem:[%s6853_s2 + $0x30] sm:$0xff] }
   0xf   :  { %v45_v37 = vld [vmem:[%s6854_s0] sm:$0xff]  ;;  %v133_v39 = vpack.c.bf16 %v118_v36, %v117_v34  ;;  %v4731_v53 = vld [vmem:[%s6854_s0 + $0x30] sm:$0xff]  ;;  %v4376_v6 = vld [vmem:[%s6851_s4 + $0x168] sm:$0xff]  }
  0x10   :  { %3674 = vmatpush3.bf16.msra.mxu0 %v4354_v14  ;;  %v61_v40 = vpack.c.bf16 %v4687_v38, %v45_v37  ;;  %v93_v41 = vld [vmem:[%s6854_s0 + $0x1] sm:$0xff]  ;;  %871 = vmatprep.mubr.bf16.mxu0 %v85_v35  ;;  %v4741_v55 = vld [vmem:[%s6854_s0 + $0x31] sm:$0xff] }
  0x11   :  { %3738 = vmatpush3.bf16.msra.mxu1 %v4355_v15  ;;  %3675 = vmatprep.subr.bf16.mxu0 %v4356_v16  ;;  %v109_v43 = vpack.c.bf16 %v4696_v42, %v93_v41  ;;  %v4708_v46 = vld [vmem:[%s6852_s1 + $0x20] sm:$0xff]  ;;  %v4374_v58 = vld [vmem:[%s6851_s4 + $0x170] sm:$0xff]   ;;  %v4377_v8 = vld [vmem:[%s6851_s4 + $0x128] sm:$0xff]  }
  0x12   :  { %3739 = vmatprep.subr.bf16.mxu1 %v4357_v17  ;;  %968 = vmatprep.mubr.bf16.mxu1 %v133_v39  ;;  %v119_v48 = vld [vmem:[%s6853_s2 + $0x20] sm:$0xff]  ;;  %v86_v50 = vpack.c.bf16 %v4713_v47, %v4708_v46  ;;  %v4375_v60 = vld [vmem:[%s6851_s4 + $0x130] sm:$0xff]   ;;  %v4382_v32 = vld [vmem:[%s6851_s4 + $0x118] sm:$0xff]  }
  0x13   :  { %v134_v51 = vpack.c.bf16 %v120_v49, %v119_v48  ;;  %v4726_v52 = vld [vmem:[%s6854_s0 + $0x20] sm:$0xff]  ;;  %v4763_v62 = vld [vmem:[%s6852_s1 + $0x50] sm:$0xff]  ;;  %v4383_v36 = vld [vmem:[%s6851_s4 + $0x1b8] sm:$0xff]  }
  0x14   :  { %3676 = vmatpush3.bf16.msra.mxu0 %v4358_v18  ;;  %v4736_v54 = vld [vmem:[%s6854_s0 + $0x21] sm:$0xff]  ;;  %v62_v57 = vpack.c.bf16 %v4731_v53, %v4726_v52  ;;  %v122_v1 = vld [vmem:[%s6853_s2 + $0x50] sm:$0xff] }
  0x15   :  { %3740 = vmatpush3.bf16.msra.mxu1 %v4359_v19  ;;  %3677 = vmatprep.subr.bf16.mxu0 %v4360_v20  ;;  %v255_v56 = vpack.c.bf16 %v4736_v54, %v4696_v42  ;;  %v110_v59 = vpack.c.bf16 %v4741_v55, %v4736_v54  ;;  %v4758_v61 = vld [vmem:[%s6852_s1 + $0x40] sm:$0xff]  ;;  %v4781_v4 = vld [vmem:[%s6854_s0 + $0x50] sm:$0xff] }
  0x16   :  { %3741 = vmatprep.subr.bf16.mxu1 %v4361_v21  ;;  %v87_v63 = vpack.c.bf16 %v4763_v62, %v4758_v61  ;;  %v121_v0 = vld [vmem:[%s6853_s2 + $0x40] sm:$0xff]  ;;  %v4799_v9 = vld [vmem:[%s6854_s0 + $0x51] sm:$0xff] }
  0x17   :  { %v135_v2 = vpack.c.bf16 %v122_v1, %v121_v0  ;;  %v4776_v3 = vld [vmem:[%s6854_s0 + $0x40] sm:$0xff]  ;;  %v4809_v11 = vld [vmem:[%s6852_s1 + $0x70] sm:$0xff]  ;;  %v4388_v0 = vld [vmem:[%s6851_s4 + $0x1e8] sm:$0xff]  }
  0x18   :  { %3678 = vmatpush3.bf16.msra.mxu0 %v4362_v22  ;;  %v4786_v5 = vld [vmem:[%s6854_s0 + $0x41] sm:$0xff]  ;;  %v124_v13 = vld [vmem:[%s6853_s2 + $0x70] sm:$0xff]  ;;  %v63_v14 = vpack.c.bf16 %v4781_v4, %v4776_v3 }
  0x19   :  { %3742 = vmatpush3.bf16.msra.mxu1 %v4363_v23  ;;  %3679 = vmatprep.subr.bf16.mxu0 %v4364_v24  ;;  %v256_v7 = vpack.c.bf16 %v4786_v5, %v4741_v55  ;;  %v4804_v10 = vld [vmem:[%s6852_s1 + $0x60] sm:$0xff]  ;;  %v111_v16 = vpack.c.bf16 %v4799_v9, %v4786_v5  ;;  %v4844_v23 = vld [vmem:[%s6854_s0 + $0x70] sm:$0xff]  ;;  %v4412_v55 = vld [vmem:[%s6856_s5 + $0x38] sm:$0xff]  }
  0x1a   :  { %3743 = vmatprep.subr.bf16.mxu1 %v4365_v25  ;;  %v123_v12 = vld [vmem:[%s6853_s2 + $0x60] sm:$0xff]  ;;  %v88_v17 = vpack.c.bf16 %v4809_v11, %v4804_v10  ;;  %v4849_v24 = vld [vmem:[%s6854_s0 + $0x71] sm:$0xff]  ;;  %v4414_v5 = vld [vmem:[%s6856_s5 + $0x28] sm:$0xff]  }
  0x1b   :  { %v4822_v15 = vld [vmem:[%s6854_s0 + $0x61] sm:$0xff]  ;;  %v136_v20 = vpack.c.bf16 %v124_v13, %v123_v12  ;;  %v77_v25 = vld [vmem:[%s6852_s1 + $0x90] sm:$0xff] }
  0x1c   :  { %3680 = vmatpush3.bf16.msra.mxu0 %v4366_v26  ;;  %v4378_v18 = vld [vmem:[%s6851_s4 + $0x160] sm:$0xff]   ;;  %v257_v19 = vpack.c.bf16 %v4822_v15, %v4799_v9  ;;  %v112_v34 = vpack.c.bf16 %v4849_v24, %v4822_v15  ;;  %v4384_v39 = vld [vmem:[%s6851_s4 + $0x1f0] sm:$0xff]   ;;  %v4416_v9 = vld [vmem:[%s6856_s5 + $0x18] sm:$0xff]  }
  0x1d   :  { %3744 = vmatpush3.bf16.msra.mxu1 %v4367_v27  ;;  %3681 = vmatprep.subr.bf16.mxu0 %v4368_v28  ;;  %v4379_v21 = vld [vmem:[%s6851_s4 + $0x120] sm:$0xff]   ;;  %v125_v27 = vld [vmem:[%s6853_s2 + $0x90] sm:$0xff] }
  0x1e   :  { %3745 = vmatprep.subr.bf16.mxu1 %v4369_v29  ;;  %v4839_v22 = vld [vmem:[%s6854_s0 + $0x60] sm:$0xff]  ;;  %v4380_v29 = vld [vmem:[%s6851_s4 + $0x158] sm:$0xff]   ;;  %v4385_v49 = vld [vmem:[%s6851_s4 + $0x1b0] sm:$0xff]  }
  0x1f   :  { %v4857_v26 = vld [vmem:[%s6852_s1 + $0xa0] sm:$0xff]  ;;  %v4949_v13 = vld [vmem:[%s6854_s0 + $0xb0] sm:$0xff] }
  0x20   :  { %3682 = vmatpush3.bf16.msra.mxu0 %v4370_v30  ;;  %v126_v28 = vld [vmem:[%s6853_s2 + $0xa0] sm:$0xff]  ;;  %v4381_v30 = vld [vmem:[%s6851_s4 + $0x1f8] sm:$0xff]   ;;  %v89_v35 = vpack.c.bf16 %v4857_v26, %v77_v25  ;;  %v4417_v15 = vld [vmem:[%s6856_s5 + $0x10] sm:$0xff]  }
  0x21   :  { %3746 = vmatpush3.bf16.msra.mxu1 %v4371_v31  ;;  %3795 = vmatprep.subr.bf16.mxu0 %v4372_v44  ;;  %v64_v31 = vpack.c.bf16 %v4844_v23, %v4839_v22  ;;  %v137_v37 = vpack.c.bf16 %v126_v28, %v125_v27  ;;  %v4891_v41 = vld [vmem:[%s6854_s0 + $0xa0] sm:$0xff]  ;;  %v101_v44 = vld [vmem:[%s6854_s0 + $0x91] sm:$0xff]  ;;  %v4392_v28 = vld [vmem:[%s6851_s4 + $0x148] sm:$0xff]  }
  0x22   :  { %3859 = vmatprep.subr.bf16.mxu1 %v4381_v30  ;;  %v4909_v48 = vld [vmem:[%s6852_s1 + $0xc0] sm:$0xff]  ;;  %v4983_v27 = vld [vmem:[%s6854_s0 + $0xd1] sm:$0xff] }
  0x23   :  { %872 = vmatmul.mubr.bf16.vlgmr.msra.gmra.mxu0 %v61_v40  ;;  %v53_v40 = vld [vmem:[%s6854_s0 + $0x90] sm:$0xff]  ;;  %v4390_v12 = vld [vmem:[%s6851_s4 + $0x1e0] sm:$0xff]  }
  0x24   :  { %969 = vmatmul.mubr.bf16.vlgmr.msra.gmra.mxu1 %v109_v43  ;;  %3796 = vmatpush3.bf16.msra.mxu0 %v4373_v45  ;;  %v4896_v43 = vld [vmem:[%s6854_s0 + $0xa1] sm:$0xff]  ;;  %v4904_v45 = vld [vmem:[%s6852_s1 + $0xb0] sm:$0xff] }
  0x25   :  { %879 = vmatprep.mubr.bf16.mxu0 %v86_v50  ;;  %976 = vmatprep.mubr.bf16.mxu1 %v134_v51  ;;  %v127_v50 = vld [vmem:[%s6853_s2 + $0xb0] sm:$0xff]  ;;  %v128_v51 = vld [vmem:[%s6853_s2 + $0xc0] sm:$0xff]  ;;  %v113_v1 = vpack.c.bf16 %v4896_v43, %v101_v44 }
  0x26   :  { %3797 = vmatprep.subr.bf16.mxu0 %v4374_v58  ;;  %3860 = vmatpush3.bf16.msra.mxu1 %v4383_v36  ;;  %v4386_v58 = vld [vmem:[%s6851_s4 + $0x150] sm:$0xff]   ;;  %v130_v25 = vld [vmem:[%s6853_s2 + $0xe0] sm:$0xff] }
  0x27   :  { %3861 = vmatprep.subr.bf16.mxu1 %v4384_v39  ;;  %v5008_v39 = vld [vmem:[%s6854_s0 + $0xd0] sm:$0xff]  ;;  %v5016_v44 = vld [vmem:[%s6854_s0 + $0xe0] sm:$0xff] }
  0x28   :  { %3798 = vmatpush3.bf16.msra.mxu0 %v4375_v60  ;;  %v4387_v60 = vld [vmem:[%s6851_s4 + $0x110] sm:$0xff]  }
  0x29   :  { %3799 = vmatprep.subr.bf16.mxu0 %v4376_v6  ;;  %v4389_v6 = vld [vmem:[%s6851_s4 + $0x1a8] sm:$0xff]   ;;  %v3429_v42 = vld [vmem:[%s6854_s0 + $0x111] sm:$0xff] }
  0x2a   :  { %3862 = vmatpush3.bf16.msra.mxu1 %v4385_v49  ;;  %v5021_v49 = vld [vmem:[%s6854_s0 + $0xe1] sm:$0xff] }
  0x2b   :  { %880 = vmatmul.mubr.bf16.gmra.mxu0 %v62_v57  ;;  %v4923_v57 = vld [vmem:[%s6854_s0 + $0xb1] sm:$0xff]  ;;  %3863 = vmatprep.subr.bf16.mxu1 %v4388_v0  ;;  %v132_v0 = vld [vmem:[%s6853_s2 + $0x100] sm:$0xff] }
  0x2c   :  { %977 = vmatmul.mubr.bf16.gmra.mxu1 %v110_v59  ;;  %887 = vmatprep.mubr.bf16.mxu0 %v87_v63  ;;  %v259_v59 = vpack.c.bf16 %v4923_v57, %v4896_v43  ;;  %v65_v63 = vpack.c.bf16 %v4891_v41, %v53_v40  ;;  %v4396_v40 = vld [vmem:[%s6851_s4 + $0x1d0] sm:$0xff]  }
  0x2d   :  { %984 = vmatprep.mubr.bf16.mxu1 %v135_v2  ;;  %3800 = vmatpush3.bf16.msra.mxu0 %v4377_v8  ;;  %v90_v2 = vpack.c.bf16 %v4909_v48, %v4904_v45  ;;  %v138_v8 = vpack.c.bf16 %v128_v51, %v127_v50  ;;  %v5026_v50 = vld [vmem:[%s6852_s1 + $0xf0] sm:$0xff] }
  0x2e   :  { %3801 = vmatprep.subr.bf16.mxu0 %v4378_v18  ;;  %3864 = vmatpush3.bf16.msra.mxu1 %v4389_v6  ;;  %v4969_v18 = vld [vmem:[%s6852_s1 + $0xe0] sm:$0xff]  ;;  %v4397_v51 = vld [vmem:[%s6851_s4 + $0x190] sm:$0xff]  }
  0x2f   :  { %3865 = vmatprep.subr.bf16.mxu1 %v4390_v12  ;;  %v4398_v6 = vld [vmem:[%s6851_s4 + $0x140] sm:$0xff]  }
  0x31   :  { %3802 = vmatpush3.bf16.msra.mxu0 %v4379_v21  ;;  %v4391_v21 = vld [vmem:[%s6851_s4 + $0x1a0] sm:$0xff]  }
  0x32   :  { %3803 = vmatprep.subr.bf16.mxu0 %v4380_v29  ;;  %3866 = vmatpush3.bf16.msra.mxu1 %v4391_v21 }
  0x33   :  { %888 = vmatmul.mubr.bf16.gmra.mxu0 %v63_v14  ;;  %v4954_v14 = vld [vmem:[%s6854_s0 + $0xc0] sm:$0xff] }
  0x34   :  { %985 = vmatmul.mubr.bf16.gmra.mxu1 %v111_v16  ;;  %895 = vmatprep.mubr.bf16.mxu0 %v88_v17  ;;  %v4959_v16 = vld [vmem:[%s6854_s0 + $0xc1] sm:$0xff]  ;;  %v4964_v17 = vld [vmem:[%s6852_s1 + $0xd0] sm:$0xff]  ;;  %v66_v30 = vpack.c.bf16 %v4954_v14, %v4949_v13 }
  0x35   :  { %992 = vmatprep.mubr.bf16.mxu1 %v136_v20  ;;  %3804 = vmatpush3.bf16.msra.mxu0 %v4382_v32  ;;  %v129_v20 = vld [vmem:[%s6853_s2 + $0xd0] sm:$0xff]  ;;  %v260_v29 = vpack.c.bf16 %v4983_v27, %v4959_v16  ;;  %v114_v32 = vpack.c.bf16 %v4959_v16, %v4923_v57 }
  0x36   :  { %3805 = vmatprep.subr.bf16.mxu0 %v4386_v58  ;;  %v139_v36 = vpack.c.bf16 %v130_v25, %v129_v20  ;;  %v5034_v58 = vld [vmem:[%s6852_s1 + $0x100] sm:$0xff]  ;;  %v4400_v25 = vld [vmem:[%s6851_s4 + $0x1c8] sm:$0xff]  }
  0x37   :  { %v92_v12 = vpack.c.bf16 %v5034_v58, %v5026_v50  ;;  %v4399_v20 = vld [vmem:[%s6851_s4 + $0x100] sm:$0xff]  }
  0x39   :  { %3806 = vmatpush3.bf16.msra.mxu0 %v4387_v60  ;;  %v131_v60 = vld [vmem:[%s6853_s2 + $0xf0] sm:$0xff] }
  0x3a   :  { %3807 = vmatprep.subr.bf16.mxu0 %v4392_v28  ;;  %v140_v21 = vpack.c.bf16 %v132_v0, %v131_v60  ;;  %v5067_v28 = vld [vmem:[%s6854_s0 + $0xf0] sm:$0xff] }
  0x3b   :  { %896 = vmatmul.mubr.bf16.gmra.mxu0 %v64_v31  ;;  %v4393_v31 = vld [vmem:[%s6851_s4 + $0x108] sm:$0xff]  }
  0x3c   :  { %993 = vmatmul.mubr.bf16.gmra.mxu1 %v112_v34  ;;  %903 = vmatprep.mubr.bf16.mxu0 %v89_v35  ;;  %v91_v34 = vpack.c.bf16 %v4969_v18, %v4964_v17  ;;  %v4394_v35 = vld [vmem:[%s6851_s4 + $0x1d8] sm:$0xff]  }
  0x3d   :  { %1000 = vmatprep.mubr.bf16.mxu1 %v137_v37  ;;  %3808 = vmatpush3.bf16.msra.mxu0 %v4393_v31  ;;  %v4395_v37 = vld [vmem:[%s6851_s4 + $0x198] sm:$0xff]   ;;  %v5075_v31 = vld [vmem:[%s6854_s0 + $0x100] sm:$0xff] }
  0x3e   :  { %3867 = vmatprep.subr.bf16.mxu1 %v4394_v35  ;;  %3809 = vmatprep.subr.bf16.mxu0 %v4398_v6  ;;  %v165_v35 = vld [vmem:[%s6853_s2 + $0x1] sm:$0xff] }
  0x3f   :  { %3868 = vmatpush3.bf16.msra.mxu1 %v4395_v37  ;;  %v4403_v37 = vld [vmem:[%s6851_s4 + $0x180] sm:$0xff]  }
  0x40   :  { %3869 = vmatprep.subr.bf16.mxu1 %v4396_v40  ;;  %v4404_v40 = vld [vmem:[%s6851_s4 + $0x238] sm:$0xff]   ;;  %v141_v6 = vld [vmem:[%s6855_s3] sm:$0xff] }
  0x41   :  { %3810 = vmatpush3.bf16.msra.mxu0 %v4399_v20  ;;  %v206_v20 = vpack.c.bf16 %v4726_v52, %v4687_v38  ;;  %v144_v38 = vld [vmem:[%s6855_s3 + $0x30] sm:$0xff]  ;;  %v169_v52 = vld [vmem:[%s6853_s2 + $0x41] sm:$0xff] }
  0x42   :  { %4227 = vmatprep.subr.bf16.mxu0 %v4404_v40 }
  0x43   :  { %904 = vmatmul.mubr.bf16.gmra.mxu0 %v65_v63  ;;  %v5042_v63 = vld [vmem:[%s6854_s0 + $0xf1] sm:$0xff]  ;;  %3870 = vmatpush3.bf16.msra.mxu1 %v4397_v51  ;;  %v68_v51 = vpack.c.bf16 %v5075_v31, %v5067_v28 }
  0x44   :  { %1001 = vmatmul.mubr.bf16.gmra.mxu1 %v113_v1  ;;  %911 = vmatprep.mubr.bf16.mxu0 %v90_v2  ;;  %v261_v1 = vpack.c.bf16 %v5042_v63, %v5021_v49  ;;  %v67_v2 = vpack.c.bf16 %v5016_v44, %v5008_v39 }
  0x45   :  { %1008 = vmatprep.mubr.bf16.mxu1 %v138_v8  ;;  %v115_v8 = vpack.c.bf16 %v5021_v49, %v4983_v27  ;;  %3871 = vmatprep.subr.bf16.mxu1 %v4400_v25  ;;  %v4405_v25 = vld [vmem:[%s6851_s4 + $0x230] sm:$0xff]  }
  0x4b   :  { %912 = vmatmul.mubr.bf16.gmra.mxu0 %v66_v30  ;;  %v4401_v30 = vld [vmem:[%s6851_s4 + $0x188] sm:$0xff]  }
  0x4c   :  { %1009 = vmatmul.mubr.bf16.gmra.mxu1 %v114_v32  ;;  %919 = vmatprep.mubr.bf16.mxu0 %v91_v34  ;;  %v5080_v32 = vld [vmem:[%s6854_s0 + $0x101] sm:$0xff] }
  0x4d   :  { %1016 = vmatprep.mubr.bf16.mxu1 %v139_v36  ;;  %v4402_v34 = vld [vmem:[%s6851_s4 + $0x1c0] sm:$0xff]   ;;  %3872 = vmatpush3.bf16.msra.mxu1 %v4401_v30  ;;  %v166_v36 = vld [vmem:[%s6853_s2 + $0x11] sm:$0xff]  ;;  %v116_v60 = vpack.c.bf16 %v5080_v32, %v5042_v63  ;;  %v232_v30 = vpack.c.bf16 %v4758_v61, %v4713_v47  ;;  %v4406_v61 = vld [vmem:[%s6851_s4 + $0x228] sm:$0xff]   ;;  %v262_v54 = vpack.c.bf16 %v3429_v42, %v5080_v32 }
  0x4e   :  { %3873 = vmatprep.subr.bf16.mxu1 %v4402_v34  ;;  %v181_v0 = vpack.c.bf16 %v166_v36, %v165_v35  ;;  %v143_v34 = vld [vmem:[%s6855_s3 + $0x20] sm:$0xff]  ;;  %v170_v47 = vld [vmem:[%s6853_s2 + $0x51] sm:$0xff]  ;;  %v207_v36 = vpack.c.bf16 %v4776_v3, %v4731_v53 }
  0x4f   :  { %v5140_v35 = vpack.c.bf16 %v144_v38, %v143_v34  ;;  %v146_v53 = vld [vmem:[%s6855_s3 + $0x50] sm:$0xff] }
  0x50   :  { %v172_v3 = vld [vmem:[%s6853_s2 + $0x71] sm:$0xff] }
  0x51   :  { %3874 = vmatpush3.bf16.msra.mxu1 %v4403_v37  ;;  %v183_v37 = vpack.c.bf16 %v170_v47, %v169_v52  ;;  %v235_v52 = vpack.c.bf16 %v4904_v45, %v4857_v26  ;;  %v4411_v47 = vld [vmem:[%s6851_s4 + $0x200] sm:$0xff]   ;;  %v175_v26 = vld [vmem:[%s6853_s2 + $0xb1] sm:$0xff] }
  0x52   :  { %v176_v45 = vld [vmem:[%s6853_s2 + $0xc1] sm:$0xff]  ;;  %4259 = vmatprep.subr.bf16.mxu1 %v4412_v55 }
  0x53   :  { %920 = vmatmul.mubr.bf16.gmra.mxu0 %v67_v2  ;;  %v231_v2 = vpack.c.bf16 %v4708_v46, %v4672_v33  ;;  %v168_v33 = vld [vmem:[%s6853_s2 + $0x31] sm:$0xff] }
  0x54   :  { %1017 = vmatmul.mubr.bf16.gmra.mxu1 %v115_v8  ;;  %927 = vmatprep.mubr.bf16.mxu0 %v92_v12  ;;  %v142_v8 = vld [vmem:[%s6855_s3 + $0x10] sm:$0xff]  ;;  %v167_v12 = vld [vmem:[%s6853_s2 + $0x21] sm:$0xff] }
  0x55   :  { %1024 = vmatprep.mubr.bf16.mxu1 %v140_v21  ;;  %v5115_v46 = vpack.c.bf16 %v142_v8, %v141_v6  ;;  %v182_v21 = vpack.c.bf16 %v168_v33, %v167_v12  ;;  %v208_v6 = vpack.c.bf16 %v4839_v22, %v4781_v4  ;;  %v4409_v33 = vld [vmem:[%s6851_s4 + $0x210] sm:$0xff]  }
  0x56   :  { %v148_v4 = vld [vmem:[%s6855_s3 + $0x70] sm:$0xff] }
  0x57   :  { %v173_v22 = vld [vmem:[%s6853_s2 + $0x91] sm:$0xff] }
  0x5b   :  { %928 = vmatmul.mubr.bf16.gmra.mxu0 %v68_v51  ;;  %v4407_v51 = vld [vmem:[%s6851_s4 + $0x220] sm:$0xff]  }
  0x5c   :  { %1025 = vmatmul.mubr.bf16.gmra.mxu1 %v116_v60  ;;  %1065 = vmatprep.mubr.bf16.mxu0 %v181_v0  ;;  %v145_v60 = vld [vmem:[%s6855_s3 + $0x40] sm:$0xff]  ;;  %v4408_v0 = vld [vmem:[%s6851_s4 + $0x218] sm:$0xff]  }
  0x5d   :  { %1162 = vmatprep.mubr.bf16.mxu1 %v231_v2  ;;  %v5168_v2 = vpack.c.bf16 %v146_v53, %v145_v60  ;;  %v151_v60 = vld [vmem:[%s6855_s3 + $0xb0] sm:$0xff]  ;;  %v152_v53 = vld [vmem:[%s6855_s3 + $0xc0] sm:$0xff] }
  0x63   :  { %1066 = vmatmul.mubr.bf16.vlgmr.msra.gmra.mxu0 %v5115_v46 }
  0x64   :  { %4228 = vmatpush3.bf16.msra.mxu0 %v4404_v40  ;;  %1163 = vmatmul.mubr.bf16.vlgmr.msra.gmra.mxu1 %v206_v20  ;;  %v233_v40 = vpack.c.bf16 %v4804_v10, %v4763_v62  ;;  %v171_v62 = vld [vmem:[%s6853_s2 + $0x61] sm:$0xff] }
  0x65   :  { %1073 = vmatprep.mubr.bf16.mxu0 %v182_v21  ;;  %4229 = vmatprep.subr.bf16.mxu0 %v4405_v25  ;;  %v3405_v10 = vld [vmem:[%s6852_s1 + $0x80] sm:$0xff]  ;;  %v184_v8 = vpack.c.bf16 %v172_v3, %v171_v62  ;;  %v237_v3 = vpack.c.bf16 %v5026_v50, %v4969_v18 }
  0x66   :  { %1170 = vmatprep.mubr.bf16.mxu1 %v232_v30  ;;  %v234_v12 = vpack.c.bf16 %v3405_v10, %v4809_v11  ;;  %v147_v20 = vld [vmem:[%s6855_s3 + $0x60] sm:$0xff]  ;;  %v153_v10 = vld [vmem:[%s6855_s3 + $0xd0] sm:$0xff]  ;;  %4260 = vmatpush3.bf16.msra.mxu1 %v4412_v55 }
  0x67   :  { %v3389_v11 = vld [vmem:[%s6854_s0 + $0x80] sm:$0xff]  ;;  %v5195_v30 = vpack.c.bf16 %v148_v4, %v147_v20 }
  0x68   :  { %4230 = vmatpush3.bf16.msra.mxu0 %v4405_v25  ;;  %v174_v21 = vld [vmem:[%s6853_s2 + $0xa1] sm:$0xff]  ;;  %v209_v34 = vpack.c.bf16 %v3389_v11, %v4844_v23 }
  0x69   :  { %4231 = vmatprep.subr.bf16.mxu0 %v4406_v61  ;;  %v4410_v25 = vld [vmem:[%s6851_s4 + $0x208] sm:$0xff]   ;;  %v185_v38 = vpack.c.bf16 %v174_v21, %v173_v22  ;;  %v150_v23 = vld [vmem:[%s6855_s3 + $0xa0] sm:$0xff] }
  0x6a   :  { %v180_v18 = vld [vmem:[%s6853_s2 + $0x101] sm:$0xff] }
  0x6b   :  { %1074 = vmatmul.mubr.bf16.gmra.mxu0 %v5140_v35  ;;  %v156_v20 = vld [vmem:[%s6855_s3 + $0x100] sm:$0xff] }
  0x6c   :  { %1171 = vmatmul.mubr.bf16.gmra.mxu1 %v207_v36  ;;  %1081 = vmatprep.mubr.bf16.mxu0 %v183_v37  ;;  %v210_v37 = vpack.c.bf16 %v4949_v13, %v4891_v41  ;;  %v177_v41 = vld [vmem:[%s6853_s2 + $0xd1] sm:$0xff]  ;;  %v5235_v13 = vpack.c.bf16 %v152_v53, %v151_v60 }
  0x6d   :  { %1178 = vmatprep.mubr.bf16.mxu1 %v233_v40  ;;  %4232 = vmatpush3.bf16.msra.mxu0 %v4406_v61  ;;  %v149_v61 = vld [vmem:[%s6855_s3 + $0x90] sm:$0xff]  ;;  %v186_v40 = vpack.c.bf16 %v176_v45, %v175_v26 }
  0x6e   :  { %4233 = vmatprep.subr.bf16.mxu0 %v4407_v51  ;;  %v5216_v36 = vpack.c.bf16 %v150_v23, %v149_v61 }
  0x71   :  { %4234 = vmatpush3.bf16.msra.mxu0 %v4407_v51  ;;  %v236_v51 = vpack.c.bf16 %v4964_v17, %v4909_v48  ;;  %v178_v48 = vld [vmem:[%s6853_s2 + $0xe1] sm:$0xff]  ;;  %v211_v17 = vpack.c.bf16 %v5008_v39, %v4954_v14  ;;  %v179_v14 = vld [vmem:[%s6853_s2 + $0xf1] sm:$0xff] }
  0x72   :  { %4235 = vmatprep.subr.bf16.mxu0 %v4408_v0  ;;  %v187_v62 = vpack.c.bf16 %v178_v48, %v177_v41  ;;  %v3413_v39 = vld [vmem:[%s6852_s1 + $0x110] sm:$0xff] }
  0x73   :  { %1082 = vmatmul.mubr.bf16.gmra.mxu0 %v5168_v2 }
  0x74   :  { %1179 = vmatmul.mubr.bf16.gmra.mxu1 %v208_v6  ;;  %1089 = vmatprep.mubr.bf16.mxu0 %v184_v8  ;;  %v212_v6 = vpack.c.bf16 %v5067_v28, %v5016_v44  ;;  %v188_v8 = vpack.c.bf16 %v180_v18, %v179_v14  ;;  %v3397_v44 = vld [vmem:[%s6854_s0 + $0x110] sm:$0xff] }
  0x75   :  { %1186 = vmatprep.mubr.bf16.mxu1 %v234_v12  ;;  %4236 = vmatpush3.bf16.msra.mxu0 %v4408_v0  ;;  %v154_v0 = vld [vmem:[%s6855_s3 + $0xe0] sm:$0xff]  ;;  %v238_v12 = vpack.c.bf16 %v3413_v39, %v5034_v58  ;;  %v213_v58 = vpack.c.bf16 %v3397_v44, %v5075_v31 }
  0x76   :  { %4237 = vmatprep.subr.bf16.mxu0 %v4409_v33  ;;  %v5257_v50 = vpack.c.bf16 %v154_v0, %v153_v10  ;;  %v3421_v31 = vld [vmem:[%s6854_s0 + $0x81] sm:$0xff] }
  0x77   :  { %v258_v4 = vpack.c.bf16 %v3421_v31, %v4849_v24 }
  0x79   :  { %4238 = vmatpush3.bf16.msra.mxu0 %v4409_v33  ;;  %v155_v33 = vld [vmem:[%s6855_s3 + $0xf0] sm:$0xff] }
  0x7a   :  { %4239 = vmatprep.subr.bf16.mxu0 %v4410_v25  ;;  %v5272_v28 = vpack.c.bf16 %v156_v20, %v155_v33 }
  0x7b   :  { %1090 = vmatmul.mubr.bf16.gmra.mxu0 %v5195_v30 }
  0x7c   :  { %1187 = vmatmul.mubr.bf16.gmra.mxu1 %v209_v34  ;;  %1097 = vmatprep.mubr.bf16.mxu0 %v185_v38 }
  0x7d   :  { %1194 = vmatprep.mubr.bf16.mxu1 %v235_v52  ;;  %4240 = vmatpush3.bf16.msra.mxu0 %v4410_v25 }
  0x7e   :  { %4241 = vmatprep.subr.bf16.mxu0 %v4411_v47 }
  0x81   :  { %4242 = vmatpush3.bf16.msra.mxu0 %v4411_v47 }
  0x83   :  { %1098 = vmatmul.mubr.bf16.gmra.mxu0 %v5216_v36 }
  0x84   :  { %1195 = vmatmul.mubr.bf16.gmra.mxu1 %v210_v37  ;;  %1105 = vmatprep.mubr.bf16.mxu0 %v186_v40 }
  0x85   :  { %1202 = vmatprep.mubr.bf16.mxu1 %v236_v51 }
  0x8b   :  { %1106 = vmatmul.mubr.bf16.gmra.mxu0 %v5235_v13 }
  0x8c   :  { %1203 = vmatmul.mubr.bf16.gmra.mxu1 %v211_v17  ;;  %1113 = vmatprep.mubr.bf16.mxu0 %v187_v62 }
  0x8d   :  { %1210 = vmatprep.mubr.bf16.mxu1 %v237_v3 }
  0x93   :  { %1114 = vmatmul.mubr.bf16.gmra.mxu0 %v5257_v50 }
  0x94   :  { %1211 = vmatmul.mubr.bf16.gmra.mxu1 %v212_v6  ;;  %1121 = vmatprep.mubr.bf16.mxu0 %v188_v8 }
  0x95   :  { %1218 = vmatprep.mubr.bf16.mxu1 %v238_v12 }
  0x9b   :  { %1122 = vmatmul.mubr.bf16.gmra.mxu0 %v5272_v28 }
  0x9c   :  { %1219 = vmatmul.mubr.bf16.gmra.mxu1 %v213_v58  ;;  %4243 = vmatprep.mubr.bf16.mxu0 %v255_v56  ;;  %v4413_v56 = vld [vmem:[%s6856_s5 + $0x30] sm:$0xff]  }
  0x9d   :  { %4275 = vmatprep.mubr.bf16.mxu1 %v5115_v46  ;;  %4261 = vmatprep.subr.bf16.mxu1 %v4413_v56 }
  0x9e   :  { %4262 = vmatpush3.bf16.msra.mxu1 %v4413_v56 }
  0x9f   :  { %4263 = vmatprep.subr.bf16.mxu1 %v4414_v5 }
  0xa2   :  { %4264 = vmatpush3.bf16.msra.mxu1 %v4414_v5 }
  0xa3   :  { %4244 = vmatmul.mubr.bf16.vlgmr.msra.gmra.mxu0 %v256_v7  ;;  %v4415_v7 = vld [vmem:[%s6856_s5 + $0x20] sm:$0xff]  }
  0xa4   :  { %4247 = vmatprep.mubr.bf16.mxu0 %v257_v19  ;;  %4265 = vmatprep.subr.bf16.mxu1 %v4415_v7  ;;  %v4418_v19 = vld [vmem:[%s6856_s5 + $0x8] sm:$0xff]  }
  0xa6   :  { %4266 = vmatpush3.bf16.msra.mxu1 %v4415_v7 }
  0xa7   :  { %4267 = vmatprep.subr.bf16.mxu1 %v4416_v9 }
  0xaa   :  { %4268 = vmatpush3.bf16.msra.mxu1 %v4416_v9 }
  0xab   :  { %4248 = vmatmul.mubr.bf16.gmra.mxu0 %v258_v4  ;;  %4269 = vmatprep.subr.bf16.mxu1 %v4417_v15 }
  0xac   :  { %4251 = vmatprep.mubr.bf16.mxu0 %v259_v59  ;;  %v4419_v59 = vld [vmem:[%s6856_s5] sm:$0xff]  }
  0xae   :  { %4270 = vmatpush3.bf16.msra.mxu1 %v4417_v15 }
  0xaf   :  { %4271 = vmatprep.subr.bf16.mxu1 %v4418_v19 }
  0xb2   :  { %4272 = vmatpush3.bf16.msra.mxu1 %v4418_v19 }
  0xb3   :  { %4252 = vmatmul.mubr.bf16.gmra.mxu0 %v260_v29  ;;  %4273 = vmatprep.subr.bf16.mxu1 %v4419_v59 }
  0xb4   :  { %4255 = vmatprep.mubr.bf16.mxu0 %v261_v1 }
  0xb6   :  { %4274 = vmatpush3.bf16.msra.mxu1 %v4419_v59 }
  0xb9   :  { %4276 = vmatmul.mubr.bf16.vlgmr.msra.gmra.mxu1 %v5140_v35 }
  0xba   :  { %4279 = vmatprep.mubr.bf16.mxu1 %v5168_v2 }
  0xbb   :  { %4256 = vmatmul.mubr.bf16.gmra.mxu0 %v262_v54 }
  0xc1   :  { %4280 = vmatmul.mubr.bf16.gmra.mxu1 %v5195_v30 }
  0xc2   :  { %4283 = vmatprep.mubr.bf16.mxu1 %v5216_v36 }
  0xc9   :  { %4284 = vmatmul.mubr.bf16.gmra.mxu1 %v5235_v13 }
  0xca   :  { %4287 = vmatprep.mubr.bf16.mxu1 %v5257_v50 }
  0xd1   :  { %4288 = vmatmul.mubr.bf16.gmra.mxu1 %v5272_v28 }
  0xe3   :  { %v3683_v24 = vpop.f32.mrf.mxu0 }
  0xe4   :  { %v3747_v43 = vpop.f32.mrf.mxu1 }
  0xe5   :  { %v3684_v57 = vpop.f32.mrf.mxu0 }
  0xe6   :  { %v3685_v16 = vadd.f32 %v3684_v57, %v3683_v24  ;;  %v3748_v27 = vpop.f32.mrf.mxu1 }
  0xe7   :  { %v3749_v29 = vadd.f32 %v3748_v27, %v3747_v43  ;;  %v3686_v49 = vpop.f32.mrf.mxu0 }
  0xe8   :  { %v3750_v63 = vpop.f32.mrf.mxu1 }
  0xe9   :  { %v5327_v1 = vadd.f32 %v3749_v29, %v3685_v16  ;;  %v3687_v32 = vpop.f32.mrf.mxu0 }
  0xea   :  { %v3688_v46 = vadd.f32 %v3687_v32, %v3686_v49  ;;  %v3751_v11 = vpop.f32.mrf.mxu1 }
  0xeb   :  { %v3752_v22 = vadd.f32 %v3751_v11, %v3750_v63  ;;  %v3689_v21 = vpop.f32.mrf.mxu0 }
  0xec   :  { %v3753_v25 = vpop.f32.mrf.mxu1 }
  0xed   :  { %v5331_v34 = vadd.f32 %v3752_v22, %v3688_v46  ;;  %v3690_v38 = vpop.f32.mrf.mxu0 }
  0xee   :  { %v3691_v52 = vadd.f32 %v3690_v38, %v3689_v21  ;;  %v3754_v47 = vpop.f32.mrf.mxu1 }
  0xef   :  { %v3755_v61 = vadd.f32 %v3754_v47, %v3753_v25  ;;  %v3692_v23 = vpop.f32.mrf.mxu0 }
  0xf0   :  { %v3756_v26 = vpop.f32.mrf.mxu1 }
  0xf1   :  { %v5333_v45 = vadd.f32 %v3755_v61, %v3691_v52  ;;  %v3693_v37 = vpop.f32.mrf.mxu0 }
  0xf2   :  { %v3694_v40 = vadd.f32 %v3693_v37, %v3692_v23  ;;  %v3757_v51 = vpop.f32.mrf.mxu1 }
  0xf3   :  { %v3758_v60 = vadd.f32 %v3757_v51, %v3756_v26  ;;  %v3695_v53 = vpop.f32.mrf.mxu0 }
  0xf4   :  { %v3759_v35 = vpop.f32.mrf.mxu1 }
  0xf5   :  { %v5337_v2 = vadd.f32 %v3758_v60, %v3694_v40  ;;  %v3696_v41 = vpop.f32.mrf.mxu0 }
  0xf6   :  { %v3697_v48 = vadd.f32 %v3696_v41, %v3695_v53  ;;  %v3760_v17 = vpop.f32.mrf.mxu1 }
  0xf7   :  { %v3761_v62 = vadd.f32 %v3760_v17, %v3759_v35  ;;  %v3698_v3 = vpop.f32.mrf.mxu0 }
  0xf8   :  { %v3762_v10 = vpop.f32.mrf.mxu1 }
  0xf9   :  { %v5339_v0 = vadd.f32 %v3761_v62, %v3697_v48  ;;  %v3699_v14 = vpop.f32.mrf.mxu0 }
  0xfa   :  { %v3700_v18 = vadd.f32 %v3699_v14, %v3698_v3  ;;  %v3763_v39 = vpop.f32.mrf.mxu1 }
  0xfb   :  { %v3764_v6 = vadd.f32 %v3763_v39, %v3762_v10  ;;  %v3701_v8 = vpop.f32.mrf.mxu0 }
  0xfc   :  { %v3765_v30 = vpop.f32.mrf.mxu1 }
  0xfd   :  { %v5343_v36 = vadd.f32 %v3764_v6, %v3700_v18  ;;  %v3702_v12 = vpop.f32.mrf.mxu0 }
  0xfe   :  { %v3703_v33 = vadd.f32 %v3702_v12, %v3701_v8  ;;  %v3766_v20 = vpop.f32.mrf.mxu1 }
  0xff   :  { %v3767_v44 = vadd.f32 %v3766_v20, %v3765_v30  ;;  %v3704_v58 = vpop.f32.mrf.mxu0 }
 0x100   :  { %v3768_v31 = vpop.f32.mrf.mxu1 }
 0x101   :  { %v5345_v4 = vadd.f32 %v3767_v44, %v3703_v33  ;;  %v3705_v42 = vpop.f32.mrf.mxu0  ;;  %v4420_v44 = vld [vmem:[%s6857_s6 + $0x78] sm:$0xff]  }
 0x102   :  { %v3706_v54 = vadd.f32 %v3705_v42, %v3704_v58  ;;  %v3769_v55 = vpop.f32.mrf.mxu1  ;;  %3955 = vmatprep.subr.bf16.mxu0 %v4420_v44  ;;  %v4443_v44 = vld [vmem:[%s6857_s6 + $0x90] sm:$0xff]  }
 0x103   :  { %v3770_v56 = vadd.f32 %v3769_v55, %v3768_v31  ;;  %v3707_v5 = vpop.f32.mrf.mxu0  ;;  %v4421_v31 = vld [vmem:[%s6857_s6 + $0xf8] sm:$0xff]  }
 0x104   :  { %v3771_v13 = vpop.f32.mrf.mxu1  ;;  %v4422_v55 = vld [vmem:[%s6857_s6 + $0x38] sm:$0xff]   ;;  %4019 = vmatprep.subr.bf16.mxu1 %v4421_v31 }
 0x105   :  { %v5348_v7 = vadd.f32 %v3770_v56, %v3706_v54  ;;  %v3708_v50 = vpop.f32.mrf.mxu0  ;;  %3956 = vmatpush3.bf16.msra.mxu0 %v4422_v55  ;;  %v4444_v55 = vld [vmem:[%s6857_s6 + $0x48] sm:$0xff]  }
 0x106   :  { %v3709_v9 = vadd.f32 %v3708_v50, %v3707_v5  ;;  %v3772_v15 = vpop.f32.mrf.mxu1  ;;  %v4423_v5 = vld [vmem:[%s6857_s6 + $0xb8] sm:$0xff]   ;;  %v4424_v50 = vld [vmem:[%s6857_s6 + $0x70] sm:$0xff]  }
 0x107   :  { %v3773_v19 = vadd.f32 %v3772_v15, %v3771_v13  ;;  %v3710_v24 = vpop.f32.mrf.mxu0  ;;  %4020 = vmatpush3.bf16.msra.mxu1 %v4423_v5  ;;  %v4425_v15 = vld [vmem:[%s6857_s6 + $0xf0] sm:$0xff]   ;;  %3957 = vmatprep.subr.bf16.mxu0 %v4424_v50 }
 0x108   :  { %v3774_v43 = vpop.f32.mrf.mxu1  ;;  %4021 = vmatprep.subr.bf16.mxu1 %v4425_v15  ;;  %v4446_v15 = vld [vmem:[%s6857_s6 + $0x8] sm:$0xff]  }
 0x109   :  { %v5350_v57 = vadd.f32 %v3773_v19, %v3709_v9  ;;  %v3711_v59 = vpop.f32.mrf.mxu0 }
 0x10a   :  { %v3712_v16 = vadd.f32 %v3711_v59, %v3710_v24  ;;  %v3775_v27 = vpop.f32.mrf.mxu1  ;;  %v4426_v24 = vld [vmem:[%s6857_s6 + $0x30] sm:$0xff]  }
 0x10b   :  { %v3776_v29 = vadd.f32 %v3775_v27, %v3774_v43  ;;  %v3713_v49 = vpop.f32.mrf.mxu0  ;;  %3958 = vmatpush3.bf16.msra.mxu0 %v4426_v24  ;;  %v4447_v24 = vld [vmem:[%s6857_s6 + $0x88] sm:$0xff]  }
 0x10c   :  { %v3777_v63 = vpop.f32.mrf.mxu1 }
 0x10d   :  { %v5352_v32 = vadd.f32 %v3776_v29, %v3712_v16  ;;  %v3714_v28 = vpop.f32.mrf.mxu0  ;;  %v4427_v16 = vld [vmem:[%s6857_s6 + $0xb0] sm:$0xff]   ;;  %v4428_v29 = vld [vmem:[%s6857_s6 + $0x68] sm:$0xff]  }
 0x10e   :  { %v3715_v46 = vadd.f32 %v3714_v28, %v3713_v49  ;;  %v3778_v11 = vpop.f32.mrf.mxu1  ;;  %4022 = vmatpush3.bf16.msra.mxu1 %v4427_v16  ;;  %v4429_v28 = vld [vmem:[%s6857_s6 + $0xe8] sm:$0xff]   ;;  %3959 = vmatprep.subr.bf16.mxu0 %v4428_v29  ;;  %v4448_v16 = vld [vmem:[%s6857_s6 + $0x40] sm:$0xff]  }
 0x10f   :  { %6882 = vst [vmem:[#allocation3_spill] sm:$0xff] %v5352_v32  ;;  %v3779_v22 = vadd.f32 %v3778_v11, %v3777_v63  ;;  %v3716_v21 = vpop.f32.mrf.mxu0  ;;  %v4430_v11 = vld [vmem:[%s6857_s6 + $0x28] sm:$0xff]   ;;  %4023 = vmatprep.subr.bf16.mxu1 %v4429_v28  ;;  %v4449_v28 = vld [vmem:[%s6857_s6 + $0xc0] sm:$0xff]  }
 0x110   :  { %v3780_v25 = vpop.f32.mrf.mxu1  ;;  %3960 = vmatpush3.bf16.msra.mxu0 %v4430_v11 }
 0x111   :  { %v5354_v38 = vadd.f32 %v3779_v22, %v3715_v46  ;;  %v3717_v52 = vpop.f32.mrf.mxu0 }
 0x112   :  { %v3718_v47 = vadd.f32 %v3717_v52, %v3716_v21  ;;  %v3781_v61 = vpop.f32.mrf.mxu1 }
 0x113   :  { %6883 = vst [vmem:[#allocation4_spill] sm:$0xff] %v5354_v38  ;;  %v3782_v23 = vadd.f32 %v3781_v61, %v3780_v25  ;;  %v3719_v26 = vpop.f32.mrf.mxu0  ;;  %v4432_v25 = vld [vmem:[%s6857_s6 + $0x60] sm:$0xff]  }
 0x114   :  { %v3783_v37 = vpop.f32.mrf.mxu1  ;;  %3961 = vmatprep.subr.bf16.mxu0 %v4432_v25 }
 0x115   :  { %v5356_v40 = vadd.f32 %v3782_v23, %v3718_v47  ;;  %v3720_v51 = vpop.f32.mrf.mxu0  ;;  %v4433_v47 = vld [vmem:[%s6857_s6 + $0xe0] sm:$0xff]  }
 0x116   :  { %v3721_v60 = vadd.f32 %v3720_v51, %v3719_v26  ;;  %v3784_v53 = vpop.f32.mrf.mxu1  ;;  %v4434_v23 = vld [vmem:[%s6857_s6 + $0x20] sm:$0xff]  }
 0x117   :  { %6884 = vst [vmem:[#allocation5_spill] sm:$0xff] %v5356_v40  ;;  %v3785_v35 = vadd.f32 %v3784_v53, %v3783_v37  ;;  %v3722_v41 = vpop.f32.mrf.mxu0  ;;  %v4435_v37 = vld [vmem:[%s6857_s6 + $0xa0] sm:$0xff]   ;;  %3962 = vmatpush3.bf16.msra.mxu0 %v4434_v23  ;;  %v6865_v53 = vmov 0.0  }
 0x118   :  { %v3786_v48 = vpop.f32.mrf.mxu1  ;;  %1787 = vst [vmem:[#allocation2] sm:$0xff] %v6865_v53  ;;  %1788 = vst [vmem:[#allocation2 + $0x8] sm:$0x3] %v6865_v53 }
 0x119   :  { %v5358_v17 = vadd.f32 %v3785_v35, %v3721_v60  ;;  %v3723_v62 = vpop.f32.mrf.mxu0  ;;  %v4436_v60 = vld [vmem:[%s6857_s6 + $0x58] sm:$0xff]   ;;  %1789 = vst [vmem:[#allocation2 + $0xa0] sm:$0xff] %v6865_v53  ;;  %1790 = vst [vmem:[#allocation2 + $0xa8] sm:$0x3] %v6865_v53 }
 0x11a   :  { %v3724_v3 = vadd.f32 %v3723_v62, %v3722_v41  ;;  %v3787_v10 = vpop.f32.mrf.mxu1  ;;  %1792 = vst [vmem:[#allocation2 + $0x90] sm:$0xff] %v6865_v53  ;;  %1793 = vst [vmem:[#allocation2 + $0x98] sm:$0x3] %v6865_v53  ;;  %v4437_v41 = vld [vmem:[%s6857_s6 + $0xd8] sm:$0xff]   ;;  %3963 = vmatprep.subr.bf16.mxu0 %v4436_v60 }
 0x11b   :  { %6885 = vst [vmem:[#allocation6_spill] sm:$0xff] %v5358_v17  ;;  %v3788_v14 = vadd.f32 %v3787_v10, %v3786_v48  ;;  %v3725_v18 = vpop.f32.mrf.mxu0  ;;  %1794 = vst [vmem:[#allocation2 + $0x130] sm:$0xff] %v6865_v53  ;;  %v4438_v62 = vld [vmem:[%s6857_s6 + $0x18] sm:$0xff]  }
 0x11c   :  { %v3789_v39 = vpop.f32.mrf.mxu1  ;;  %1795 = vst [vmem:[#allocation2 + $0x138] sm:$0x3] %v6865_v53  ;;  %1797 = vst [vmem:[#allocation2 + $0x10] sm:$0x1] %v6865_v53  ;;  %v4439_v10 = vld [vmem:[%s6857_s6 + $0x98] sm:$0xff]   ;;  %3964 = vmatpush3.bf16.msra.mxu0 %v4438_v62 }
 0x11d   :  { %v5360_v6 = vadd.f32 %v3788_v14, %v3724_v3  ;;  %v3726_v8 = vpop.f32.mrf.mxu0  ;;  %1798 = vst [vmem:[#allocation2 + $0x20] sm:$0x1] %v6865_v53  ;;  %1799 = vst [vmem:[#allocation2 + $0x30] sm:$0x1] %v6865_v53 }
 0x11e   :  { %v3727_v30 = vadd.f32 %v3726_v8, %v3725_v18  ;;  %v3790_v12 = vpop.f32.mrf.mxu1  ;;  %1800 = vst [vmem:[#allocation2 + $0x40] sm:$0x1] %v6865_v53  ;;  %1801 = vst [vmem:[#allocation2 + $0x50] sm:$0x1] %v6865_v53  ;;  %v4440_v18 = vld [vmem:[%s6857_s6 + $0x50] sm:$0xff]  }
 0x11f   :  { %6886 = vst [vmem:[#allocation7_spill] sm:$0xff] %v5360_v6  ;;  %v3791_v33 = vadd.f32 %v3790_v12, %v3789_v39  ;;  %v5362_v20 = vpop.f32.mrf.mxu0  ;;  %1802 = vst [vmem:[#allocation2 + $0x60] sm:$0x1] %v6865_v53  ;;  %v4441_v8 = vld [vmem:[%s6857_s6 + $0xd0] sm:$0xff]   ;;  %3965 = vmatprep.subr.bf16.mxu0 %v4440_v18 }
 0x120   :  { %v5367_v58 = vpop.f32.mrf.mxu1  ;;  %1803 = vst [vmem:[#allocation2 + $0x70] sm:$0x1] %v6865_v53  ;;  %1804 = vst [vmem:[#allocation2 + $0x80] sm:$0x1] %v6865_v53  ;;  %v4442_v12 = vld [vmem:[%s6857_s6 + $0x10] sm:$0xff]  }
 0x121   :  { %v5372_v42 = vadd.f32 %v3791_v33, %v3727_v30  ;;  %v5374_v54 = vpop.f32.mrf.mxu0  ;;  %1805 = vst [vmem:[#allocation2 + $0xb0] sm:$0x1] %v6865_v53  ;;  %1806 = vst [vmem:[#allocation2 + $0xc0] sm:$0x1] %v6865_v53  ;;  %3966 = vmatpush3.bf16.msra.mxu0 %v4442_v12 }
 0x122   :  { %v5379_v56 = vpop.f32.mrf.mxu1  ;;  %1807 = vst [vmem:[#allocation2 + $0xd0] sm:$0x1] %v6865_v53  ;;  %1808 = vst [vmem:[#allocation2 + $0xe0] sm:$0x1] %v6865_v53  ;;  %3967 = vmatprep.subr.bf16.mxu0 %v4444_v55 }
 0x123   :  { %6887 = vst [vmem:[#allocation8_spill] sm:$0xff] %v5372_v42  ;;  %v3811_v13 = vpop.f32.mrf.mxu0  ;;  %1809 = vst [vmem:[#allocation2 + $0xf0] sm:$0x1] %v6865_v53 }
 0x124   :  { %v5387_v9 = vpop.f32.mrf.mxu1  ;;  %1810 = vst [vmem:[#allocation2 + $0x100] sm:$0x1] %v6865_v53  ;;  %1811 = vst [vmem:[#allocation2 + $0x110] sm:$0x1] %v6865_v53 }
 0x125   :  { %v3812_v19 = vpop.f32.mrf.mxu0  ;;  %1812 = vst [vmem:[#allocation2 + $0x120] sm:$0x1] %v6865_v53  ;;  %1813 = vst [vmem:[#allocation2 + $0x19] sm:$0x1] %v6865_v53  ;;  %3968 = vmatpush3.bf16.msra.mxu0 %v4446_v15 }
 0x126   :  { %v3813_v43 = vadd.f32 %v3812_v19, %v3811_v13  ;;  %v5395_v59 = vpop.f32.mrf.mxu1  ;;  %1814 = vst [vmem:[#allocation2 + $0x29] sm:$0x1] %v6865_v53  ;;  %1815 = vst [vmem:[#allocation2 + $0x39] sm:$0x1] %v6865_v53  ;;  %v4445_v13 = vld [vmem:[%s6857_s6 + $0xc8] sm:$0xff]   ;;  %3969 = vmatprep.subr.bf16.mxu0 %v4448_v16 }
 0x127   :  { %v5400_v27 = vpop.f32.mrf.mxu0  ;;  %1816 = vst [vmem:[#allocation2 + $0x49] sm:$0x1] %v6865_v53  ;;  %1817 = vst [vmem:[#allocation2 + $0x59] sm:$0x1] %v6865_v53 }
 0x128   :  { %v5406_v49 = vadd.f32 %v3813_v43, %v5327_v1  ;;  %v5408_v63 = vpop.f32.mrf.mxu1  ;;  %v4431_v1 = vld [vmem:[%s6857_s6 + $0xa8] sm:$0xff]   ;;  %1818 = vst [vmem:[#allocation2 + $0x69] sm:$0x1] %v6865_v53  ;;  %1819 = vst [vmem:[#allocation2 + $0x79] sm:$0x1] %v6865_v53 }
 0x129   :  { %v5413_v46 = vpop.f32.mrf.mxu0  ;;  %4024 = vmatpush3.bf16.msra.mxu1 %v4431_v1  ;;  %1820 = vst [vmem:[#allocation2 + $0x89] sm:$0x1] %v6865_v53  ;;  %1821 = vst [vmem:[#allocation2 + $0xb9] sm:$0x1] %v6865_v53  ;;  %v4450_v1 = vld [vmem:[%s6857_s6] sm:$0xff]  }
 0x12a   :  { %v5418_v22 = vpop.f32.mrf.mxu1  ;;  %4025 = vmatprep.subr.bf16.mxu1 %v4433_v47  ;;  %1822 = vst [vmem:[#allocation2 + $0xc9] sm:$0x1] %v6865_v53  ;;  %1823 = vst [vmem:[#allocation2 + $0xd9] sm:$0x1] %v6865_v53  ;;  %v4451_v47 = vld [vmem:[%s6857_s6 + $0x80] sm:$0xff]   ;;  %3970 = vmatpush3.bf16.msra.mxu0 %v4450_v1 }
 0x12b   :  { %v5423_v21 = vpop.f32.mrf.mxu0  ;;  %1824 = vst [vmem:[#allocation2 + $0xe9] sm:$0x1] %v6865_v53  ;;  %1825 = vst [vmem:[#allocation2 + $0xf9] sm:$0x1] %v6865_v53 }
 0x12c   :  { %v5428_v52 = vpop.f32.mrf.mxu1  ;;  %1826 = vst [vmem:[#allocation2 + $0x109] sm:$0x1] %v6865_v53  ;;  %1827 = vst [vmem:[#allocation2 + $0x119] sm:$0x1] %v6865_v53 }
 0x12d   :  { %v5433_v61 = vpop.f32.mrf.mxu0  ;;  %1828 = vst [vmem:[#allocation2 + $0x129] sm:$0x1] %v6865_v53  ;;  %4026 = vmatpush3.bf16.msra.mxu1 %v4435_v37 }
 0x12e   :  { %v5438_v26 = vpop.f32.mrf.mxu1  ;;  %4027 = vmatprep.subr.bf16.mxu1 %v4437_v41  ;;  %v4452_v41 = vld [vmem:[%s6857_s6 + $0x178] sm:$0xff]  }
 0x12f   :  { %v5443_v51 = vpop.f32.mrf.mxu0  ;;  %4083 = vmatprep.subr.bf16.mxu0 %v4452_v41  ;;  %v4457_v41 = vld [vmem:[%s6857_s6 + $0x1f8] sm:$0xff]  }
 0x130   :  { %v5488_v35 = vpop.f32.mrf.mxu1 }
 0x131   :  { %v5493_v48 = vpop.f32.mrf.mxu0  ;;  %4028 = vmatpush3.bf16.msra.mxu1 %v4439_v10 }
 0x132   :  { %v5498_v3 = vpop.f32.mrf.mxu1  ;;  %4029 = vmatprep.subr.bf16.mxu1 %v4441_v8 }
 0x133   :  { %v5503_v14 = vpop.f32.mrf.mxu0 }
 0x134   :  { %v5508_v39 = vpop.f32.mrf.mxu1 }
 0x135   :  { %v5513_v30 = vpop.f32.mrf.mxu0  ;;  %4030 = vmatpush3.bf16.msra.mxu1 %v4443_v44 }
 0x136   :  { %v5518_v33 = vpop.f32.mrf.mxu1  ;;  %4031 = vmatprep.subr.bf16.mxu1 %v4445_v13 }
 0x137   :  { %v5523_v31 = vpop.f32.mrf.mxu0 }
 0x138   :  { %v5528_v5 = vpop.f32.mrf.mxu1 }
 0x139   :  { %v5533_v50 = vpop.f32.mrf.mxu0  ;;  %4032 = vmatpush3.bf16.msra.mxu1 %v4447_v24 }
 0x13a   :  { %v5538_v19 = vpop.f32.mrf.mxu1  ;;  %4033 = vmatprep.subr.bf16.mxu1 %v4449_v28 }
 0x13b   :  { %v5543_v43 = vpop.f32.mrf.mxu0 }
 0x13c   :  { %v5548_v29 = vpop.f32.mrf.mxu1 }
 0x13d   :  { %v3830_v11 = vpop.f32.mrf.mxu0  ;;  %4034 = vmatpush3.bf16.msra.mxu1 %v4451_v47 }
 0x13e   :  { %v5556_v25 = vpop.f32.mrf.mxu1  ;;  %4147 = vmatprep.subr.bf16.mxu1 %v4457_v41  ;;  %v3816_v41 = vadd.f32 %v5413_v46, %v5400_v27  ;;  %v3880_v27 = vadd.f32 %v5418_v22, %v5408_v63 }
 0x13f   :  { %v3832_v23 = vpop.f32.mrf.mxu0 }
 0x140   :  { %v5561_v37 = vpop.f32.mrf.mxu1 }
 0x141   :  { %v3833_v60 = vpop.f32.mrf.mxu0 }
 0x142   :  { %v5566_v62 = vpop.f32.mrf.mxu1  ;;  %v3834_v22 = vadd.f32 %v3833_v60, %v3832_v23 }
 0x143   :  { %v3835_v10 = vpop.f32.mrf.mxu0 }
 0x144   :  { %v5568_v18 = vpop.f32.mrf.mxu1 }
 0x145   :  { %v3836_v8 = vpop.f32.mrf.mxu0 }
 0x146   :  { %v5570_v12 = vpop.f32.mrf.mxu1 }
 0x147   :  { %v5572_v44 = vpop.f32.mrf.mxu0  ;;  %v3901_v23 = vadd.f32 %v5570_v12, %v5568_v18 }
 0x148   :  { %v5574_v55 = vpop.f32.mrf.mxu1 }
 0x149   :  { %6888 = vst [vmem:[#allocation9_spill] sm:$0xff] %v5574_v55  ;;  %v5576_v13 = vpop.f32.mrf.mxu0 }
 0x14a   :  { %v5578_v15 = vpop.f32.mrf.mxu1 }
 0x14b   :  { %6889 = vst [vmem:[#allocation10_spill] sm:$0xff] %v5578_v15  ;;  %v5580_v24 = vpop.f32.mrf.mxu0 }
 0x14c   :  { %v5584_v28 = vpop.f32.mrf.mxu1 }
 0x14d   :  { %v5582_v16 = vpop.f32.mrf.mxu0  ;;  %6890 = vst [vmem:[#allocation11_spill] sm:$0xff] %v5584_v28 }
 0x14e   :  { %v5593_v53 = vpop.f32.mrf.mxu1 }
 0x14f   :  { %v5586_v1 = vpop.f32.mrf.mxu0  ;;  %6891 = vst [vmem:[#allocation12_spill] sm:$0xff] %v5593_v53 }
 0x150   :  { %v5599_v17 = vpop.f32.mrf.mxu1 }
 0x151   :  { %v5588_v47 = vpop.f32.mrf.mxu0  ;;  %6892 = vst [vmem:[#allocation13_spill] sm:$0xff] %v5599_v17  ;;  %v3819_v17 = vadd.f32 %v5433_v61, %v5423_v21  ;;  %v3883_v21 = vadd.f32 %v5438_v26, %v5428_v52 }
 0x152   :  { %v5605_v38 = vpop.f32.mrf.mxu1 }
 0x153   :  { %v5595_v42 = vpop.f32.mrf.mxu0  ;;  %6895 = vst [vmem:[#allocation16_spill] sm:$0xff] %v5605_v38  ;;  %v1076_v46 = vadd.f32 %v3819_v17, %v5333_v45  ;;  %v3831_v17 = vadd.f32 %v3830_v11, %v5543_v43  ;;  %v1095_v43 = vadd.f32 %v3834_v22, %v5348_v7  ;;  %v3898_v11 = vadd.f32 %v5566_v62, %v5561_v37 }
 0x154   :  { %v5611_v32 = vpop.f32.mrf.mxu1  ;;  %v3794_v7 = vadd.f32 %v5379_v56, %v5367_v58 }
 0x155   :  { %v5597_v6 = vpop.f32.mrf.mxu0  ;;  %6898 = vst [vmem:[#allocation19_spill] sm:$0xff] %v5611_v32  ;;  %v1071_v32 = vadd.f32 %v3816_v41, %v5331_v34  ;;  %v3828_v34 = vadd.f32 %v5533_v50, %v5523_v31  ;;  %v1092_v50 = vadd.f32 %v3831_v17, %v5345_v4  ;;  %v1192_v41 = vadd.f32 %v3898_v11, %v1095_v43 }
 0x156   :  { %v6905_v17 = vld [vmem:[#allocation12_spill] sm:$0xff] }
 0x157   :  { %v5601_v40 = vpop.f32.mrf.mxu0  ;;  %v1168_v26 = vadd.f32 %v3880_v27, %v1071_v32  ;;  %v3895_v32 = vadd.f32 %v5556_v25, %v5548_v29  ;;  %v3730_v29 = vadd.f32 %v5374_v54, %v5362_v20  ;;  %v3840_v20 = vadd.f32 %v5576_v13, %v5572_v44 }
 0x158   :  { %6893 = vst [vmem:[#allocation14_spill] sm:$0xff] %v5601_v40  ;;  %v3822_v40 = vadd.f32 %v5493_v48, %v5443_v51  ;;  %v3886_v51 = vadd.f32 %v5498_v3, %v5488_v35  ;;  %v3846_v27 = vadd.f32 %v5588_v47, %v5586_v1  ;;  %v6902_v1 = vld [vmem:[#allocation10_spill] sm:$0xff] }
 0x159   :  { %v5603_v28 = vpop.f32.mrf.mxu0  ;;  %v1189_v58 = vadd.f32 %v3895_v32, %v1092_v50  ;;  %v6909_v32 = vld [vmem:[#allocation6_spill] sm:$0xff] }
 0x15a   :  { %6894 = vst [vmem:[#allocation15_spill] sm:$0xff] %v5603_v28  ;;  %v3825_v28 = vadd.f32 %v5513_v30, %v5503_v14  ;;  %v1079_v61 = vadd.f32 %v3822_v40, %v5337_v2  ;;  %v1173_v40 = vadd.f32 %v3883_v21, %v1076_v46  ;;  %v3892_v30 = vadd.f32 %v5538_v19, %v5528_v5 }
 0x15b   :  { %v5607_v15 = vpop.f32.mrf.mxu0  ;;  %v3849_v46 = vadd.f32 %v5597_v6, %v5595_v42  ;;  %v6904_v42 = vld [vmem:[#allocation11_spill] sm:$0xff] }
 0x15c   :  { %6896 = vst [vmem:[#allocation17_spill] sm:$0xff] %v5607_v15  ;;  %v5627_v15 = vpop.f32.mrf.mxu1  ;;  %v1176_v35 = vadd.f32 %v3886_v51, %v1079_v61  ;;  %v3907_v22 = vadd.f32 %v6905_v17, %v6904_v42  ;;  %v6910_v11 = vld [vmem:[#allocation19_spill] sm:$0xff] }
 0x15d   :  { %v5609_v55 = vpop.f32.mrf.mxu0  ;;  %v1116_v43 = vadd.f32 %v3849_v46, %v6909_v32 }
 0x15e   :  { %6897 = vst [vmem:[#allocation18_spill] sm:$0xff] %v5609_v55  ;;  %v3877_v55 = vadd.f32 %v5395_v59, %v5387_v9  ;;  %v1084_v9 = vadd.f32 %v3825_v28, %v5339_v0  ;;  %v3889_v59 = vadd.f32 %v5518_v33, %v5508_v39  ;;  %v5643_v63 = vpop.f32.mrf.mxu1  ;;  %v3837_v0 = vadd.f32 %v3836_v8, %v3835_v10 }
 0x15f   :  { %v5613_v53 = vpop.f32.mrf.mxu0  ;;  %v1087_v39 = vadd.f32 %v3828_v34, %v5343_v36  ;;  %v6901_v34 = vld [vmem:[#allocation9_spill] sm:$0xff] }
 0x160   :  { %6899 = vst [vmem:[#allocation20_spill] sm:$0xff] %v5613_v53  ;;  %v1165_v45 = vadd.f32 %v3877_v55, %v5406_v49  ;;  %v1181_v14 = vadd.f32 %v3889_v59, %v1084_v9  ;;  %v5652_v33 = vpop.f32.mrf.mxu1  ;;  %v1100_v25 = vadd.f32 %v3837_v0, %v5350_v57  ;;  %v3843_v57 = vadd.f32 %v5582_v16, %v5580_v24  ;;  %v6900_v59 = vld [vmem:[#allocation3_spill] sm:$0xff] }
 0x161   :  { %v5623_v38 = vpop.f32.mrf.mxu0  ;;  %v1184_v56 = vadd.f32 %v3892_v30, %v1087_v39  ;;  %v3904_v47 = vadd.f32 %v6902_v1, %v6901_v34  ;;  %v6907_v39 = vld [vmem:[#allocation13_spill] sm:$0xff]  ;;  %v6908_v30 = vld [vmem:[#allocation16_spill] sm:$0xff]  ;;  %v6916_v1 = vld [vmem:[#allocation7_spill] sm:$0xff] }
 0x162   :  { %v5679_v60 = vpop.f32.mrf.mxu1  ;;  %v1197_v24 = vadd.f32 %v3901_v23, %v1100_v25  ;;  %v3910_v50 = vadd.f32 %v6908_v30, %v6907_v39 }
 0x163   :  { %v4245_v53 = vpop.f32.mrf.mxu0 }
 0x164   :  { %v5654_v49 = vadd.f32 %v4245_v53, %v1173_v40  ;;  %v3918_v16 = vpop.f32.mrf.mxu1 }
 0x165   :  { %v1261_v48 = vpop.f32.mrf.mxu0 }
 0x166   :  { %v5647_v52 = vadd.f32 %v1261_v48, %v1165_v45  ;;  %v1350_v62 = vmul.f32 %v5654_v49, %v5654_v49  ;;  %v1103_v48 = vadd.f32 %v3840_v20, %v6900_v59  ;;  %v6903_v45 = vld [vmem:[#allocation4_spill] sm:$0xff] }
 0x167   :  { %v4246_v2 = vpop.f32.mrf.mxu0  ;;  %v1108_v6 = vadd.f32 %v3843_v57, %v6903_v45  ;;  %v6913_v57 = vld [vmem:[#allocation17_spill] sm:$0xff] }
 0x168   :  { %v1348_v5 = vmul.f32 %v5647_v52, %v5647_v52  ;;  %v5666_v19 = vadd.f32 %v4246_v2, %v1176_v35 }
 0x169   :  { %v1264_v3 = vpop.f32.mrf.mxu0 }
 0x16a   :  { %v5656_v31 = vadd.f32 %v1264_v3, %v1168_v26  ;;  %v1351_v18 = vmul.f32 %v5666_v19, %v5666_v19  ;;  %v6906_v3 = vld [vmem:[#allocation5_spill] sm:$0xff] }
 0x16b   :  { %v4249_v36 = vpop.f32.mrf.mxu0 }
 0x16c   :  { %v1326_v53 = vadd.f32 %v5656_v31, %v5647_v52  ;;  %v1349_v4 = vmul.f32 %v5656_v31, %v5656_v31  ;;  %v5697_v44 = vadd.f32 %v4249_v36, %v1189_v58  ;;  %v3913_v36 = vadd.f32 %v5627_v15, %v6910_v11  ;;  %v6914_v58 = vld [vmem:[#allocation18_spill] sm:$0xff] }
 0x16d   :  { %v1277_v37 = vpop.f32.mrf.mxu0 }
 0x16e   :  { %v1327_v10 = vadd.f32 %v1326_v53, %v5654_v49  ;;  %v1364_v8 = vadd.f32 %v1349_v4, %v1348_v5  ;;  %v5684_v55 = vadd.f32 %v1277_v37, %v1181_v14  ;;  %v1111_v14 = vadd.f32 %v3846_v27, %v6906_v3  ;;  %v3920_v53 = vpop.f32.mrf.mxu1  ;;  %v6915_v27 = vld [vmem:[#allocation20_spill] sm:$0xff] }
 0x16f   :  { %v4250_v54 = vpop.f32.mrf.mxu0  ;;  %v1354_v4 = vmul.f32 %v5697_v44, %v5697_v44  ;;  %v3858_v46 = vadd.f32 %v5623_v38, %v6915_v27  ;;  %v6917_v38 = vld [vmem:[#allocation8_spill] sm:$0xff] }
 0x170   :  { %v1365_v12 = vadd.f32 %v1364_v8, %v1350_v62  ;;  %v1328_v28 = vadd.f32 %v1327_v10, %v5666_v19  ;;  %v1352_v61 = vmul.f32 %v5684_v55, %v5684_v55  ;;  %v5710_v26 = vadd.f32 %v4250_v54, %v1192_v41  ;;  %v6911_v10 = vld [vmem:[#allocation14_spill] sm:$0xff]  ;;  %v6912_v8 = vld [vmem:[#allocation15_spill] sm:$0xff] }
 0x171   :  { %v1280_v13 = vpop.f32.mrf.mxu0  ;;  %v1030_v62 = vadd.f32 %v3794_v7, %v3730_v29  ;;  %v3852_v20 = vadd.f32 %v6912_v8, %v6911_v10  ;;  %v3855_v54 = vadd.f32 %v6914_v58, %v6913_v57  ;;  %v1200_v41 = vadd.f32 %v3904_v47, %v1103_v48 }
 0x172   :  { %v1329_v21 = vadd.f32 %v1328_v28, %v5684_v55  ;;  %v1366_v51 = vadd.f32 %v1365_v12, %v1351_v18  ;;  %v5702_v9 = vadd.f32 %v1280_v13, %v1184_v56  ;;  %v1205_v56 = vadd.f32 %v3907_v22, %v1108_v6 }
 0x173   :  { %v4253_v2 = vpop.f32.mrf.mxu0  ;;  %v1355_v15 = vmul.f32 %v5710_v26, %v5710_v26  ;;  %v1208_v29 = vadd.f32 %v3910_v50, %v1111_v14  ;;  %v1119_v45 = vadd.f32 %v3852_v20, %v6916_v1  ;;  %v3916_v48 = vadd.f32 %v5652_v33, %v5643_v63 }
 0x174   :  { %v1367_v40 = vadd.f32 %v1366_v51, %v1352_v61  ;;  %v1330_v0 = vadd.f32 %v1329_v21, %v5702_v9  ;;  %v1353_v35 = vmul.f32 %v5702_v9, %v5702_v9  ;;  %v5735_v13 = vadd.f32 %v4253_v2, %v1205_v56  ;;  %v3921_v21 = vpop.f32.mrf.mxu1 }
 0x175   :  { %v1293_v5 = vpop.f32.mrf.mxu0  ;;  %v1124_v47 = vadd.f32 %v3855_v54, %v6917_v38  ;;  %v3919_v6 = vadd.f32 %v3918_v16, %v5679_v60 }
 0x176   :  { %v1331_v25 = vadd.f32 %v1330_v0, %v5697_v44  ;;  %v1368_v23 = vadd.f32 %v1367_v40, %v1353_v35  ;;  %v5724_v37 = vadd.f32 %v1293_v5, %v1197_v24  ;;  %v1213_v24 = vadd.f32 %v3913_v36, %v1116_v43 }
 0x177   :  { %v4254_v18 = vpop.f32.mrf.mxu0  ;;  %v1127_v0 = vadd.f32 %v3858_v46, %v1030_v62  ;;  %v3922_v35 = vadd.f32 %v3921_v21, %v3920_v53  ;;  %v1358_v14 = vmul.f32 %v5735_v13, %v5735_v13  ;;  %v1221_v60 = vadd.f32 %v3919_v6, %v1124_v47 }
 0x178   :  { %v1369_v12 = vadd.f32 %v1368_v23, %v1354_v4  ;;  %v1332_v28 = vadd.f32 %v1331_v25, %v5710_v26  ;;  %v1356_v51 = vmul.f32 %v5724_v37, %v5724_v37  ;;  %v5747_v22 = vadd.f32 %v4254_v18, %v1208_v29 }
 0x179   :  { %v1296_v7 = vpop.f32.mrf.mxu0  ;;  %v1216_v43 = vadd.f32 %v3916_v48, %v1119_v45  ;;  %v1224_v36 = vadd.f32 %v3922_v35, %v1127_v0 }
 0x17a   :  { %v1333_v61 = vadd.f32 %v1332_v28, %v5724_v37  ;;  %v1370_v59 = vadd.f32 %v1369_v12, %v1355_v15  ;;  %v5740_v34 = vadd.f32 %v1296_v7, %v1200_v41  ;;  %v1359_v30 = vmul.f32 %v5747_v22, %v5747_v22 }
 0x17b   :  { %v4257_v42 = vpop.f32.mrf.mxu0 }
 0x17c   :  { %v1371_v17 = vadd.f32 %v1370_v59, %v1356_v51  ;;  %v1334_v2 = vadd.f32 %v1333_v61, %v5740_v34  ;;  %v1357_v40 = vmul.f32 %v5740_v34, %v5740_v34  ;;  %v5760_v11 = vadd.f32 %v4257_v42, %v1221_v60 }
 0x17d   :  { %v1309_v3 = vpop.f32.mrf.mxu0 }
 0x17e   :  { %v1335_v63 = vadd.f32 %v1334_v2, %v5735_v13  ;;  %v1372_v33 = vadd.f32 %v1371_v17, %v1357_v40  ;;  %v5755_v39 = vadd.f32 %v1309_v3, %v1213_v24  ;;  %v1362_v57 = vmul.f32 %v5760_v11, %v5760_v11 }
 0x17f   :  { %v4258_v16 = vpop.f32.mrf.mxu0 }
 0x180   :  { %v1373_v50 = vadd.f32 %v1372_v33, %v1358_v14  ;;  %v1336_v32 = vadd.f32 %v1335_v63, %v5747_v22  ;;  %v1360_v4 = vmul.f32 %v5755_v39, %v5755_v39  ;;  %v5765_v10 = vadd.f32 %v4258_v16, %v1224_v36 }
 0x181   :  { %v1312_v5 = vpop.f32.mrf.mxu0 }
 0x182   :  { %v1337_v53 = vadd.f32 %v1336_v32, %v5755_v39  ;;  %v1374_v25 = vadd.f32 %v1373_v50, %v1359_v30  ;;  %v1313_v23 = vadd.f32 %v1312_v5, %v1216_v43  ;;  %v1363_v56 = vmul.f32 %v5765_v10, %v5765_v10  ;;  %v5816_v30 = vld [vmem:[%s6859_s8] ss:$0 sm:$0xff] }
 0x184   :  { %v1375_v62 = vadd.f32 %v1374_v25, %v1360_v4  ;;  %v1338_v8 = vadd.f32 %v1337_v53, %v1313_v23  ;;  %v1361_v20 = vmul.f32 %v1313_v23, %v1313_v23 }
 0x186   :  { %v1339_v58 = vadd.f32 %v1338_v8, %v5760_v11  ;;  %v1376_v54 = vadd.f32 %v1375_v62, %v1361_v20 }
 0x188   :  { %v1340_v18 = vadd.f32 %v1339_v58, %v5765_v10  ;;  %v1377_v15 = vadd.f32 %v1376_v54, %v1362_v57 }
 0x18a   :  { %v1341_v12 = vrot.slane %v1340_v18, 4  ;;  %v1378_v28 = vadd.f32 %v1377_v15, %v1363_v56 }
 0x18c   :  { %v1342_v41 = vadd.f32 %v1341_v12, %v1340_v18  ;;  %v1379_v27 = vrot.slane %v1378_v28, 4  ;;  %v1869_v18 = vld [vmem:[#allocation2 + $0x1] sm:$0xff] }
 0x18e   :  { %v1343_v46 = vrot.slane %v1342_v41, 2  ;;  %v1380_v29 = vadd.f32 %v1379_v27, %v1378_v28 }
 0x190   :  { %v1344_v7 = vadd.f32 %v1343_v46, %v1342_v41  ;;  %v1381_v24 = vrot.slane %v1380_v29, 2 }
 0x192   :  { %v1345_v21 = vrot.slane %v1344_v7, 1  ;;  %v1382_v61 = vadd.f32 %v1381_v24, %v1380_v29 }
 0x194   :  { %v1346_v51 = vadd.f32 %v1345_v21, %v1344_v7  ;;  %v1383_v59 = vrot.slane %v1382_v61, 1 }
 0x196   :  { %v5773_v1 = vmul.f32 0.0078125, %v1346_v51  ;;  %v1384_v45 = vadd.f32 %v1383_v59, %v1382_v61 }
 0x198   :  { %v1385_v48 = vmul.f32 0.0078125, %v1384_v45  ;;  %v1386_v38 = vmul.f32 %v5773_v1, %v5773_v1  ;;  %v1402_v47 = vsub.f32 %v1313_v23, %v5773_v1  ;;  %v1389_v6 = vsub.f32 %v5647_v52, %v5773_v1 }
 0x199   :  { %v1390_v42 = vsub.f32 %v5656_v31, %v5773_v1  ;;  %v1391_v17 = vsub.f32 %v5654_v49, %v5773_v1  ;;  %v1392_v2 = vsub.f32 %v5666_v19, %v5773_v1  ;;  %v1393_v40 = vsub.f32 %v5684_v55, %v5773_v1 }
 0x19a   :  { %v1387_v0 = vsub.f32 %v1385_v48, %v1386_v38  ;;  %v1394_v35 = vsub.f32 %v5702_v9, %v5773_v1  ;;  %v1395_v3 = vsub.f32 %v5697_v44, %v5773_v1  ;;  %v1396_v52 = vsub.f32 %v5710_v26, %v5773_v1 }
 0x19b   :  { %v1397_v31 = vsub.f32 %v5724_v37, %v5773_v1  ;;  %v1398_v49 = vsub.f32 %v5740_v34, %v5773_v1  ;;  %v1399_v19 = vsub.f32 %v5735_v13, %v5773_v1  ;;  %v1400_v55 = vsub.f32 %v5747_v22, %v5773_v1  ;;  %v5811_v13 = vld [vmem:[%s6858_s7] ss:$0 sm:$0xff] }
 0x19c   :  { %v1388_v14 = vmax.f32 %v1387_v0, 0.0  ;;  %v1401_v9 = vsub.f32 %v5755_v39, %v5773_v1  ;;  %v1403_v44 = vsub.f32 %v5760_v11, %v5773_v1  ;;  %v1404_v26 = vsub.f32 %v5765_v10, %v5773_v1 }
 0x19e   :  { %v1405_v37 = vadd.f32 1e-05, %v1388_v14  ;;  %v1893_v14 = vld [vmem:[#allocation2 + $0x2] sm:$0xff] }
 0x1a0   :  { %4492 = vrsqrt.f32 %v1405_v37 }
 0x1ad   :  { %v4493_v63 = vpop.eup %4492 }
 0x1ae   :  { %v1420_v34 = vmul.f32 %v4493_v63, %v1402_v47  ;;  %v1407_v33 = vmul.f32 %v4493_v63, %v1389_v6  ;;  %v1408_v60 = vmul.f32 %v4493_v63, %v1390_v42  ;;  %v1409_v16 = vmul.f32 %v4493_v63, %v1391_v17 }
 0x1af   :  { %v1410_v50 = vmul.f32 %v4493_v63, %v1392_v2  ;;  %v1411_v32 = vmul.f32 %v4493_v63, %v1393_v40  ;;  %v1412_v43 = vmul.f32 %v4493_v63, %v1394_v35  ;;  %v1413_v36 = vmul.f32 %v4493_v63, %v1395_v3 }
 0x1b0   :  { %v1442_v5 = vmul.f32 %v5811_v13, %v1420_v34  ;;  %v1429_v53 = vmul.f32 %v5811_v13, %v1407_v33  ;;  %v1430_v4 = vmul.f32 %v5811_v13, %v1408_v60  ;;  %v1431_v25 = vmul.f32 %v5811_v13, %v1409_v16 }
 0x1b1   :  { %v1432_v23 = vmul.f32 %v5811_v13, %v1410_v50  ;;  %v1433_v62 = vmul.f32 %v5811_v13, %v1411_v32  ;;  %v1434_v8 = vmul.f32 %v5811_v13, %v1412_v43  ;;  %v1435_v20 = vmul.f32 %v5811_v13, %v1413_v36 }
 0x1b2   :  { %v5827_v57 = vadd.f32 %v5816_v30, %v1442_v5  ;;  %v1451_v58 = vadd.f32 %v5816_v30, %v1429_v53  ;;  %v1452_v54 = vadd.f32 %v5816_v30, %v1430_v4  ;;  %v1453_v56 = vadd.f32 %v5816_v30, %v1431_v25 }
 0x1b3   :  { %v1454_v15 = vadd.f32 %v5816_v30, %v1432_v23  ;;  %v1455_v12 = vadd.f32 %v5816_v30, %v1433_v62  ;;  %v1456_v28 = vadd.f32 %v5816_v30, %v1434_v8  ;;  %v1457_v41 = vadd.f32 %v5816_v30, %v1435_v20  ;;  %v4453_v23 = vld [vmem:[%s6857_s6 + $0x138] sm:$0xff]  }
 0x1b4   :  { %v1480_v27 = vmax.f32 %v5827_v57, 0.0  ;;  %v5837_v46 = vmax.f32 %v1451_v58, 0.0  ;;  %v5839_v29 = vmax.f32 %v1452_v54, 0.0  ;;  %v5841_v7 = vmax.f32 %v1453_v56, 0.0  ;;  %v4459_v62 = vld [vmem:[%s6857_s6 + $0x1b8] sm:$0xff]   ;;  %v4461_v54 = vld [vmem:[%s6857_s6 + $0x1f0] sm:$0xff]  }
 0x1b5   :  { %v5843_v24 = vmax.f32 %v1454_v15, 0.0  ;;  %v5845_v21 = vmax.f32 %v1455_v12, 0.0  ;;  %v5847_v61 = vmax.f32 %v1456_v28, 0.0  ;;  %v5849_v51 = vmax.f32 %v1457_v41, 0.0  ;;  %v4455_v12 = vld [vmem:[%s6857_s6 + $0x130] sm:$0xff]   ;;  %v4456_v41 = vld [vmem:[%s6857_s6 + $0x168] sm:$0xff]  }
 0x1b6   :  { %1842 = vst [vmem:[#allocation2 + $0x101] sm:$0xff] %v1480_v27  ;;  %1829 = vst [vmem:[#allocation2 + $0x11] sm:$0xff] %v5837_v46  ;;  %v1885_v59 = vpack.c.bf16 %v5837_v46, %v1869_v18  ;;  %v5859_v45 = vpack.c.bf16 %v5841_v7, %v5839_v29  ;;  %v1414_v48 = vmul.f32 %v4493_v63, %v1396_v52  ;;  %v6918_v36 = vmov 0.0  }
 0x1b7   :  { %1830 = vst [vmem:[#allocation2 + $0x21] sm:$0xff] %v5839_v29  ;;  %1831 = vst [vmem:[#allocation2 + $0x31] sm:$0xff] %v5841_v7  ;;  %v1415_v38 = vmul.f32 %v4493_v63, %v1397_v31  ;;  %v5865_v47 = vpack.c.bf16 %v5845_v21, %v5843_v24  ;;  %v5871_v6 = vpack.c.bf16 %v5849_v51, %v5847_v61 }
 0x1b8   :  { %1832 = vst [vmem:[#allocation2 + $0x41] sm:$0xff] %v5843_v24  ;;  %1833 = vst [vmem:[#allocation2 + $0x51] sm:$0xff] %v5845_v21  ;;  %v1416_v42 = vmul.f32 %v4493_v63, %v1398_v49  ;;  %v1417_v17 = vmul.f32 %v4493_v63, %v1399_v19  ;;  %2670 = vmatprep.mubr.bf16.mxu0 %v1885_v59  ;;  %v1436_v2 = vmul.f32 %v5811_v13, %v1414_v48  ;;  %v4463_v59 = vld [vmem:[%s6857_s6 + $0x1b0] sm:$0xff]  }
 0x1b9   :  { %1834 = vst [vmem:[#allocation2 + $0x61] sm:$0xff] %v5847_v61  ;;  %1835 = vst [vmem:[#allocation2 + $0x71] sm:$0xff] %v5849_v51  ;;  %v1437_v40 = vmul.f32 %v5811_v13, %v1415_v38  ;;  %v1418_v0 = vmul.f32 %v4493_v63, %v1400_v55  ;;  %v1419_v35 = vmul.f32 %v4493_v63, %v1401_v9 }
 0x1ba   :  { %v1438_v3 = vmul.f32 %v5811_v13, %v1416_v42  ;;  %v1439_v52 = vmul.f32 %v5811_v13, %v1417_v17  ;;  %v1421_v31 = vmul.f32 %v4493_v63, %v1403_v44  ;;  %v1422_v49 = vmul.f32 %v4493_v63, %v1404_v26 }
 0x1bb   :  { %v1458_v19 = vadd.f32 %v5816_v30, %v1436_v2  ;;  %v1459_v22 = vadd.f32 %v5816_v30, %v1437_v40  ;;  %v1440_v55 = vmul.f32 %v5811_v13, %v1418_v0  ;;  %v1441_v39 = vmul.f32 %v5811_v13, %v1419_v35  ;;  %v4465_v2 = vld [vmem:[%s6857_s6 + $0x1e8] sm:$0xff]  }
 0x1bc   :  { %v1460_v9 = vadd.f32 %v5816_v30, %v1438_v3  ;;  %v1461_v37 = vadd.f32 %v5816_v30, %v1439_v52  ;;  %v1443_v11 = vmul.f32 %v5811_v13, %v1421_v31  ;;  %v1444_v44 = vmul.f32 %v5811_v13, %v1422_v49  ;;  %v4458_v49 = vld [vmem:[%s6857_s6 + $0x128] sm:$0xff]  }
 0x1bd   :  { %v5897_v34 = vmax.f32 %v1458_v19, 0.0  ;;  %v5899_v10 = vmax.f32 %v1459_v22, 0.0  ;;  %v1462_v1 = vadd.f32 %v5816_v30, %v1440_v55  ;;  %v1463_v26 = vadd.f32 %v5816_v30, %v1441_v39  ;;  %v1917_v63 = vld [vmem:[#allocation2 + $0x10] sm:$0xff]  ;;  %v4460_v22 = vld [vmem:[%s6857_s6 + $0x160] sm:$0xff]   ;;  %v4467_v55 = vld [vmem:[%s6857_s6 + $0x1a8] sm:$0xff]  }
 0x1be   :  { %v1918_v33 = vld [vmem:[#allocation2 + $0x20] sm:$0xff]  ;;  %v5903_v60 = vld [vmem:[#allocation2 + $0x12] sm:$0xff]  ;;  %v5905_v16 = vmax.f32 %v1460_v9, 0.0  ;;  %v5907_v50 = vmax.f32 %v1461_v37, 0.0  ;;  %v1465_v32 = vadd.f32 %v5816_v30, %v1443_v11  ;;  %v1466_v13 = vadd.f32 %v5816_v30, %v1444_v44 }
 0x1bf   :  { %v1933_v43 = vpack.c.bf16 %v1918_v33, %v1917_v63  ;;  %v1861_v5 = vpack.c.bf16 %v1917_v63, %v6918_v36  ;;  %v1909_v53 = vpack.c.bf16 %v5903_v60, %v1893_v14  ;;  %v1919_v4 = vld [vmem:[#allocation2 + $0x30] sm:$0xff]  ;;  %v5913_v25 = vld [vmem:[#allocation2 + $0x40] sm:$0xff]  ;;  %1836 = vst [vmem:[#allocation2 + $0x81] sm:$0xff] %v5897_v34  ;;  %1837 = vst [vmem:[#allocation2 + $0xb1] sm:$0xff] %v5899_v10  ;;  %v5932_v20 = vmax.f32 %v1462_v1, 0.0 }
 0x1c0   :  { %v4454_v30 = vld [vmem:[%s6857_s6 + $0x170] sm:$0xff]   ;;  %1838 = vst [vmem:[#allocation2 + $0xc1] sm:$0xff] %v5905_v16  ;;  %1839 = vst [vmem:[#allocation2 + $0xd1] sm:$0xff] %v5907_v50  ;;  %v5930_v8 = vpack.c.bf16 %v5907_v50, %v5905_v16  ;;  %v1934_v58 = vpack.c.bf16 %v5913_v25, %v1919_v4  ;;  %v5938_v56 = vmax.f32 %v1463_v26, 0.0  ;;  %v5942_v18 = vmax.f32 %v1465_v32, 0.0  ;;  %v5969_v42 = vld [vmem:[#allocation2 + $0x22] sm:$0xff] }
 0x1c1   :  { %2767 = vmatprep.mubr.bf16.mxu1 %v1933_v43  ;;  %2671 = vmatmul.mubr.bf16.vlgmr.msra.gmra.mxu0 %v1861_v5  ;;  %1840 = vst [vmem:[#allocation2 + $0xe1] sm:$0xff] %v5932_v20  ;;  %v5944_v15 = vmax.f32 %v1466_v13, 0.0  ;;  %v1957_v38 = vpack.c.bf16 %v5839_v29, %v5837_v46  ;;  %v5971_v17 = vld [vmem:[#allocation2 + $0x32] sm:$0xff]  ;;  %v1958_v57 = vpack.c.bf16 %v5843_v24, %v5841_v7  ;;  %v1922_v0 = vld [vmem:[#allocation2 + $0x60] sm:$0xff] }
 0x1c2   :  { %2768 = vmatmul.mubr.bf16.vlgmr.msra.gmra.mxu1 %v1909_v53  ;;  %2678 = vmatprep.mubr.bf16.mxu0 %v5859_v45  ;;  %1841 = vst [vmem:[#allocation2 + $0xf1] sm:$0xff] %v5938_v56  ;;  %v5952_v28 = vpack.c.bf16 %v5938_v56, %v5932_v20  ;;  %1843 = vst [vmem:[#allocation2 + $0x111] sm:$0xff] %v5942_v18  ;;  %v5964_v48 = vpack.c.bf16 %v5942_v18, %v1480_v27  ;;  %v1921_v40 = vld [vmem:[#allocation2 + $0x50] sm:$0xff]  ;;  %v4469_v14 = vld [vmem:[%s6857_s6 + $0x1e0] sm:$0xff]  }
 0x1c3   :  { %2775 = vmatprep.mubr.bf16.mxu1 %v1934_v58  ;;  %4084 = vmatpush3.bf16.msra.mxu0 %v4453_v23  ;;  %1844 = vst [vmem:[#allocation2 + $0x121] sm:$0xff] %v5944_v15  ;;  %v1959_v27 = vpack.c.bf16 %v5847_v61, %v5845_v21  ;;  %v1960_v35 = vpack.c.bf16 %v5897_v34, %v5849_v51  ;;  %v4462_v9 = vld [vmem:[%s6857_s6 + $0x120] sm:$0xff]   ;;  %v4464_v37 = vld [vmem:[%s6857_s6 + $0x158] sm:$0xff]   ;;  %v1923_v63 = vld [vmem:[#allocation2 + $0x70] sm:$0xff] }
 0x1c4   :  { %4085 = vmatprep.subr.bf16.mxu0 %v4454_v30  ;;  %4148 = vmatpush3.bf16.msra.mxu1 %v4459_v62  ;;  %v1961_v3 = vpack.c.bf16 %v5905_v16, %v5899_v10  ;;  %v1962_v52 = vpack.c.bf16 %v5932_v20, %v5907_v50  ;;  %v5986_v31 = vpack.c.bf16 %v1919_v4, %v1918_v33  ;;  %v4471_v11 = vld [vmem:[%s6857_s6 + $0x1a0] sm:$0xff]   ;;  %v6018_v1 = vld [vmem:[#allocation2 + $0x52] sm:$0xff]  ;;  %v4472_v62 = vld [vmem:[%s6857_s6 + $0x148] sm:$0xff]   ;;  %v6228_v20 = vpop.f32.mrf.mxu1 }
 0x1c5   :  { %4149 = vmatprep.subr.bf16.mxu1 %v4461_v54  ;;  %v5993_v19 = vpack.c.bf16 %v5971_v17, %v5969_v42  ;;  %v1935_v39 = vpack.c.bf16 %v1922_v0, %v1921_v40  ;;  %v6016_v44 = vld [vmem:[#allocation2 + $0x42] sm:$0xff]  ;;  %v4473_v26 = vld [vmem:[%s6857_s6 + $0x1d8] sm:$0xff]   ;;  %v6026_v32 = vpack.c.bf16 %v1921_v40, %v5913_v25  ;;  %v1964_v43 = vpack.c.bf16 %v5944_v15, %v5942_v18  ;;  %v4468_v5 = vld [vmem:[%s6857_s6 + $0x150] sm:$0xff]  }
 0x1c6   :  { %v6023_v33 = vld [vmem:[#allocation2 + $0x80] sm:$0xff]  ;;  %v4466_v13 = vld [vmem:[%s6857_s6 + $0x118] sm:$0xff]   ;;  %v6035_v36 = vpack.c.bf16 %v6018_v1, %v6016_v44  ;;  %v4476_v25 = vld [vmem:[%s6857_s6 + $0x1d0] sm:$0xff]   ;;  %v6066_v40 = vpack.c.bf16 %v1923_v63, %v1922_v0  ;;  %6919 = vst [vmem:[#allocation3_spill] sm:$0xff] %v6228_v20 }
 0x1c7   :  { %4086 = vmatpush3.bf16.msra.mxu0 %v4455_v12  ;;  %v4475_v53 = vld [vmem:[%s6857_s6 + $0x198] sm:$0xff]   ;;  %v1936_v4 = vpack.c.bf16 %v6023_v33, %v1923_v63  ;;  %v4470_v23 = vld [vmem:[%s6857_s6 + $0x110] sm:$0xff]   ;;  %v1877_v30 = vld [vmem:[#allocation2 + $0xa1] sm:$0xff] }
 0x1c8   :  { %4087 = vmatprep.subr.bf16.mxu0 %v4456_v41  ;;  %4150 = vmatpush3.bf16.msra.mxu1 %v4463_v59  ;;  %v4477_v58 = vld [vmem:[%s6857_s6 + $0x190] sm:$0xff]   ;;  %v6059_v54 = vld [vmem:[#allocation2 + $0x62] sm:$0xff]  ;;  %v4488_v29 = vld [vmem:[%s6857_s6 + $0x218] sm:$0xff]  }
 0x1c9   :  { %2679 = vmatmul.mubr.bf16.gmra.mxu0 %v5986_v31  ;;  %4151 = vmatprep.subr.bf16.mxu1 %v4465_v2  ;;  %v6061_v12 = vld [vmem:[#allocation2 + $0x72] sm:$0xff]  ;;  %v4479_v41 = vld [vmem:[%s6857_s6 + $0x1c8] sm:$0xff]   ;;  %v1926_v2 = vld [vmem:[#allocation2 + $0xc0] sm:$0xff] }
 0x1ca   :  { %2776 = vmatmul.mubr.bf16.gmra.mxu1 %v5993_v19  ;;  %2686 = vmatprep.mubr.bf16.mxu0 %v5865_v47  ;;  %v1925_v59 = vld [vmem:[#allocation2 + $0xb0] sm:$0xff]  ;;  %v4481_v0 = vld [vmem:[%s6857_s6 + $0x188] sm:$0xff]   ;;  %v4487_v46 = vld [vmem:[%s6857_s6 + $0x220] sm:$0xff]  }
 0x1cb   :  { %2783 = vmatprep.mubr.bf16.mxu1 %v1935_v39  ;;  %4088 = vmatpush3.bf16.msra.mxu0 %v4458_v49  ;;  %v4474_v49 = vld [vmem:[%s6857_s6 + $0x108] sm:$0xff]   ;;  %v4478_v39 = vld [vmem:[%s6857_s6 + $0x140] sm:$0xff]   ;;  %v4489_v24 = vld [vmem:[%s6857_s6 + $0x210] sm:$0xff]  }
 0x1cc   :  { %4089 = vmatprep.subr.bf16.mxu0 %v4460_v22  ;;  %4152 = vmatpush3.bf16.msra.mxu1 %v4467_v55  ;;  %v6073_v22 = vpack.c.bf16 %v6061_v12, %v6059_v54  ;;  %v1889_v55 = vpack.c.bf16 %v5899_v10, %v1877_v30  ;;  %v1901_v63 = vld [vmem:[#allocation2 + $0xa2] sm:$0xff]  ;;  %v2029_v16 = vld [vmem:[#allocation2 + $0x131] sm:$0xff] }
 0x1cd   :  { %4153 = vmatprep.subr.bf16.mxu1 %v4469_v14  ;;  %v1937_v14 = vpack.c.bf16 %v1926_v2, %v1925_v59  ;;  %v2026_v51 = vld [vmem:[#allocation2 + $0x101] sm:$0xff] }
 0x1ce   :  { %v1980_v10 = vld [vmem:[#allocation2 + $0x122] sm:$0xff] }
 0x1cf   :  { %4090 = vmatpush3.bf16.msra.mxu0 %v4462_v9  ;;  %v4482_v9 = vld [vmem:[%s6857_s6 + $0x1c0] sm:$0xff]  }
 0x1d0   :  { %4091 = vmatprep.subr.bf16.mxu0 %v4464_v37  ;;  %4154 = vmatpush3.bf16.msra.mxu1 %v4471_v11  ;;  %v4480_v37 = vld [vmem:[%s6857_s6 + $0x100] sm:$0xff]  }
 0x1d1   :  { %2687 = vmatmul.mubr.bf16.gmra.mxu0 %v6026_v32  ;;  %4155 = vmatprep.subr.bf16.mxu1 %v4473_v26  ;;  %v4483_v11 = vld [vmem:[%s6857_s6 + $0x180] sm:$0xff]   ;;  %v4484_v26 = vld [vmem:[%s6857_s6 + $0x238] sm:$0xff]  }
 0x1d2   :  { %2784 = vmatmul.mubr.bf16.gmra.mxu1 %v6035_v36  ;;  %2694 = vmatprep.mubr.bf16.mxu0 %v5871_v6 }
 0x1d3   :  { %2791 = vmatprep.mubr.bf16.mxu1 %v1936_v4  ;;  %4092 = vmatpush3.bf16.msra.mxu0 %v4466_v13  ;;  %v6096_v13 = vld [vmem:[#allocation2 + $0xb2] sm:$0xff]  ;;  %v6098_v4 = vld [vmem:[#allocation2] sm:$0xff] }
 0x1d4   :  { %4093 = vmatprep.subr.bf16.mxu0 %v4468_v5  ;;  %4156 = vmatpush3.bf16.msra.mxu1 %v4475_v53  ;;  %v1927_v5 = vld [vmem:[#allocation2 + $0xd0] sm:$0xff]  ;;  %v1928_v53 = vld [vmem:[#allocation2 + $0xe0] sm:$0xff]  ;;  %v2009_v21 = vpack.c.bf16 %v6098_v4, %v6023_v33 }
 0x1d5   :  { %4157 = vmatprep.subr.bf16.mxu1 %v4476_v25  ;;  %v1865_v25 = vpack.c.bf16 %v1925_v59, %v6098_v4  ;;  %v1938_v30 = vpack.c.bf16 %v1928_v53, %v1927_v5 }
 0x1d7   :  { %4094 = vmatpush3.bf16.msra.mxu0 %v4470_v23  ;;  %v1913_v23 = vpack.c.bf16 %v6096_v13, %v1901_v63 }
 0x1d8   :  { %4095 = vmatprep.subr.bf16.mxu0 %v4472_v62  ;;  %4158 = vmatpush3.bf16.msra.mxu1 %v4477_v58  ;;  %v6103_v62 = vld [vmem:[#allocation2 + $0xc2] sm:$0xff]  ;;  %v6105_v58 = vld [vmem:[#allocation2 + $0xd2] sm:$0xff] }
 0x1d9   :  { %2695 = vmatmul.mubr.bf16.gmra.mxu0 %v6066_v40  ;;  %4159 = vmatprep.subr.bf16.mxu1 %v4479_v41  ;;  %v1929_v41 = vld [vmem:[#allocation2 + $0xf0] sm:$0xff]  ;;  %v6111_v59 = vpack.c.bf16 %v6105_v58, %v6103_v62  ;;  %v1985_v61 = vpack.c.bf16 %v6103_v62, %v6096_v13 }
 0x1da   :  { %2792 = vmatmul.mubr.bf16.gmra.mxu1 %v6073_v22  ;;  %2702 = vmatprep.mubr.bf16.mxu0 %v1889_v55  ;;  %v6107_v55 = vpack.c.bf16 %v1927_v5, %v1926_v2  ;;  %v6122_v2 = vpack.c.bf16 %v1929_v41, %v1928_v53  ;;  %v6132_v5 = vld [vmem:[#allocation2 + $0x102] sm:$0xff] }
 0x1db   :  { %2799 = vmatprep.mubr.bf16.mxu1 %v1937_v14  ;;  %4096 = vmatpush3.bf16.msra.mxu0 %v4474_v49  ;;  %v1930_v49 = vld [vmem:[#allocation2 + $0x100] sm:$0xff]  ;;  %v6118_v14 = vld [vmem:[#allocation2 + $0xf2] sm:$0xff] }
 0x1dc   :  { %4097 = vmatprep.subr.bf16.mxu0 %v4478_v39  ;;  %4160 = vmatpush3.bf16.msra.mxu1 %v4481_v0  ;;  %v1939_v39 = vpack.c.bf16 %v1930_v49, %v1929_v41  ;;  %v6116_v0 = vld [vmem:[#allocation2 + $0xe2] sm:$0xff]  ;;  %v4485_v41 = vld [vmem:[%s6857_s6 + $0x230] sm:$0xff]  }
 0x1dd   :  { %4161 = vmatprep.subr.bf16.mxu1 %v4482_v9  ;;  %v1931_v9 = vld [vmem:[#allocation2 + $0x110] sm:$0xff] }
 0x1df   :  { %4098 = vmatpush3.bf16.msra.mxu0 %v4480_v37  ;;  %v6120_v37 = vld [vmem:[#allocation2 + $0x120] sm:$0xff] }
 0x1e0   :  { %4162 = vmatpush3.bf16.msra.mxu1 %v4483_v11  ;;  %4291 = vmatprep.subr.bf16.mxu0 %v4484_v26  ;;  %v6126_v11 = vpack.c.bf16 %v6118_v14, %v6116_v0  ;;  %v1940_v63 = vpack.c.bf16 %v6120_v37, %v1931_v9  ;;  %v2013_v50 = vpack.c.bf16 %v6098_v4, %v6120_v37 }
 0x1e1   :  { %2703 = vmatmul.mubr.bf16.gmra.mxu0 %v1865_v25  ;;  %4323 = vmatprep.subr.bf16.mxu1 %v4484_v26  ;;  %v6134_v25 = vld [vmem:[#allocation2 + $0x112] sm:$0xff] }
 0x1e2   :  { %2800 = vmatmul.mubr.bf16.gmra.mxu1 %v1913_v23  ;;  %2710 = vmatprep.mubr.bf16.mxu0 %v5930_v8  ;;  %v6136_v23 = vpack.c.bf16 %v1931_v9, %v1930_v49  ;;  %v6140_v53 = vpack.c.bf16 %v6134_v25, %v6132_v5 }
 0x1e3   :  { %2807 = vmatprep.mubr.bf16.mxu1 %v1938_v30  ;;  %v1981_v30 = vpack.c.bf16 %v5969_v42, %v5903_v60  ;;  %v1983_v60 = vpack.c.bf16 %v6059_v54, %v6018_v1  ;;  %v4490_v42 = vld [vmem:[%s6857_s6 + $0x208] sm:$0xff]  }
 0x1e9   :  { %2711 = vmatmul.mubr.bf16.gmra.mxu0 %v6107_v55 }
 0x1ea   :  { %2808 = vmatmul.mubr.bf16.gmra.mxu1 %v6111_v59  ;;  %2718 = vmatprep.mubr.bf16.mxu0 %v5952_v28 }
 0x1eb   :  { %2815 = vmatprep.mubr.bf16.mxu1 %v1939_v39 }
 0x1f1   :  { %2719 = vmatmul.mubr.bf16.gmra.mxu0 %v6122_v2 }
 0x1f2   :  { %2816 = vmatmul.mubr.bf16.gmra.mxu1 %v6126_v11  ;;  %2726 = vmatprep.mubr.bf16.mxu0 %v5964_v48  ;;  %v1982_v48 = vpack.c.bf16 %v6016_v44, %v5971_v17  ;;  %v4491_v17 = vld [vmem:[%s6857_s6 + $0x200] sm:$0xff]  }
 0x1f3   :  { %2823 = vmatprep.mubr.bf16.mxu1 %v1940_v63 }
 0x1f9   :  { %2727 = vmatmul.mubr.bf16.gmra.mxu0 %v6136_v23 }
 0x1fa   :  { %2824 = vmatmul.mubr.bf16.gmra.mxu1 %v6140_v53  ;;  %2864 = vmatprep.mubr.bf16.mxu0 %v1981_v30 }
 0x1fb   :  { %2961 = vmatprep.mubr.bf16.mxu1 %v5859_v45  ;;  %v4486_v45 = vld [vmem:[%s6857_s6 + $0x228] sm:$0xff]  }
 0x201   :  { %2865 = vmatmul.mubr.bf16.vlgmr.msra.gmra.mxu0 %v1957_v38  ;;  %v2021_v38 = vld [vmem:[#allocation2 + $0x91] sm:$0xff] }
 0x202   :  { %2962 = vmatmul.mubr.bf16.vlgmr.msra.gmra.mxu1 %v5986_v31  ;;  %2872 = vmatprep.mubr.bf16.mxu0 %v1982_v48 }
 0x203   :  { %2969 = vmatprep.mubr.bf16.mxu1 %v5865_v47  ;;  %4292 = vmatpush3.bf16.msra.mxu0 %v4484_v26  ;;  %v6173_v47 = vld [vmem:[#allocation2 + $0x82] sm:$0xff] }
 0x204   :  { %4293 = vmatprep.subr.bf16.mxu0 %v4485_v41  ;;  %4331 = vmatpush3.bf16.msra.mxu1 %v4484_v26  ;;  %v1984_v7 = vpack.c.bf16 %v6173_v47, %v6061_v12 }
 0x205   :  { %4324 = vmatprep.subr.bf16.mxu1 %v4485_v41 }
 0x207   :  { %4294 = vmatpush3.bf16.msra.mxu0 %v4485_v41 }
 0x208   :  { %4295 = vmatprep.subr.bf16.mxu0 %v4486_v45  ;;  %4332 = vmatpush3.bf16.msra.mxu1 %v4485_v41 }
 0x209   :  { %2873 = vmatmul.mubr.bf16.gmra.mxu0 %v1958_v57  ;;  %4325 = vmatprep.subr.bf16.mxu1 %v4486_v45  ;;  %v1986_v57 = vpack.c.bf16 %v6116_v0, %v6105_v58 }
 0x20a   :  { %2970 = vmatmul.mubr.bf16.gmra.mxu1 %v6026_v32  ;;  %2880 = vmatprep.mubr.bf16.mxu0 %v1983_v60 }
 0x20b   :  { %2977 = vmatprep.mubr.bf16.mxu1 %v5871_v6  ;;  %4296 = vmatpush3.bf16.msra.mxu0 %v4486_v45  ;;  %v2033_v6 = vpack.c.bf16 %v2021_v38, %v5897_v34  ;;  %v1987_v34 = vpack.c.bf16 %v6132_v5, %v6118_v14 }
 0x20c   :  { %4297 = vmatprep.subr.bf16.mxu0 %v4487_v46  ;;  %4333 = vmatpush3.bf16.msra.mxu1 %v4486_v45 }
 0x20d   :  { %4326 = vmatprep.subr.bf16.mxu1 %v4487_v46 }
 0x20f   :  { %4298 = vmatpush3.bf16.msra.mxu0 %v4487_v46 }
 0x210   :  { %4299 = vmatprep.subr.bf16.mxu0 %v4488_v29  ;;  %4334 = vmatpush3.bf16.msra.mxu1 %v4487_v46 }
 0x211   :  { %2881 = vmatmul.mubr.bf16.gmra.mxu0 %v1959_v27  ;;  %4327 = vmatprep.subr.bf16.mxu1 %v4488_v29  ;;  %v1963_v27 = vpack.c.bf16 %v2026_v51, %v5938_v56  ;;  %v2045_v56 = vld [vmem:[#allocation2 + $0x92] sm:$0xff] }
 0x212   :  { %2978 = vmatmul.mubr.bf16.gmra.mxu1 %v6066_v40  ;;  %2888 = vmatprep.mubr.bf16.mxu0 %v1984_v7 }
 0x213   :  { %2985 = vmatprep.mubr.bf16.mxu1 %v2033_v6  ;;  %4300 = vmatpush3.bf16.msra.mxu0 %v4488_v29 }
 0x214   :  { %4301 = vmatprep.subr.bf16.mxu0 %v4489_v24  ;;  %4335 = vmatpush3.bf16.msra.mxu1 %v4488_v29 }
 0x215   :  { %4328 = vmatprep.subr.bf16.mxu1 %v4489_v24 }
 0x217   :  { %4302 = vmatpush3.bf16.msra.mxu0 %v4489_v24 }
 0x218   :  { %4303 = vmatprep.subr.bf16.mxu0 %v4490_v42  ;;  %4336 = vmatpush3.bf16.msra.mxu1 %v4489_v24 }
 0x219   :  { %2889 = vmatmul.mubr.bf16.gmra.mxu0 %v1960_v35  ;;  %4329 = vmatprep.subr.bf16.mxu1 %v4490_v42  ;;  %v2037_v35 = vpack.c.bf16 %v2029_v16, %v5944_v15  ;;  %v6231_v15 = vpop.f32.mrf.mxu1 }
 0x21a   :  { %2986 = vmatmul.mubr.bf16.gmra.mxu1 %v2009_v21  ;;  %2896 = vmatprep.mubr.bf16.mxu0 %v1985_v61  ;;  %6920 = vst [vmem:[#allocation9_spill] sm:$0xff] %v6231_v15 }
 0x21b   :  { %2993 = vmatprep.mubr.bf16.mxu1 %v5930_v8  ;;  %4304 = vmatpush3.bf16.msra.mxu0 %v4490_v42  ;;  %v2036_v8 = vpack.c.bf16 %v5942_v18, %v2026_v51  ;;  %v2057_v18 = vpack.c.bf16 %v2045_v56, %v6173_v47  ;;  %v6233_v31 = vpop.f32.mrf.mxu1 }
 0x21c   :  { %4305 = vmatprep.subr.bf16.mxu0 %v4491_v17  ;;  %4337 = vmatpush3.bf16.msra.mxu1 %v4490_v42  ;;  %6921 = vst [vmem:[#allocation10_spill] sm:$0xff] %v6233_v31 }
 0x21d   :  { %4330 = vmatprep.subr.bf16.mxu1 %v4491_v17 }
 0x21f   :  { %4306 = vmatpush3.bf16.msra.mxu0 %v4491_v17 }
 0x220   :  { %4338 = vmatpush3.bf16.msra.mxu1 %v4491_v17 }
 0x221   :  { %2897 = vmatmul.mubr.bf16.gmra.mxu0 %v1961_v3  ;;  %v2053_v3 = vld [vmem:[#allocation2 + $0x132] sm:$0xff] }
 0x222   :  { %2994 = vmatmul.mubr.bf16.gmra.mxu1 %v6107_v55  ;;  %2904 = vmatprep.mubr.bf16.mxu0 %v1986_v57 }
 0x223   :  { %3001 = vmatprep.mubr.bf16.mxu1 %v5952_v28  ;;  %v1988_v28 = vpack.c.bf16 %v1980_v10, %v6134_v25 }
 0x229   :  { %2905 = vmatmul.mubr.bf16.gmra.mxu0 %v1962_v52  ;;  %v2061_v52 = vpack.c.bf16 %v2053_v3, %v1980_v10 }
 0x22a   :  { %3002 = vmatmul.mubr.bf16.gmra.mxu1 %v6122_v2  ;;  %2912 = vmatprep.mubr.bf16.mxu0 %v1987_v34 }
 0x22b   :  { %3009 = vmatprep.mubr.bf16.mxu1 %v2036_v8 }
 0x231   :  { %2913 = vmatmul.mubr.bf16.gmra.mxu0 %v1963_v27 }
 0x232   :  { %3010 = vmatmul.mubr.bf16.gmra.mxu1 %v6136_v23  ;;  %2920 = vmatprep.mubr.bf16.mxu0 %v1988_v28 }
 0x233   :  { %3017 = vmatprep.mubr.bf16.mxu1 %v2037_v35 }
 0x239   :  { %2921 = vmatmul.mubr.bf16.gmra.mxu0 %v1964_v43 }
 0x23a   :  { %3018 = vmatmul.mubr.bf16.gmra.mxu1 %v2013_v50  ;;  %4307 = vmatprep.mubr.bf16.mxu0 %v5993_v19  ;;  %v6235_v19 = vpop.f32.mrf.mxu1 }
 0x23b   :  { %4315 = vmatprep.mubr.bf16.mxu1 %v6111_v59  ;;  %6922 = vst [vmem:[#allocation4_spill] sm:$0xff] %v6235_v19 }
 0x23c   :  { %v6237_v44 = vpop.f32.mrf.mxu1 }
 0x23d   :  { %6923 = vst [vmem:[#allocation11_spill] sm:$0xff] %v6237_v44 }
 0x23e   :  { %v6239_v1 = vpop.f32.mrf.mxu1 }
 0x23f   :  { %6924 = vst [vmem:[#allocation12_spill] sm:$0xff] %v6239_v1 }
 0x240   :  { %v6241_v33 = vpop.f32.mrf.mxu1 }
 0x241   :  { %4308 = vmatmul.mubr.bf16.vlgmr.msra.gmra.mxu0 %v6035_v36  ;;  %6925 = vst [vmem:[#allocation5_spill] sm:$0xff] %v6241_v33 }
 0x242   :  { %4316 = vmatmul.mubr.bf16.vlgmr.msra.gmra.mxu1 %v6126_v11  ;;  %4311 = vmatprep.mubr.bf16.mxu0 %v6073_v22  ;;  %v6243_v32 = vpop.f32.mrf.mxu1 }
 0x243   :  { %4319 = vmatprep.mubr.bf16.mxu1 %v6140_v53  ;;  %6926 = vst [vmem:[#allocation13_spill] sm:$0xff] %v6243_v32 }
 0x244   :  { %v6245_v43 = vpop.f32.mrf.mxu1 }
 0x245   :  { %6927 = vst [vmem:[#allocation16_spill] sm:$0xff] %v6245_v43 }
 0x246   :  { %v6247_v36 = vpop.f32.mrf.mxu1 }
 0x247   :  { %6928 = vst [vmem:[#allocation6_spill] sm:$0xff] %v6247_v36 }
 0x248   :  { %v6249_v54 = vpop.f32.mrf.mxu1 }
 0x249   :  { %4312 = vmatmul.mubr.bf16.gmra.mxu0 %v2057_v18  ;;  %6929 = vst [vmem:[#allocation19_spill] sm:$0xff] %v6249_v54 }
 0x24a   :  { %4320 = vmatmul.mubr.bf16.gmra.mxu1 %v2061_v52  ;;  %v6251_v12 = vpop.f32.mrf.mxu1 }
 0x24b   :  { %6930 = vst [vmem:[#allocation14_spill] sm:$0xff] %v6251_v12 }
 0x24c   :  { %v6253_v40 = vpop.f32.mrf.mxu1 }
 0x24d   :  { %6931 = vst [vmem:[#allocation15_spill] sm:$0xff] %v6253_v40 }
 0x24e   :  { %v6255_v22 = vpop.f32.mrf.mxu1 }
 0x24f   :  { %6932 = vst [vmem:[#allocation17_spill] sm:$0xff] %v6255_v22 }
 0x250   :  { %v6257_v26 = vpop.f32.mrf.mxu1 }
 0x251   :  { %6933 = vst [vmem:[#allocation18_spill] sm:$0xff] %v6257_v26 }
 0x252   :  { %v6259_v13 = vpop.f32.mrf.mxu1 }
 0x253   :  { %6934 = vst [vmem:[#allocation20_spill] sm:$0xff] %v6259_v13 }
 0x281   :  { %v3971_v4 = vpop.f32.mrf.mxu0 }
 0x282   :  { %v4035_v62 = vpop.f32.mrf.mxu1 }
 0x283   :  { %v3972_v58 = vpop.f32.mrf.mxu0 }
 0x284   :  { %v3973_v49 = vadd.f32 %v3972_v58, %v3971_v4  ;;  %v4036_v55 = vpop.f32.mrf.mxu1 }
 0x285   :  { %v4037_v59 = vadd.f32 %v4036_v55, %v4035_v62  ;;  %v3974_v39 = vpop.f32.mrf.mxu0 }
 0x286   :  { %v4038_v0 = vpop.f32.mrf.mxu1 }
 0x287   :  { %v6261_v14 = vadd.f32 %v4037_v59, %v3973_v49  ;;  %v3975_v9 = vpop.f32.mrf.mxu0 }
 0x288   :  { %v3976_v37 = vadd.f32 %v3975_v9, %v3974_v39  ;;  %v4039_v2 = vpop.f32.mrf.mxu1 }
 0x289   :  { %v4040_v11 = vadd.f32 %v4039_v2, %v4038_v0  ;;  %v3977_v63 = vpop.f32.mrf.mxu0 }
 0x28a   :  { %v4041_v5 = vpop.f32.mrf.mxu1 }
 0x28b   :  { %v6263_v25 = vadd.f32 %v4040_v11, %v3976_v37  ;;  %v3978_v23 = vpop.f32.mrf.mxu0 }
 0x28c   :  { %v3979_v53 = vadd.f32 %v3978_v23, %v3977_v63  ;;  %v4042_v30 = vpop.f32.mrf.mxu1 }
 0x28d   :  { %v4043_v48 = vadd.f32 %v4042_v30, %v4041_v5  ;;  %v3980_v41 = vpop.f32.mrf.mxu0 }
 0x28e   :  { %v4044_v45 = vpop.f32.mrf.mxu1 }
 0x28f   :  { %v6265_v60 = vadd.f32 %v4043_v48, %v3979_v53  ;;  %v3981_v46 = vpop.f32.mrf.mxu0 }
 0x290   :  { %v3982_v29 = vadd.f32 %v3981_v46, %v3980_v41  ;;  %v4045_v47 = vpop.f32.mrf.mxu1 }
 0x291   :  { %v4046_v38 = vadd.f32 %v4045_v47, %v4044_v45  ;;  %v3983_v7 = vpop.f32.mrf.mxu0 }
 0x292   :  { %v4047_v24 = vpop.f32.mrf.mxu1 }
 0x293   :  { %v6267_v6 = vadd.f32 %v4046_v38, %v3982_v29  ;;  %v3984_v42 = vpop.f32.mrf.mxu0 }
 0x294   :  { %v3985_v21 = vadd.f32 %v3984_v42, %v3983_v7  ;;  %v4048_v61 = vpop.f32.mrf.mxu1 }
 0x295   :  { %v4049_v17 = vadd.f32 %v4048_v61, %v4047_v24  ;;  %v3986_v57 = vpop.f32.mrf.mxu0 }
 0x296   :  { %v4050_v51 = vpop.f32.mrf.mxu1 }
 0x297   :  { %v6269_v34 = vadd.f32 %v4049_v17, %v3985_v21  ;;  %v3987_v8 = vpop.f32.mrf.mxu0 }
 0x298   :  { %v3988_v10 = vadd.f32 %v3987_v8, %v3986_v57  ;;  %v4051_v16 = vpop.f32.mrf.mxu1 }
 0x299   :  { %v4052_v27 = vadd.f32 %v4051_v16, %v4050_v51  ;;  %v3989_v28 = vpop.f32.mrf.mxu0 }
 0x29a   :  { %v4053_v35 = vpop.f32.mrf.mxu1 }
 0x29b   :  { %v6271_v50 = vadd.f32 %v4052_v27, %v3988_v10  ;;  %v3990_v56 = vpop.f32.mrf.mxu0 }
 0x29c   :  { %v3991_v3 = vadd.f32 %v3990_v56, %v3989_v28  ;;  %v4054_v18 = vpop.f32.mrf.mxu1 }
 0x29d   :  { %v4055_v52 = vadd.f32 %v4054_v18, %v4053_v35  ;;  %v3992_v4 = vpop.f32.mrf.mxu0 }
 0x29e   :  { %v4056_v62 = vpop.f32.mrf.mxu1 }
 0x29f   :  { %v6273_v58 = vadd.f32 %v4055_v52, %v3991_v3  ;;  %v3993_v49 = vpop.f32.mrf.mxu0 }
 0x2a0   :  { %v3994_v55 = vadd.f32 %v3993_v49, %v3992_v4  ;;  %v4057_v59 = vpop.f32.mrf.mxu1 }
 0x2a1   :  { %v4058_v39 = vadd.f32 %v4057_v59, %v4056_v62  ;;  %v3995_v0 = vpop.f32.mrf.mxu0 }
 0x2a2   :  { %v4059_v9 = vpop.f32.mrf.mxu1 }
 0x2a3   :  { %v6275_v37 = vadd.f32 %v4058_v39, %v3994_v55  ;;  %v3996_v2 = vpop.f32.mrf.mxu0 }
 0x2a4   :  { %v3997_v11 = vadd.f32 %v3996_v2, %v3995_v0  ;;  %v4060_v63 = vpop.f32.mrf.mxu1  ;;  %v1646_v0 = vadd.f32 %v6235_v19, %v6231_v15 }
 0x2a5   :  { %v4061_v5 = vadd.f32 %v4060_v63, %v4059_v9  ;;  %v3998_v23 = vpop.f32.mrf.mxu0  ;;  %v1668_v63 = vmul.f32 %v6231_v15, %v6231_v15 }
 0x2a6   :  { %v4062_v53 = vpop.f32.mrf.mxu1 }
 0x2a7   :  { %v6277_v30 = vadd.f32 %v4061_v5, %v3997_v11  ;;  %v3999_v48 = vpop.f32.mrf.mxu0  ;;  %v1669_v5 = vmul.f32 %v6235_v19, %v6235_v19 }
 0x2a8   :  { %v4000_v41 = vadd.f32 %v3999_v48, %v3998_v23  ;;  %v4063_v45 = vpop.f32.mrf.mxu1 }
 0x2a9   :  { %v4064_v46 = vadd.f32 %v4063_v45, %v4062_v53  ;;  %v4001_v29 = vpop.f32.mrf.mxu0  ;;  %v1647_v45 = vadd.f32 %v6228_v20, %v1646_v0 }
 0x2aa   :  { %v4065_v47 = vpop.f32.mrf.mxu1 }
 0x2ab   :  { %v6279_v38 = vadd.f32 %v4064_v46, %v4000_v41  ;;  %v4002_v7 = vpop.f32.mrf.mxu0 }
 0x2ac   :  { %v4003_v24 = vadd.f32 %v4002_v7, %v4001_v29  ;;  %v4066_v42 = vpop.f32.mrf.mxu1  ;;  %v1670_v7 = vmul.f32 %v6228_v20, %v6228_v20 }
 0x2ad   :  { %6935 = vst [vmem:[#allocation7_spill] sm:$0xff] %v6279_v38  ;;  %v4067_v21 = vadd.f32 %v4066_v42, %v4065_v47  ;;  %v4004_v61 = vpop.f32.mrf.mxu0 }
 0x2ae   :  { %v4068_v17 = vpop.f32.mrf.mxu1 }
 0x2af   :  { %v6281_v57 = vadd.f32 %v4067_v21, %v4003_v24  ;;  %v4005_v51 = vpop.f32.mrf.mxu0  ;;  %v1684_v24 = vadd.f32 %v1669_v5, %v1668_v63 }
 0x2b0   :  { %v4006_v8 = vadd.f32 %v4005_v51, %v4004_v61  ;;  %v4069_v10 = vpop.f32.mrf.mxu1  ;;  %v1648_v51 = vadd.f32 %v6233_v31, %v1647_v45 }
 0x2b1   :  { %6936 = vst [vmem:[#allocation8_spill] sm:$0xff] %v6281_v57  ;;  %v4070_v16 = vadd.f32 %v4069_v10, %v4068_v17  ;;  %v4007_v27 = vpop.f32.mrf.mxu0 }
 0x2b2   :  { %v4071_v28 = vpop.f32.mrf.mxu1 }
 0x2b3   :  { %v6283_v35 = vadd.f32 %v4070_v16, %v4006_v8  ;;  %v4008_v56 = vpop.f32.mrf.mxu0 }
 0x2b4   :  { %v4009_v3 = vadd.f32 %v4008_v56, %v4007_v27  ;;  %v4072_v18 = vpop.f32.mrf.mxu1  ;;  %v1671_v27 = vmul.f32 %v6233_v31, %v6233_v31 }
 0x2b5   :  { %6937 = vst [vmem:[#allocation21_spill] sm:$0xff] %v6283_v35  ;;  %v4073_v52 = vadd.f32 %v4072_v18, %v4071_v28  ;;  %v4010_v4 = vpop.f32.mrf.mxu0  ;;  %v1685_v28 = vadd.f32 %v1684_v24, %v1670_v7 }
 0x2b6   :  { %v4074_v62 = vpop.f32.mrf.mxu1 }
 0x2b7   :  { %v6285_v49 = vadd.f32 %v4073_v52, %v4009_v3  ;;  %v4011_v55 = vpop.f32.mrf.mxu0  ;;  %v1686_v0 = vadd.f32 %v1685_v28, %v1671_v27 }
 0x2b8   :  { %v4012_v59 = vadd.f32 %v4011_v55, %v4010_v4  ;;  %v4075_v39 = vpop.f32.mrf.mxu1  ;;  %v1649_v4 = vadd.f32 %v1648_v51, %v6239_v1 }
 0x2b9   :  { %6938 = vst [vmem:[#allocation22_spill] sm:$0xff] %v6285_v49  ;;  %v4076_v9 = vadd.f32 %v4075_v39, %v4074_v62  ;;  %v4013_v2 = vpop.f32.mrf.mxu0  ;;  %v1672_v39 = vmul.f32 %v6239_v1, %v6239_v1 }
 0x2ba   :  { %v4077_v11 = vpop.f32.mrf.mxu1 }
 0x2bb   :  { %v6293_v23 = vadd.f32 %v4076_v9, %v4012_v59  ;;  %v4014_v53 = vpop.f32.mrf.mxu0 }
 0x2bc   :  { %v4015_v48 = vadd.f32 %v4014_v53, %v4013_v2  ;;  %v4078_v41 = vpop.f32.mrf.mxu1  ;;  %v1687_v53 = vadd.f32 %v1686_v0, %v1672_v39  ;;  %v1676_v39 = vmul.f32 %v6247_v36, %v6247_v36 }
 0x2bd   :  { %6939 = vst [vmem:[#allocation23_spill] sm:$0xff] %v6293_v23  ;;  %v4079_v46 = vadd.f32 %v4078_v41, %v4077_v11  ;;  %v4016_v29 = vpop.f32.mrf.mxu0  ;;  %v1650_v11 = vadd.f32 %v1649_v4, %v6243_v32 }
 0x2be   :  { %v4080_v47 = vpop.f32.mrf.mxu1 }
 0x2bf   :  { %v6298_v42 = vadd.f32 %v4079_v46, %v4015_v48  ;;  %v4017_v21 = vpop.f32.mrf.mxu0  ;;  %v1651_v45 = vadd.f32 %v6237_v44, %v1650_v11 }
 0x2c0   :  { %v4018_v61 = vadd.f32 %v4017_v21, %v4016_v29  ;;  %v4081_v17 = vpop.f32.mrf.mxu1 }
 0x2c1   :  { %6940 = vst [vmem:[#allocation24_spill] sm:$0xff] %v6298_v42  ;;  %v4082_v8 = vadd.f32 %v4081_v17, %v4080_v47  ;;  %v4099_v10 = vpop.f32.mrf.mxu0  ;;  %v1674_v47 = vmul.f32 %v6237_v44, %v6237_v44 }
 0x2c2   :  { %v6301_v16 = vpop.f32.mrf.mxu1 }
 0x2c3   :  { %v6305_v56 = vadd.f32 %v4082_v8, %v4018_v61  ;;  %v4100_v3 = vpop.f32.mrf.mxu0  ;;  %v1652_v61 = vadd.f32 %v6241_v33, %v1651_v45  ;;  %v1675_v8 = vmul.f32 %v6241_v33, %v6241_v33 }
 0x2c4   :  { %v4101_v18 = vadd.f32 %v4100_v3, %v4099_v10  ;;  %v6307_v52 = vpop.f32.mrf.mxu1 }
 0x2c5   :  { %6941 = vst [vmem:[#allocation25_spill] sm:$0xff] %v6305_v56  ;;  %v6310_v62 = vpop.f32.mrf.mxu0  ;;  %v1653_v3 = vadd.f32 %v1652_v61, %v6247_v36  ;;  %v1677_v61 = vmul.f32 %v6251_v12, %v6251_v12 }
 0x2c6   :  { %v6313_v55 = vadd.f32 %v4101_v18, %v6261_v14  ;;  %v6315_v59 = vpop.f32.mrf.mxu1  ;;  %v1673_v14 = vmul.f32 %v6243_v32, %v6243_v32 }
 0x2c7   :  { %v6319_v9 = vpop.f32.mrf.mxu0 }
 0x2c8   :  { %v6321_v2 = vpop.f32.mrf.mxu1  ;;  %v1688_v7 = vadd.f32 %v1687_v53, %v1673_v14  ;;  %v1654_v14 = vadd.f32 %v1653_v3, %v6251_v12  ;;  %v1678_v3 = vmul.f32 %v6245_v43, %v6245_v43 }
 0x2c9   :  { %v6324_v63 = vpop.f32.mrf.mxu0 }
 0x2ca   :  { %v6326_v5 = vpop.f32.mrf.mxu1  ;;  %v1689_v10 = vadd.f32 %v1688_v7, %v1674_v47 }
 0x2cb   :  { %v6330_v48 = vpop.f32.mrf.mxu0 }
 0x2cc   :  { %v6332_v41 = vpop.f32.mrf.mxu1  ;;  %v1690_v0 = vadd.f32 %v1689_v10, %v1675_v8  ;;  %v1655_v8 = vadd.f32 %v6245_v43, %v1654_v14  ;;  %v1679_v14 = vmul.f32 %v6249_v54, %v6249_v54 }
 0x2cd   :  { %v6335_v46 = vpop.f32.mrf.mxu0 }
 0x2ce   :  { %v6337_v29 = vpop.f32.mrf.mxu1  ;;  %v1691_v7 = vadd.f32 %v1690_v0, %v1676_v39  ;;  %v1656_v0 = vadd.f32 %v6249_v54, %v1655_v8  ;;  %v1680_v8 = vmul.f32 %v6255_v22, %v6255_v22 }
 0x2cf   :  { %v6341_v24 = vpop.f32.mrf.mxu0 }
 0x2d0   :  { %v6343_v21 = vpop.f32.mrf.mxu1  ;;  %v1692_v32 = vadd.f32 %v1691_v7, %v1677_v61  ;;  %v1657_v7 = vadd.f32 %v1656_v0, %v6255_v22  ;;  %v1681_v0 = vmul.f32 %v6259_v13, %v6259_v13 }
 0x2d1   :  { %v6346_v17 = vpop.f32.mrf.mxu0 }
 0x2d2   :  { %v6348_v51 = vpop.f32.mrf.mxu1  ;;  %v1693_v20 = vadd.f32 %v1692_v32, %v1678_v3  ;;  %v1658_v32 = vadd.f32 %v1657_v7, %v6259_v13  ;;  %v1682_v7 = vmul.f32 %v6253_v40, %v6253_v40 }
 0x2d3   :  { %v6352_v27 = vpop.f32.mrf.mxu0 }
 0x2d4   :  { %v6354_v28 = vpop.f32.mrf.mxu1  ;;  %v1694_v56 = vadd.f32 %v1693_v20, %v1679_v14  ;;  %v1659_v20 = vadd.f32 %v6253_v40, %v1658_v32  ;;  %v1683_v32 = vmul.f32 %v6257_v26, %v6257_v26 }
 0x2d5   :  { %v6357_v18 = vpop.f32.mrf.mxu0 }
 0x2d6   :  { %v6359_v4 = vpop.f32.mrf.mxu1  ;;  %v1695_v49 = vadd.f32 %v1694_v56, %v1680_v8  ;;  %v1660_v8 = vadd.f32 %v6257_v26, %v1659_v20 }
 0x2d7   :  { %v6363_v11 = vpop.f32.mrf.mxu0 }
 0x2d8   :  { %v6365_v53 = vpop.f32.mrf.mxu1  ;;  %v1661_v40 = vrot.slane %v1660_v8, 4 }
 0x2d9   :  { %v6368_v45 = vpop.f32.mrf.mxu0 }
 0x2da   :  { %v6370_v47 = vpop.f32.mrf.mxu1 }
 0x2db   :  { %v6374_v33 = vpop.f32.mrf.mxu0 }
 0x2dc   :  { %v6376_v44 = vpop.f32.mrf.mxu1 }
 0x2dd   :  { %v6379_v10 = vpop.f32.mrf.mxu0 }
 0x2de   :  { %v6381_v36 = vpop.f32.mrf.mxu1 }
 0x2df   :  { %v6385_v1 = vpop.f32.mrf.mxu0 }
 0x2e0   :  { %v6387_v39 = vpop.f32.mrf.mxu1 }
 0x2e1   :  { %v6390_v12 = vpop.f32.mrf.mxu0 }
 0x2e2   :  { %v6392_v31 = vpop.f32.mrf.mxu1 }
 0x2e3   :  { %v6396_v19 = vpop.f32.mrf.mxu0 }
 0x2e4   :  { %v6398_v15 = vpop.f32.mrf.mxu1 }
 0x2e5   :  { %v6401_v61 = vpop.f32.mrf.mxu0 }
 0x2e6   :  { %v6403_v43 = vpop.f32.mrf.mxu1 }
 0x2e7   :  { %6942 = vst [vmem:[#allocation26_spill] sm:$0xff] %v6403_v43  ;;  %v6407_v42 = vpop.f32.mrf.mxu0 }
 0x2e8   :  { %v6409_v23 = vpop.f32.mrf.mxu1 }
 0x2e9   :  { %6943 = vst [vmem:[#allocation27_spill] sm:$0xff] %v6409_v23  ;;  %v6412_v3 = vpop.f32.mrf.mxu0  ;;  %v1696_v23 = vadd.f32 %v1695_v49, %v1681_v0 }
 0x2ea   :  { %v6414_v54 = vpop.f32.mrf.mxu1 }
 0x2eb   :  { %6944 = vst [vmem:[#allocation28_spill] sm:$0xff] %v6414_v54  ;;  %v6418_v35 = vpop.f32.mrf.mxu0 }
 0x2ec   :  { %v6420_v57 = vpop.f32.mrf.mxu1 }
 0x2ed   :  { %6945 = vst [vmem:[#allocation29_spill] sm:$0xff] %v6420_v57  ;;  %v6423_v14 = vpop.f32.mrf.mxu0  ;;  %v1697_v57 = vadd.f32 %v1696_v23, %v1682_v7 }
 0x2ee   :  { %6946 = vst [vmem:[#allocation30_spill] sm:$0xff] %v6423_v14  ;;  %v6425_v22 = vpop.f32.mrf.mxu1 }
 0x2ef   :  { %6947 = vst [vmem:[#allocation31_spill] sm:$0xff] %v6425_v22  ;;  %v6429_v43 = vpop.f32.mrf.mxu0 }
 0x2f0   :  { %6948 = vst [vmem:[#allocation32_spill] sm:$0xff] %v6429_v43  ;;  %v6431_v56 = vpop.f32.mrf.mxu1 }
 0x2f1   :  { %6949 = vst [vmem:[#allocation33_spill] sm:$0xff] %v6431_v56  ;;  %v6434_v13 = vpop.f32.mrf.mxu0  ;;  %v1698_v56 = vadd.f32 %v1697_v57, %v1683_v32  ;;  %v4104_v57 = vadd.f32 %v6319_v9, %v6310_v62  ;;  %v4107_v32 = vadd.f32 %v6330_v48, %v6324_v63  ;;  %v4168_v48 = vadd.f32 %v6321_v2, %v6315_v59 }
 0x2f2   :  { %6950 = vst [vmem:[#allocation34_spill] sm:$0xff] %v6434_v13  ;;  %v6436_v54 = vpop.f32.mrf.mxu1  ;;  %v1662_v13 = vadd.f32 %v1661_v40, %v1660_v8  ;;  %v4110_v8 = vadd.f32 %v6341_v24, %v6335_v46  ;;  %v4171_v46 = vadd.f32 %v6332_v41, %v6326_v5  ;;  %v4119_v5 = vadd.f32 %v6374_v33, %v6368_v45 }
 0x2f3   :  { %6951 = vst [vmem:[#allocation35_spill] sm:$0xff] %v6436_v54  ;;  %v6440_v14 = vpop.f32.mrf.mxu0  ;;  %v1699_v23 = vrot.slane %v1698_v56, 4  ;;  %v2870_v63 = vadd.f32 %v4104_v57, %v6263_v25 }
 0x2f4   :  { %6952 = vst [vmem:[#allocation36_spill] sm:$0xff] %v6440_v14  ;;  %v6442_v22 = vpop.f32.mrf.mxu1 }
 0x2f5   :  { %6953 = vst [vmem:[#allocation37_spill] sm:$0xff] %v6442_v22  ;;  %v6444_v49 = vpop.f32.mrf.mxu0  ;;  %v1663_v22 = vrot.slane %v1662_v13, 2  ;;  %v1700_v40 = vadd.f32 %v1699_v23, %v1698_v56  ;;  %v2875_v56 = vadd.f32 %v4107_v32, %v6265_v60  ;;  %v4177_v60 = vadd.f32 %v6354_v28, %v6348_v51 }
 0x2f6   :  { %v6446_v0 = vpop.f32.mrf.mxu1 }
 0x2f7   :  { %6954 = vst [vmem:[#allocation38_spill] sm:$0xff] %v6446_v0  ;;  %v6448_v43 = vpop.f32.mrf.mxu0  ;;  %v1664_v62 = vadd.f32 %v1663_v22, %v1662_v13  ;;  %v4116_v22 = vadd.f32 %v6363_v11, %v6357_v18  ;;  %v2967_v18 = vadd.f32 %v4168_v48, %v2870_v63 }
 0x2f8   :  { %v6450_v20 = vpop.f32.mrf.mxu1 }
 0x2f9   :  { %6955 = vst [vmem:[#allocation39_spill] sm:$0xff] %v6450_v20  ;;  %v6452_v54 = vpop.f32.mrf.mxu0  ;;  %v2886_v51 = vadd.f32 %v4116_v22, %v6271_v50  ;;  %v4186_v50 = vadd.f32 %v6387_v39, %v6381_v36  ;;  %v4128_v36 = vadd.f32 %v6407_v42, %v6401_v61  ;;  %v6959_v22 = vld [vmem:[#allocation7_spill] sm:$0xff] }
 0x2fa   :  { %v6454_v38 = vpop.f32.mrf.mxu1 }
 0x2fb   :  { %6956 = vst [vmem:[#allocation40_spill] sm:$0xff] %v6454_v38  ;;  %v6456_v7 = vpop.f32.mrf.mxu0 }
 0x2fc   :  { %v6458_v26 = vpop.f32.mrf.mxu1 }
 0x2fd   :  { %6957 = vst [vmem:[#allocation41_spill] sm:$0xff] %v6458_v26  ;;  %v6460_v14 = vpop.f32.mrf.mxu0  ;;  %v4165_v26 = vadd.f32 %v6307_v52, %v6301_v16  ;;  %v1701_v16 = vrot.slane %v1700_v40, 2  ;;  %v2878_v52 = vadd.f32 %v4110_v8, %v6267_v6  ;;  %v4122_v6 = vadd.f32 %v6385_v1, %v6379_v10 }
 0x2fe   :  { %6958 = vst [vmem:[#allocation42_spill] sm:$0xff] %v6460_v14  ;;  %v6466_v20 = vpop.f32.mrf.mxu1  ;;  %v4113_v14 = vadd.f32 %v6352_v27, %v6346_v17  ;;  %v4174_v17 = vadd.f32 %v6343_v21, %v6337_v29  ;;  %v1665_v29 = vrot.slane %v1664_v62, 1  ;;  %v2972_v21 = vadd.f32 %v4171_v46, %v2875_v56 }
 0x2ff   :  { %v6470_v38 = vpop.f32.mrf.mxu0  ;;  %v2964_v59 = vadd.f32 %v4165_v26, %v6313_v55  ;;  %v4180_v26 = vadd.f32 %v6365_v53, %v6359_v4  ;;  %v4183_v1 = vadd.f32 %v6376_v44, %v6370_v47  ;;  %v2894_v23 = vadd.f32 %v4122_v6, %v6275_v37 }
 0x300   :  { %v6476_v0 = vpop.f32.mrf.mxu1  ;;  %v2883_v25 = vadd.f32 %v4113_v14, %v6269_v34  ;;  %v6503_v34 = vadd.f32 %v1701_v16, %v1700_v40  ;;  %v2975_v55 = vadd.f32 %v4174_v17, %v2878_v52  ;;  %v2891_v14 = vadd.f32 %v4119_v5, %v6273_v58  ;;  %v6963_v5 = vld [vmem:[#allocation32_spill] sm:$0xff] }
 0x301   :  { %v4309_v9 = vpop.f32.mrf.mxu0  ;;  %v4125_v4 = vadd.f32 %v6396_v19, %v6390_v12  ;;  %v6530_v32 = vadd.f32 %v1665_v29, %v1664_v62  ;;  %v2983_v39 = vadd.f32 %v4180_v26, %v2886_v51  ;;  %v4189_v62 = vadd.f32 %v6398_v15, %v6392_v31  ;;  %v6965_v26 = vld [vmem:[#allocation28_spill] sm:$0xff] }
 0x302   :  { %v6484_v24 = vpop.f32.mrf.mxu1  ;;  %v6512_v11 = vadd.f32 %v4309_v9, %v2972_v21  ;;  %v2980_v10 = vadd.f32 %v4177_v60, %v2883_v25  ;;  %v1703_v37 = vrot.slane %v6503_v34, 1  ;;  %v4131_v56 = vadd.f32 %v6418_v35, %v6412_v3  ;;  %v6960_v25 = vld [vmem:[#allocation26_spill] sm:$0xff]  ;;  %v6961_v60 = vld [vmem:[#allocation27_spill] sm:$0xff] }
 0x303   :  { %v3060_v13 = vpop.f32.mrf.mxu0  ;;  %v2899_v48 = vadd.f32 %v4125_v4, %v6277_v30  ;;  %v2988_v42 = vadd.f32 %v4183_v1, %v2891_v14  ;;  %v2991_v17 = vadd.f32 %v4186_v50, %v2894_v23  ;;  %v4192_v30 = vadd.f32 %v6961_v60, %v6960_v25  ;;  %v6967_v1 = vld [vmem:[#allocation34_spill] sm:$0xff]  ;;  %v6975_v60 = vld [vmem:[#allocation23_spill] sm:$0xff] }
 0x304   :  { %v6495_v2 = vpop.f32.mrf.mxu1  ;;  %v6501_v27 = vadd.f32 %v3060_v13, %v2964_v59  ;;  %v3149_v40 = vmul.f32 %v6512_v11, %v6512_v11  ;;  %v2902_v13 = vadd.f32 %v4128_v36, %v6959_v22  ;;  %v6962_v59 = vld [vmem:[#allocation30_spill] sm:$0xff]  ;;  %v6970_v36 = vld [vmem:[#allocation31_spill] sm:$0xff]  ;;  %v4143_v22 = vadd.f32 %v6456_v7, %v6452_v54 }
 0x305   :  { %v4310_v41 = vpop.f32.mrf.mxu0  ;;  %v4134_v15 = vadd.f32 %v6963_v5, %v6962_v59  ;;  %v2996_v23 = vadd.f32 %v4189_v62, %v2899_v48  ;;  %v6976_v59 = vld [vmem:[#allocation38_spill] sm:$0xff]  ;;  %v6977_v5 = vld [vmem:[#allocation39_spill] sm:$0xff] }
 0x306   :  { %v6508_v28 = vpop.f32.mrf.mxu1  ;;  %v3147_v57 = vmul.f32 %v6501_v27, %v6501_v27  ;;  %v6524_v44 = vadd.f32 %v4310_v41, %v2975_v55  ;;  %v6966_v55 = vld [vmem:[#allocation29_spill] sm:$0xff] }
 0x307   :  { %v3063_v33 = vpop.f32.mrf.mxu0  ;;  %v6578_v48 = vadd.f32 %v6495_v2, %v2996_v23 }
 0x308   :  { %v6514_v45 = vadd.f32 %v3063_v33, %v2967_v18  ;;  %v3095_v19 = vpop.f32.mrf.mxu1  ;;  %v3150_v46 = vmul.f32 %v6524_v44, %v6524_v44  ;;  %v6964_v18 = vld [vmem:[#allocation8_spill] sm:$0xff]  ;;  %v4195_v33 = vadd.f32 %v6966_v55, %v6965_v26 }
 0x309   :  { %v4313_v53 = vpop.f32.mrf.mxu0  ;;  %v2907_v51 = vadd.f32 %v4131_v56, %v6964_v18  ;;  %v3155_v7 = vmul.f32 %v6578_v48, %v6578_v48  ;;  %v6979_v26 = vld [vmem:[#allocation24_spill] sm:$0xff] }
 0x30a   :  { %v3125_v47 = vadd.f32 %v6514_v45, %v6501_v27  ;;  %v3148_v58 = vmul.f32 %v6514_v45, %v6514_v45  ;;  %v6553_v31 = vadd.f32 %v4313_v53, %v2988_v42  ;;  %v6555_v35 = vpop.f32.mrf.mxu1  ;;  %v2923_v55 = vadd.f32 %v4143_v22, %v6979_v26 }
 0x30b   :  { %v3076_v12 = vpop.f32.mrf.mxu0 }
 0x30c   :  { %v3126_v8 = vadd.f32 %v3125_v47, %v6512_v11  ;;  %v3163_v9 = vadd.f32 %v3148_v58, %v3147_v57  ;;  %v6538_v63 = vadd.f32 %v3076_v12, %v2980_v10  ;;  %v6968_v10 = vld [vmem:[#allocation36_spill] sm:$0xff]  ;;  %v6969_v47 = vld [vmem:[#allocation21_spill] sm:$0xff]  ;;  %v3153_v62 = vmul.f32 %v6553_v31, %v6553_v31 }
 0x30d   :  { %v4314_v61 = vpop.f32.mrf.mxu0  ;;  %v4137_v14 = vadd.f32 %v6968_v10, %v6967_v1  ;;  %v2910_v58 = vadd.f32 %v4134_v15, %v6969_v47  ;;  %v6971_v12 = vld [vmem:[#allocation33_spill] sm:$0xff]  ;;  %v4204_v15 = vadd.f32 %v6977_v5, %v6976_v59  ;;  %v4210_v47 = vadd.f32 %v6476_v0, %v6466_v20 }
 0x30e   :  { %v3164_v16 = vadd.f32 %v3163_v9, %v3149_v40  ;;  %v3127_v52 = vadd.f32 %v3126_v8, %v6524_v44  ;;  %v3151_v41 = vmul.f32 %v6538_v63, %v6538_v63  ;;  %v6567_v4 = vadd.f32 %v4314_v61, %v2991_v17  ;;  %v3108_v9 = vpop.f32.mrf.mxu1  ;;  %v6972_v61 = vld [vmem:[#allocation22_spill] sm:$0xff]  ;;  %v6981_v1 = vld [vmem:[#allocation41_spill] sm:$0xff] }
 0x30f   :  { %v3079_v3 = vpop.f32.mrf.mxu0  ;;  %v4140_v40 = vadd.f32 %v6448_v43, %v6444_v49  ;;  %v2999_v8 = vadd.f32 %v4192_v30, %v2902_v13  ;;  %v3004_v43 = vadd.f32 %v4195_v33, %v2907_v51  ;;  %v6605_v51 = vmul.f32 0.0078125, %v6530_v32  ;;  %v6980_v33 = vld [vmem:[#allocation40_spill] sm:$0xff] }
 0x310   :  { %v3128_v6 = vadd.f32 %v3127_v52, %v6538_v63  ;;  %v3165_v29 = vadd.f32 %v3164_v16, %v3150_v46  ;;  %v6560_v21 = vadd.f32 %v3079_v3, %v2983_v39  ;;  %v4198_v39 = vadd.f32 %v6971_v12, %v6970_v36  ;;  %v6973_v16 = vld [vmem:[#allocation35_spill] sm:$0xff]  ;;  %v6974_v52 = vld [vmem:[#allocation37_spill] sm:$0xff]  ;;  %v6978_v3 = vld [vmem:[#allocation42_spill] sm:$0xff] }
 0x311   :  { %v2915_v46 = vadd.f32 %v4137_v14, %v6972_v61  ;;  %v4201_v17 = vadd.f32 %v6974_v52, %v6973_v16  ;;  %v6588_v49 = vadd.f32 %v3095_v19, %v2999_v8  ;;  %v3154_v2 = vmul.f32 %v6567_v4, %v6567_v4 }
 0x312   :  { %v3166_v50 = vadd.f32 %v3165_v29, %v3151_v41  ;;  %v3129_v53 = vadd.f32 %v3128_v6, %v6560_v21  ;;  %v3152_v57 = vmul.f32 %v6560_v21, %v6560_v21  ;;  %v2918_v30 = vadd.f32 %v4140_v40, %v6975_v60  ;;  %v4322_v29 = vpop.f32.mrf.mxu1 }
 0x313   :  { %v4146_v6 = vadd.f32 %v6470_v38, %v6978_v3  ;;  %v3007_v41 = vadd.f32 %v4198_v39, %v2910_v58  ;;  %v6599_v54 = vadd.f32 %v6484_v24, %v3004_v43  ;;  %v4207_v10 = vadd.f32 %v6981_v1, %v6980_v33 }
 0x314   :  { %v3130_v56 = vadd.f32 %v3129_v53, %v6553_v31  ;;  %v3167_v42 = vadd.f32 %v3166_v50, %v3152_v57  ;;  %v3012_v38 = vadd.f32 %v4201_v17, %v2915_v46  ;;  %v3156_v24 = vmul.f32 %v6588_v49, %v6588_v49  ;;  %v6982_v53 = vld [vmem:[#allocation25_spill] sm:$0xff]  ;;  %v3111_v36 = vpop.f32.mrf.mxu1 }
 0x315   :  { %v6611_v14 = vadd.f32 %v6508_v28, %v3007_v41  ;;  %v1704_v32 = vadd.f32 %v1703_v37, %v6503_v34  ;;  %v2926_v57 = vadd.f32 %v4146_v6, %v6982_v53  ;;  %v3015_v58 = vadd.f32 %v4204_v15, %v2918_v30 }
 0x316   :  { %v3131_v13 = vadd.f32 %v3130_v56, %v6567_v4  ;;  %v3168_v25 = vadd.f32 %v3167_v42, %v3153_v62  ;;  %v3157_v28 = vmul.f32 %v6599_v54, %v6599_v54  ;;  %v6624_v12 = vadd.f32 %v3108_v9, %v3012_v38 }
 0x317   :  { %v3020_v8 = vadd.f32 %v4207_v10, %v2923_v55  ;;  %v3158_v62 = vmul.f32 %v6611_v14, %v6611_v14  ;;  %v6629_v34 = vadd.f32 %v3111_v36, %v3015_v58  ;;  %v1705_v0 = vmul.f32 0.0078125, %v1704_v32 }
 0x318   :  { %v3132_v19 = vadd.f32 %v3131_v13, %v6578_v48  ;;  %v3169_v18 = vadd.f32 %v3168_v25, %v3154_v2  ;;  %v1706_v20 = vmul.f32 %v6605_v51, %v6605_v51  ;;  %v3023_v42 = vadd.f32 %v4210_v47, %v2926_v57 }
 0x319   :  { %v6635_v9 = vadd.f32 %v6555_v35, %v3020_v8  ;;  %v3159_v61 = vmul.f32 %v6624_v12, %v6624_v12  ;;  %v3160_v22 = vmul.f32 %v6629_v34, %v6629_v34 }
 0x31a   :  { %v3170_v23 = vadd.f32 %v3169_v18, %v3155_v7  ;;  %v3133_v50 = vadd.f32 %v3132_v19, %v6588_v49  ;;  %v6640_v52 = vadd.f32 %v4322_v29, %v3023_v42  ;;  %v1707_v2 = vsub.f32 %v1705_v0, %v1706_v20 }
 0x31b   :  { %v3161_v13 = vmul.f32 %v6635_v9, %v6635_v9 }
 0x31c   :  { %v3134_v39 = vadd.f32 %v3133_v50, %v6599_v54  ;;  %v3171_v40 = vadd.f32 %v3170_v23, %v3156_v24  ;;  %v3162_v60 = vmul.f32 %v6640_v52, %v6640_v52  ;;  %v1708_v5 = vmax.f32 %v1707_v2, 0.0  ;;  %v6985_v2 = vld [vmem:[#allocation4_spill] sm:$0xff] }
 0x31e   :  { %v3135_v37 = vadd.f32 %v3134_v39, %v6611_v14  ;;  %v3172_v56 = vadd.f32 %v3171_v40, %v3157_v28  ;;  %v1725_v29 = vadd.f32 1e-05, %v1708_v5 }
 0x320   :  { %v3136_v46 = vadd.f32 %v3135_v37, %v6624_v12  ;;  %v3173_v16 = vadd.f32 %v3172_v56, %v3158_v62  ;;  %4494 = vrsqrt.f32 %v1725_v29  ;;  %v6990_v29 = vld [vmem:[#allocation11_spill] sm:$0xff] }
 0x322   :  { %v3137_v17 = vadd.f32 %v3136_v46, %v6629_v34  ;;  %v3174_v43 = vadd.f32 %v3173_v16, %v3159_v61  ;;  %v6983_v16 = vld [vmem:[#allocation20_spill] sm:$0xff] }
 0x324   :  { %v3138_v35 = vadd.f32 %v3137_v17, %v6635_v9  ;;  %v3175_v25 = vadd.f32 %v3174_v43, %v3160_v22  ;;  %v1722_v17 = vsub.f32 %v6983_v16, %v6605_v51  ;;  %v6984_v22 = vld [vmem:[#allocation9_spill] sm:$0xff]  ;;  %v6997_v16 = vld [vmem:[#allocation15_spill] sm:$0xff] }
 0x325   :  { %v1709_v43 = vsub.f32 %v6984_v22, %v6605_v51  ;;  %v1723_v22 = vsub.f32 %v6997_v16, %v6605_v51 }
 0x326   :  { %v3139_v30 = vadd.f32 %v3138_v35, %v6640_v52  ;;  %v3176_v59 = vadd.f32 %v3175_v25, %v3161_v13  ;;  %v1710_v13 = vsub.f32 %v6985_v2, %v6605_v51  ;;  %v6986_v35 = vld [vmem:[#allocation3_spill] sm:$0xff]  ;;  %v6998_v2 = vld [vmem:[#allocation18_spill] sm:$0xff] }
 0x327   :  { %v1711_v25 = vsub.f32 %v6986_v35, %v6605_v51  ;;  %v1724_v35 = vsub.f32 %v6998_v2, %v6605_v51  ;;  %v3513_v2 = vld [vmem:[%s6861_s10] ss:$0 sm:$0xff] }
 0x328   :  { %v3140_v15 = vrot.slane %v3139_v30, 4  ;;  %v3177_v3 = vadd.f32 %v3176_v59, %v3162_v60  ;;  %v6987_v60 = vld [vmem:[#allocation10_spill] sm:$0xff] }
 0x32a   :  { %v3141_v6 = vadd.f32 %v3140_v15, %v3139_v30  ;;  %v3178_v41 = vrot.slane %v3177_v3, 4  ;;  %v1712_v30 = vsub.f32 %v6987_v60, %v6605_v51  ;;  %v6988_v15 = vld [vmem:[#allocation12_spill] sm:$0xff] }
 0x32c   :  { %v3142_v7 = vrot.slane %v3141_v6, 2  ;;  %v3179_v19 = vadd.f32 %v3178_v41, %v3177_v3  ;;  %v1713_v3 = vsub.f32 %v6988_v15, %v6605_v51 }
 0x32d   :  { %v4495_v5 = vpop.eup %4494 }
 0x32e   :  { %v3143_v18 = vadd.f32 %v3142_v7, %v3141_v6  ;;  %v3180_v26 = vrot.slane %v3179_v19, 2  ;;  %v6989_v6 = vld [vmem:[#allocation13_spill] sm:$0xff]  ;;  %v1715_v7 = vsub.f32 %v6990_v29, %v6605_v51  ;;  %v1740_v60 = vmul.f32 %v4495_v5, %v1722_v17 }
 0x32f   :  { %v1714_v41 = vsub.f32 %v6989_v6, %v6605_v51  ;;  %v1727_v15 = vmul.f32 %v4495_v5, %v1709_v43  ;;  %v1728_v6 = vmul.f32 %v4495_v5, %v1710_v13  ;;  %v1729_v29 = vmul.f32 %v4495_v5, %v1711_v25 }
 0x330   :  { %v3144_v55 = vrot.slane %v3143_v18, 1  ;;  %v3181_v33 = vadd.f32 %v3180_v26, %v3179_v19  ;;  %v6991_v19 = vld [vmem:[#allocation5_spill] sm:$0xff]  ;;  %v6992_v26 = vld [vmem:[#allocation6_spill] sm:$0xff]  ;;  %v1741_v0 = vmul.f32 %v4495_v5, %v1723_v22 }
 0x332   :  { %v3145_v1 = vadd.f32 %v3144_v55, %v3143_v18  ;;  %v3182_v10 = vrot.slane %v3181_v33, 1  ;;  %v1716_v18 = vsub.f32 %v6991_v19, %v6605_v51  ;;  %v1717_v55 = vsub.f32 %v6992_v26, %v6605_v51 }
 0x333   :  { %v1730_v19 = vmul.f32 %v4495_v5, %v1712_v30  ;;  %v1731_v26 = vmul.f32 %v4495_v5, %v1713_v3 }
 0x334   :  { %v6651_v38 = vmul.f32 0.0078125, %v3145_v1  ;;  %v3183_v24 = vadd.f32 %v3182_v10, %v3181_v33  ;;  %v6993_v33 = vld [vmem:[#allocation14_spill] sm:$0xff]  ;;  %v6994_v10 = vld [vmem:[#allocation16_spill] sm:$0xff] }
 0x335   :  { %v1718_v1 = vsub.f32 %v6993_v33, %v6605_v51  ;;  %v1732_v33 = vmul.f32 %v4495_v5, %v1714_v41 }
 0x336   :  { %v3184_v23 = vmul.f32 0.0078125, %v3183_v24  ;;  %v3185_v50 = vmul.f32 %v6651_v38, %v6651_v38  ;;  %v3188_v32 = vsub.f32 %v6501_v27, %v6651_v38  ;;  %v3189_v53 = vsub.f32 %v6514_v45, %v6651_v38 }
 0x337   :  { %v3190_v57 = vsub.f32 %v6512_v11, %v6651_v38  ;;  %v3191_v47 = vsub.f32 %v6524_v44, %v6651_v38  ;;  %v3192_v58 = vsub.f32 %v6538_v63, %v6651_v38  ;;  %v3193_v36 = vsub.f32 %v6560_v21, %v6651_v38 }
 0x338   :  { %v3186_v28 = vsub.f32 %v3184_v23, %v3185_v50  ;;  %v3194_v39 = vsub.f32 %v6553_v31, %v6651_v38  ;;  %v3195_v40 = vsub.f32 %v6567_v4, %v6651_v38  ;;  %v3196_v8 = vsub.f32 %v6578_v48, %v6651_v38  ;;  %v6995_v23 = vld [vmem:[#allocation19_spill] sm:$0xff] }
 0x339   :  { %v3197_v62 = vsub.f32 %v6588_v49, %v6651_v38  ;;  %v3198_v37 = vsub.f32 %v6599_v54, %v6651_v38  ;;  %v3199_v56 = vsub.f32 %v6611_v14, %v6651_v38  ;;  %v1719_v24 = vsub.f32 %v6994_v10, %v6605_v51 }
 0x33a   :  { %v3187_v20 = vmax.f32 %v3186_v28, 0.0  ;;  %v1720_v50 = vsub.f32 %v6995_v23, %v6605_v51  ;;  %v6996_v28 = vld [vmem:[#allocation17_spill] sm:$0xff]  ;;  %v1733_v10 = vmul.f32 %v4495_v5, %v1715_v7  ;;  %v1734_v23 = vmul.f32 %v4495_v5, %v1716_v18 }
 0x33b   :  { %v1736_v46 = vmul.f32 %v4495_v5, %v1718_v1  ;;  %v1737_v61 = vmul.f32 %v4495_v5, %v1719_v24  ;;  %v6999_v4 = vsub.f32 %v6624_v12, %v6651_v38  ;;  %v7000_v48 = vsub.f32 %v6629_v34, %v6651_v38  ;;  %v3587_v12 = vld [vmem:[%s6863_s12] ss:$0 sm:$0xff] }
 0x33c   :  { %v3204_v59 = vadd.f32 1e-05, %v3187_v20  ;;  %v1721_v20 = vsub.f32 %v6996_v28, %v6605_v51  ;;  %v1735_v28 = vmul.f32 %v4495_v5, %v1717_v55  ;;  %v1738_v16 = vmul.f32 %v4495_v5, %v1720_v50 }
 0x33d   :  { %v1742_v51 = vmul.f32 %v4495_v5, %v1724_v35  ;;  %v7001_v49 = vsub.f32 %v6635_v9, %v6651_v38  ;;  %v7002_v54 = vsub.f32 %v6640_v52, %v6651_v38 }
 0x33e   :  { %4496 = vrsqrt.f32 %v3204_v59  ;;  %v3512_v59 = vld [vmem:[%s6860_s9] ss:$0 sm:$0xff]  ;;  %v1739_v42 = vmul.f32 %v4495_v5, %v1721_v20 }
 0x33f   :  { %v1762_v17 = vmul.f32 %v3512_v59, %v1740_v60  ;;  %v1749_v43 = vmul.f32 %v3512_v59, %v1727_v15  ;;  %v1750_v13 = vmul.f32 %v3512_v59, %v1728_v6  ;;  %v1751_v25 = vmul.f32 %v3512_v59, %v1729_v29 }
 0x340   :  { %v1752_v30 = vmul.f32 %v3512_v59, %v1730_v19  ;;  %v1753_v3 = vmul.f32 %v3512_v59, %v1731_v26  ;;  %v1754_v41 = vmul.f32 %v3512_v59, %v1732_v33  ;;  %v1755_v7 = vmul.f32 %v3512_v59, %v1733_v10 }
 0x341   :  { %v1756_v18 = vmul.f32 %v3512_v59, %v1734_v23  ;;  %v1757_v55 = vmul.f32 %v3512_v59, %v1735_v28  ;;  %v1758_v1 = vmul.f32 %v3512_v59, %v1736_v46  ;;  %v1759_v24 = vmul.f32 %v3512_v59, %v1737_v61 }
 0x342   :  { %v1760_v50 = vmul.f32 %v3512_v59, %v1738_v16  ;;  %v1761_v20 = vmul.f32 %v3512_v59, %v1739_v42  ;;  %v1763_v22 = vmul.f32 %v3512_v59, %v1741_v0  ;;  %v1764_v5 = vmul.f32 %v3512_v59, %v1742_v51 }
 0x343   :  { %v6725_v35 = vadd.f32 %v3513_v2, %v1762_v17  ;;  %v6727_v60 = vadd.f32 %v3513_v2, %v1749_v43  ;;  %v6729_v15 = vadd.f32 %v3513_v2, %v1750_v13  ;;  %v6731_v6 = vadd.f32 %v3513_v2, %v1751_v25  ;;  %v3586_v25 = vld [vmem:[%s6862_s11] ss:$0 sm:$0xff] }
 0x344   :  { %v6733_v29 = vadd.f32 %v3513_v2, %v1752_v30  ;;  %v6735_v19 = vadd.f32 %v3513_v2, %v1753_v3  ;;  %v6737_v26 = vadd.f32 %v3513_v2, %v1754_v41  ;;  %v6739_v46 = vadd.f32 %v3513_v2, %v1755_v7 }
 0x345   :  { %v6741_v61 = vadd.f32 %v3513_v2, %v1756_v18  ;;  %v6743_v0 = vadd.f32 %v3513_v2, %v1757_v55  ;;  %v6745_v42 = vadd.f32 %v3513_v2, %v1758_v1  ;;  %v6747_v59 = vadd.f32 %v3513_v2, %v1759_v24 }
 0x346   :  { %v6749_v10 = vadd.f32 %v3513_v2, %v1760_v50  ;;  %v6751_v23 = vadd.f32 %v3513_v2, %v1761_v20  ;;  %v6753_v28 = vadd.f32 %v3513_v2, %v1763_v22  ;;  %v6755_v16 = vadd.f32 %v3513_v2, %v1764_v5 }
 0x34b   :  { %v4497_v33 = vpop.eup %4496 }
 0x34c   :  { %v3206_v51 = vmul.f32 %v4497_v33, %v3188_v32  ;;  %v3207_v17 = vmul.f32 %v4497_v33, %v3189_v53  ;;  %v3208_v43 = vmul.f32 %v4497_v33, %v3190_v57  ;;  %v3209_v13 = vmul.f32 %v4497_v33, %v3191_v47 }
 0x34d   :  { %v3210_v27 = vmul.f32 %v4497_v33, %v3192_v58  ;;  %v3211_v45 = vmul.f32 %v4497_v33, %v3193_v36  ;;  %v3212_v11 = vmul.f32 %v4497_v33, %v3194_v39  ;;  %v3213_v44 = vmul.f32 %v4497_v33, %v3195_v40 }
 0x34e   :  { %v3214_v32 = vmul.f32 %v4497_v33, %v3196_v8  ;;  %v3215_v63 = vmul.f32 %v4497_v33, %v3197_v62  ;;  %v3216_v21 = vmul.f32 %v4497_v33, %v3198_v37  ;;  %v3217_v31 = vmul.f32 %v4497_v33, %v3199_v56 }
 0x34f   :  { %v3218_v53 = vmul.f32 %v4497_v33, %v6999_v4  ;;  %v3219_v57 = vmul.f32 %v4497_v33, %v7000_v48  ;;  %v3220_v47 = vmul.f32 %v4497_v33, %v7001_v49  ;;  %v3221_v58 = vmul.f32 %v4497_v33, %v7002_v54 }
 0x350   :  { %v3228_v36 = vmul.f32 %v3586_v25, %v3206_v51  ;;  %v3229_v39 = vmul.f32 %v3586_v25, %v3207_v17  ;;  %v3230_v14 = vmul.f32 %v3586_v25, %v3208_v43  ;;  %v3231_v40 = vmul.f32 %v3586_v25, %v3209_v13 }
 0x351   :  { %v3232_v8 = vmul.f32 %v3586_v25, %v3210_v27  ;;  %v3233_v62 = vmul.f32 %v3586_v25, %v3211_v45  ;;  %v3234_v34 = vmul.f32 %v3586_v25, %v3212_v11  ;;  %v3235_v37 = vmul.f32 %v3586_v25, %v3213_v44 }
 0x352   :  { %v3236_v56 = vmul.f32 %v3586_v25, %v3214_v32  ;;  %v3237_v2 = vmul.f32 %v3586_v25, %v3215_v63  ;;  %v3238_v9 = vmul.f32 %v3586_v25, %v3216_v21  ;;  %v3239_v30 = vmul.f32 %v3586_v25, %v3217_v31 }
 0x353   :  { %v3240_v3 = vmul.f32 %v3586_v25, %v3218_v53  ;;  %v3241_v41 = vmul.f32 %v3586_v25, %v3219_v57  ;;  %v3242_v52 = vmul.f32 %v3586_v25, %v3220_v47  ;;  %v3243_v38 = vmul.f32 %v3586_v25, %v3221_v58 }
 0x354   :  { %v3250_v7 = vadd.f32 %v3587_v12, %v3228_v36  ;;  %v3251_v18 = vadd.f32 %v3587_v12, %v3229_v39  ;;  %v3252_v55 = vadd.f32 %v3587_v12, %v3230_v14  ;;  %v3253_v1 = vadd.f32 %v3587_v12, %v3231_v40 }
 0x355   :  { %v3254_v24 = vadd.f32 %v3587_v12, %v3232_v8  ;;  %v3255_v50 = vadd.f32 %v3587_v12, %v3233_v62  ;;  %v3256_v20 = vadd.f32 %v3587_v12, %v3234_v34  ;;  %v3257_v22 = vadd.f32 %v3587_v12, %v3235_v37 }
 0x356   :  { %v3258_v5 = vadd.f32 %v3587_v12, %v3236_v56  ;;  %v3259_v33 = vadd.f32 %v3587_v12, %v3237_v2  ;;  %v3260_v51 = vadd.f32 %v3587_v12, %v3238_v9  ;;  %v3261_v17 = vadd.f32 %v3587_v12, %v3239_v30 }
 0x357   :  { %v3262_v43 = vadd.f32 %v3587_v12, %v3240_v3  ;;  %v3263_v13 = vadd.f32 %v3587_v12, %v3241_v41  ;;  %v3264_v27 = vadd.f32 %v3587_v12, %v3242_v52  ;;  %v3265_v45 = vadd.f32 %v3587_v12, %v3243_v38 }
 0x358   :  { %v3266_v11 = vadd.f32 %v3250_v7, %v6727_v60  ;;  %v3267_v25 = vadd.f32 %v3251_v18, %v6729_v15  ;;  %v3268_v44 = vadd.f32 %v3252_v55, %v6731_v6  ;;  %v3269_v32 = vadd.f32 %v3253_v1, %v6733_v29 }
 0x359   :  { %v3270_v63 = vadd.f32 %v3254_v24, %v6735_v19  ;;  %v3271_v21 = vadd.f32 %v3255_v50, %v6737_v26  ;;  %v3272_v31 = vadd.f32 %v3256_v20, %v6739_v46  ;;  %v3273_v4 = vadd.f32 %v3257_v22, %v6741_v61 }
 0x35a   :  { %v3274_v53 = vadd.f32 %v3258_v5, %v6743_v0  ;;  %v3275_v48 = vadd.f32 %v3259_v33, %v6745_v42  ;;  %v3276_v60 = vadd.f32 %v3260_v51, %v6747_v59  ;;  %v3277_v15 = vadd.f32 %v3261_v17, %v6749_v10 }
 0x35b   :  { %v3278_v6 = vadd.f32 %v3262_v43, %v6751_v23  ;;  %v3279_v29 = vadd.f32 %v3263_v13, %v6725_v35  ;;  %v3280_v19 = vadd.f32 %v3264_v27, %v6753_v28  ;;  %v3281_v26 = vadd.f32 %v3265_v45, %v6755_v16 }
 0x35c   :  { %v3282_v57 = vmax.f32 %v3266_v11, 0.0  ;;  %v3283_v46 = vmax.f32 %v3267_v25, 0.0  ;;  %v3284_v49 = vmax.f32 %v3268_v44, 0.0  ;;  %v3285_v61 = vmax.f32 %v3269_v32, 0.0 }
 0x35d   :  { %v3286_v47 = vmax.f32 %v3270_v63, 0.0  ;;  %v3287_v0 = vmax.f32 %v3271_v21, 0.0  ;;  %v3288_v54 = vmax.f32 %v3272_v31, 0.0  ;;  %v3289_v42 = vmax.f32 %v3273_v4, 0.0 }
 0x35e   :  { %v3290_v58 = vmax.f32 %v3274_v53, 0.0  ;;  %v3291_v59 = vmax.f32 %v3275_v48, 0.0  ;;  %v3292_v36 = vmax.f32 %v3276_v60, 0.0  ;;  %v3293_v10 = vmax.f32 %v3277_v15, 0.0 }
 0x35f   :  { %v3294_v39 = vmax.f32 %v3278_v6, 0.0  ;;  %v3295_v23 = vmax.f32 %v3279_v29, 0.0  ;;  %v3296_v14 = vmax.f32 %v3280_v19, 0.0  ;;  %v3297_v35 = vmax.f32 %v3281_v26, 0.0 }
 0x360   :  { %v3623_v40 = vpack.c.bf16 %v3283_v46, %v3282_v57  ;;  %v3628_v28 = vpack.c.bf16 %v3285_v61, %v3284_v49  ;;  %v3633_v12 = vpack.c.bf16 %v3287_v0, %v3286_v47  ;;  %v3638_v16 = vpack.c.bf16 %v3289_v42, %v3288_v54 }
 0x361   :  { %v3643_v8 = vpack.c.bf16 %v3291_v59, %v3290_v58  ;;  %v3648_v62 = vpack.c.bf16 %v3293_v10, %v3292_v36  ;;  %v3653_v34 = vpack.c.bf16 %v3295_v23, %v3294_v39  ;;  %v3658_v37 = vpack.c.bf16 %v3297_v35, %v3296_v14 }
 0x362   :  { %3624 = vst [vmem:[%s6864_s13] sm:$0xff] %v3623_v40   ;;  %3660 = vst [vmem:[%s6864_s13 + $0x8] sm:$0xff] %v3628_v28  }
 0x363   :  { %3661 = vst [vmem:[%s6864_s13 + $0x10] sm:$0xff] %v3633_v12   ;;  %3662 = vst [vmem:[%s6864_s13 + $0x18] sm:$0xff] %v3638_v16  }
 0x364   :  { %3663 = vst [vmem:[%s6864_s13 + $0x20] sm:$0xff] %v3643_v8   ;;  %3664 = vst [vmem:[%s6864_s13 + $0x28] sm:$0xff] %v3648_v62  }
 0x365   :  { %3665 = vst [vmem:[%s6864_s13 + $0x30] sm:$0xff] %v3653_v34   ;;  %3666 = vst [vmem:[%s6864_s13 + $0x38] sm:$0xff] %v3658_v37  }

</bundles_post_ra>
